<compile_context>
chip_gen: v6e
topology: v6e:2x2x1
jax: 0.10.0
libtpu: 0.0.40
codegen_flags: <defaults>
</compile_context>

<pallas_src>
import functools

import jax
import jax.numpy as jnp
import numpy as np
from jax.experimental import pallas as pl
from jax.experimental.pallas import tpu as pltpu


def _round_up(x, m):
    return (x + m - 1) // m * m


def recurrent_block_kernel(x_ref, w_ref, scale_ref, shift_ref, o_ref,
                           h_ref, acc_ref, *, t, H, W, C, Cp, Wb):
    """One image per grid step.

    x_ref:     (1, H, W, C)        input image (real channels only)
    w_ref:     (3, 3*Cp, Cp) bf16  conv taps; per kernel row dy the 3 dx taps
                                   are stacked along the contraction dim
    scale_ref: (1, Cp) f32         folded BN scale  = gamma / sqrt(var + eps)
    shift_ref: (1, Cp) f32         folded BN shift  = beta + scale*(bias - mean)
    o_ref:     (1, H, W, C)        output image
    h_ref:     (1, H+2, Wb, Cp)    f32 halo scratch; interior at [1:H+1, 0:W],
                                   columns [W:Wb] stay zero (right border and,
                                   via rotate wrap, the left border)
    acc_ref:   (H*W, Cp) f32       matmul accumulator
    """
    scale = scale_ref[...]                       # (1, Cp) f32
    shift = shift_ref[...]

    # Zero the halo scratch once per image (multi-core safe; see header note).
    h_ref[...] = jnp.zeros_like(h_ref)

    def store_interior(v):                       # v: (H, W, C) f32
        # Only the first C lanes are ever written; lanes >= C stay zero so the
        # padded input channels of the matmul operand are exactly zero.
        h_ref[0, 1:H + 1, 0:W, 0:C] = v

    def conv_bn_relu():
        # 3x3 conv = 3 MXU matmuls (one per kernel row), the three column taps
        # fused along K.  Column shifts come from XLU sublane rotates of the
        # tile-aligned slab -- no unaligned slices, no retiling copies.
        n = H * Wb
        for dy in range(3):
            slab = h_ref[0, dy:dy + H, :, :].reshape(n, Cp)   # aligned load
            parts = []
            for dx in range(3):
                if dx == 1:
                    r = slab                                  # aligned as-is
                elif dx == 0:
                    r = pltpu.roll(slab, 1, axis=0)           # left neighbour
                else:
                    r = pltpu.roll(slab, n - 1, axis=0)       # right neighbour
                p = r.reshape(H, Wb, Cp)[:, :W, :].reshape(H * W, Cp)
                parts.append(p.astype(jnp.bfloat16))
            operand = jnp.concatenate(parts, axis=-1)         # (H*W, 3*Cp) bf16
            contrib = jnp.dot(operand, w_ref[dy],
                              preferred_element_type=jnp.float32)
            if dy == 0:
                acc_ref[...] = contrib
            else:
                acc_ref[...] = acc_ref[...] + contrib
        y = acc_ref[...] * scale + shift                      # folded BN + bias
        y = jnp.maximum(y, 0.0)                               # ReLU
        return y.reshape(H, W, Cp)

    # i == 0 branch of the PyTorch loop: x1 = conv(x)
    store_interior(x_ref[0].astype(jnp.float32))
    y = conv_bn_relu()
    # remaining applications: x1 = conv(x + x1)   (t of them)
    for _ in range(t):
        store_interior(x_ref[0].astype(jnp.float32) + y[:, :, :C])
        y = conv_bn_relu()

    o_ref[0] = y[:, :, :C].astype(o_ref.dtype)


def recurrent_block_forward(x, conv_weight, conv_bias, gamma, beta,
                            running_mean, running_var, *, t=2, eps=1e-5,
                            lane=128):
    """x: (N, C, H, W) NCHW (PyTorch layout). Returns (N, C, H, W)."""
    assert t >= 1, "Recurrent_block requires t >= 1"
    N, C, H, W = x.shape
    Cp = _round_up(C, lane)
    Wb = _round_up(W + 2, 8)           # halo width, sublane-tile aligned

    # ---- one-time layout prep (traced under jit) ---------------------------
    inv_std = 1.0 / jnp.sqrt(running_var.astype(jnp.float32) + eps)
    scale = gamma.astype(jnp.float32) * inv_std
    shift = (beta.astype(jnp.float32)
             + scale * (conv_bias.astype(jnp.float32)
                        - running_mean.astype(jnp.float32)))
    scale_p = jnp.zeros((1, Cp), jnp.float32).at[0, :C].set(scale)
    shift_p = jnp.zeros((1, Cp), jnp.float32).at[0, :C].set(shift)

    # Conv weight (Cout, Cin, 3, 3) -> (dy, dx, Cin, Cout), zero-padded to Cp,
    # stacked along K per kernel row (K = 3*Cp), cast once to bf16.
    w4 = jnp.transpose(conv_weight.astype(jnp.float32), (2, 3, 1, 0))  # (3,3,C,C)
    w_p = jnp.zeros((3, 3, Cp, Cp), jnp.float32).at[:, :, :C, :C].set(w4)
    w_p = w_p.reshape(3, 3 * Cp, Cp).astype(jnp.bfloat16)

    # NCHW -> NHWC.  Channels stay at C in HBM; lane padding happens in VMEM.
    x_nhwc = jnp.transpose(x, (0, 2, 3, 1))

    kernel = functools.partial(recurrent_block_kernel, t=t, H=H, W=W, C=C,
                               Cp=Cp, Wb=Wb)
    out_nhwc = pl.pallas_call(
        kernel,
        out_shape=jax.ShapeDtypeStruct((N, H, W, C), x.dtype),
        grid_spec=pltpu.PrefetchScalarGridSpec(
            num_scalar_prefetch=0,
            grid=(N,),
            in_specs=[
                pl.BlockSpec((1, H, W, C), lambda n: (n, 0, 0, 0)),   # image
                pl.BlockSpec((3, 3 * Cp, Cp), lambda n: (0, 0, 0)),   # weights
                pl.BlockSpec((1, Cp), lambda n: (0, 0)),              # scale
                pl.BlockSpec((1, Cp), lambda n: (0, 0)),              # shift
            ],
            out_specs=pl.BlockSpec((1, H, W, C), lambda n: (n, 0, 0, 0)),
            scratch_shapes=[
                pltpu.VMEM((1, H + 2, Wb, Cp), jnp.float32),   # halo activations
                pltpu.VMEM((H * W, Cp), jnp.float32),          # accumulator
            ],
        ),
        compiler_params=pltpu.CompilerParams(
            dimension_semantics=("parallel",)),
    )(x_nhwc, w_p, scale_p, shift_p)

    return jnp.transpose(out_nhwc, (0, 3, 1, 2))


def recurrent_block_ref(x, conv_weight, conv_bias, gamma, beta,
                        running_mean, running_var, *, t=2, eps=1e-5):
    """Pure-JAX reference (matches the PyTorch module in eval mode)."""
    def bc(v):
        return v.reshape(1, -1, 1, 1)

    def conv_bn_relu(z):
        y = jax.lax.conv_general_dilated(
            z, conv_weight, window_strides=(1, 1), padding=((1, 1), (1, 1)),
            dimension_numbers=("NCHW", "OIHW", "NCHW"),
            precision=jax.lax.Precision.HIGHEST)
        y = y + bc(conv_bias)
        y = bc(gamma) * (y - bc(running_mean)) / jnp.sqrt(bc(running_var) + eps) \
            + bc(beta)
        return jnp.maximum(y, 0.0)

    x1 = conv_bn_relu(x)
    for _ in range(t):
        x1 = conv_bn_relu(x + x1)
    return x1


def init_params(key, nch):
    """Deterministic parameters: PyTorch-style conv init + non-trivial BN stats."""
    ks = jax.random.split(key, 6)
    fan_in = nch * 3 * 3
    bound = 1.0 / float(np.sqrt(fan_in))
    conv_weight = jax.random.uniform(ks[0], (nch, nch, 3, 3), jnp.float32,
                                     -bound, bound)
    conv_bias = jax.random.uniform(ks[1], (nch,), jnp.float32, -bound, bound)
    gamma = jax.random.uniform(ks[2], (nch,), jnp.float32, 0.5, 1.5)
    beta = 0.1 * jax.random.normal(ks[3], (nch,), jnp.float32)
    running_mean = 0.1 * jax.random.normal(ks[4], (nch,), jnp.float32)
    running_var = jax.random.uniform(ks[5], (nch,), jnp.float32, 0.5, 1.5)
    return conv_weight, conv_bias, gamma, beta, running_mean, running_var


if __name__ == "__main__":
    nch, t = 4, 2
    N, H, W = 2, 16, 16

    key = jax.random.PRNGKey(0)
    k_x, k_p = jax.random.split(key)
    x = jax.random.normal(k_x, (N, nch, H, W), dtype=jnp.float32)
    params = init_params(k_p, nch)

    fwd = jax.jit(functools.partial(recurrent_block_forward, t=t))
    out = jax.block_until_ready(fwd(x, *params))

    ref = recurrent_block_ref(x, *params, t=t)
    np.testing.assert_allclose(np.asarray(out), np.asarray(ref),
                               rtol=2e-2, atol=2e-2)
    print("KERNEL_OK")
</pallas_src>

<mosaic_0001>
module attributes {stable_mosaic.version = 11 : i64} {
  func.func @recurrent_block_kernel(%arg0: i32, %arg1: memref<1x16x16x4xf32, #tpu.memory_space<vmem>>, %arg2: memref<3x384x128xbf16, #tpu.memory_space<vmem>>, %arg3: memref<1x128xf32, #tpu.memory_space<vmem>>, %arg4: memref<1x128xf32, #tpu.memory_space<vmem>>, %arg5: memref<1x16x16x4xf32, #tpu.memory_space<vmem>>, %arg6: memref<1x18x24x128xf32, #tpu.memory_space<vmem>>, %arg7: memref<256x128xf32, #tpu.memory_space<vmem>>) attributes {dimension_semantics = [#tpu.dimension_semantics<parallel>], iteration_bounds = array<i64: 2>, scalar_prefetch = 0 : i64, scratch_operands = 2 : i64, tpu.core_type = #tpu.core_type<tc>, window_params = [{transform_indices = @transform_0, window_bounds = array<i64: 1, 16, 16, 4>}, {pipeline_mode = #tpu.pipeline_mode<synchronous>, transform_indices = @transform_1, window_bounds = array<i64: 3, 384, 128>}, {pipeline_mode = #tpu.pipeline_mode<synchronous>, transform_indices = @transform_2, window_bounds = array<i64: 1, 128>}, {pipeline_mode = #tpu.pipeline_mode<synchronous>, transform_indices = @transform_3, window_bounds = array<i64: 1, 128>}, {transform_indices = @transform_4, window_bounds = array<i64: 1, 16, 16, 4>}]} {
    %c0 = arith.constant 0 : index
    %c0_0 = arith.constant 0 : index
    %0 = vector.load %arg3[%c0, %c0_0] : memref<1x128xf32, #tpu.memory_space<vmem>>, vector<1x128xf32>
    %c0_1 = arith.constant 0 : index
    %c0_2 = arith.constant 0 : index
    %1 = vector.load %arg4[%c0_1, %c0_2] : memref<1x128xf32, #tpu.memory_space<vmem>>, vector<1x128xf32>
    %cst = arith.constant 0.000000e+00 : f32
    %2 = vector.broadcast %cst : f32 to vector<1x18x24x128xf32>
    %c0_3 = arith.constant 0 : index
    %c0_4 = arith.constant 0 : index
    %c0_5 = arith.constant 0 : index
    %c0_6 = arith.constant 0 : index
    %3 = vector.load %arg6[%c0_3, %c0_4, %c0_5, %c0_6] : memref<1x18x24x128xf32, #tpu.memory_space<vmem>>, vector<1x18x24x128xf32>
    tpu.vector_store %arg6[%c0_3, %c0_4, %c0_5, %c0_6], %2 {strides = array<i32>} : memref<1x18x24x128xf32, #tpu.memory_space<vmem>>, vector<1x18x24x128xf32>,
    %c0_7 = arith.constant 0 : index
    %c0_8 = arith.constant 0 : index
    %c0_9 = arith.constant 0 : index
    %c0_10 = arith.constant 0 : index
    %4 = vector.load %arg1[%c0_7, %c0_8, %c0_9, %c0_10] : memref<1x16x16x4xf32, #tpu.memory_space<vmem>>, vector<1x16x16x4xf32>
    %5 = vector.shape_cast %4 : vector<1x16x16x4xf32> to vector<16x16x4xf32>
    %c0_11 = arith.constant 0 : index
    %c1 = arith.constant 1 : index
    %c0_12 = arith.constant 0 : index
    %c0_13 = arith.constant 0 : index
    %6 = vector.load %arg6[%c0_11, %c1, %c0_12, %c0_13] : memref<1x18x24x128xf32, #tpu.memory_space<vmem>>, vector<1x16x16x4xf32>
    %7 = vector.shape_cast %6 : vector<1x16x16x4xf32> to vector<16x16x4xf32>
    %8 = vector.shape_cast %5 : vector<16x16x4xf32> to vector<1x16x16x4xf32>
    tpu.vector_store %arg6[%c0_11, %c1, %c0_12, %c0_13], %8 {strides = array<i32>} : memref<1x18x24x128xf32, #tpu.memory_space<vmem>>, vector<1x16x16x4xf32>,
    %c0_14 = arith.constant 0 : index
    %c0_15 = arith.constant 0 : index
    %c0_16 = arith.constant 0 : index
    %c0_17 = arith.constant 0 : index
    %9 = vector.load %arg6[%c0_14, %c0_15, %c0_16, %c0_17] : memref<1x18x24x128xf32, #tpu.memory_space<vmem>>, vector<1x16x24x128xf32>
    %10 = vector.shape_cast %9 : vector<1x16x24x128xf32> to vector<16x24x128xf32>
    %11 = vector.shape_cast %10 : vector<16x24x128xf32> to vector<384x128xf32>
    %c1_i32 = arith.constant 1 : i32
    %12 = tpu.dynamic_rotate %11 by %c1_i32 dim 0 : vector<384x128xf32>, i32 -> vector<384x128xf32>
    %13 = vector.shape_cast %12 : vector<384x128xf32> to vector<16x24x128xf32>
    %14 = vector.extract_strided_slice %13 {offsets = [0, 0, 0], sizes = [16, 16, 128], strides = [1, 1, 1]} : vector<16x24x128xf32> to vector<16x16x128xf32>
    %15 = vector.shape_cast %14 : vector<16x16x128xf32> to vector<256x128xf32>
    %16 = arith.truncf %15 : vector<256x128xf32> to vector<256x128xbf16>
    %17 = vector.shape_cast %11 : vector<384x128xf32> to vector<16x24x128xf32>
    %18 = vector.extract_strided_slice %17 {offsets = [0, 0, 0], sizes = [16, 16, 128], strides = [1, 1, 1]} : vector<16x24x128xf32> to vector<16x16x128xf32>
    %19 = vector.shape_cast %18 : vector<16x16x128xf32> to vector<256x128xf32>
    %20 = arith.truncf %19 : vector<256x128xf32> to vector<256x128xbf16>
    %c383_i32 = arith.constant 383 : i32
    %21 = tpu.dynamic_rotate %11 by %c383_i32 dim 0 : vector<384x128xf32>, i32 -> vector<384x128xf32>
    %22 = vector.shape_cast %21 : vector<384x128xf32> to vector<16x24x128xf32>
    %23 = vector.extract_strided_slice %22 {offsets = [0, 0, 0], sizes = [16, 16, 128], strides = [1, 1, 1]} : vector<16x24x128xf32> to vector<16x16x128xf32>
    %24 = vector.shape_cast %23 : vector<16x16x128xf32> to vector<256x128xf32>
    %25 = arith.truncf %24 : vector<256x128xf32> to vector<256x128xbf16>
    %26 = tpu.concatenate %16, %20, %25 in 1 : vector<256x128xbf16>, vector<256x128xbf16>, vector<256x128xbf16> -> vector<256x384xbf16>
    %c0_18 = arith.constant 0 : index
    %c0_19 = arith.constant 0 : index
    %c0_20 = arith.constant 0 : index
    %27 = vector.load %arg2[%c0_18, %c0_19, %c0_20] : memref<3x384x128xbf16, #tpu.memory_space<vmem>>, vector<1x384x128xbf16>
    %28 = vector.shape_cast %27 : vector<1x384x128xbf16> to vector<384x128xbf16>
    %cst_21 = arith.constant dense<0.000000e+00> : vector<256x128xf32>
    %29 = tpu.matmul %26, %28, %cst_21 {dimension_numbers = #tpu.dot_dimension_numbers<[1], [0], [0], [1], [0, 0, 1, 1], [], []>} : vector<256x384xbf16>, vector<384x128xbf16>, vector<256x128xf32> -> vector<256x128xf32>
    %c0_22 = arith.constant 0 : index
    %c0_23 = arith.constant 0 : index
    %30 = vector.load %arg7[%c0_22, %c0_23] : memref<256x128xf32, #tpu.memory_space<vmem>>, vector<256x128xf32>
    tpu.vector_store %arg7[%c0_22, %c0_23], %29 {strides = array<i32>} : memref<256x128xf32, #tpu.memory_space<vmem>>, vector<256x128xf32>,
    %c0_24 = arith.constant 0 : index
    %c1_25 = arith.constant 1 : index
    %c0_26 = arith.constant 0 : index
    %c0_27 = arith.constant 0 : index
    %31 = vector.load %arg6[%c0_24, %c1_25, %c0_26, %c0_27] : memref<1x18x24x128xf32, #tpu.memory_space<vmem>>, vector<1x16x24x128xf32>
    %32 = vector.shape_cast %31 : vector<1x16x24x128xf32> to vector<16x24x128xf32>
    %33 = vector.shape_cast %32 : vector<16x24x128xf32> to vector<384x128xf32>
    %c1_i32_28 = arith.constant 1 : i32
    %34 = tpu.dynamic_rotate %33 by %c1_i32_28 dim 0 : vector<384x128xf32>, i32 -> vector<384x128xf32>
    %35 = vector.shape_cast %34 : vector<384x128xf32> to vector<16x24x128xf32>
    %36 = vector.extract_strided_slice %35 {offsets = [0, 0, 0], sizes = [16, 16, 128], strides = [1, 1, 1]} : vector<16x24x128xf32> to vector<16x16x128xf32>
    %37 = vector.shape_cast %36 : vector<16x16x128xf32> to vector<256x128xf32>
    %38 = arith.truncf %37 : vector<256x128xf32> to vector<256x128xbf16>
    %39 = vector.shape_cast %33 : vector<384x128xf32> to vector<16x24x128xf32>
    %40 = vector.extract_strided_slice %39 {offsets = [0, 0, 0], sizes = [16, 16, 128], strides = [1, 1, 1]} : vector<16x24x128xf32> to vector<16x16x128xf32>
    %41 = vector.shape_cast %40 : vector<16x16x128xf32> to vector<256x128xf32>
    %42 = arith.truncf %41 : vector<256x128xf32> to vector<256x128xbf16>
    %c383_i32_29 = arith.constant 383 : i32
    %43 = tpu.dynamic_rotate %33 by %c383_i32_29 dim 0 : vector<384x128xf32>, i32 -> vector<384x128xf32>
    %44 = vector.shape_cast %43 : vector<384x128xf32> to vector<16x24x128xf32>
    %45 = vector.extract_strided_slice %44 {offsets = [0, 0, 0], sizes = [16, 16, 128], strides = [1, 1, 1]} : vector<16x24x128xf32> to vector<16x16x128xf32>
    %46 = vector.shape_cast %45 : vector<16x16x128xf32> to vector<256x128xf32>
    %47 = arith.truncf %46 : vector<256x128xf32> to vector<256x128xbf16>
    %48 = tpu.concatenate %38, %42, %47 in 1 : vector<256x128xbf16>, vector<256x128xbf16>, vector<256x128xbf16> -> vector<256x384xbf16>
    %c1_30 = arith.constant 1 : index
    %c0_31 = arith.constant 0 : index
    %c0_32 = arith.constant 0 : index
    %49 = vector.load %arg2[%c1_30, %c0_31, %c0_32] : memref<3x384x128xbf16, #tpu.memory_space<vmem>>, vector<1x384x128xbf16>
    %50 = vector.shape_cast %49 : vector<1x384x128xbf16> to vector<384x128xbf16>
    %cst_33 = arith.constant dense<0.000000e+00> : vector<256x128xf32>
    %51 = tpu.matmul %48, %50, %cst_33 {dimension_numbers = #tpu.dot_dimension_numbers<[1], [0], [0], [1], [0, 0, 1, 1], [], []>} : vector<256x384xbf16>, vector<384x128xbf16>, vector<256x128xf32> -> vector<256x128xf32>
    %c0_34 = arith.constant 0 : index
    %c0_35 = arith.constant 0 : index
    %52 = vector.load %arg7[%c0_34, %c0_35] : memref<256x128xf32, #tpu.memory_space<vmem>>, vector<256x128xf32>
    %53 = arith.addf %52, %51 : vector<256x128xf32>
    %c0_36 = arith.constant 0 : index
    %c0_37 = arith.constant 0 : index
    %54 = vector.load %arg7[%c0_36, %c0_37] : memref<256x128xf32, #tpu.memory_space<vmem>>, vector<256x128xf32>
    tpu.vector_store %arg7[%c0_36, %c0_37], %53 {strides = array<i32>} : memref<256x128xf32, #tpu.memory_space<vmem>>, vector<256x128xf32>,
    %c0_38 = arith.constant 0 : index
    %c2 = arith.constant 2 : index
    %c0_39 = arith.constant 0 : index
    %c0_40 = arith.constant 0 : index
    %55 = vector.load %arg6[%c0_38, %c2, %c0_39, %c0_40] : memref<1x18x24x128xf32, #tpu.memory_space<vmem>>, vector<1x16x24x128xf32>
    %56 = vector.shape_cast %55 : vector<1x16x24x128xf32> to vector<16x24x128xf32>
    %57 = vector.shape_cast %56 : vector<16x24x128xf32> to vector<384x128xf32>
    %c1_i32_41 = arith.constant 1 : i32
    %58 = tpu.dynamic_rotate %57 by %c1_i32_41 dim 0 : vector<384x128xf32>, i32 -> vector<384x128xf32>
    %59 = vector.shape_cast %58 : vector<384x128xf32> to vector<16x24x128xf32>
    %60 = vector.extract_strided_slice %59 {offsets = [0, 0, 0], sizes = [16, 16, 128], strides = [1, 1, 1]} : vector<16x24x128xf32> to vector<16x16x128xf32>
    %61 = vector.shape_cast %60 : vector<16x16x128xf32> to vector<256x128xf32>
    %62 = arith.truncf %61 : vector<256x128xf32> to vector<256x128xbf16>
    %63 = vector.shape_cast %57 : vector<384x128xf32> to vector<16x24x128xf32>
    %64 = vector.extract_strided_slice %63 {offsets = [0, 0, 0], sizes = [16, 16, 128], strides = [1, 1, 1]} : vector<16x24x128xf32> to vector<16x16x128xf32>
    %65 = vector.shape_cast %64 : vector<16x16x128xf32> to vector<256x128xf32>
    %66 = arith.truncf %65 : vector<256x128xf32> to vector<256x128xbf16>
    %c383_i32_42 = arith.constant 383 : i32
    %67 = tpu.dynamic_rotate %57 by %c383_i32_42 dim 0 : vector<384x128xf32>, i32 -> vector<384x128xf32>
    %68 = vector.shape_cast %67 : vector<384x128xf32> to vector<16x24x128xf32>
    %69 = vector.extract_strided_slice %68 {offsets = [0, 0, 0], sizes = [16, 16, 128], strides = [1, 1, 1]} : vector<16x24x128xf32> to vector<16x16x128xf32>
    %70 = vector.shape_cast %69 : vector<16x16x128xf32> to vector<256x128xf32>
    %71 = arith.truncf %70 : vector<256x128xf32> to vector<256x128xbf16>
    %72 = tpu.concatenate %62, %66, %71 in 1 : vector<256x128xbf16>, vector<256x128xbf16>, vector<256x128xbf16> -> vector<256x384xbf16>
    %c2_43 = arith.constant 2 : index
    %c0_44 = arith.constant 0 : index
    %c0_45 = arith.constant 0 : index
    %73 = vector.load %arg2[%c2_43, %c0_44, %c0_45] : memref<3x384x128xbf16, #tpu.memory_space<vmem>>, vector<1x384x128xbf16>
    %74 = vector.shape_cast %73 : vector<1x384x128xbf16> to vector<384x128xbf16>
    %cst_46 = arith.constant dense<0.000000e+00> : vector<256x128xf32>
    %75 = tpu.matmul %72, %74, %cst_46 {dimension_numbers = #tpu.dot_dimension_numbers<[1], [0], [0], [1], [0, 0, 1, 1], [], []>} : vector<256x384xbf16>, vector<384x128xbf16>, vector<256x128xf32> -> vector<256x128xf32>
    %c0_47 = arith.constant 0 : index
    %c0_48 = arith.constant 0 : index
    %76 = vector.load %arg7[%c0_47, %c0_48] : memref<256x128xf32, #tpu.memory_space<vmem>>, vector<256x128xf32>
    %77 = arith.addf %76, %75 : vector<256x128xf32>
    %c0_49 = arith.constant 0 : index
    %c0_50 = arith.constant 0 : index
    %78 = vector.load %arg7[%c0_49, %c0_50] : memref<256x128xf32, #tpu.memory_space<vmem>>, vector<256x128xf32>
    tpu.vector_store %arg7[%c0_49, %c0_50], %77 {strides = array<i32>} : memref<256x128xf32, #tpu.memory_space<vmem>>, vector<256x128xf32>,
    %c0_51 = arith.constant 0 : index
    %c0_52 = arith.constant 0 : index
    %79 = vector.load %arg7[%c0_51, %c0_52] : memref<256x128xf32, #tpu.memory_space<vmem>>, vector<256x128xf32>
    %80 = vector.broadcast %0 : vector<1x128xf32> to vector<256x128xf32>
    %81 = arith.mulf %79, %80 : vector<256x128xf32>
    %82 = vector.broadcast %1 : vector<1x128xf32> to vector<256x128xf32>
    %83 = arith.addf %81, %82 : vector<256x128xf32>
    %cst_53 = arith.constant 0.000000e+00 : f32
    %84 = vector.broadcast %cst_53 : f32 to vector<256x128xf32>
    %85 = arith.maximumf %83, %84 : vector<256x128xf32>
    %86 = vector.shape_cast %85 : vector<256x128xf32> to vector<16x16x128xf32>
    %c0_54 = arith.constant 0 : index
    %c0_55 = arith.constant 0 : index
    %c0_56 = arith.constant 0 : index
    %c0_57 = arith.constant 0 : index
    %87 = vector.load %arg1[%c0_54, %c0_55, %c0_56, %c0_57] : memref<1x16x16x4xf32, #tpu.memory_space<vmem>>, vector<1x16x16x4xf32>
    %88 = vector.shape_cast %87 : vector<1x16x16x4xf32> to vector<16x16x4xf32>
    %89 = vector.extract_strided_slice %86 {offsets = [0, 0, 0], sizes = [16, 16, 4], strides = [1, 1, 1]} : vector<16x16x128xf32> to vector<16x16x4xf32>
    %90 = arith.addf %88, %89 : vector<16x16x4xf32>
    %c0_58 = arith.constant 0 : index
    %c1_59 = arith.constant 1 : index
    %c0_60 = arith.constant 0 : index
    %c0_61 = arith.constant 0 : index
    %91 = vector.load %arg6[%c0_58, %c1_59, %c0_60, %c0_61] : memref<1x18x24x128xf32, #tpu.memory_space<vmem>>, vector<1x16x16x4xf32>
    %92 = vector.shape_cast %91 : vector<1x16x16x4xf32> to vector<16x16x4xf32>
    %93 = vector.shape_cast %90 : vector<16x16x4xf32> to vector<1x16x16x4xf32>
    tpu.vector_store %arg6[%c0_58, %c1_59, %c0_60, %c0_61], %93 {strides = array<i32>} : memref<1x18x24x128xf32, #tpu.memory_space<vmem>>, vector<1x16x16x4xf32>,
    %c0_62 = arith.constant 0 : index
    %c0_63 = arith.constant 0 : index
    %c0_64 = arith.constant 0 : index
    %c0_65 = arith.constant 0 : index
    %94 = vector.load %arg6[%c0_62, %c0_63, %c0_64, %c0_65] : memref<1x18x24x128xf32, #tpu.memory_space<vmem>>, vector<1x16x24x128xf32>
    %95 = vector.shape_cast %94 : vector<1x16x24x128xf32> to vector<16x24x128xf32>
    %96 = vector.shape_cast %95 : vector<16x24x128xf32> to vector<384x128xf32>
    %c1_i32_66 = arith.constant 1 : i32
    %97 = tpu.dynamic_rotate %96 by %c1_i32_66 dim 0 : vector<384x128xf32>, i32 -> vector<384x128xf32>
    %98 = vector.shape_cast %97 : vector<384x128xf32> to vector<16x24x128xf32>
    %99 = vector.extract_strided_slice %98 {offsets = [0, 0, 0], sizes = [16, 16, 128], strides = [1, 1, 1]} : vector<16x24x128xf32> to vector<16x16x128xf32>
    %100 = vector.shape_cast %99 : vector<16x16x128xf32> to vector<256x128xf32>
    %101 = arith.truncf %100 : vector<256x128xf32> to vector<256x128xbf16>
    %102 = vector.shape_cast %96 : vector<384x128xf32> to vector<16x24x128xf32>
    %103 = vector.extract_strided_slice %102 {offsets = [0, 0, 0], sizes = [16, 16, 128], strides = [1, 1, 1]} : vector<16x24x128xf32> to vector<16x16x128xf32>
    %104 = vector.shape_cast %103 : vector<16x16x128xf32> to vector<256x128xf32>
    %105 = arith.truncf %104 : vector<256x128xf32> to vector<256x128xbf16>
    %c383_i32_67 = arith.constant 383 : i32
    %106 = tpu.dynamic_rotate %96 by %c383_i32_67 dim 0 : vector<384x128xf32>, i32 -> vector<384x128xf32>
    %107 = vector.shape_cast %106 : vector<384x128xf32> to vector<16x24x128xf32>
    %108 = vector.extract_strided_slice %107 {offsets = [0, 0, 0], sizes = [16, 16, 128], strides = [1, 1, 1]} : vector<16x24x128xf32> to vector<16x16x128xf32>
    %109 = vector.shape_cast %108 : vector<16x16x128xf32> to vector<256x128xf32>
    %110 = arith.truncf %109 : vector<256x128xf32> to vector<256x128xbf16>
    %111 = tpu.concatenate %101, %105, %110 in 1 : vector<256x128xbf16>, vector<256x128xbf16>, vector<256x128xbf16> -> vector<256x384xbf16>
    %c0_68 = arith.constant 0 : index
    %c0_69 = arith.constant 0 : index
    %c0_70 = arith.constant 0 : index
    %112 = vector.load %arg2[%c0_68, %c0_69, %c0_70] : memref<3x384x128xbf16, #tpu.memory_space<vmem>>, vector<1x384x128xbf16>
    %113 = vector.shape_cast %112 : vector<1x384x128xbf16> to vector<384x128xbf16>
    %cst_71 = arith.constant dense<0.000000e+00> : vector<256x128xf32>
    %114 = tpu.matmul %111, %113, %cst_71 {dimension_numbers = #tpu.dot_dimension_numbers<[1], [0], [0], [1], [0, 0, 1, 1], [], []>} : vector<256x384xbf16>, vector<384x128xbf16>, vector<256x128xf32> -> vector<256x128xf32>
    %c0_72 = arith.constant 0 : index
    %c0_73 = arith.constant 0 : index
    %115 = vector.load %arg7[%c0_72, %c0_73] : memref<256x128xf32, #tpu.memory_space<vmem>>, vector<256x128xf32>
    tpu.vector_store %arg7[%c0_72, %c0_73], %114 {strides = array<i32>} : memref<256x128xf32, #tpu.memory_space<vmem>>, vector<256x128xf32>,
    %c0_74 = arith.constant 0 : index
    %c1_75 = arith.constant 1 : index
    %c0_76 = arith.constant 0 : index
    %c0_77 = arith.constant 0 : index
    %116 = vector.load %arg6[%c0_74, %c1_75, %c0_76, %c0_77] : memref<1x18x24x128xf32, #tpu.memory_space<vmem>>, vector<1x16x24x128xf32>
    %117 = vector.shape_cast %116 : vector<1x16x24x128xf32> to vector<16x24x128xf32>
    %118 = vector.shape_cast %117 : vector<16x24x128xf32> to vector<384x128xf32>
    %c1_i32_78 = arith.constant 1 : i32
    %119 = tpu.dynamic_rotate %118 by %c1_i32_78 dim 0 : vector<384x128xf32>, i32 -> vector<384x128xf32>
    %120 = vector.shape_cast %119 : vector<384x128xf32> to vector<16x24x128xf32>
    %121 = vector.extract_strided_slice %120 {offsets = [0, 0, 0], sizes = [16, 16, 128], strides = [1, 1, 1]} : vector<16x24x128xf32> to vector<16x16x128xf32>
    %122 = vector.shape_cast %121 : vector<16x16x128xf32> to vector<256x128xf32>
    %123 = arith.truncf %122 : vector<256x128xf32> to vector<256x128xbf16>
    %124 = vector.shape_cast %118 : vector<384x128xf32> to vector<16x24x128xf32>
    %125 = vector.extract_strided_slice %124 {offsets = [0, 0, 0], sizes = [16, 16, 128], strides = [1, 1, 1]} : vector<16x24x128xf32> to vector<16x16x128xf32>
    %126 = vector.shape_cast %125 : vector<16x16x128xf32> to vector<256x128xf32>
    %127 = arith.truncf %126 : vector<256x128xf32> to vector<256x128xbf16>
    %c383_i32_79 = arith.constant 383 : i32
    %128 = tpu.dynamic_rotate %118 by %c383_i32_79 dim 0 : vector<384x128xf32>, i32 -> vector<384x128xf32>
    %129 = vector.shape_cast %128 : vector<384x128xf32> to vector<16x24x128xf32>
    %130 = vector.extract_strided_slice %129 {offsets = [0, 0, 0], sizes = [16, 16, 128], strides = [1, 1, 1]} : vector<16x24x128xf32> to vector<16x16x128xf32>
    %131 = vector.shape_cast %130 : vector<16x16x128xf32> to vector<256x128xf32>
    %132 = arith.truncf %131 : vector<256x128xf32> to vector<256x128xbf16>
    %133 = tpu.concatenate %123, %127, %132 in 1 : vector<256x128xbf16>, vector<256x128xbf16>, vector<256x128xbf16> -> vector<256x384xbf16>
    %c1_80 = arith.constant 1 : index
    %c0_81 = arith.constant 0 : index
    %c0_82 = arith.constant 0 : index
    %134 = vector.load %arg2[%c1_80, %c0_81, %c0_82] : memref<3x384x128xbf16, #tpu.memory_space<vmem>>, vector<1x384x128xbf16>
    %135 = vector.shape_cast %134 : vector<1x384x128xbf16> to vector<384x128xbf16>
    %cst_83 = arith.constant dense<0.000000e+00> : vector<256x128xf32>
    %136 = tpu.matmul %133, %135, %cst_83 {dimension_numbers = #tpu.dot_dimension_numbers<[1], [0], [0], [1], [0, 0, 1, 1], [], []>} : vector<256x384xbf16>, vector<384x128xbf16>, vector<256x128xf32> -> vector<256x128xf32>
    %c0_84 = arith.constant 0 : index
    %c0_85 = arith.constant 0 : index
    %137 = vector.load %arg7[%c0_84, %c0_85] : memref<256x128xf32, #tpu.memory_space<vmem>>, vector<256x128xf32>
    %138 = arith.addf %137, %136 : vector<256x128xf32>
    %c0_86 = arith.constant 0 : index
    %c0_87 = arith.constant 0 : index
    %139 = vector.load %arg7[%c0_86, %c0_87] : memref<256x128xf32, #tpu.memory_space<vmem>>, vector<256x128xf32>
    tpu.vector_store %arg7[%c0_86, %c0_87], %138 {strides = array<i32>} : memref<256x128xf32, #tpu.memory_space<vmem>>, vector<256x128xf32>,
    %c0_88 = arith.constant 0 : index
    %c2_89 = arith.constant 2 : index
    %c0_90 = arith.constant 0 : index
    %c0_91 = arith.constant 0 : index
    %140 = vector.load %arg6[%c0_88, %c2_89, %c0_90, %c0_91] : memref<1x18x24x128xf32, #tpu.memory_space<vmem>>, vector<1x16x24x128xf32>
    %141 = vector.shape_cast %140 : vector<1x16x24x128xf32> to vector<16x24x128xf32>
    %142 = vector.shape_cast %141 : vector<16x24x128xf32> to vector<384x128xf32>
    %c1_i32_92 = arith.constant 1 : i32
    %143 = tpu.dynamic_rotate %142 by %c1_i32_92 dim 0 : vector<384x128xf32>, i32 -> vector<384x128xf32>
    %144 = vector.shape_cast %143 : vector<384x128xf32> to vector<16x24x128xf32>
    %145 = vector.extract_strided_slice %144 {offsets = [0, 0, 0], sizes = [16, 16, 128], strides = [1, 1, 1]} : vector<16x24x128xf32> to vector<16x16x128xf32>
    %146 = vector.shape_cast %145 : vector<16x16x128xf32> to vector<256x128xf32>
    %147 = arith.truncf %146 : vector<256x128xf32> to vector<256x128xbf16>
    %148 = vector.shape_cast %142 : vector<384x128xf32> to vector<16x24x128xf32>
    %149 = vector.extract_strided_slice %148 {offsets = [0, 0, 0], sizes = [16, 16, 128], strides = [1, 1, 1]} : vector<16x24x128xf32> to vector<16x16x128xf32>
    %150 = vector.shape_cast %149 : vector<16x16x128xf32> to vector<256x128xf32>
    %151 = arith.truncf %150 : vector<256x128xf32> to vector<256x128xbf16>
    %c383_i32_93 = arith.constant 383 : i32
    %152 = tpu.dynamic_rotate %142 by %c383_i32_93 dim 0 : vector<384x128xf32>, i32 -> vector<384x128xf32>
    %153 = vector.shape_cast %152 : vector<384x128xf32> to vector<16x24x128xf32>
    %154 = vector.extract_strided_slice %153 {offsets = [0, 0, 0], sizes = [16, 16, 128], strides = [1, 1, 1]} : vector<16x24x128xf32> to vector<16x16x128xf32>
    %155 = vector.shape_cast %154 : vector<16x16x128xf32> to vector<256x128xf32>
    %156 = arith.truncf %155 : vector<256x128xf32> to vector<256x128xbf16>
    %157 = tpu.concatenate %147, %151, %156 in 1 : vector<256x128xbf16>, vector<256x128xbf16>, vector<256x128xbf16> -> vector<256x384xbf16>
    %c2_94 = arith.constant 2 : index
    %c0_95 = arith.constant 0 : index
    %c0_96 = arith.constant 0 : index
    %158 = vector.load %arg2[%c2_94, %c0_95, %c0_96] : memref<3x384x128xbf16, #tpu.memory_space<vmem>>, vector<1x384x128xbf16>
    %159 = vector.shape_cast %158 : vector<1x384x128xbf16> to vector<384x128xbf16>
    %cst_97 = arith.constant dense<0.000000e+00> : vector<256x128xf32>
    %160 = tpu.matmul %157, %159, %cst_97 {dimension_numbers = #tpu.dot_dimension_numbers<[1], [0], [0], [1], [0, 0, 1, 1], [], []>} : vector<256x384xbf16>, vector<384x128xbf16>, vector<256x128xf32> -> vector<256x128xf32>
    %c0_98 = arith.constant 0 : index
    %c0_99 = arith.constant 0 : index
    %161 = vector.load %arg7[%c0_98, %c0_99] : memref<256x128xf32, #tpu.memory_space<vmem>>, vector<256x128xf32>
    %162 = arith.addf %161, %160 : vector<256x128xf32>
    %c0_100 = arith.constant 0 : index
    %c0_101 = arith.constant 0 : index
    %163 = vector.load %arg7[%c0_100, %c0_101] : memref<256x128xf32, #tpu.memory_space<vmem>>, vector<256x128xf32>
    tpu.vector_store %arg7[%c0_100, %c0_101], %162 {strides = array<i32>} : memref<256x128xf32, #tpu.memory_space<vmem>>, vector<256x128xf32>,
    %c0_102 = arith.constant 0 : index
    %c0_103 = arith.constant 0 : index
    %164 = vector.load %arg7[%c0_102, %c0_103] : memref<256x128xf32, #tpu.memory_space<vmem>>, vector<256x128xf32>
    %165 = vector.broadcast %0 : vector<1x128xf32> to vector<256x128xf32>
    %166 = arith.mulf %164, %165 : vector<256x128xf32>
    %167 = vector.broadcast %1 : vector<1x128xf32> to vector<256x128xf32>
    %168 = arith.addf %166, %167 : vector<256x128xf32>
    %cst_104 = arith.constant 0.000000e+00 : f32
    %169 = vector.broadcast %cst_104 : f32 to vector<256x128xf32>
    %170 = arith.maximumf %168, %169 : vector<256x128xf32>
    %171 = vector.shape_cast %170 : vector<256x128xf32> to vector<16x16x128xf32>
    %c0_105 = arith.constant 0 : index
    %c0_106 = arith.constant 0 : index
    %c0_107 = arith.constant 0 : index
    %c0_108 = arith.constant 0 : index
    %172 = vector.load %arg1[%c0_105, %c0_106, %c0_107, %c0_108] : memref<1x16x16x4xf32, #tpu.memory_space<vmem>>, vector<1x16x16x4xf32>
    %173 = vector.shape_cast %172 : vector<1x16x16x4xf32> to vector<16x16x4xf32>
    %174 = vector.extract_strided_slice %171 {offsets = [0, 0, 0], sizes = [16, 16, 4], strides = [1, 1, 1]} : vector<16x16x128xf32> to vector<16x16x4xf32>
    %175 = arith.addf %173, %174 : vector<16x16x4xf32>
    %c0_109 = arith.constant 0 : index
    %c1_110 = arith.constant 1 : index
    %c0_111 = arith.constant 0 : index
    %c0_112 = arith.constant 0 : index
    %176 = vector.load %arg6[%c0_109, %c1_110, %c0_111, %c0_112] : memref<1x18x24x128xf32, #tpu.memory_space<vmem>>, vector<1x16x16x4xf32>
    %177 = vector.shape_cast %176 : vector<1x16x16x4xf32> to vector<16x16x4xf32>
    %178 = vector.shape_cast %175 : vector<16x16x4xf32> to vector<1x16x16x4xf32>
    tpu.vector_store %arg6[%c0_109, %c1_110, %c0_111, %c0_112], %178 {strides = array<i32>} : memref<1x18x24x128xf32, #tpu.memory_space<vmem>>, vector<1x16x16x4xf32>,
    %c0_113 = arith.constant 0 : index
    %c0_114 = arith.constant 0 : index
    %c0_115 = arith.constant 0 : index
    %c0_116 = arith.constant 0 : index
    %179 = vector.load %arg6[%c0_113, %c0_114, %c0_115, %c0_116] : memref<1x18x24x128xf32, #tpu.memory_space<vmem>>, vector<1x16x24x128xf32>
    %180 = vector.shape_cast %179 : vector<1x16x24x128xf32> to vector<16x24x128xf32>
    %181 = vector.shape_cast %180 : vector<16x24x128xf32> to vector<384x128xf32>
    %c1_i32_117 = arith.constant 1 : i32
    %182 = tpu.dynamic_rotate %181 by %c1_i32_117 dim 0 : vector<384x128xf32>, i32 -> vector<384x128xf32>
    %183 = vector.shape_cast %182 : vector<384x128xf32> to vector<16x24x128xf32>
    %184 = vector.extract_strided_slice %183 {offsets = [0, 0, 0], sizes = [16, 16, 128], strides = [1, 1, 1]} : vector<16x24x128xf32> to vector<16x16x128xf32>
    %185 = vector.shape_cast %184 : vector<16x16x128xf32> to vector<256x128xf32>
    %186 = arith.truncf %185 : vector<256x128xf32> to vector<256x128xbf16>
    %187 = vector.shape_cast %181 : vector<384x128xf32> to vector<16x24x128xf32>
    %188 = vector.extract_strided_slice %187 {offsets = [0, 0, 0], sizes = [16, 16, 128], strides = [1, 1, 1]} : vector<16x24x128xf32> to vector<16x16x128xf32>
    %189 = vector.shape_cast %188 : vector<16x16x128xf32> to vector<256x128xf32>
    %190 = arith.truncf %189 : vector<256x128xf32> to vector<256x128xbf16>
    %c383_i32_118 = arith.constant 383 : i32
    %191 = tpu.dynamic_rotate %181 by %c383_i32_118 dim 0 : vector<384x128xf32>, i32 -> vector<384x128xf32>
    %192 = vector.shape_cast %191 : vector<384x128xf32> to vector<16x24x128xf32>
    %193 = vector.extract_strided_slice %192 {offsets = [0, 0, 0], sizes = [16, 16, 128], strides = [1, 1, 1]} : vector<16x24x128xf32> to vector<16x16x128xf32>
    %194 = vector.shape_cast %193 : vector<16x16x128xf32> to vector<256x128xf32>
    %195 = arith.truncf %194 : vector<256x128xf32> to vector<256x128xbf16>
    %196 = tpu.concatenate %186, %190, %195 in 1 : vector<256x128xbf16>, vector<256x128xbf16>, vector<256x128xbf16> -> vector<256x384xbf16>
    %c0_119 = arith.constant 0 : index
    %c0_120 = arith.constant 0 : index
    %c0_121 = arith.constant 0 : index
    %197 = vector.load %arg2[%c0_119, %c0_120, %c0_121] : memref<3x384x128xbf16, #tpu.memory_space<vmem>>, vector<1x384x128xbf16>
    %198 = vector.shape_cast %197 : vector<1x384x128xbf16> to vector<384x128xbf16>
    %cst_122 = arith.constant dense<0.000000e+00> : vector<256x128xf32>
    %199 = tpu.matmul %196, %198, %cst_122 {dimension_numbers = #tpu.dot_dimension_numbers<[1], [0], [0], [1], [0, 0, 1, 1], [], []>} : vector<256x384xbf16>, vector<384x128xbf16>, vector<256x128xf32> -> vector<256x128xf32>
    %c0_123 = arith.constant 0 : index
    %c0_124 = arith.constant 0 : index
    %200 = vector.load %arg7[%c0_123, %c0_124] : memref<256x128xf32, #tpu.memory_space<vmem>>, vector<256x128xf32>
    tpu.vector_store %arg7[%c0_123, %c0_124], %199 {strides = array<i32>} : memref<256x128xf32, #tpu.memory_space<vmem>>, vector<256x128xf32>,
    %c0_125 = arith.constant 0 : index
    %c1_126 = arith.constant 1 : index
    %c0_127 = arith.constant 0 : index
    %c0_128 = arith.constant 0 : index
    %201 = vector.load %arg6[%c0_125, %c1_126, %c0_127, %c0_128] : memref<1x18x24x128xf32, #tpu.memory_space<vmem>>, vector<1x16x24x128xf32>
    %202 = vector.shape_cast %201 : vector<1x16x24x128xf32> to vector<16x24x128xf32>
    %203 = vector.shape_cast %202 : vector<16x24x128xf32> to vector<384x128xf32>
    %c1_i32_129 = arith.constant 1 : i32
    %204 = tpu.dynamic_rotate %203 by %c1_i32_129 dim 0 : vector<384x128xf32>, i32 -> vector<384x128xf32>
    %205 = vector.shape_cast %204 : vector<384x128xf32> to vector<16x24x128xf32>
    %206 = vector.extract_strided_slice %205 {offsets = [0, 0, 0], sizes = [16, 16, 128], strides = [1, 1, 1]} : vector<16x24x128xf32> to vector<16x16x128xf32>
    %207 = vector.shape_cast %206 : vector<16x16x128xf32> to vector<256x128xf32>
    %208 = arith.truncf %207 : vector<256x128xf32> to vector<256x128xbf16>
    %209 = vector.shape_cast %203 : vector<384x128xf32> to vector<16x24x128xf32>
    %210 = vector.extract_strided_slice %209 {offsets = [0, 0, 0], sizes = [16, 16, 128], strides = [1, 1, 1]} : vector<16x24x128xf32> to vector<16x16x128xf32>
    %211 = vector.shape_cast %210 : vector<16x16x128xf32> to vector<256x128xf32>
    %212 = arith.truncf %211 : vector<256x128xf32> to vector<256x128xbf16>
    %c383_i32_130 = arith.constant 383 : i32
    %213 = tpu.dynamic_rotate %203 by %c383_i32_130 dim 0 : vector<384x128xf32>, i32 -> vector<384x128xf32>
    %214 = vector.shape_cast %213 : vector<384x128xf32> to vector<16x24x128xf32>
    %215 = vector.extract_strided_slice %214 {offsets = [0, 0, 0], sizes = [16, 16, 128], strides = [1, 1, 1]} : vector<16x24x128xf32> to vector<16x16x128xf32>
    %216 = vector.shape_cast %215 : vector<16x16x128xf32> to vector<256x128xf32>
    %217 = arith.truncf %216 : vector<256x128xf32> to vector<256x128xbf16>
    %218 = tpu.concatenate %208, %212, %217 in 1 : vector<256x128xbf16>, vector<256x128xbf16>, vector<256x128xbf16> -> vector<256x384xbf16>
    %c1_131 = arith.constant 1 : index
    %c0_132 = arith.constant 0 : index
    %c0_133 = arith.constant 0 : index
    %219 = vector.load %arg2[%c1_131, %c0_132, %c0_133] : memref<3x384x128xbf16, #tpu.memory_space<vmem>>, vector<1x384x128xbf16>
    %220 = vector.shape_cast %219 : vector<1x384x128xbf16> to vector<384x128xbf16>
    %cst_134 = arith.constant dense<0.000000e+00> : vector<256x128xf32>
    %221 = tpu.matmul %218, %220, %cst_134 {dimension_numbers = #tpu.dot_dimension_numbers<[1], [0], [0], [1], [0, 0, 1, 1], [], []>} : vector<256x384xbf16>, vector<384x128xbf16>, vector<256x128xf32> -> vector<256x128xf32>
    %c0_135 = arith.constant 0 : index
    %c0_136 = arith.constant 0 : index
    %222 = vector.load %arg7[%c0_135, %c0_136] : memref<256x128xf32, #tpu.memory_space<vmem>>, vector<256x128xf32>
    %223 = arith.addf %222, %221 : vector<256x128xf32>
    %c0_137 = arith.constant 0 : index
    %c0_138 = arith.constant 0 : index
    %224 = vector.load %arg7[%c0_137, %c0_138] : memref<256x128xf32, #tpu.memory_space<vmem>>, vector<256x128xf32>
    tpu.vector_store %arg7[%c0_137, %c0_138], %223 {strides = array<i32>} : memref<256x128xf32, #tpu.memory_space<vmem>>, vector<256x128xf32>,
    %c0_139 = arith.constant 0 : index
    %c2_140 = arith.constant 2 : index
    %c0_141 = arith.constant 0 : index
    %c0_142 = arith.constant 0 : index
    %225 = vector.load %arg6[%c0_139, %c2_140, %c0_141, %c0_142] : memref<1x18x24x128xf32, #tpu.memory_space<vmem>>, vector<1x16x24x128xf32>
    %226 = vector.shape_cast %225 : vector<1x16x24x128xf32> to vector<16x24x128xf32>
    %227 = vector.shape_cast %226 : vector<16x24x128xf32> to vector<384x128xf32>
    %c1_i32_143 = arith.constant 1 : i32
    %228 = tpu.dynamic_rotate %227 by %c1_i32_143 dim 0 : vector<384x128xf32>, i32 -> vector<384x128xf32>
    %229 = vector.shape_cast %228 : vector<384x128xf32> to vector<16x24x128xf32>
    %230 = vector.extract_strided_slice %229 {offsets = [0, 0, 0], sizes = [16, 16, 128], strides = [1, 1, 1]} : vector<16x24x128xf32> to vector<16x16x128xf32>
    %231 = vector.shape_cast %230 : vector<16x16x128xf32> to vector<256x128xf32>
    %232 = arith.truncf %231 : vector<256x128xf32> to vector<256x128xbf16>
    %233 = vector.shape_cast %227 : vector<384x128xf32> to vector<16x24x128xf32>
    %234 = vector.extract_strided_slice %233 {offsets = [0, 0, 0], sizes = [16, 16, 128], strides = [1, 1, 1]} : vector<16x24x128xf32> to vector<16x16x128xf32>
    %235 = vector.shape_cast %234 : vector<16x16x128xf32> to vector<256x128xf32>
    %236 = arith.truncf %235 : vector<256x128xf32> to vector<256x128xbf16>
    %c383_i32_144 = arith.constant 383 : i32
    %237 = tpu.dynamic_rotate %227 by %c383_i32_144 dim 0 : vector<384x128xf32>, i32 -> vector<384x128xf32>
    %238 = vector.shape_cast %237 : vector<384x128xf32> to vector<16x24x128xf32>
    %239 = vector.extract_strided_slice %238 {offsets = [0, 0, 0], sizes = [16, 16, 128], strides = [1, 1, 1]} : vector<16x24x128xf32> to vector<16x16x128xf32>
    %240 = vector.shape_cast %239 : vector<16x16x128xf32> to vector<256x128xf32>
    %241 = arith.truncf %240 : vector<256x128xf32> to vector<256x128xbf16>
    %242 = tpu.concatenate %232, %236, %241 in 1 : vector<256x128xbf16>, vector<256x128xbf16>, vector<256x128xbf16> -> vector<256x384xbf16>
    %c2_145 = arith.constant 2 : index
    %c0_146 = arith.constant 0 : index
    %c0_147 = arith.constant 0 : index
    %243 = vector.load %arg2[%c2_145, %c0_146, %c0_147] : memref<3x384x128xbf16, #tpu.memory_space<vmem>>, vector<1x384x128xbf16>
    %244 = vector.shape_cast %243 : vector<1x384x128xbf16> to vector<384x128xbf16>
    %cst_148 = arith.constant dense<0.000000e+00> : vector<256x128xf32>
    %245 = tpu.matmul %242, %244, %cst_148 {dimension_numbers = #tpu.dot_dimension_numbers<[1], [0], [0], [1], [0, 0, 1, 1], [], []>} : vector<256x384xbf16>, vector<384x128xbf16>, vector<256x128xf32> -> vector<256x128xf32>
    %c0_149 = arith.constant 0 : index
    %c0_150 = arith.constant 0 : index
    %246 = vector.load %arg7[%c0_149, %c0_150] : memref<256x128xf32, #tpu.memory_space<vmem>>, vector<256x128xf32>
    %247 = arith.addf %246, %245 : vector<256x128xf32>
    %c0_151 = arith.constant 0 : index
    %c0_152 = arith.constant 0 : index
    %248 = vector.load %arg7[%c0_151, %c0_152] : memref<256x128xf32, #tpu.memory_space<vmem>>, vector<256x128xf32>
    tpu.vector_store %arg7[%c0_151, %c0_152], %247 {strides = array<i32>} : memref<256x128xf32, #tpu.memory_space<vmem>>, vector<256x128xf32>,
    %c0_153 = arith.constant 0 : index
    %c0_154 = arith.constant 0 : index
    %249 = vector.load %arg7[%c0_153, %c0_154] : memref<256x128xf32, #tpu.memory_space<vmem>>, vector<256x128xf32>
    %250 = vector.broadcast %0 : vector<1x128xf32> to vector<256x128xf32>
    %251 = arith.mulf %249, %250 : vector<256x128xf32>
    %252 = vector.broadcast %1 : vector<1x128xf32> to vector<256x128xf32>
    %253 = arith.addf %251, %252 : vector<256x128xf32>
    %cst_155 = arith.constant 0.000000e+00 : f32
    %254 = vector.broadcast %cst_155 : f32 to vector<256x128xf32>
    %255 = arith.maximumf %253, %254 : vector<256x128xf32>
    %256 = vector.shape_cast %255 : vector<256x128xf32> to vector<16x16x128xf32>
    %257 = vector.extract_strided_slice %256 {offsets = [0, 0, 0], sizes = [16, 16, 4], strides = [1, 1, 1]} : vector<16x16x128xf32> to vector<16x16x4xf32>
    %c0_156 = arith.constant 0 : index
    %c0_157 = arith.constant 0 : index
    %c0_158 = arith.constant 0 : index
    %c0_159 = arith.constant 0 : index
    %258 = vector.load %arg5[%c0_156, %c0_157, %c0_158, %c0_159] : memref<1x16x16x4xf32, #tpu.memory_space<vmem>>, vector<1x16x16x4xf32>
    %259 = vector.shape_cast %258 : vector<1x16x16x4xf32> to vector<16x16x4xf32>
    %260 = vector.shape_cast %257 : vector<16x16x4xf32> to vector<1x16x16x4xf32>
    tpu.vector_store %arg5[%c0_156, %c0_157, %c0_158, %c0_159], %260 {strides = array<i32>} : memref<1x16x16x4xf32, #tpu.memory_space<vmem>>, vector<1x16x16x4xf32>,
    return
  }
  func.func @transform_0(%arg0: i32) -> (i32, i32, i32, i32) {
    %c0_i32 = arith.constant 0 : i32
    %c0_i32_0 = arith.constant 0 : i32
    %c0_i32_1 = arith.constant 0 : i32
    %c0_i32_2 = arith.constant 0 : i32
    return %arg0, %c0_i32, %c0_i32_0, %c0_i32_1 : i32, i32, i32, i32
  }
  func.func @transform_1(%arg0: i32) -> (i32, i32, i32) {
    %c0_i32 = arith.constant 0 : i32
    %c0_i32_0 = arith.constant 0 : i32
    %c0_i32_1 = arith.constant 0 : i32
    %c0_i32_2 = arith.constant 0 : i32
    return %c0_i32, %c0_i32_0, %c0_i32_1 : i32, i32, i32
  }
  func.func @transform_2(%arg0: i32) -> (i32, i32) {
    %c0_i32 = arith.constant 0 : i32
    %c0_i32_0 = arith.constant 0 : i32
    %c0_i32_1 = arith.constant 0 : i32
    return %c0_i32, %c0_i32_0 : i32, i32
  }
  func.func @transform_3(%arg0: i32) -> (i32, i32) {
    %c0_i32 = arith.constant 0 : i32
    %c0_i32_0 = arith.constant 0 : i32
    %c0_i32_1 = arith.constant 0 : i32
    return %c0_i32, %c0_i32_0 : i32, i32
  }
  func.func @transform_4(%arg0: i32) -> (i32, i32, i32, i32) {
    %c0_i32 = arith.constant 0 : i32
    %c0_i32_0 = arith.constant 0 : i32
    %c0_i32_1 = arith.constant 0 : i32
    %c0_i32_2 = arith.constant 0 : i32
    return %arg0, %c0_i32, %c0_i32_0, %c0_i32_1 : i32, i32, i32, i32
  }
}

</mosaic_0001>

<bundles_post_ra>
// kernel: recurrent_block_forward.1
= control target key start
LH: loop header
LB: loop body
LE: loop exit
PB: predicated region body
PF: predicated region fallthrough
CT: control target
= control target key end

     0   :  { %s11074_s15 = smov 0   ;;  %s16296_s0 = inlined_call_operand.vmem [shape: f32[2,16,16,4], index: 0, kind: input, shape index: {}]   ;;  %s16297_s1 = inlined_call_operand.vmem [shape: bf16[3,384,128], index: 1, kind: input, shape index: {}]   ;;  %s16298_s2 = inlined_call_operand.vmem [shape: f32[1,128], index: 2, kind: input, shape index: {}]   ;;  %s16299_s3 = inlined_call_operand.vmem [shape: f32[1,128], index: 3, kind: input, shape index: {}]   ;;  %s16300_s4 = inlined_call_operand.vmem [shape: f32[2,16,16,4], index: 4, kind: output, shape index: {}]  }
   0x1 LB: > { %s8605_s16 = sadd.s32 4294967295, %s11045_s15   ;;  %p8609_p0 = scmp.ge.s32.totalorder %s11045_s15, 1  ;;  %s11045_s15 = sphi %s11074_s15, %s14_s15  }
   0x2   : > { %p162_p1 = scmp.lt.s32.totalorder %s11045_s15, 3 }
   0x4   : > { %p163_p2 = pnand %p8609_p0, %p162_p1 }
   0x6   : > { %166 = sbr.rel (%p163_p2) target bundleno = 1441 (0x5a1), region = 36 }
   0xb   : > { %v10805_v0 = vld [vmem:[%s16297_s1 + $0x78] sm:$0xff]   ;;  %v11047_v2 = vmov 0.0   ;;  %v10807_v3 = vld [vmem:[%s16297_s1 + $0x70] sm:$0xff]   ;;  %p188_p3 = scmp.lt.s32.totalorder %s8605_s16, 1  ;;  %v10809_v5 = vld [vmem:[%s16297_s1 + $0x68] sm:$0xff]   ;;  %v11048_v6 = vmov 0.0|0.0   ;;  %v417_v15 = vlaneseq }
   0xc   : > { %v10806_v1 = vld [vmem:[%s16297_s1 + $0x38] sm:$0xff]   ;;  %201 = vst [vmem:[#allocation2] sm:$0xff] %v11047_v2  ;;  %204 = vst [vmem:[#allocation2 + $0x18] sm:$0xff] %v11047_v2  ;;  %9124 = vmatprep.subr.bf16.mxu0 %v10805_v0  ;;  %10780 = vmatprep.subr.bf16.mxu1 %v10805_v0  ;;  %v10808_v4 = vld [vmem:[%s16297_s1 + $0x30] sm:$0xff]   ;;  %vm288_vm0 = vcmask 31744   ;;  %v11189_v25 = vrot.slane %v11047_v2, 7 }
   0xd   : > { %205 = vst [vmem:[#allocation2 + $0x20] sm:$0xff] %v11047_v2  ;;  %207 = vst [vmem:[#allocation2 + $0x30] sm:$0xff] %v11047_v2  ;;  %9125 = vmatpush3.bf16.msra.mxu0 %v10806_v1  ;;  %10788 = vmatpush3.bf16.msra.mxu1 %v10806_v1  ;;  %s16530_s16 = smov (!%p188_p3, %s8605_s16), 1  ;;  %v10810_v7 = vld [vmem:[%s16297_s1 + $0x28] sm:$0xff]   ;;  %v10811_v8 = vld [vmem:[%s16297_s1 + $0x60] sm:$0xff]   ;;  %v11173_v19 = vshrl.u32 %v417_v15, 7 }
   0xe   : > { %208 = vst [vmem:[#allocation2 + $0x38] sm:$0xff] %v11047_v2  ;;  %210 = vst [vmem:[#allocation2 + $0x48] sm:$0xff] %v11047_v2  ;;  %9126 = vmatprep.subr.bf16.mxu0 %v10807_v3  ;;  %10781 = vmatprep.subr.bf16.mxu1 %v10807_v3  ;;  %s9122_s5 = sshll.u32 %s16530_s16, 8  ;;  %v10812_v9 = vld [vmem:[%s16297_s1 + $0x20] sm:$0xff]   ;;  %v10813_v10 = vld [vmem:[%s16297_s1 + $0x58] sm:$0xff]   ;;  %v452_v45 = vpack.c.bf16 %v11189_v25, %v11189_v25 }
   0xf   : > { %211 = vst [vmem:[#allocation2 + $0x50] sm:$0xff] %v11047_v2  ;;  %213 = vst [vmem:[#allocation2 + $0x60] sm:$0xff] %v11047_v2  ;;  %805 = vmatprep.mubr.bf16.mxu0 %v11048_v6  ;;  %s11154_s12 = scalar_lea.vmem %s16296_s0, %s9122_s5  ;;  %v10814_v11 = vld [vmem:[%s16297_s1 + $0x18] sm:$0xff]   ;;  %v10815_v12 = vld [vmem:[%s16297_s1 + $0x50] sm:$0xff]   ;;  %vm419_vm1 = vcmp.lt.s32.totalorder %v11173_v19, 1  ;;  %vm532_vm2 = vcmp.lt.s32.totalorder %v11173_v19, 7  ;;  %s16095_s26 = scalar_lea.vmem %s16300_s4, %s9122_s5 }
  0x10   : > { %214 = vst [vmem:[#allocation2 + $0x68] sm:$0xff] %v11047_v2  ;;  %216 = vst [vmem:[#allocation2 + $0x78] sm:$0xff] %v11047_v2  ;;  %v277_v13 = vld [vmem:[%s11154_s12 + $0xb0] sm:$0xff]  ;;  %v278_v14 = vld [vmem:[%s11154_s12 + $0xb8] sm:$0xff] }
  0x11   : > { %217 = vst [vmem:[#allocation2 + $0x80] sm:$0xff] %v11047_v2  ;;  %219 = vst [vmem:[#allocation2 + $0x90] sm:$0xff] %v11047_v2  ;;  %9127 = vmatpush3.bf16.msra.mxu0 %v10808_v4  ;;  %10789 = vmatpush3.bf16.msra.mxu1 %v10808_v4  ;;  %v10816_v16 = vld [vmem:[%s16297_s1 + $0x10] sm:$0xff]   ;;  %v10817_v17 = vld [vmem:[%s16297_s1 + $0x48] sm:$0xff]  }
  0x12   : > { %220 = vst [vmem:[#allocation2 + $0x98] sm:$0xff] %v11047_v2  ;;  %222 = vst [vmem:[#allocation2 + $0xa8] sm:$0xff] %v11047_v2  ;;  %9128 = vmatprep.subr.bf16.mxu0 %v10809_v5  ;;  %10782 = vmatprep.subr.bf16.mxu1 %v10809_v5  ;;  %v255_v18 = vld [vmem:[%s11154_s12] sm:$0xff]  ;;  %v256_v20 = vld [vmem:[%s11154_s12 + $0x8] sm:$0xff] }
  0x13   : > { %223 = vst [vmem:[#allocation2 + $0xb0] sm:$0xff] %v11047_v2  ;;  %225 = vst [vmem:[#allocation2 + $0xc0] sm:$0xff] %v11047_v2  ;;  %v279_v21 = vld [vmem:[%s11154_s12 + $0xc0] sm:$0xff]  ;;  %v280_v22 = vld [vmem:[%s11154_s12 + $0xc8] sm:$0xff] }
  0x14   : > { %226 = vst [vmem:[#allocation2 + $0xc8] sm:$0xff] %v11047_v2  ;;  %228 = vst [vmem:[#allocation2 + $0xd8] sm:$0xff] %v11047_v2  ;;  %v10818_v23 = vld [vmem:[%s16297_s1 + $0x8] sm:$0xff]   ;;  %v10819_v24 = vld [vmem:[%s16297_s1 + $0x40] sm:$0xff]  }
  0x15   : > { %229 = vst [vmem:[#allocation2 + $0xe0] sm:$0xff] %v11047_v2  ;;  %231 = vst [vmem:[#allocation2 + $0xf0] sm:$0xff] %v11047_v2  ;;  %9129 = vmatpush3.bf16.msra.mxu0 %v10810_v7  ;;  %10790 = vmatpush3.bf16.msra.mxu1 %v10810_v7  ;;  %v257_v26 = vld [vmem:[%s11154_s12 + $0x10] sm:$0xff]  ;;  %v258_v27 = vld [vmem:[%s11154_s12 + $0x18] sm:$0xff] }
  0x16   : > { %232 = vst [vmem:[#allocation2 + $0xf8] sm:$0xff] %v11047_v2  ;;  %234 = vst [vmem:[#allocation2 + $0x108] sm:$0xff] %v11047_v2  ;;  %9130 = vmatprep.subr.bf16.mxu0 %v10811_v8  ;;  %10783 = vmatprep.subr.bf16.mxu1 %v10811_v8  ;;  %v281_v28 = vld [vmem:[%s11154_s12 + $0xd0] sm:$0xff]  ;;  %v282_v31 = vld [vmem:[%s11154_s12 + $0xd8] sm:$0xff] }
  0x17   : > { %235 = vst [vmem:[#allocation2 + $0x110] sm:$0xff] %v11047_v2  ;;  %237 = vst [vmem:[#allocation2 + $0x120] sm:$0xff] %v11047_v2  ;;  %v10820_v32 = vld [vmem:[%s16297_s1] sm:$0xff]   ;;  %v10821_v36 = vld [vmem:[%s16297_s1 + $0xb8] sm:$0xff]  }
  0x18   : > { %238 = vst [vmem:[#allocation2 + $0x128] sm:$0xff] %v11047_v2  ;;  %240 = vst [vmem:[#allocation2 + $0x138] sm:$0xff] %v11047_v2  ;;  %v10823_v37 = vld [vmem:[%s16297_s1 + $0x178] sm:$0xff]   ;;  %v259_v44 = vld [vmem:[%s11154_s12 + $0x20] sm:$0xff] }
  0x19   : > { %241 = vst [vmem:[#allocation2 + $0x140] sm:$0xff] %v11047_v2  ;;  %243 = vst [vmem:[#allocation2 + $0x150] sm:$0xff] %v11047_v2  ;;  %9131 = vmatpush3.bf16.msra.mxu0 %v10812_v9  ;;  %10791 = vmatpush3.bf16.msra.mxu1 %v10812_v9  ;;  %v260_v48 = vld [vmem:[%s11154_s12 + $0x28] sm:$0xff]  ;;  %v283_v49 = vld [vmem:[%s11154_s12 + $0xe0] sm:$0xff] }
  0x1a   : > { %244 = vst [vmem:[#allocation2 + $0x158] sm:$0xff] %v11047_v2  ;;  %246 = vst [vmem:[#allocation2 + $0x168] sm:$0xff] %v11047_v2  ;;  %9132 = vmatprep.subr.bf16.mxu0 %v10813_v10  ;;  %10784 = vmatprep.subr.bf16.mxu1 %v10813_v10  ;;  %v284_v50 = vld [vmem:[%s11154_s12 + $0xe8] sm:$0xff]  ;;  %v10822_v51 = vld [vmem:[%s16297_s1 + $0xb0] sm:$0xff]  }
  0x1b   : > { %247 = vst [vmem:[#allocation2 + $0x170] sm:$0xff] %v11047_v2  ;;  %249 = vst [vmem:[#allocation2 + $0x180] sm:$0xff] %v11047_v2  ;;  %v10827_v57 = vld [vmem:[%s16297_s1 + $0x170] sm:$0xff]   ;;  %v10824_v60 = vld [vmem:[%s16297_s1 + $0xa8] sm:$0xff]  }
  0x1c   : > { %250 = vst [vmem:[#allocation2 + $0x188] sm:$0xff] %v11047_v2  ;;  %311 = vst.msk [vmem:[#allocation2 + $0x120] sm:$0xff] %vm288_vm0, %v277_v13  ;;  %v261_v3 = vld [vmem:[%s11154_s12 + $0x30] sm:$0xff]  ;;  %v262_v4 = vld [vmem:[%s11154_s12 + $0x38] sm:$0xff] }
  0x1d   : > { %312 = vst.msk [vmem:[#allocation2 + $0x128] sm:$0xff] %vm288_vm0, %v278_v14  ;;  %9133 = vmatpush3.bf16.msra.mxu0 %v10814_v11  ;;  %10792 = vmatpush3.bf16.msra.mxu1 %v10814_v11  ;;  %16346 = vst [vmem:[#allocation4_spill] sm:$0xff] %v11173_v19  ;;  %v10825_v9 = vld [vmem:[%s16297_s1 + $0xa0] sm:$0xff]   ;;  %v264_v15 = vld [vmem:[%s11154_s12 + $0x48] sm:$0xff] }
  0x1e   : > { %9134 = vmatprep.subr.bf16.mxu0 %v10815_v12  ;;  %10785 = vmatprep.subr.bf16.mxu1 %v10815_v12  ;;  %289 = vst.msk [vmem:[#allocation2 + $0x18] sm:$0xff] %vm288_vm0, %v255_v18  ;;  %290 = vst.msk [vmem:[#allocation2 + $0x20] sm:$0xff] %vm288_vm0, %v256_v20  ;;  %v263_v14 = vld [vmem:[%s11154_s12 + $0x40] sm:$0xff] }
  0x1f   : > { %313 = vst.msk [vmem:[#allocation2 + $0x138] sm:$0xff] %vm288_vm0, %v279_v21  ;;  %314 = vst.msk [vmem:[#allocation2 + $0x140] sm:$0xff] %vm288_vm0, %v280_v22  ;;  %v10826_v21 = vld [vmem:[%s16297_s1 + $0x98] sm:$0xff]  }
  0x20   : > { %291 = vst.msk [vmem:[#allocation2 + $0x30] sm:$0xff] %vm288_vm0, %v257_v26  ;;  %292 = vst.msk [vmem:[#allocation2 + $0x38] sm:$0xff] %vm288_vm0, %v258_v27 }
  0x21   : > { %9135 = vmatpush3.bf16.msra.mxu0 %v10816_v16  ;;  %10793 = vmatpush3.bf16.msra.mxu1 %v10816_v16  ;;  %315 = vst.msk [vmem:[#allocation2 + $0x150] sm:$0xff] %vm288_vm0, %v281_v28  ;;  %316 = vst.msk [vmem:[#allocation2 + $0x158] sm:$0xff] %vm288_vm0, %v282_v31  ;;  %v10836_v31 = vld [vmem:[%s16297_s1 + $0x160] sm:$0xff]  }
  0x22   : > { %9136 = vmatprep.subr.bf16.mxu0 %v10817_v17  ;;  %10786 = vmatprep.subr.bf16.mxu1 %v10817_v17  ;;  %293 = vst.msk [vmem:[#allocation2 + $0x48] sm:$0xff] %vm288_vm0, %v259_v44  ;;  %294 = vst.msk [vmem:[#allocation2 + $0x50] sm:$0xff] %vm288_vm0, %v260_v48  ;;  %v10831_v17 = vld [vmem:[%s16297_s1 + $0x168] sm:$0xff]  }
  0x23   : > { %v11194_v29 = vld [vmem:[#allocation2 + $0x120] sm:$0xff]  ;;  %317 = vst.msk [vmem:[#allocation2 + $0x168] sm:$0xff] %vm288_vm0, %v283_v49  ;;  %318 = vst.msk [vmem:[#allocation2 + $0x170] sm:$0xff] %vm288_vm0, %v284_v50  ;;  %v268_v48 = vld [vmem:[%s11154_s12 + $0x68] sm:$0xff]  ;;  %v11352_v49 = vrot.slane %v11047_v2, 1 }
  0x24   : > { %v11196_v30 = vld [vmem:[#allocation2 + $0x128] sm:$0xff]  ;;  %v405_v33 = vrot.slane %v11194_v29, 7  ;;  %295 = vst.msk [vmem:[#allocation2 + $0x60] sm:$0xff] %vm288_vm0, %v261_v3  ;;  %296 = vst.msk [vmem:[#allocation2 + $0x68] sm:$0xff] %vm288_vm0, %v262_v4 }
  0x25   : > { %v406_v34 = vrot.slane %v11196_v30, 7  ;;  %v480_v35 = vpack.c.bf16 %v11196_v30, %v11194_v29  ;;  %9137 = vmatpush3.bf16.msra.mxu0 %v10818_v23  ;;  %10794 = vmatpush3.bf16.msra.mxu1 %v10818_v23  ;;  %v11222_v40 = vld [vmem:[#allocation2 + $0x18] sm:$0xff]  ;;  %v11224_v41 = vld [vmem:[#allocation2 + $0x20] sm:$0xff]  ;;  %297 = vst.msk [vmem:[#allocation2 + $0x78] sm:$0xff] %vm288_vm0, %v263_v14  ;;  %298 = vst.msk [vmem:[#allocation2 + $0x80] sm:$0xff] %vm288_vm0, %v264_v15 }
  0x26   : > { %v427_v39 = vsel %vm419_vm1, %v11189_v25, %v405_v33  ;;  %9138 = vmatprep.subr.bf16.mxu0 %v10819_v24  ;;  %10787 = vmatprep.subr.bf16.mxu1 %v10819_v24  ;;  %v11226_v42 = vld [vmem:[#allocation2 + $0x138] sm:$0xff]  ;;  %v11228_v43 = vld [vmem:[#allocation2 + $0x140] sm:$0xff]  ;;  %v372_v47 = vrot.slane %v11222_v40, 7  ;;  %v11243_v52 = vpack.c.bf16 %v11224_v41, %v11222_v40  ;;  %v373_v53 = vrot.slane %v11224_v41, 7  ;;  %302 = vst.msk [vmem:[#allocation2 + $0xb0] sm:$0xff] %vm288_vm0, %v268_v48  ;;  %v10834_v48 = vld [vmem:[%s16297_s1 + $0x130] sm:$0xff]  }
  0x27   : > { %v426_v38 = vsel %vm419_vm1, %v405_v33, %v406_v34  ;;  %901 = vmatprep.mubr.bf16.mxu1 %v480_v35  ;;  %v408_v54 = vrot.slane %v11226_v42, 7  ;;  %v409_v55 = vrot.slane %v11228_v43, 7  ;;  %v481_v56 = vpack.c.bf16 %v11228_v43, %v11226_v42  ;;  %v11256_v58 = vld [vmem:[#allocation2 + $0x30] sm:$0xff]  ;;  %v11264_v61 = vld [vmem:[#allocation2 + $0x38] sm:$0xff] }
  0x28   : > { %v464_v46 = vpack.c.bf16 %v426_v38, %v427_v39  ;;  %v449_v59 = vsel %vm419_vm1, %v11189_v25, %v372_v47  ;;  %v11266_v62 = vld [vmem:[#allocation2 + $0x150] sm:$0xff]  ;;  %v448_v63 = vsel %vm419_vm1, %v372_v47, %v373_v53  ;;  %v11278_v5 = vld [vmem:[#allocation2 + $0x158] sm:$0xff]  ;;  %v375_v8 = vrot.slane %v11256_v58, 7  ;;  %v267_v47 = vld [vmem:[%s11154_s12 + $0x60] sm:$0xff] }
  0x29   : > { %9139 = vmatpush3.bf16.msra.mxu0 %v10820_v32  ;;  %10795 = vmatpush3.bf16.msra.mxu1 %v10820_v32  ;;  %v424_v0 = vsel %vm419_vm1, %v408_v54, %v409_v55  ;;  %v425_v1 = vsel %vm419_vm1, %v11189_v25, %v408_v54  ;;  %v11282_v6 = vpack.c.bf16 %v448_v63, %v449_v59  ;;  %v376_v11 = vrot.slane %v11264_v61, 7  ;;  %v11304_v18 = vld [vmem:[#allocation2 + $0x48] sm:$0xff]  ;;  %v11313_v22 = vld [vmem:[#allocation2 + $0x50] sm:$0xff]  ;;  %v266_v33 = vld [vmem:[%s11154_s12 + $0x58] sm:$0xff] }
  0x2a   : > { %10348 = vmatprep.subr.bf16.mxu1 %v10821_v36  ;;  %10396 = vmatprep.subr.bf16.mxu0 %v10823_v37  ;;  %v465_v7 = vpack.c.bf16 %v424_v0, %v425_v1  ;;  %v11290_v10 = vpack.c.bf16 %v11264_v61, %v11256_v58  ;;  %v411_v12 = vrot.slane %v11266_v62, 7  ;;  %v412_v13 = vrot.slane %v11278_v5, 7  ;;  %v11323_v27 = vld [vmem:[#allocation2 + $0x168] sm:$0xff]  ;;  %v11325_v28 = vld [vmem:[#allocation2 + $0x170] sm:$0xff]  ;;  %300 = vst.msk [vmem:[#allocation2 + $0x98] sm:$0xff] %vm288_vm0, %v266_v33  ;;  %v271_v63 = vld [vmem:[%s11154_s12 + $0x80] sm:$0xff] }
  0x2b   : > { %v482_v16 = vpack.c.bf16 %v11278_v5, %v11266_v62  ;;  %v447_v20 = vsel %vm419_vm1, %v11189_v25, %v375_v8  ;;  %v446_v23 = vsel %vm419_vm1, %v375_v8, %v376_v11  ;;  %v265_v32 = vld [vmem:[%s11154_s12 + $0x50] sm:$0xff]  ;;  %v378_v34 = vrot.slane %v11304_v18, 7  ;;  %301 = vst.msk [vmem:[#allocation2 + $0xa8] sm:$0xff] %vm288_vm0, %v267_v47  ;;  %v10829_v55 = vld [vmem:[%s16297_s1 + $0x88] sm:$0xff]   ;;  %v11377_v59 = vld [vmem:[#allocation2 + $0x60] sm:$0xff] }
  0x2c   : > { %806 = vmatmul.mubr.bf16.vlgmr.msra.gmra.mxu0 %v452_v45  ;;  %902 = vmatmul.mubr.bf16.vlgmr.msra.gmra.mxu1 %v464_v46  ;;  %v422_v24 = vsel %vm419_vm1, %v411_v12, %v412_v13  ;;  %v423_v26 = vsel %vm419_vm1, %v11189_v25, %v411_v12  ;;  %299 = vst.msk [vmem:[#allocation2 + $0x90] sm:$0xff] %vm288_vm0, %v265_v32  ;;  %v379_v38 = vrot.slane %v11313_v22, 7  ;;  %v414_v39 = vrot.slane %v11323_v27, 7  ;;  %v10828_v45 = vld [vmem:[%s16297_s1 + $0x90] sm:$0xff]   ;;  %v272_v1 = vld [vmem:[%s11154_s12 + $0x88] sm:$0xff]  ;;  %v10830_v8 = vld [vmem:[%s16297_s1 + $0x80] sm:$0xff]  }
  0x2d   : > { %10349 = vmatpush3.bf16.msra.mxu1 %v10821_v36  ;;  %813 = vmatprep.mubr.bf16.mxu0 %v11243_v52  ;;  %v11335_v35 = vpack.c.bf16 %v446_v23, %v447_v20  ;;  %v466_v36 = vpack.c.bf16 %v422_v24, %v423_v26  ;;  %v415_v44 = vrot.slane %v11325_v28, 7  ;;  %v483_v46 = vpack.c.bf16 %v11325_v28, %v11323_v27  ;;  %v11400_v12 = vld [vmem:[#allocation2 + $0x78] sm:$0xff]  ;;  %v337_v13 = vld [vmem:[#allocation2 + $0x80] sm:$0xff] }
  0x2e   : > { %10350 = vmatprep.subr.bf16.mxu1 %v10822_v51  ;;  %909 = vmatprep.mubr.bf16.mxu1 %v481_v56  ;;  %v445_v50 = vsel %vm419_vm1, %v11189_v25, %v378_v34  ;;  %v444_v2 = vsel %vm419_vm1, %v378_v34, %v379_v38  ;;  %v421_v54 = vsel %vm419_vm1, %v11189_v25, %v414_v39  ;;  %v269_v56 = vld [vmem:[%s11154_s12 + $0x70] sm:$0xff]  ;;  %v487_v0 = vrot.slane %v11222_v40, 1  ;;  %v274_v20 = vld [vmem:[%s11154_s12 + $0x98] sm:$0xff] }
  0x2f   : > { %10397 = vmatpush3.bf16.msra.mxu0 %v10823_v37  ;;  %v11339_v37 = vpack.c.bf16 %v11313_v22, %v11304_v18  ;;  %v420_v53 = vsel %vm419_vm1, %v414_v39, %v415_v44  ;;  %303 = vst.msk [vmem:[#allocation2 + $0xc0] sm:$0xff] %vm288_vm0, %v269_v56  ;;  %305 = vst.msk [vmem:[#allocation2 + $0xd8] sm:$0xff] %vm288_vm0, %v271_v63  ;;  %v11386_v3 = vrot.slane %v11224_v41, 1  ;;  %v11403_v14 = vrot.slane %v11264_v61, 1  ;;  %v276_v61 = vld [vmem:[%s11154_s12 + $0xa8] sm:$0xff]  ;;  %v10833_v38 = vld [vmem:[%s16297_s1 + $0xf8] sm:$0xff]  }
  0x30   : > { %10398 = vmatprep.subr.bf16.mxu0 %v10827_v57  ;;  %v11388_v4 = vpack.c.bf16 %v444_v2, %v445_v50  ;;  %306 = vst.msk [vmem:[#allocation2 + $0xe0] sm:$0xff] %vm288_vm0, %v272_v1  ;;  %v565_v11 = vpack.c.bf16 %v11352_v49, %v11352_v49  ;;  %v490_v15 = vrot.slane %v11256_v58, 1  ;;  %308 = vst.msk [vmem:[#allocation2 + $0xf8] sm:$0xff] %vm288_vm0, %v274_v20  ;;  %v275_v58 = vld [vmem:[%s11154_s12 + $0xa0] sm:$0xff]  ;;  %v493_v33 = vrot.slane %v11304_v18, 1  ;;  %v343_v1 = vld [vmem:[#allocation2 + $0xb0] sm:$0xff] }
  0x31   : > { %10351 = vmatpush3.bf16.msra.mxu1 %v10822_v51  ;;  %v10839_v51 = vld [vmem:[%s16297_s1 + $0x158] sm:$0xff]   ;;  %v11429_v26 = vsel %vm532_vm2, %v487_v0, %v11386_v3  ;;  %309 = vst.msk [vmem:[#allocation2 + $0x108] sm:$0xff] %vm288_vm0, %v275_v58  ;;  %310 = vst.msk [vmem:[#allocation2 + $0x110] sm:$0xff] %vm288_vm0, %v276_v61  ;;  %v559_v32 = vsel %vm532_vm2, %v11403_v14, %v11352_v49  ;;  %v11442_v34 = vrot.slane %v11313_v22, 1  ;;  %v384_v44 = vrot.slane %v11400_v12, 7 }
  0x32   : > { %10352 = vmatprep.subr.bf16.mxu1 %v10824_v60  ;;  %v11452_v39 = vsel %vm532_vm2, %v490_v15, %v11403_v14  ;;  %v496_v18 = vrot.slane %v11377_v59, 1  ;;  %v340_v50 = vld [vmem:[#allocation2 + $0x98] sm:$0xff]  ;;  %v11466_v2 = vpack.c.bf16 %v337_v13, %v11400_v12  ;;  %v499_v63 = vrot.slane %v11400_v12, 1 }
  0x33   : > { %10399 = vmatpush3.bf16.msra.mxu0 %v10827_v57  ;;  %v270_v57 = vld [vmem:[%s11154_s12 + $0x78] sm:$0xff]  ;;  %v11478_v56 = vsel %vm532_vm2, %v493_v33, %v11442_v34  ;;  %v11492_v0 = vrot.slane %v337_v13, 1  ;;  %v391_v20 = vrot.slane %v343_v1, 7  ;;  %v10838_v33 = vld [vmem:[%s16297_s1 + $0xe8] sm:$0xff]  }
  0x34   : > { %814 = vmatmul.mubr.bf16.gmra.mxu0 %v11282_v6  ;;  %910 = vmatmul.mubr.bf16.gmra.mxu1 %v465_v7  ;;  %304 = vst.msk [vmem:[#allocation2 + $0xc8] sm:$0xff] %vm288_vm0, %v270_v57  ;;  %v467_v7 = vpack.c.bf16 %v420_v53, %v421_v54  ;;  %v11468_v53 = vld [vmem:[#allocation2 + $0xa8] sm:$0xff]  ;;  %v567_v54 = vpack.c.bf16 %v559_v32, %v11452_v39 }
  0x35   : > { %10353 = vmatpush3.bf16.msra.mxu1 %v10824_v60  ;;  %821 = vmatprep.mubr.bf16.mxu0 %v11290_v10  ;;  %v334_v60 = vld [vmem:[#allocation2 + $0x68] sm:$0xff]  ;;  %v390_v15 = vrot.slane %v11468_v53, 7  ;;  %v11528_v32 = vsel %vm532_vm2, %v499_v63, %v11492_v0 }
  0x36   : > { %10354 = vmatprep.subr.bf16.mxu1 %v10825_v9  ;;  %917 = vmatprep.mubr.bf16.mxu1 %v482_v16  ;;  %v11395_v40 = vpack.c.bf16 %v334_v60, %v11377_v59  ;;  %v382_v41 = vrot.slane %v334_v60, 7  ;;  %v10844_v16 = vld [vmem:[%s16297_s1 + $0x150] sm:$0xff]  }
  0x37   : > { %10400 = vmatprep.subr.bf16.mxu0 %v10831_v17 }
  0x38   : > { %10401 = vmatpush3.bf16.msra.mxu0 %v10831_v17  ;;  %v273_v17 = vld [vmem:[%s11154_s12 + $0x90] sm:$0xff] }
  0x39   : > { %10355 = vmatpush3.bf16.msra.mxu1 %v10825_v9  ;;  %10402 = vmatprep.subr.bf16.mxu0 %v10836_v31  ;;  %v381_v9 = vrot.slane %v11377_v59, 7  ;;  %307 = vst.msk [vmem:[#allocation2 + $0xf0] sm:$0xff] %vm288_vm0, %v273_v17 }
  0x3a   : > { %10356 = vmatprep.subr.bf16.mxu1 %v10826_v21 }
  0x3b   : > { %v442_v23 = vsel %vm419_vm1, %v381_v9, %v382_v41  ;;  %v443_v24 = vsel %vm419_vm1, %v11189_v25, %v381_v9  ;;  %v388_v41 = vrot.slane %v340_v50, 7  ;;  %v11510_v17 = vld [vmem:[#allocation2 + $0xc8] sm:$0xff] }
  0x3c   : > { %822 = vmatmul.mubr.bf16.gmra.mxu0 %v11335_v35  ;;  %918 = vmatmul.mubr.bf16.gmra.mxu1 %v466_v36  ;;  %v11444_v36 = vrot.slane %v334_v60, 1  ;;  %v11456_v22 = vpack.c.bf16 %v442_v23, %v443_v24 }
  0x3d   : > { %10357 = vmatpush3.bf16.msra.mxu1 %v10826_v21  ;;  %829 = vmatprep.mubr.bf16.mxu0 %v11339_v37  ;;  %v561_v21 = vsel %vm532_vm2, %v11386_v3, %v11352_v49 }
  0x3e   : > { %10358 = vmatprep.subr.bf16.mxu1 %v10828_v45  ;;  %925 = vmatprep.mubr.bf16.mxu1 %v483_v46  ;;  %v339_v46 = vld [vmem:[#allocation2 + $0x90] sm:$0xff]  ;;  %v566_v47 = vpack.c.bf16 %v561_v21, %v11429_v26  ;;  %v555_v57 = vsel %vm532_vm2, %v11444_v36, %v11352_v49  ;;  %v11489_v60 = vsel %vm532_vm2, %v496_v18, %v11444_v36  ;;  %v10852_v21 = vld [vmem:[%s16297_s1 + $0x140] sm:$0xff]  }
  0x3f   : > { %10403 = vmatpush3.bf16.msra.mxu0 %v10836_v31  ;;  %v10832_v31 = vld [vmem:[%s16297_s1 + $0x138] sm:$0xff]   ;;  %v387_v9 = vrot.slane %v339_v46, 7  ;;  %v502_v12 = vrot.slane %v339_v46, 1  ;;  %v569_v23 = vpack.c.bf16 %v555_v57, %v11489_v60  ;;  %v11519_v24 = vpack.c.bf16 %v340_v50, %v339_v46  ;;  %v10840_v18 = vld [vmem:[%s16297_s1 + $0x120] sm:$0xff]  }
  0x40   : > { %10404 = vmatprep.subr.bf16.mxu0 %v10839_v51 }
  0x41   : > { %10359 = vmatpush3.bf16.msra.mxu1 %v10828_v45  ;;  %v385_v45 = vrot.slane %v337_v13, 7  ;;  %v11505_v13 = vrot.slane %v340_v50, 1  ;;  %v439_v46 = vsel %vm419_vm1, %v11189_v25, %v387_v9 }
  0x42   : > { %10360 = vmatprep.subr.bf16.mxu1 %v10829_v55 }
  0x43   : > { %10405 = vmatpush3.bf16.msra.mxu0 %v10839_v51  ;;  %v10847_v51 = vld [vmem:[%s16297_s1 + $0x148] sm:$0xff]   ;;  %v440_v59 = vsel %vm419_vm1, %v384_v44, %v385_v45  ;;  %v438_v45 = vsel %vm419_vm1, %v387_v9, %v388_v41  ;;  %v551_v50 = vsel %vm532_vm2, %v11505_v13, %v11352_v49  ;;  %v10841_v9 = vld [vmem:[%s16297_s1 + $0xe0] sm:$0xff]   ;;  %v11573_v41 = vld [vmem:[#allocation2 + $0xf8] sm:$0xff] }
  0x44   : > { %830 = vmatmul.mubr.bf16.gmra.mxu0 %v11388_v4  ;;  %926 = vmatmul.mubr.bf16.gmra.mxu1 %v467_v7  ;;  %v441_v7 = vsel %vm419_vm1, %v11189_v25, %v384_v44  ;;  %v11534_v44 = vld [vmem:[#allocation2 + $0xd8] sm:$0xff] }
  0x45   : > { %10361 = vmatpush3.bf16.msra.mxu1 %v10829_v55  ;;  %837 = vmatprep.mubr.bf16.mxu0 %v11395_v40  ;;  %v557_v55 = vsel %vm532_vm2, %v11442_v34, %v11352_v49  ;;  %v11515_v58 = vpack.c.bf16 %v440_v59, %v441_v7  ;;  %v11561_v59 = vld [vmem:[#allocation2 + $0xf0] sm:$0xff]  ;;  %v11565_v7 = vpack.c.bf16 %v438_v45, %v439_v46  ;;  %v11582_v45 = vrot.slane %v343_v1, 1 }
  0x46   : > { %10362 = vmatprep.subr.bf16.mxu1 %v10830_v8  ;;  %10364 = vmatprep.mubr.bf16.mxu1 %v565_v11  ;;  %v10837_v11 = vld [vmem:[%s16297_s1 + $0x128] sm:$0xff]   ;;  %v568_v61 = vpack.c.bf16 %v557_v55, %v11478_v56  ;;  %v10854_v55 = vld [vmem:[%s16297_s1 + $0x1f8] sm:$0xff]  }
  0x47   : > { %10406 = vmatprep.subr.bf16.mxu0 %v10844_v16 }
  0x48   : > { %10407 = vmatpush3.bf16.msra.mxu0 %v10844_v16  ;;  %v11508_v16 = vld [vmem:[#allocation2 + $0xc0] sm:$0xff] }
  0x49   : > { %10363 = vmatpush3.bf16.msra.mxu1 %v10830_v8  ;;  %10408 = vmatprep.subr.bf16.mxu0 %v10847_v51  ;;  %v10835_v8 = vld [vmem:[%s16297_s1 + $0xf0] sm:$0xff]  }
  0x4a   : > { %9260 = vmatprep.subr.bf16.mxu1 %v10832_v31  ;;  %v553_v31 = vsel %vm532_vm2, %v11492_v0, %v11352_v49 }
  0x4b   : > { %v570_v57 = vpack.c.bf16 %v553_v31, %v11528_v32  ;;  %v505_v31 = vrot.slane %v11468_v53, 1 }
  0x4c   : > { %838 = vmatmul.mubr.bf16.gmra.mxu0 %v11456_v22  ;;  %10365 = vmatmul.mubr.bf16.vlgmr.msra.gmra.mxu1 %v566_v47  ;;  %v394_v47 = vrot.slane %v11510_v17, 7 }
  0x4d   : > { %9261 = vmatpush3.bf16.msra.mxu1 %v10833_v38  ;;  %845 = vmatprep.mubr.bf16.mxu0 %v11466_v2  ;;  %v393_v38 = vrot.slane %v11508_v16, 7 }
  0x4e   : > { %10368 = vmatprep.mubr.bf16.mxu1 %v567_v54  ;;  %9262 = vmatprep.subr.bf16.mxu1 %v10834_v48  ;;  %v11545_v48 = vld [vmem:[#allocation2 + $0xe0] sm:$0xff]  ;;  %v396_v54 = vrot.slane %v11534_v44, 7 }
  0x4f   : > { %10409 = vmatpush3.bf16.msra.mxu0 %v10847_v51  ;;  %v11554_v51 = vsel %vm532_vm2, %v502_v12, %v11505_v13  ;;  %v397_v63 = vrot.slane %v11545_v48, 7  ;;  %v399_v12 = vrot.slane %v11561_v59, 7  ;;  %v434_v46 = vsel %vm419_vm1, %v393_v38, %v394_v47 }
  0x50   : > { %10410 = vmatprep.subr.bf16.mxu0 %v10852_v21 }
  0x51   : > { %9263 = vmatpush3.bf16.msra.mxu1 %v10835_v8  ;;  %v11568_v8 = vpack.c.bf16 %v343_v1, %v11468_v53  ;;  %v1240_v53 = vsel %vm419_vm1, %v11189_v25, %v393_v38  ;;  %v1238_v1 = vsel %vm419_vm1, %v11189_v25, %v396_v54  ;;  %v508_v38 = vrot.slane %v11508_v16, 1 }
  0x52   : > { %9264 = vmatprep.subr.bf16.mxu1 %v10837_v11  ;;  %v571_v11 = vpack.c.bf16 %v551_v50, %v11554_v51  ;;  %v432_v50 = vsel %vm419_vm1, %v396_v54, %v397_v63  ;;  %v1236_v63 = vsel %vm419_vm1, %v11189_v25, %v399_v12  ;;  %v11616_v54 = vrot.slane %v11510_v17, 1 }
  0x53   : > { %10411 = vmatpush3.bf16.msra.mxu0 %v10852_v21  ;;  %16347 = vst [vmem:[#allocation5_spill] sm:$0xff] %v11568_v8  ;;  %v400_v21 = vrot.slane %v11573_v41, 7 }
  0x54   : > { %846 = vmatmul.mubr.bf16.gmra.mxu0 %v11515_v58  ;;  %10369 = vmatmul.mubr.bf16.gmra.mxu1 %v568_v61  ;;  %v436_v61 = vsel %vm419_vm1, %v390_v15, %v391_v20  ;;  %v1242_v20 = vsel %vm419_vm1, %v11189_v25, %v390_v15  ;;  %v11609_v15 = vpack.c.bf16 %v432_v50, %v1238_v1  ;;  %v511_v50 = vrot.slane %v11534_v44, 1 }
  0x55   : > { %853 = vmatprep.mubr.bf16.mxu0 %v11519_v24  ;;  %10372 = vmatprep.mubr.bf16.mxu1 %v569_v23  ;;  %v10842_v23 = vld [vmem:[%s16297_s1 + $0x118] sm:$0xff]   ;;  %v430_v47 = vsel %vm419_vm1, %v399_v12, %v400_v21  ;;  %v10845_v21 = vld [vmem:[%s16297_s1 + $0x110] sm:$0xff]   ;;  %v11632_v12 = vsel %vm532_vm2, %v505_v31, %v11582_v45  ;;  %v10848_v31 = vld [vmem:[%s16297_s1 + $0x108] sm:$0xff]   ;;  %v11657_v1 = vrot.slane %v11545_v48, 1 }
  0x56   : > { %9265 = vmatpush3.bf16.msra.mxu1 %v10838_v33  ;;  %9396 = vmatprep.subr.bf16.mxu0 %v10854_v55  ;;  %v11594_v33 = vpack.c.bf16 %v436_v61, %v1242_v20  ;;  %v11607_v55 = vpack.c.bf16 %v434_v46, %v1240_v53  ;;  %v11618_v61 = vpack.c.bf16 %v430_v47, %v1236_v63  ;;  %v514_v47 = vrot.slane %v11561_v59, 1 }
  0x57   : > { %9266 = vmatprep.subr.bf16.mxu1 %v10840_v18  ;;  %v10843_v18 = vld [vmem:[%s16297_s1 + $0xd8] sm:$0xff]   ;;  %v547_v46 = vsel %vm532_vm2, %v11616_v54, %v11352_v49  ;;  %v11653_v20 = vpack.c.bf16 %v11510_v17, %v11508_v16  ;;  %v11664_v63 = vrot.slane %v11573_v41, 1  ;;  %v10850_v16 = vld [vmem:[%s16297_s1 + $0x100] sm:$0xff]   ;;  %v11670_v17 = vld [vmem:[#allocation2 + $0x108] sm:$0xff] }
  0x58   : > { %16348 = vst [vmem:[#allocation6_spill] sm:$0xff] %v11594_v33 }
  0x59   : > { %16349 = vst [vmem:[#allocation7_spill] sm:$0xff] %v11653_v20 }
  0x5a   : > { %9267 = vmatpush3.bf16.msra.mxu1 %v10841_v9  ;;  %v549_v9 = vsel %vm532_vm2, %v11582_v45, %v11352_v49 }
  0x5b   : > { %9268 = vmatprep.subr.bf16.mxu1 %v10842_v23  ;;  %v572_v23 = vpack.c.bf16 %v549_v9, %v11632_v12  ;;  %v355_v9 = vld [vmem:[#allocation2 + $0x110] sm:$0xff] }
  0x5c   : > { %854 = vmatmul.mubr.bf16.gmra.mxu0 %v11565_v7  ;;  %10373 = vmatmul.mubr.bf16.gmra.mxu1 %v570_v57  ;;  %v11641_v57 = vsel %vm532_vm2, %v508_v38, %v11616_v54  ;;  %v545_v38 = vsel %vm532_vm2, %v11657_v1, %v11352_v49 }
  0x5d   : > { %861 = vmatprep.mubr.bf16.mxu0 %v11568_v8  ;;  %10376 = vmatprep.mubr.bf16.mxu1 %v571_v11  ;;  %v10846_v11 = vld [vmem:[%s16297_s1 + $0xd0] sm:$0xff]   ;;  %v573_v53 = vpack.c.bf16 %v547_v46, %v11641_v57  ;;  %v11710_v8 = vrot.slane %v355_v9, 1 }
  0x5e   : > { %9269 = vmatpush3.bf16.msra.mxu1 %v10843_v18  ;;  %v10849_v18 = vld [vmem:[%s16297_s1 + $0xc8] sm:$0xff]   ;;  %v285_v46 = vld [vmem:[%s11154_s12 + $0xf0] sm:$0xff] }
  0x5f   : > { %9270 = vmatprep.subr.bf16.mxu1 %v10845_v21  ;;  %v11680_v21 = vsel %vm532_vm2, %v511_v50, %v11657_v1  ;;  %319 = vst.msk [vmem:[#allocation2 + $0x180] sm:$0xff] %vm288_vm0, %v285_v46  ;;  %v11701_v50 = vld [vmem:[%s16297_s1 + $0x238] sm:$0xff]   ;;  %v520_v46 = vrot.slane %v11194_v29, 1 }
  0x62   : > { %9271 = vmatpush3.bf16.msra.mxu1 %v10846_v11  ;;  %v286_v11 = vld [vmem:[%s11154_s12 + $0xf8] sm:$0xff] }
  0x63   : > { %9272 = vmatprep.subr.bf16.mxu1 %v10848_v31  ;;  %v543_v31 = vsel %vm532_vm2, %v11664_v63, %v11352_v49  ;;  %320 = vst.msk [vmem:[#allocation2 + $0x188] sm:$0xff] %vm288_vm0, %v286_v11 }
  0x64   : > { %862 = vmatmul.mubr.bf16.gmra.mxu0 %v11594_v33  ;;  %10377 = vmatmul.mubr.bf16.gmra.mxu1 %v572_v23  ;;  %v11691_v23 = vsel %vm532_vm2, %v514_v47, %v11664_v63  ;;  %v11706_v47 = vpack.c.bf16 %v11545_v48, %v11534_v44  ;;  %v517_v33 = vrot.slane %v11670_v17, 1  ;;  %v541_v44 = vsel %vm532_vm2, %v11710_v8, %v11352_v49 }
  0x65   : > { %869 = vmatprep.mubr.bf16.mxu0 %v11653_v20  ;;  %10380 = vmatprep.mubr.bf16.mxu1 %v573_v53  ;;  %v10851_v53 = vld [vmem:[%s16297_s1 + $0xc0] sm:$0xff]   ;;  %v574_v20 = vpack.c.bf16 %v545_v38, %v11680_v21 }
  0x66   : > { %9273 = vmatpush3.bf16.msra.mxu1 %v10849_v18  ;;  %16350 = vst [vmem:[#allocation8_spill] sm:$0xff] %v11706_v47  ;;  %v575_v18 = vpack.c.bf16 %v543_v31, %v11691_v23  ;;  %v11724_v29 = vsel %vm532_vm2, %v517_v33, %v11710_v8  ;;  %v11021_v38 = vld [vmem:[#allocation2] sm:$0xff]  ;;  %v11736_v31 = vpack.c.bf16 %v11573_v41, %v11561_v59  ;;  %v523_v33 = vrot.slane %v11226_v42, 1 }
  0x67   : > { %9274 = vmatprep.subr.bf16.mxu1 %v10850_v16  ;;  %v521_v16 = vrot.slane %v11196_v30, 1  ;;  %v11732_v11 = vrot.slane %v11021_v38, 1 }
  0x69   : > { %v539_v30 = vsel %vm532_vm2, %v521_v16, %v11352_v49  ;;  %v540_v48 = vsel %vm532_vm2, %v520_v46, %v521_v16  ;;  %v527_v49 = vrot.slane %v11278_v5, 1  ;;  %v530_v5 = vrot.slane %v11325_v28, 1 }
  0x6a   : > { %9275 = vmatpush3.bf16.msra.mxu1 %v10851_v53  ;;  %v577_v53 = vpack.c.bf16 %v539_v30, %v540_v48  ;;  %v402_v16 = vrot.slane %v11670_v17, 7  ;;  %v11758_v30 = vpack.c.bf16 %v355_v9, %v11670_v17 }
  0x6b   : > { %10444 = vmatprep.subr.bf16.mxu1 %v11701_v50  ;;  %v535_v42 = vsel %vm532_vm2, %v527_v49, %v11732_v11 }
  0x6c   : > { %870 = vmatmul.mubr.bf16.gmra.mxu0 %v11607_v55  ;;  %10381 = vmatmul.mubr.bf16.gmra.mxu1 %v574_v20  ;;  %v576_v20 = vpack.c.bf16 %v541_v44, %v11724_v29  ;;  %v403_v44 = vrot.slane %v355_v9, 7  ;;  %v429_v28 = vsel %vm419_vm1, %v11189_v25, %v402_v16  ;;  %v1365_v9 = vsel %vm532_vm2, %v11386_v3, %v11732_v11 }
  0x6d   : > { %877 = vmatprep.mubr.bf16.mxu0 %v11706_v47  ;;  %10384 = vmatprep.mubr.bf16.mxu1 %v575_v18  ;;  %v524_v18 = vrot.slane %v11228_v43, 1  ;;  %v526_v47 = vrot.slane %v11266_v62, 1  ;;  %v529_v62 = vrot.slane %v11323_v27, 1  ;;  %v1363_v3 = vsel %vm532_vm2, %v11403_v14, %v11732_v11  ;;  %v10855_v14 = vld [vmem:[%s16297_s1 + $0x1b8] sm:$0xff]  }
  0x6e   : > { %v428_v27 = vsel %vm419_vm1, %v402_v16, %v403_v44  ;;  %v11815_v16 = vld [vmem:[#allocation2 + $0x158] sm:$0xff] }
  0x6f   : > { %v537_v59 = vsel %vm532_vm2, %v524_v18, %v11732_v11  ;;  %v538_v41 = vsel %vm532_vm2, %v523_v33, %v524_v18  ;;  %v536_v43 = vsel %vm532_vm2, %v526_v47, %v527_v49  ;;  %v534_v17 = vsel %vm532_vm2, %v529_v62, %v530_v5  ;;  %v11779_v33 = vld [vmem:[#allocation2 + $0x120] sm:$0xff]  ;;  %v11781_v18 = vld [vmem:[#allocation2 + $0x128] sm:$0xff]  ;;  %v11783_v49 = vld [vmem:[#allocation2 + $0x138] sm:$0xff] }
  0x70   : > { %v578_v46 = vpack.c.bf16 %v537_v59, %v538_v41  ;;  %v579_v48 = vpack.c.bf16 %v535_v42, %v536_v43  ;;  %v11776_v47 = vpack.c.bf16 %v428_v27, %v429_v28  ;;  %v11785_v59 = vld [vmem:[#allocation2 + $0x140] sm:$0xff]  ;;  %v1321_v41 = vrot.slane %v11781_v18, 1  ;;  %v10859_v27 = vld [vmem:[%s16297_s1 + $0x1e8] sm:$0xff]  }
  0x71   : > { %v1361_v42 = vsel %vm532_vm2, %v11442_v34, %v11732_v11  ;;  %v1323_v43 = vrot.slane %v11783_v49, 1  ;;  %v11801_v62 = vrot.slane %v11785_v59, 1  ;;  %v11813_v34 = vld [vmem:[#allocation2 + $0x150] sm:$0xff]  ;;  %v11843_v28 = vrot.slane %v11779_v33, 7 }
  0x72   : > { %v1369_v44 = vpack.c.bf16 %v1361_v42, %v11478_v56  ;;  %v1359_v56 = vsel %vm532_vm2, %v11444_v36, %v11732_v11  ;;  %v1209_v36 = vrot.slane %v11781_v18, 7  ;;  %v10868_v42 = vld [vmem:[%s16297_s1 + $0x220] sm:$0xff]  }
  0x74   : > { %878 = vmatmul.mubr.bf16.gmra.mxu0 %v11609_v15  ;;  %10385 = vmatmul.mubr.bf16.gmra.mxu1 %v576_v20  ;;  %v533_v20 = vsel %vm532_vm2, %v530_v5, %v11732_v11  ;;  %v10856_v5 = vld [vmem:[%s16297_s1 + $0x1f0] sm:$0xff]  }
  0x75   : > { %885 = vmatprep.mubr.bf16.mxu0 %v11736_v31  ;;  %10388 = vmatprep.mubr.bf16.mxu1 %v577_v53  ;;  %v580_v38 = vpack.c.bf16 %v533_v20, %v534_v17  ;;  %v1367_v53 = vpack.c.bf16 %v1365_v9, %v11429_v26  ;;  %v1320_v26 = vrot.slane %v11779_v33, 1  ;;  %v10863_v20 = vld [vmem:[%s16297_s1 + $0x228] sm:$0xff]   ;;  %v11846_v17 = vld [vmem:[#allocation2 + $0x170] sm:$0xff]  ;;  %v1370_v9 = vpack.c.bf16 %v1359_v56, %v11489_v60 }
  0x76   : > { %v11861_v60 = vrot.slane %v11846_v17, 1  ;;  %v10874_v56 = vld [vmem:[%s16297_s1 + $0x210] sm:$0xff]  }
  0x7c   : > { %886 = vmatmul.mubr.bf16.gmra.mxu0 %v11618_v61  ;;  %10389 = vmatmul.mubr.bf16.gmra.mxu1 %v578_v46  ;;  %v10858_v46 = vld [vmem:[%s16297_s1 + $0x230] sm:$0xff]  }
  0x7d   : > { %893 = vmatprep.mubr.bf16.mxu0 %v11758_v30  ;;  %10392 = vmatprep.mubr.bf16.mxu1 %v579_v48  ;;  %v11818_v48 = vld [vmem:[#allocation2 + $0x168] sm:$0xff] }
  0x84   : > { %894 = vmatmul.mubr.bf16.gmra.mxu0 %v11776_v47  ;;  %10393 = vmatmul.mubr.bf16.gmra.mxu1 %v580_v38  ;;  %v10860_v38 = vld [vmem:[%s16297_s1 + $0x1a8] sm:$0xff]  }
  0x85   : > { %1608 = vmatprep.mubr.bf16.mxu1 %v11243_v52  ;;  %10412 = vmatprep.mubr.bf16.mxu0 %v1367_v53  ;;  %v1368_v52 = vpack.c.bf16 %v1363_v3, %v11452_v39  ;;  %v10857_v39 = vld [vmem:[%s16297_s1 + $0x1b0] sm:$0xff]   ;;  %v10861_v3 = vld [vmem:[%s16297_s1 + $0x1e0] sm:$0xff]  }
  0x8c   : > { %1609 = vmatmul.mubr.bf16.vlgmr.msra.gmra.mxu1 %v11282_v6  ;;  %10413 = vmatmul.mubr.bf16.vlgmr.msra.gmra.mxu0 %v1368_v52  ;;  %v1357_v6 = vsel %vm532_vm2, %v11492_v0, %v11732_v11  ;;  %v1329_v0 = vrot.slane %v11818_v48, 1  ;;  %v11863_v52 = vld [vmem:[#allocation2 + $0x30] sm:$0xff] }
  0x8d   : > { %10445 = vmatpush3.bf16.msra.mxu1 %v11701_v50  ;;  %1616 = vmatprep.mubr.bf16.mxu1 %v11290_v10  ;;  %v1326_v50 = vrot.slane %v11813_v34, 1  ;;  %v1327_v10 = vrot.slane %v11815_v16, 1  ;;  %v1371_v53 = vpack.c.bf16 %v1357_v6, %v11528_v32  ;;  %v10862_v32 = vld [vmem:[%s16297_s1 + $0x1a0] sm:$0xff]   ;;  %v10869_v6 = vld [vmem:[%s16297_s1 + $0x1c8] sm:$0xff]  }
  0x8e   : > { %10416 = vmatprep.mubr.bf16.mxu0 %v1369_v44  ;;  %9397 = vmatpush3.bf16.msra.mxu0 %v10855_v14  ;;  %v1355_v14 = vsel %vm532_vm2, %v11505_v13, %v11732_v11  ;;  %v10865_v44 = vld [vmem:[%s16297_s1 + $0x198] sm:$0xff]  }
  0x8f   : > { %9398 = vmatprep.subr.bf16.mxu0 %v10856_v5  ;;  %10446 = vmatprep.subr.bf16.mxu1 %v10858_v46  ;;  %v10864_v5 = vld [vmem:[%s16297_s1 + $0x1d8] sm:$0xff]   ;;  %v1372_v13 = vpack.c.bf16 %v1355_v14, %v11554_v51  ;;  %v10867_v51 = vld [vmem:[%s16297_s1 + $0x190] sm:$0xff]  }
  0x91   : > { %10447 = vmatpush3.bf16.msra.mxu1 %v10858_v46  ;;  %v2043_v46 = vrot.slane %v11863_v52, 7 }
  0x92   : > { %9399 = vmatpush3.bf16.msra.mxu0 %v10857_v39  ;;  %10448 = vmatprep.subr.bf16.mxu1 %v10863_v20 }
  0x93   : > { %9400 = vmatprep.subr.bf16.mxu0 %v10859_v27 }
  0x94   : > { %1617 = vmatmul.mubr.bf16.gmra.mxu1 %v11335_v35  ;;  %10417 = vmatmul.mubr.bf16.gmra.mxu0 %v1370_v9  ;;  %v1353_v35 = vsel %vm532_vm2, %v11582_v45, %v11732_v11  ;;  %v10866_v45 = vld [vmem:[%s16297_s1 + $0x1d0] sm:$0xff]   ;;  %v10870_v9 = vld [vmem:[%s16297_s1 + $0x188] sm:$0xff]  }
  0x95   : > { %1624 = vmatprep.mubr.bf16.mxu1 %v11339_v37  ;;  %10420 = vmatprep.mubr.bf16.mxu0 %v1371_v53  ;;  %v10873_v37 = vld [vmem:[%s16297_s1 + $0x218] sm:$0xff]   ;;  %v1373_v39 = vpack.c.bf16 %v1353_v35, %v11632_v12  ;;  %v1351_v12 = vsel %vm532_vm2, %v11616_v54, %v11732_v11  ;;  %v11926_v53 = vld [vmem:[#allocation2 + $0x48] sm:$0xff]  ;;  %v11950_v35 = vld [vmem:[#allocation2 + $0x60] sm:$0xff] }
  0x96   : > { %9401 = vmatpush3.bf16.msra.mxu0 %v10860_v38  ;;  %10449 = vmatpush3.bf16.msra.mxu1 %v10863_v20  ;;  %v11893_v20 = vld [vmem:[#allocation2 + $0x38] sm:$0xff]  ;;  %v1374_v54 = vpack.c.bf16 %v1351_v12, %v11641_v57  ;;  %v10872_v57 = vld [vmem:[%s16297_s1 + $0x180] sm:$0xff]  }
  0x97   : > { %9402 = vmatprep.subr.bf16.mxu0 %v10861_v3  ;;  %10450 = vmatprep.subr.bf16.mxu1 %v10868_v42  ;;  %v2044_v27 = vrot.slane %v11893_v20, 7  ;;  %v11928_v3 = vld [vmem:[#allocation2 + $0x50] sm:$0xff] }
  0x98   : > { %v2047_v14 = vrot.slane %v11928_v3, 7 }
  0x9a   : > { %9403 = vmatpush3.bf16.msra.mxu0 %v10862_v32  ;;  %10451 = vmatpush3.bf16.msra.mxu1 %v10868_v42  ;;  %v10876_v42 = vld [vmem:[%s16297_s1 + $0x200] sm:$0xff]   ;;  %v1345_v32 = vsel %vm532_vm2, %v11710_v8, %v11732_v11  ;;  %v1343_v8 = vsel %vm532_vm2, %v1321_v41, %v11732_v11 }
  0x9b   : > { %9404 = vmatprep.subr.bf16.mxu0 %v10864_v5  ;;  %10452 = vmatprep.subr.bf16.mxu1 %v10873_v37  ;;  %v1377_v5 = vpack.c.bf16 %v1345_v32, %v11724_v29  ;;  %v2049_v29 = vrot.slane %v11950_v35, 7  ;;  %v2121_v32 = vsel %vm419_vm1, %v2043_v46, %v2044_v27 }
  0x9c   : > { %1625 = vmatmul.mubr.bf16.gmra.mxu1 %v11388_v4  ;;  %10421 = vmatmul.mubr.bf16.gmra.mxu0 %v1372_v13  ;;  %v1349_v4 = vsel %vm532_vm2, %v11657_v1, %v11732_v11  ;;  %v10871_v1 = vld [vmem:[%s16297_s1 + $0x1c0] sm:$0xff]  }
  0x9d   : > { %1632 = vmatprep.mubr.bf16.mxu1 %v11395_v40  ;;  %10424 = vmatprep.mubr.bf16.mxu0 %v1373_v39  ;;  %v10875_v40 = vld [vmem:[%s16297_s1 + $0x208] sm:$0xff]   ;;  %v1375_v38 = vpack.c.bf16 %v1349_v4, %v11680_v21  ;;  %v1347_v21 = vsel %vm532_vm2, %v11664_v63, %v11732_v11  ;;  %v16351_v39 = vld [vmem:[#allocation5_spill] sm:$0xff]  ;;  %v12016_v4 = vld [vmem:[#allocation2 + $0x80] sm:$0xff] }
  0x9e   : > { %9405 = vmatpush3.bf16.msra.mxu0 %v10865_v44  ;;  %10453 = vmatpush3.bf16.msra.mxu1 %v10873_v37  ;;  %v11952_v63 = vld [vmem:[#allocation2 + $0x68] sm:$0xff] }
  0x9f   : > { %9406 = vmatprep.subr.bf16.mxu0 %v10866_v45  ;;  %10454 = vmatprep.subr.bf16.mxu1 %v10874_v56  ;;  %v2050_v37 = vrot.slane %v11952_v63, 7  ;;  %v1340_v45 = vsel %vm532_vm2, %v1326_v50, %v1327_v10 }
  0xa2   : > { %9407 = vmatpush3.bf16.msra.mxu0 %v10867_v51  ;;  %10455 = vmatpush3.bf16.msra.mxu1 %v10874_v56  ;;  %v12007_v56 = vsel %vm532_vm2, %v1329_v0, %v11861_v60 }
  0xa3   : > { %9408 = vmatprep.subr.bf16.mxu0 %v10869_v6  ;;  %10456 = vmatprep.subr.bf16.mxu1 %v10875_v40  ;;  %16352 = vst [vmem:[#allocation5_spill] sm:$0xff] %v12007_v56 }
  0xa4   : > { %1633 = vmatmul.mubr.bf16.gmra.mxu1 %v11456_v22  ;;  %10425 = vmatmul.mubr.bf16.gmra.mxu0 %v1374_v54  ;;  %v2046_v22 = vrot.slane %v11926_v53, 7  ;;  %v16354_v54 = vld [vmem:[#allocation7_spill] sm:$0xff] }
  0xa5   : > { %1640 = vmatprep.mubr.bf16.mxu1 %v11466_v2  ;;  %10428 = vmatprep.mubr.bf16.mxu0 %v1375_v38  ;;  %v1376_v2 = vpack.c.bf16 %v1347_v21, %v11691_v23  ;;  %v1344_v23 = vsel %vm532_vm2, %v1320_v26, %v1321_v41  ;;  %v11981_v26 = vld [vmem:[#allocation2 + $0x180] sm:$0xff]  ;;  %v11983_v41 = vld [vmem:[#allocation2 + $0x188] sm:$0xff]  ;;  %v16356_v21 = vld [vmem:[#allocation8_spill] sm:$0xff] }
  0xa6   : > { %9409 = vmatpush3.bf16.msra.mxu0 %v10870_v9  ;;  %10457 = vmatpush3.bf16.msra.mxu1 %v10875_v40  ;;  %v1378_v13 = vpack.c.bf16 %v1343_v8, %v1344_v23  ;;  %v1332_v51 = vrot.slane %v11981_v26, 1  ;;  %v12011_v12 = vrot.slane %v11983_v41, 1  ;;  %v16353_v40 = vld [vmem:[#allocation6_spill] sm:$0xff]  ;;  %v2119_v27 = vsel %vm419_vm1, %v2046_v22, %v2047_v14 }
  0xa7   : > { %9410 = vmatprep.subr.bf16.mxu0 %v10871_v1  ;;  %10458 = vmatprep.subr.bf16.mxu1 %v10876_v42  ;;  %v2053_v1 = vrot.slane %v12016_v4, 7  ;;  %v2141_v23 = vpack.c.bf16 %v11952_v63, %v11950_v35 }
  0xa8   : > { %v1335_v0 = vsel %vm532_vm2, %v12011_v12, %v11732_v11  ;;  %v12027_v9 = vsel %vm532_vm2, %v1332_v51, %v12011_v12 }
  0xa9   : > { %16355 = vst [vmem:[#allocation6_spill] sm:$0xff] %v12027_v9 }
  0xaa   : > { %9411 = vmatpush3.bf16.msra.mxu0 %v10872_v57  ;;  %10459 = vmatpush3.bf16.msra.mxu1 %v10876_v42  ;;  %v1382_v42 = vpack.c.bf16 %v1335_v0, %v12027_v9  ;;  %v2139_v57 = vpack.c.bf16 %v11893_v20, %v11863_v52 }
  0xac   : > { %1641 = vmatmul.mubr.bf16.gmra.mxu1 %v11515_v58  ;;  %10429 = vmatmul.mubr.bf16.gmra.mxu0 %v1376_v2  ;;  %v1341_v58 = vsel %vm532_vm2, %v11801_v62, %v11732_v11  ;;  %v2122_v2 = vsel %vm419_vm1, %v11189_v25, %v2043_v46  ;;  %v2120_v46 = vsel %vm419_vm1, %v11189_v25, %v2046_v22 }
  0xad   : > { %1648 = vmatprep.mubr.bf16.mxu1 %v11519_v24  ;;  %10432 = vmatprep.mubr.bf16.mxu0 %v1377_v5  ;;  %v11976_v24 = vsel %vm532_vm2, %v1323_v43, %v11801_v62  ;;  %v1339_v43 = vsel %vm532_vm2, %v1327_v10, %v11732_v11  ;;  %v12014_v10 = vld [vmem:[#allocation2 + $0x78] sm:$0xff]  ;;  %v2123_v5 = vpack.c.bf16 %v2121_v32, %v2122_v2 }
  0xae   : > { %v1379_v44 = vpack.c.bf16 %v1341_v58, %v11976_v24  ;;  %v1380_v6 = vpack.c.bf16 %v1339_v43, %v1340_v45  ;;  %v2052_v38 = vrot.slane %v12014_v10, 7  ;;  %v2124_v8 = vpack.c.bf16 %v2119_v27, %v2120_v46  ;;  %v10877_v46 = vld [vmem:[%s16297_s1 + $0xb8] sm:$0xff]  }
  0xaf   : > { %v12071_v22 = vpack.c.bf16 %v11781_v18, %v11779_v33  ;;  %v2142_v58 = vpack.c.bf16 %v12016_v4, %v12014_v10  ;;  %v12100_v18 = vpack.c.bf16 %v11785_v59, %v11783_v49  ;;  %v1212_v43 = vrot.slane %v11785_v59, 7  ;;  %10492 = vmatprep.subr.bf16.mxu0 %v10877_v46 }
  0xb0   : > { %v2115_v33 = vsel %vm419_vm1, %v2052_v38, %v2053_v1  ;;  %v1215_v1 = vrot.slane %v11815_v16, 7 }
  0xb4   : > { %1649 = vmatmul.mubr.bf16.gmra.mxu1 %v11565_v7  ;;  %10433 = vmatmul.mubr.bf16.gmra.mxu0 %v1378_v13  ;;  %v1337_v7 = vsel %vm532_vm2, %v11861_v60, %v11732_v11 }
  0xb5   : > { %1656 = vmatprep.mubr.bf16.mxu1 %v16351_v39  ;;  %10436 = vmatprep.mubr.bf16.mxu0 %v1379_v44  ;;  %v1381_v50 = vpack.c.bf16 %v1337_v7, %v12007_v56 }
  0xbc   : > { %1657 = vmatmul.mubr.bf16.gmra.mxu1 %v16353_v40  ;;  %10437 = vmatmul.mubr.bf16.gmra.mxu0 %v1380_v6  ;;  %v12127_v40 = vld [vmem:[#allocation2 + $0xb0] sm:$0xff] }
  0xbd   : > { %1664 = vmatprep.mubr.bf16.mxu1 %v16354_v54  ;;  %10440 = vmatprep.mubr.bf16.mxu0 %v1381_v50  ;;  %v12125_v50 = vld [vmem:[#allocation2 + $0xa8] sm:$0xff]  ;;  %v2059_v32 = vrot.slane %v12127_v40, 7 }
  0xc4   : > { %1665 = vmatmul.mubr.bf16.gmra.mxu1 %v11607_v55  ;;  %10441 = vmatmul.mubr.bf16.gmra.mxu0 %v1382_v42  ;;  %v2140_v55 = vpack.c.bf16 %v11928_v3, %v11926_v53  ;;  %v12136_v42 = vpack.c.bf16 %v11815_v16, %v11813_v34 }
  0xc5   : > { %1672 = vmatprep.mubr.bf16.mxu1 %v16356_v21  ;;  %2476 = vmatprep.mubr.bf16.mxu0 %v2139_v57  ;;  %v2144_v57 = vpack.c.bf16 %v12127_v40, %v12125_v50  ;;  %v2058_v21 = vrot.slane %v12125_v50, 7 }
  0xc7   : > { %v2111_v16 = vsel %vm419_vm1, %v2058_v21, %v2059_v32  ;;  %v2112_v27 = vsel %vm419_vm1, %v11189_v25, %v2058_v21 }
  0xcc   : > { %1673 = vmatmul.mubr.bf16.gmra.mxu1 %v11609_v15  ;;  %2477 = vmatmul.mubr.bf16.vlgmr.msra.gmra.mxu0 %v2123_v5  ;;  %v2117_v15 = vsel %vm419_vm1, %v2049_v29, %v2050_v37  ;;  %v12095_v37 = vld [vmem:[#allocation2 + $0x98] sm:$0xff] }
  0xcd   : > { %1680 = vmatprep.mubr.bf16.mxu1 %v11736_v31  ;;  %2484 = vmatprep.mubr.bf16.mxu0 %v2140_v55  ;;  %v2118_v31 = vsel %vm419_vm1, %v11189_v25, %v2049_v29  ;;  %v12093_v29 = vld [vmem:[#allocation2 + $0x90] sm:$0xff]  ;;  %v2056_v7 = vrot.slane %v12095_v37, 7 }
  0xce   : > { %v2125_v14 = vpack.c.bf16 %v2117_v15, %v2118_v31  ;;  %v2143_v39 = vpack.c.bf16 %v12095_v37, %v12093_v29  ;;  %v2055_v45 = vrot.slane %v12093_v29, 7  ;;  %v12160_v15 = vld [vmem:[#allocation2 + $0xc0] sm:$0xff]  ;;  %v12162_v31 = vld [vmem:[#allocation2 + $0xc8] sm:$0xff]  ;;  %10493 = vmatpush3.bf16.msra.mxu0 %v10877_v46 }
  0xd0   : > { %v2113_v59 = vsel %vm419_vm1, %v2055_v45, %v2056_v7  ;;  %v2114_v6 = vsel %vm419_vm1, %v11189_v25, %v2055_v45  ;;  %v12178_v45 = vpack.c.bf16 %v11846_v17, %v11818_v48  ;;  %v2145_v7 = vpack.c.bf16 %v12162_v31, %v12160_v15 }
  0xd1   : > { %v2127_v0 = vpack.c.bf16 %v2113_v59, %v2114_v6  ;;  %v2062_v59 = vrot.slane %v12162_v31, 7 }
  0xd4   : > { %1681 = vmatmul.mubr.bf16.gmra.mxu1 %v11618_v61  ;;  %2485 = vmatmul.mubr.bf16.gmra.mxu0 %v2124_v8  ;;  %v1232_v61 = vsel %vm419_vm1, %v11189_v25, %v11843_v28 }
  0xd5   : > { %1688 = vmatprep.mubr.bf16.mxu1 %v11758_v30  ;;  %2492 = vmatprep.mubr.bf16.mxu0 %v2141_v23  ;;  %v12086_v30 = vsel %vm419_vm1, %v11843_v28, %v1209_v36  ;;  %v12103_v36 = vrot.slane %v11783_v49, 7 }
  0xd6   : > { %v1266_v13 = vpack.c.bf16 %v12086_v30, %v1232_v61  ;;  %v12168_v61 = vld [vmem:[#allocation2] sm:$0xff] }
  0xd7   : > { %v1230_v51 = vsel %vm419_vm1, %v11189_v25, %v12103_v36  ;;  %v12118_v49 = vsel %vm419_vm1, %v12103_v36, %v1212_v43  ;;  %16358 = vst [vmem:[#allocation8_spill] sm:$0xff] %v12168_v61  ;;  %v1218_v43 = vrot.slane %v11846_v17, 7 }
  0xd8   : > { %v1267_v54 = vpack.c.bf16 %v12118_v49, %v1230_v51  ;;  %v2061_v51 = vrot.slane %v12160_v15, 7 }
  0xda   : > { %v2109_v32 = vsel %vm419_vm1, %v2061_v51, %v2062_v59 }
  0xdc   : > { %1689 = vmatmul.mubr.bf16.gmra.mxu1 %v11776_v47  ;;  %2493 = vmatmul.mubr.bf16.gmra.mxu0 %v2125_v14  ;;  %v2116_v47 = vsel %vm419_vm1, %v11189_v25, %v2052_v38  ;;  %v12131_v38 = vrot.slane %v11813_v34, 7 }
  0xdd   : > { %1696 = vmatprep.mubr.bf16.mxu1 %v12071_v22  ;;  %2500 = vmatprep.mubr.bf16.mxu0 %v2142_v58  ;;  %v2126_v44 = vpack.c.bf16 %v2115_v33, %v2116_v47  ;;  %v12171_v33 = vrot.slane %v12168_v61, 7 }
  0xde   : > { %v12145_v55 = vsel %vm419_vm1, %v12131_v38, %v1215_v1  ;;  %v1228_v34 = vsel %vm419_vm1, %v11189_v25, %v12131_v38 }
  0xdf   : > { %16359 = vst [vmem:[#allocation9_spill] sm:$0xff] %v12171_v33 }
  0xe4   : > { %1697 = vmatmul.mubr.bf16.gmra.mxu1 %v1266_v13  ;;  %2501 = vmatmul.mubr.bf16.gmra.mxu0 %v2126_v44  ;;  %v1268_v13 = vpack.c.bf16 %v12145_v55, %v1228_v34  ;;  %v2128_v44 = vpack.c.bf16 %v2111_v16, %v2112_v27  ;;  %v12199_v16 = vld [vmem:[#allocation2 + $0xd8] sm:$0xff]  ;;  %v12201_v27 = vld [vmem:[#allocation2 + $0xe0] sm:$0xff] }
  0xe5   : > { %1704 = vmatprep.mubr.bf16.mxu1 %v12100_v18  ;;  %2508 = vmatprep.mubr.bf16.mxu0 %v2143_v39  ;;  %v1217_v39 = vrot.slane %v11818_v48, 7  ;;  %v2065_v59 = vrot.slane %v12201_v27, 7 }
  0xe7   : > { %v1226_v48 = vsel %vm419_vm1, %v12171_v33, %v1217_v39  ;;  %v1225_v17 = vsel %vm419_vm1, %v1217_v39, %v1218_v43  ;;  %v1221_v39 = vrot.slane %v11983_v41, 7  ;;  %v12213_v43 = vpack.c.bf16 %v11983_v41, %v11981_v26 }
  0xec   : > { %v9140_v2 = vpop.f32.mrf.mxu0  ;;  %v9212_v5 = vpop.f32.mrf.mxu1  ;;  %1705 = vmatmul.mubr.bf16.gmra.mxu1 %v1267_v54  ;;  %2509 = vmatmul.mubr.bf16.gmra.mxu0 %v2127_v0 }
  0xed   : > { %1712 = vmatprep.mubr.bf16.mxu1 %v12136_v42  ;;  %2516 = vmatprep.mubr.bf16.mxu0 %v2144_v57 }
  0xee   : > { %v9141_v8 = vpop.f32.mrf.mxu0  ;;  %v9213_v23 = vpop.f32.mrf.mxu1 }
  0xef   : > { %v12164_v14 = vadd.f32 %v9141_v8, %v9140_v2  ;;  %v12166_v58 = vadd.f32 %v9213_v23, %v9212_v5  ;;  %v2110_v2 = vsel %vm419_vm1, %v12171_v33, %v2061_v51  ;;  %v2064_v51 = vrot.slane %v12199_v16, 7 }
  0xf0   : > { %v9143_v25 = vpop.f32.mrf.mxu0  ;;  %v9215_v47 = vpop.f32.mrf.mxu1 }
  0xf1   : > { %16357 = vst [vmem:[#allocation7_spill] sm:$0xff] %v12166_v58 }
  0xf2   : > { %v9144_v6 = vpop.f32.mrf.mxu0  ;;  %v9216_v54 = vpop.f32.mrf.mxu1 }
  0xf3   : > { %v12184_v0 = vadd.f32 %v9144_v6, %v9143_v25  ;;  %v12186_v1 = vadd.f32 %v9216_v54, %v9215_v47  ;;  %v12207_v47 = vpack.c.bf16 %v1225_v17, %v1226_v48  ;;  %v2156_v48 = vrot.slane %v11893_v20, 1 }
  0xf4   : > { %v9146_v57 = vpop.f32.mrf.mxu0  ;;  %v9218_v21 = vpop.f32.mrf.mxu1  ;;  %1713 = vmatmul.mubr.bf16.gmra.mxu1 %v1268_v13  ;;  %2517 = vmatmul.mubr.bf16.gmra.mxu0 %v2128_v44  ;;  %v2129_v13 = vpack.c.bf16 %v2109_v32, %v2110_v2  ;;  %v1220_v44 = vrot.slane %v11981_v26, 7  ;;  %v2107_v20 = vsel %vm419_vm1, %v2064_v51, %v2065_v59 }
  0xf5   : > { %16360 = vst [vmem:[#allocation10_spill] sm:$0xff] %v12186_v1  ;;  %1720 = vmatprep.mubr.bf16.mxu1 %v12178_v45  ;;  %2524 = vmatprep.mubr.bf16.mxu0 %v2145_v7  ;;  %v2146_v7 = vpack.c.bf16 %v12201_v27, %v12199_v16 }
  0xf6   : > { %v9147_v5 = vpop.f32.mrf.mxu0  ;;  %v9219_v34 = vpop.f32.mrf.mxu1  ;;  %v1223_v2 = vsel %vm419_vm1, %v1220_v44, %v1221_v39  ;;  %v12245_v39 = vld [vmem:[#allocation2 + $0xf8] sm:$0xff] }
  0xf7   : > { %v12203_v46 = vadd.f32 %v9147_v5, %v9146_v57  ;;  %v12205_v8 = vadd.f32 %v9219_v34, %v9218_v21  ;;  %v12220_v57 = vrot.slane %v12168_v61, 1  ;;  %v2155_v21 = vrot.slane %v11863_v52, 1  ;;  %v10878_v34 = vld [vmem:[%s16297_s1 + $0xb0] sm:$0xff]  }
  0xf8   : > { %v9149_v23 = vpop.f32.mrf.mxu0  ;;  %v9221_v25 = vpop.f32.mrf.mxu1  ;;  %v1224_v52 = vsel %vm419_vm1, %v12171_v33, %v1220_v44  ;;  %v2108_v5 = vsel %vm419_vm1, %v12171_v33, %v2064_v51  ;;  %10494 = vmatprep.subr.bf16.mxu0 %v10878_v34  ;;  %v2068_v61 = vrot.slane %v12245_v39, 7 }
  0xf9   : > { %16361 = vst [vmem:[#allocation11_spill] sm:$0xff] %v12205_v8  ;;  %16362 = vst [vmem:[#allocation12_spill] sm:$0xff] %v12220_v57  ;;  %v2233_v44 = vsel %vm532_vm2, %v2156_v48, %v12220_v57  ;;  %v12258_v58 = vpack.c.bf16 %v1223_v2, %v1224_v52  ;;  %v2130_v8 = vpack.c.bf16 %v2107_v20, %v2108_v5  ;;  %10495 = vmatpush3.bf16.msra.mxu0 %v10878_v34 }
  0xfa   : > { %v9150_v6 = vpop.f32.mrf.mxu0  ;;  %v9222_v54 = vpop.f32.mrf.mxu1 }
  0xfb   : > { %v12224_v17 = vadd.f32 %v9150_v6, %v9149_v23  ;;  %v12226_v26 = vadd.f32 %v9222_v54, %v9221_v25  ;;  %v2158_v6 = vrot.slane %v11926_v53, 1  ;;  %v2159_v54 = vrot.slane %v11928_v3, 1  ;;  %16365 = vst [vmem:[#allocation15_spill] sm:$0xff] %v12258_v58 }
  0xfc   : > { %v9152_v41 = vpop.f32.mrf.mxu0  ;;  %v9224_v32 = vpop.f32.mrf.mxu1  ;;  %1721 = vmatmul.mubr.bf16.gmra.mxu1 %v12207_v47  ;;  %2525 = vmatmul.mubr.bf16.gmra.mxu0 %v2129_v13  ;;  %v12243_v13 = vld [vmem:[#allocation2 + $0xf0] sm:$0xff]  ;;  %v2161_v53 = vrot.slane %v11950_v35, 1  ;;  %v2162_v3 = vrot.slane %v11952_v63, 1 }
  0xfd   : > { %16363 = vst [vmem:[#allocation13_spill] sm:$0xff] %v12226_v26  ;;  %1728 = vmatprep.mubr.bf16.mxu1 %v12213_v43  ;;  %2532 = vmatprep.mubr.bf16.mxu0 %v2146_v7  ;;  %v2234_v7 = vsel %vm532_vm2, %v2155_v21, %v2156_v48  ;;  %v2067_v9 = vrot.slane %v12243_v13, 7  ;;  %v2147_v21 = vpack.c.bf16 %v12245_v39, %v12243_v13 }
  0xfe   : > { %v9153_v23 = vpop.f32.mrf.mxu0  ;;  %v9225_v25 = vpop.f32.mrf.mxu1  ;;  %v2235_v48 = vpack.c.bf16 %v2233_v44, %v2234_v7  ;;  %v2232_v52 = vsel %vm532_vm2, %v2158_v6, %v2159_v54  ;;  %v2231_v34 = vsel %vm532_vm2, %v2159_v54, %v11732_v11  ;;  %v2230_v7 = vsel %vm532_vm2, %v2161_v53, %v2162_v3 }
  0xff   : > { %v12252_v59 = vadd.f32 %v9153_v23, %v9152_v41  ;;  %v12254_v51 = vadd.f32 %v9225_v25, %v9224_v32  ;;  %v2105_v35 = vsel %vm419_vm1, %v2067_v9, %v2068_v61  ;;  %v2106_v63 = vsel %vm419_vm1, %v12171_v33, %v2067_v9 }
 0x100   : > { %v9155_v1 = vpop.f32.mrf.mxu0  ;;  %v9227_v26 = vpop.f32.mrf.mxu1  ;;  %v2236_v61 = vpack.c.bf16 %v2231_v34, %v2232_v52  ;;  %v2131_v9 = vpack.c.bf16 %v2105_v35, %v2106_v63  ;;  %v2168_v52 = vrot.slane %v12095_v37, 1 }
 0x101   : > { %16364 = vst [vmem:[#allocation14_spill] sm:$0xff] %v12254_v51  ;;  %v2165_v51 = vrot.slane %v12016_v4, 1 }
 0x102   : > { %v9156_v41 = vpop.f32.mrf.mxu0  ;;  %v9228_v32 = vpop.f32.mrf.mxu1 }
 0x103   : > { %v12266_v23 = vadd.f32 %v9156_v41, %v9155_v1  ;;  %v12268_v2 = vadd.f32 %v9228_v32, %v9227_v26  ;;  %v12281_v1 = vld [vmem:[#allocation2 + $0x108] sm:$0xff]  ;;  %v12283_v26 = vld [vmem:[#allocation2 + $0x110] sm:$0xff] }
 0x104   : > { %v9158_v20 = vpop.f32.mrf.mxu0  ;;  %v9230_v5 = vpop.f32.mrf.mxu1  ;;  %1729 = vmatmul.mubr.bf16.gmra.mxu1 %v12258_v58  ;;  %2533 = vmatmul.mubr.bf16.gmra.mxu0 %v2130_v8  ;;  %v2229_v8 = vsel %vm532_vm2, %v2162_v3, %v12220_v57  ;;  %v2070_v41 = vrot.slane %v12281_v1, 7  ;;  %v2071_v32 = vrot.slane %v12283_v26, 7  ;;  %v2148_v58 = vpack.c.bf16 %v12283_v26, %v12281_v1 }
 0x105   : > { %16366 = vst [vmem:[#allocation16_spill] sm:$0xff] %v12268_v2  ;;  %2540 = vmatprep.mubr.bf16.mxu0 %v2147_v21  ;;  %10460 = vmatprep.mubr.bf16.mxu1 %v2235_v48  ;;  %v2164_v2 = vrot.slane %v12014_v10, 1  ;;  %v2237_v56 = vpack.c.bf16 %v2229_v8, %v2230_v7 }
 0x106   : > { %v9159_v25 = vpop.f32.mrf.mxu0  ;;  %v9231_v44 = vpop.f32.mrf.mxu1  ;;  %v2103_v10 = vsel %vm419_vm1, %v2070_v41, %v2071_v32  ;;  %v2104_v4 = vsel %vm419_vm1, %v12171_v33, %v2070_v41 }
 0x107   : > { %v9160_v6 = vadd.f32 %v9159_v25, %v9158_v20  ;;  %v12290_v54 = vadd.f32 %v9231_v44, %v9230_v5  ;;  %v2167_v20 = vrot.slane %v12093_v29, 1  ;;  %v2227_v29 = vsel %vm532_vm2, %v2165_v51, %v11732_v11  ;;  %v10879_v44 = vld [vmem:[%s16297_s1 + $0xa8] sm:$0xff]  }
 0x108   : > { %v9161_v21 = vpop.f32.mrf.mxu0  ;;  %v9233_v48 = vpop.f32.mrf.mxu1  ;;  %v2228_v37 = vsel %vm532_vm2, %v2164_v2, %v2165_v51  ;;  %10496 = vmatprep.subr.bf16.mxu0 %v10879_v44 }
 0x109   : > { %10497 = vmatpush3.bf16.msra.mxu0 %v10879_v44 }
 0x10a   : > { %v9162_v53 = vpop.f32.mrf.mxu0  ;;  %v9234_v3 = vpop.f32.mrf.mxu1 }
 0x10b   : > { %v9163_v5 = vadd.f32 %v9162_v53, %v9161_v21  ;;  %v12300_v34 = vadd.f32 %v9234_v3, %v9233_v48  ;;  %v2238_v21 = vpack.c.bf16 %v2227_v29, %v2228_v37  ;;  %v2170_v48 = vrot.slane %v12125_v50, 1 }
 0x10c   : > { %v9164_v35 = vpop.f32.mrf.mxu0  ;;  %v10366_v63 = vpop.f32.mrf.mxu1  ;;  %2541 = vmatmul.mubr.bf16.gmra.mxu0 %v2131_v9  ;;  %10461 = vmatmul.mubr.bf16.vlgmr.msra.gmra.mxu1 %v2236_v61  ;;  %v2132_v61 = vpack.c.bf16 %v2103_v10, %v2104_v4  ;;  %v2171_v9 = vrot.slane %v12127_v40, 1  ;;  %v2102_v50 = vsel %vm419_vm1, %v12171_v33, %v11843_v28 }
 0x10d   : > { %v12308_v25 = vadd.f32 %v10366_v63, %v12203_v46  ;;  %2548 = vmatprep.mubr.bf16.mxu0 %v2148_v58  ;;  %10464 = vmatprep.mubr.bf16.mxu1 %v2237_v56  ;;  %v2225_v46 = vsel %vm532_vm2, %v2168_v52, %v12220_v57  ;;  %v2226_v56 = vsel %vm532_vm2, %v2167_v20, %v2168_v52  ;;  %v2173_v20 = vrot.slane %v12160_v15, 1 }
 0x10e   : > { %v9165_v8 = vpop.f32.mrf.mxu0  ;;  %v968_v7 = vpop.f32.mrf.mxu1  ;;  %v2239_v32 = vpack.c.bf16 %v2225_v46, %v2226_v56  ;;  %v2223_v15 = vsel %vm532_vm2, %v2171_v9, %v12220_v57  ;;  %v2133_v44 = vpack.c.bf16 %v12086_v30, %v2102_v50  ;;  %v2177_v46 = vrot.slane %v12201_v27, 1 }
 0x10f   : > { %v12323_v58 = vadd.f32 %v9165_v8, %v9164_v35  ;;  %v12326_v11 = vadd.f32 %v12164_v14, %v968_v7  ;;  %v2174_v14 = vrot.slane %v12162_v31, 1  ;;  %v2224_v31 = vsel %vm532_vm2, %v2170_v48, %v2171_v9 }
 0x110   : > { %v9167_v51 = vpop.f32.mrf.mxu0  ;;  %v10367_v2 = vpop.f32.mrf.mxu1  ;;  %v2240_v8 = vpack.c.bf16 %v2223_v15, %v2224_v31  ;;  %v2176_v7 = vrot.slane %v12199_v16, 1  ;;  %v2180_v48 = vrot.slane %v12245_v39, 1  ;;  %v2100_v16 = vsel %vm419_vm1, %v12171_v33, %v12103_v36 }
 0x111   : > { %v12331_v41 = vadd.f32 %v10367_v2, %v12224_v17  ;;  %v2221_v4 = vsel %vm532_vm2, %v2174_v14, %v12220_v57  ;;  %v2222_v28 = vsel %vm532_vm2, %v2173_v20, %v2174_v14  ;;  %v2182_v15 = vrot.slane %v12281_v1, 1 }
 0x112   : > { %v9168_v53 = vpop.f32.mrf.mxu0  ;;  %v971_v3 = vpop.f32.mrf.mxu1  ;;  %v2220_v39 = vsel %vm532_vm2, %v2176_v7, %v2177_v46  ;;  %v2217_v36 = vsel %vm532_vm2, %v2180_v48, %v12220_v57  ;;  %v2183_v31 = vrot.slane %v12283_v26, 1  ;;  %v2098_v1 = vsel %vm419_vm1, %v12171_v33, %v12131_v38 }
 0x113   : > { %v12335_v52 = vadd.f32 %v9168_v53, %v9167_v51  ;;  %v12338_v35 = vadd.f32 %v12184_v0, %v971_v3  ;;  %v2241_v51 = vpack.c.bf16 %v2221_v4, %v2222_v28 }
 0x114   : > { %v9170_v63 = vpop.f32.mrf.mxu0  ;;  %v10370_v10 = vpop.f32.mrf.mxu1  ;;  %2549 = vmatmul.mubr.bf16.gmra.mxu0 %v2132_v61  ;;  %10465 = vmatmul.mubr.bf16.gmra.mxu1 %v2238_v21  ;;  %v2179_v21 = vrot.slane %v12243_v13, 1  ;;  %v2219_v13 = vsel %vm532_vm2, %v2177_v46, %v12220_v57  ;;  %v2215_v26 = vsel %vm532_vm2, %v2183_v31, %v12220_v57 }
 0x115   : > { %v12344_v40 = vadd.f32 %v10370_v10, %v9160_v6  ;;  %2556 = vmatprep.mubr.bf16.mxu0 %v12071_v22  ;;  %10468 = vmatprep.mubr.bf16.mxu1 %v2239_v32  ;;  %v2134_v10 = vpack.c.bf16 %v12118_v49, %v2100_v16  ;;  %v2242_v50 = vpack.c.bf16 %v2219_v13, %v2220_v39 }
 0x116   : > { %v9171_v0 = vpop.f32.mrf.mxu0  ;;  %v984_v17 = vpop.f32.mrf.mxu1 }
 0x117   : > { %v9172_v6 = vadd.f32 %v9171_v0, %v9170_v63  ;;  %v12358_v22 = vadd.f32 %v12252_v59, %v984_v17 }
 0x118   : > { %v9173_v29 = vpop.f32.mrf.mxu0  ;;  %v10371_v37 = vpop.f32.mrf.mxu1 }
 0x119   : > { %v12363_v56 = vadd.f32 %v10371_v37, %v9163_v5 }
 0x11a   : > { %v9174_v2 = vpop.f32.mrf.mxu0  ;;  %v987_v61 = vpop.f32.mrf.mxu1 }
 0x11b   : > { %v9175_v59 = vadd.f32 %v9174_v2, %v9173_v29  ;;  %v12368_v9 = vadd.f32 %v12266_v23, %v987_v61  ;;  %v10880_v23 = vld [vmem:[%s16297_s1 + $0xa0] sm:$0xff]  }
 0x11c   : > { %v9176_v32 = vpop.f32.mrf.mxu0  ;;  %v10374_v30 = vpop.f32.mrf.mxu1  ;;  %2557 = vmatmul.mubr.bf16.gmra.mxu0 %v2133_v44  ;;  %10469 = vmatmul.mubr.bf16.gmra.mxu1 %v2240_v8 }
 0x11d   : > { %v12374_v27 = vadd.f32 %v10374_v30, %v9172_v6  ;;  %2564 = vmatprep.mubr.bf16.mxu0 %v12100_v18  ;;  %10472 = vmatprep.mubr.bf16.mxu1 %v2241_v51  ;;  %v2218_v18 = vsel %vm532_vm2, %v2179_v21, %v2180_v48  ;;  %v11023_v6 = vld [vmem:[#allocation2 + $0x120] sm:$0xff] }
 0x11e   : > { %v9177_v5 = vpop.f32.mrf.mxu0  ;;  %v1000_v53 = vpop.f32.mrf.mxu1  ;;  %10498 = vmatprep.subr.bf16.mxu0 %v10880_v23  ;;  %v2243_v17 = vpack.c.bf16 %v2217_v36, %v2218_v18  ;;  %v2185_v29 = vrot.slane %v11023_v6, 1 }
 0x11f   : > { %v9178_v3 = vadd.f32 %v9177_v5, %v9176_v32  ;;  %v12391_v20 = vadd.f32 %v12323_v58, %v1000_v53  ;;  %10499 = vmatpush3.bf16.msra.mxu0 %v10880_v23  ;;  %v11024_v58 = vld [vmem:[#allocation2 + $0x128] sm:$0xff]  ;;  %v11025_v23 = vld [vmem:[#allocation2 + $0x150] sm:$0xff]  ;;  %v11026_v53 = vld [vmem:[#allocation2 + $0x158] sm:$0xff] }
 0x120   : > { %v9179_v14 = vpop.f32.mrf.mxu0  ;;  %v10375_v63 = vpop.f32.mrf.mxu1  ;;  %v2186_v37 = vrot.slane %v11024_v58, 1  ;;  %v2191_v5 = vrot.slane %v11025_v23, 1  ;;  %v2192_v36 = vrot.slane %v11026_v53, 1 }
 0x121   : > { %v12396_v0 = vadd.f32 %v10375_v63, %v9175_v59  ;;  %v2135_v59 = vpack.c.bf16 %v12145_v55, %v2098_v1  ;;  %v2211_v55 = vsel %vm532_vm2, %v11801_v62, %v12220_v57 }
 0x122   : > { %v9180_v4 = vpop.f32.mrf.mxu0  ;;  %v1003_v28 = vpop.f32.mrf.mxu1  ;;  %v2213_v2 = vsel %vm532_vm2, %v2186_v37, %v12220_v57  ;;  %v2210_v62 = vsel %vm532_vm2, %v2191_v5, %v2192_v36  ;;  %v2246_v58 = vpack.c.bf16 %v2211_v55, %v11976_v24  ;;  %v2207_v24 = vsel %vm532_vm2, %v11861_v60, %v12220_v57  ;;  %v16367_v60 = vld [vmem:[#allocation5_spill] sm:$0xff] }
 0x123   : > { %v9181_v44 = vadd.f32 %v9180_v4, %v9179_v14  ;;  %v12399_v8 = vadd.f32 %v12335_v52, %v1003_v28  ;;  %v2216_v52 = vsel %vm532_vm2, %v2182_v15, %v2183_v31  ;;  %v10882_v15 = vld [vmem:[%s16297_s1 + $0x38] sm:$0xff]   ;;  %v2209_v4 = vsel %vm532_vm2, %v2192_v36, %v12220_v57 }
 0x124   : > { %v9182_v49 = vpop.f32.mrf.mxu0  ;;  %v10378_v7 = vpop.f32.mrf.mxu1  ;;  %2565 = vmatmul.mubr.bf16.gmra.mxu0 %v2134_v10  ;;  %10473 = vmatmul.mubr.bf16.gmra.mxu1 %v2242_v50  ;;  %v2244_v32 = vpack.c.bf16 %v2215_v26, %v2216_v52  ;;  %v10881_v50 = vld [vmem:[%s16297_s1 + $0x78] sm:$0xff]  }
 0x125   : > { %2572 = vmatprep.mubr.bf16.mxu0 %v12136_v42  ;;  %10476 = vmatprep.mubr.bf16.mxu1 %v2243_v17  ;;  %v2214_v42 = vsel %vm532_vm2, %v2185_v29, %v2186_v37  ;;  %v10883_v31 = vld [vmem:[%s16297_s1 + $0x98] sm:$0xff]  }
 0x126   : > { %v9183_v46 = vpop.f32.mrf.mxu0  ;;  %v1016_v51 = vpop.f32.mrf.mxu1  ;;  %v2245_v16 = vpack.c.bf16 %v2213_v2, %v2214_v42  ;;  %9532 = vmatprep.subr.bf16.mxu1 %v10881_v50  ;;  %10500 = vmatprep.subr.bf16.mxu0 %v10883_v31  ;;  %v10885_v2 = vld [vmem:[%s16297_s1 + $0x30] sm:$0xff]   ;;  %v16371_v50 = vld [vmem:[#allocation11_spill] sm:$0xff] }
 0x127   : > { %v9184_v61 = vadd.f32 %v9183_v46, %v9182_v49  ;;  %v12416_v21 = vadd.f32 %v9178_v3, %v1016_v51  ;;  %9533 = vmatpush3.bf16.msra.mxu1 %v10882_v15  ;;  %10501 = vmatpush3.bf16.msra.mxu0 %v10883_v31  ;;  %v10884_v51 = vld [vmem:[%s16297_s1 + $0x70] sm:$0xff]   ;;  %v10887_v31 = vld [vmem:[%s16297_s1 + $0x28] sm:$0xff]  }
 0x128   : > { %v9185_v38 = vpop.f32.mrf.mxu0  ;;  %v10379_v48 = vpop.f32.mrf.mxu1  ;;  %9534 = vmatprep.subr.bf16.mxu1 %v10884_v51 }
 0x129   : > { %v12419_v30 = vadd.f32 %v10378_v7, %v9184_v61 }
 0x12a   : > { %v9186_v13 = vpop.f32.mrf.mxu0  ;;  %v1019_v39 = vpop.f32.mrf.mxu1 }
 0x12b   : > { %v9187_v18 = vadd.f32 %v9186_v13, %v9185_v38  ;;  %v12421_v14 = vadd.f32 %v9181_v44, %v1019_v39  ;;  %v2247_v44 = vpack.c.bf16 %v2209_v4, %v2210_v62  ;;  %9535 = vmatpush3.bf16.msra.mxu1 %v10885_v2  ;;  %v16369_v39 = vld [vmem:[#allocation6_spill] sm:$0xff] }
 0x12c   : > { %v9188_v63 = vpop.f32.mrf.mxu0  ;;  %v10382_v3 = vpop.f32.mrf.mxu1  ;;  %2573 = vmatmul.mubr.bf16.gmra.mxu0 %v2135_v59  ;;  %10477 = vmatmul.mubr.bf16.gmra.mxu1 %v2244_v32  ;;  %v2248_v59 = vpack.c.bf16 %v2207_v24, %v16367_v60 }
 0x12d   : > { %v12423_v10 = vadd.f32 %v10379_v48, %v9187_v18  ;;  %2580 = vmatprep.mubr.bf16.mxu0 %v12178_v45  ;;  %10480 = vmatprep.mubr.bf16.mxu1 %v2245_v16  ;;  %v16368_v16 = vld [vmem:[#allocation8_spill] sm:$0xff] }
 0x12e   : > { %v9189_v17 = vpop.f32.mrf.mxu0  ;;  %v1032_v45 = vpop.f32.mrf.mxu1  ;;  %v2154_v13 = vpack.c.bf16 %v16368_v16, %v16368_v16  ;;  %v16374_v16 = vld [vmem:[#allocation14_spill] sm:$0xff] }
 0x12f   : > { %v9190_v28 = vadd.f32 %v9189_v17, %v9188_v63  ;;  %v16370_v63 = vld [vmem:[#allocation15_spill] sm:$0xff]  ;;  %v10888_v17 = vld [vmem:[%s16297_s1 + $0x90] sm:$0xff]  }
 0x130   : > { %v9191_v6 = vpop.f32.mrf.mxu0  ;;  %v10383_v29 = vpop.f32.mrf.mxu1  ;;  %10502 = vmatprep.subr.bf16.mxu0 %v10888_v17 }
 0x131   : > { %v12445_v37 = vadd.f32 %v9190_v28, %v1032_v45  ;;  %v16372_v28 = vld [vmem:[#allocation7_spill] sm:$0xff]  ;;  %10503 = vmatpush3.bf16.msra.mxu0 %v10888_v17 }
 0x132   : > { %v9192_v49 = vpop.f32.mrf.mxu0  ;;  %v1035_v7 = vpop.f32.mrf.mxu1 }
 0x133   : > { %v9193_v1 = vadd.f32 %v9192_v49, %v9191_v6  ;;  %v12501_v49 = vpack.c.bf16 %v12220_v57, %v12220_v57 }
 0x134   : > { %v9194_v26 = vpop.f32.mrf.mxu0  ;;  %v12447_v52 = vpop.f32.mrf.mxu1  ;;  %2581 = vmatmul.mubr.bf16.gmra.mxu0 %v12207_v47  ;;  %10481 = vmatmul.mubr.bf16.gmra.mxu1 %v2246_v58 }
 0x135   : > { %v12450_v46 = vadd.f32 %v9193_v1, %v1035_v7  ;;  %2588 = vmatprep.mubr.bf16.mxu0 %v12213_v43  ;;  %10484 = vmatprep.mubr.bf16.mxu1 %v2247_v44  ;;  %v2205_v43 = vsel %vm532_vm2, %v12011_v12, %v12220_v57  ;;  %v12497_v44 = vpack.c.bf16 %v12171_v33, %v12171_v33  ;;  %v16373_v1 = vld [vmem:[#allocation13_spill] sm:$0xff] }
 0x136   : > { %v9195_v47 = vpop.f32.mrf.mxu0  ;;  %v1048_v42 = vpop.f32.mrf.mxu1  ;;  %v2249_v23 = vpack.c.bf16 %v2205_v43, %v16369_v39 }
 0x137   : > { %v9196_v61 = vadd.f32 %v9195_v47, %v9194_v26 }
 0x138   : > { %v9197_v38 = vpop.f32.mrf.mxu0  ;;  %v10387_v48 = vpop.f32.mrf.mxu1 }
 0x139   : > { %v12468_v32 = vadd.f32 %v10382_v3, %v9196_v61  ;;  %v10886_v3 = vld [vmem:[%s16297_s1 + $0x68] sm:$0xff]   ;;  %v10890_v61 = vld [vmem:[%s16297_s1 + $0x20] sm:$0xff]  }
 0x13a   : > { %v9198_v5 = vpop.f32.mrf.mxu0  ;;  %v12473_v53 = vpop.f32.mrf.mxu1  ;;  %9536 = vmatprep.subr.bf16.mxu1 %v10886_v3 }
 0x13b   : > { %v9199_v36 = vadd.f32 %v9198_v5, %v9197_v38  ;;  %9537 = vmatpush3.bf16.msra.mxu1 %v10887_v31 }
 0x13c   : > { %v9200_v18 = vpop.f32.mrf.mxu0  ;;  %v10390_v12 = vpop.f32.mrf.mxu1  ;;  %2589 = vmatmul.mubr.bf16.gmra.mxu0 %v16370_v63  ;;  %10485 = vmatmul.mubr.bf16.gmra.mxu1 %v2248_v59 }
 0x13d   : > { %v12476_v55 = vadd.f32 %v10383_v29, %v9199_v36  ;;  %v12479_v15 = vadd.f32 %v10390_v12, %v16371_v50  ;;  %2596 = vmatprep.mubr.bf16.mxu0 %v2154_v13  ;;  %10488 = vmatprep.mubr.bf16.mxu1 %v2249_v23 }
 0x13e   : > { %v9201_v45 = vpop.f32.mrf.mxu0  ;;  %v1064_v4 = vpop.f32.mrf.mxu1 }
 0x13f   : > { %v9202_v62 = vadd.f32 %v9201_v45, %v9200_v18  ;;  %v12491_v6 = vadd.f32 %v16372_v28, %v1064_v4  ;;  %v10891_v4 = vld [vmem:[%s16297_s1 + $0x58] sm:$0xff]  }
 0x140   : > { %v12493_v29 = vpop.f32.mrf.mxu0  ;;  %v10391_v58 = vpop.f32.mrf.mxu1 }
 0x141   : > { %v12503_v7 = vadd.f32 %v9202_v62, %v1048_v42  ;;  %v12506_v26 = vadd.f32 %v10391_v58, %v16373_v1  ;;  %v10889_v42 = vld [vmem:[%s16297_s1 + $0x60] sm:$0xff]  }
 0x142   : > { %v12508_v24 = vpop.f32.mrf.mxu0  ;;  %v12510_v51 = vpop.f32.mrf.mxu1  ;;  %9538 = vmatprep.subr.bf16.mxu1 %v10889_v42 }
 0x143   : > { %9539 = vmatpush3.bf16.msra.mxu1 %v10890_v61 }
 0x144   : > { %v9206_v2 = vpop.f32.mrf.mxu0  ;;  %v10394_v47 = vpop.f32.mrf.mxu1  ;;  %2597 = vmatmul.mubr.bf16.gmra.mxu0 %v12497_v44  ;;  %10489 = vmatmul.mubr.bf16.gmra.mxu1 %v12501_v49 }
 0x145   : > { %v12515_v43 = vadd.f32 %v10394_v47, %v12290_v54  ;;  %3578 = vmatprep.mubr.bf16.mxu1 %v2154_v13  ;;  %9540 = vmatprep.subr.bf16.mxu1 %v10891_v4  ;;  %v10896_v4 = vld [vmem:[%s16297_s1 + $0x48] sm:$0xff]  }
 0x146   : > { %v9207_v38 = vpop.f32.mrf.mxu0  ;;  %v1080_v60 = vpop.f32.mrf.mxu1  ;;  %10508 = vmatprep.mubr.bf16.mxu0 %v12501_v49 }
 0x147   : > { %v9208_v59 = vadd.f32 %v9207_v38, %v9206_v2  ;;  %v12524_v39 = vadd.f32 %v16374_v16, %v1080_v60 }
 0x148   : > { %v9209_v23 = vpop.f32.mrf.mxu0  ;;  %v10395_v5 = vpop.f32.mrf.mxu1 }
 0x149   : > { %v12527_v54 = vadd.f32 %v12447_v52, %v9208_v59  ;;  %v12530_v36 = vadd.f32 %v10395_v5, %v12300_v34  ;;  %v10892_v34 = vld [vmem:[%s16297_s1 + $0x18] sm:$0xff]  }
 0x14a   : > { %v9210_v18 = vpop.f32.mrf.mxu0  ;;  %v12532_v12 = vpop.f32.mrf.mxu1  ;;  %9541 = vmatpush3.bf16.msra.mxu1 %v10892_v34 }
 0x14b   : > { %v9211_v13 = vadd.f32 %v9210_v18, %v9209_v23  ;;  %v10894_v23 = vld [vmem:[%s16297_s1 + $0x50] sm:$0xff]  }
 0x14c   : > { %v9276_v63 = vpop.f32.mrf.mxu1  ;;  %v10414_v50 = vpop.f32.mrf.mxu0  ;;  %9542 = vmatprep.subr.bf16.mxu1 %v10894_v23 }
 0x14d   : > { %v12534_v3 = vadd.f32 %v10387_v48, %v9211_v13 }
 0x14e   : > { %v9277_v31 = vpop.f32.mrf.mxu1  ;;  %v1771_v17 = vpop.f32.mrf.mxu0 }
 0x14f   : > { %v9278_v45 = vadd.f32 %v9277_v31, %v9276_v63  ;;  %v10893_v63 = vld [vmem:[%s16297_s1 + $0x88] sm:$0xff]  }
 0x150   : > { %v9279_v52 = vpop.f32.mrf.mxu1  ;;  %v10415_v62 = vpop.f32.mrf.mxu0  ;;  %10504 = vmatprep.subr.bf16.mxu0 %v10893_v63 }
 0x151   : > { %v1772_v28 = vadd.f32 %v9278_v45, %v1771_v17  ;;  %10505 = vmatpush3.bf16.msra.mxu0 %v10893_v63 }
 0x152   : > { %v9280_v58 = vpop.f32.mrf.mxu1  ;;  %v1774_v1 = vpop.f32.mrf.mxu0 }
 0x153   : > { %v12543_v48 = vadd.f32 %v1772_v28, %v12326_v11  ;;  %v9281_v2 = vadd.f32 %v9280_v58, %v9279_v52  ;;  %v10895_v11 = vld [vmem:[%s16297_s1 + $0x10] sm:$0xff]  }
 0x154   : > { %v9282_v47 = vpop.f32.mrf.mxu1  ;;  %v10418_v42 = vpop.f32.mrf.mxu0  ;;  %9543 = vmatpush3.bf16.msra.mxu1 %v10895_v11 }
 0x155   : > { %v1775_v61 = vadd.f32 %v9281_v2, %v1774_v1  ;;  %9544 = vmatprep.subr.bf16.mxu1 %v10896_v4 }
 0x156   : > { %v9283_v38 = vpop.f32.mrf.mxu1  ;;  %v1787_v60 = vpop.f32.mrf.mxu0 }
 0x157   : > { %v12546_v59 = vadd.f32 %v1775_v61, %v12338_v35  ;;  %v9284_v16 = vadd.f32 %v9283_v38, %v9282_v47  ;;  %v10899_v47 = vld [vmem:[%s16297_s1 + $0x40] sm:$0xff]  }
 0x158   : > { %v9285_v5 = vpop.f32.mrf.mxu1  ;;  %v10419_v18 = vpop.f32.mrf.mxu0 }
 0x159   : > { %v1780_v13 = vadd.f32 %v10414_v50, %v9284_v16  ;;  %v10897_v50 = vld [vmem:[%s16297_s1 + $0x8] sm:$0xff]   ;;  %v10900_v16 = vld [vmem:[%s16297_s1] sm:$0xff]  }
 0x15a   : > { %v9286_v31 = vpop.f32.mrf.mxu1  ;;  %v1790_v35 = vpop.f32.mrf.mxu0  ;;  %9545 = vmatpush3.bf16.msra.mxu1 %v10897_v50 }
 0x15b   : > { %v9287_v17 = vadd.f32 %v9286_v31, %v9285_v5  ;;  %v12558_v45 = vadd.f32 %v1780_v13, %v12308_v25  ;;  %9546 = vmatprep.subr.bf16.mxu1 %v10899_v47 }
 0x15c   : > { %v9288_v34 = vpop.f32.mrf.mxu1  ;;  %v12563_v52 = vpop.f32.mrf.mxu0 }
 0x15d   : > { %v1783_v28 = vadd.f32 %v10415_v62, %v9287_v17 }
 0x15e   : > { %v9289_v58 = vpop.f32.mrf.mxu1  ;;  %v1803_v1 = vpop.f32.mrf.mxu0  ;;  %9547 = vmatpush3.bf16.msra.mxu1 %v10900_v16 }
 0x15f   : > { %v9290_v25 = vadd.f32 %v9289_v58, %v9288_v34  ;;  %v12569_v2 = vadd.f32 %v1783_v28, %v12331_v41 }
 0x160   : > { %v9291_v61 = vpop.f32.mrf.mxu1  ;;  %v12574_v38 = vpop.f32.mrf.mxu0 }
 0x161   : > { %v1788_v62 = vadd.f32 %v9290_v25, %v1787_v60  ;;  %3579 = vmatmul.mubr.bf16.vlgmr.msra.gmra.mxu1 %v12497_v44  ;;  %v10898_v60 = vld [vmem:[%s16297_s1 + $0x80] sm:$0xff]  }
 0x162   : > { %v9292_v23 = vpop.f32.mrf.mxu1  ;;  %v1806_v5 = vpop.f32.mrf.mxu0  ;;  %10506 = vmatprep.subr.bf16.mxu0 %v10898_v60 }
 0x163   : > { %v9293_v11 = vadd.f32 %v9292_v23, %v9291_v61  ;;  %v12580_v41 = vadd.f32 %v1788_v62, %v12358_v22  ;;  %10507 = vmatpush3.bf16.msra.mxu0 %v10898_v60 }
 0x164   : > { %v9294_v13 = vpop.f32.mrf.mxu1  ;;  %v12582_v63 = vpop.f32.mrf.mxu0 }
 0x165   : > { %v1791_v31 = vadd.f32 %v9293_v11, %v1790_v35 }
 0x166   : > { %v9295_v17 = vpop.f32.mrf.mxu1  ;;  %v1819_v4 = vpop.f32.mrf.mxu0 }
 0x167   : > { %v9296_v34 = vadd.f32 %v9295_v17, %v9294_v13  ;;  %v12586_v50 = vadd.f32 %v1791_v31, %v12368_v9 }
 0x168   : > { %v9297_v28 = vpop.f32.mrf.mxu1  ;;  %v12591_v58 = vpop.f32.mrf.mxu0 }
 0x169   : > { %v1796_v22 = vadd.f32 %v10418_v42, %v9296_v34 }
 0x16a   : > { %v9298_v25 = vpop.f32.mrf.mxu1  ;;  %v1822_v47 = vpop.f32.mrf.mxu0 }
 0x16b   : > { %v9299_v35 = vadd.f32 %v9298_v25, %v9297_v28  ;;  %v12594_v44 = vadd.f32 %v1796_v22, %v12344_v40 }
 0x16c   : > { %v9300_v61 = vpop.f32.mrf.mxu1  ;;  %v12596_v16 = vpop.f32.mrf.mxu0 }
 0x16d   : > { %v1799_v9 = vadd.f32 %v10419_v18, %v9299_v35 }
 0x16e   : > { %v9301_v62 = vpop.f32.mrf.mxu1  ;;  %v12598_v23 = vpop.f32.mrf.mxu0 }
 0x16f   : > { %v9302_v11 = vadd.f32 %v9301_v62, %v9300_v61  ;;  %v12602_v42 = vadd.f32 %v1799_v9, %v12363_v56 }
 0x170   : > { %v9303_v13 = vpop.f32.mrf.mxu1  ;;  %v12604_v31 = vpop.f32.mrf.mxu0 }
 0x171   : > { %v1804_v17 = vadd.f32 %v9302_v11, %v1803_v1 }
 0x172   : > { %v9304_v34 = vpop.f32.mrf.mxu1  ;;  %v12606_v40 = vpop.f32.mrf.mxu0 }
 0x173   : > { %v9305_v60 = vadd.f32 %v9304_v34, %v9303_v13  ;;  %v12609_v28 = vadd.f32 %v1804_v17, %v12391_v20  ;;  %v10901_v20 = vld [vmem:[%s16297_s1 + $0x178] sm:$0xff]  }
 0x174   : > { %v9306_v18 = vpop.f32.mrf.mxu1  ;;  %v12611_v22 = vpop.f32.mrf.mxu0  ;;  %10540 = vmatprep.subr.bf16.mxu1 %v10901_v20 }
 0x175   : > { %v1807_v25 = vadd.f32 %v9305_v60, %v1806_v5  ;;  %v10902_v5 = vld [vmem:[%s16297_s1 + $0x138] sm:$0xff]   ;;  %10541 = vmatpush3.bf16.msra.mxu1 %v10901_v20 }
 0x176   : > { %v9307_v49 = vpop.f32.mrf.mxu1  ;;  %v12613_v35 = vpop.f32.mrf.mxu0  ;;  %9668 = vmatprep.subr.bf16.mxu0 %v10902_v5 }
 0x177   : > { %v9308_v56 = vadd.f32 %v9307_v49, %v9306_v18  ;;  %v12616_v61 = vadd.f32 %v1807_v25, %v12399_v8 }
 0x178   : > { %v9309_v9 = vpop.f32.mrf.mxu1  ;;  %v12618_v1 = vpop.f32.mrf.mxu0 }
 0x179   : > { %v1812_v62 = vadd.f32 %v12563_v52, %v9308_v56 }
 0x17a   : > { %v9310_v11 = vpop.f32.mrf.mxu1  ;;  %v12627_v13 = vpop.f32.mrf.mxu0 }
 0x17b   : > { %v9311_v17 = vadd.f32 %v9310_v11, %v9309_v9  ;;  %v12630_v8 = vadd.f32 %v1812_v62, %v12374_v27 }
 0x17c   : > { %v9312_v34 = vpop.f32.mrf.mxu1  ;;  %v12632_v60 = vpop.f32.mrf.mxu0 }
 0x17d   : > { %v1815_v52 = vadd.f32 %v12574_v38, %v9311_v17 }
 0x17e   : > { %v9313_v18 = vpop.f32.mrf.mxu1  ;;  %v12635_v25 = vpop.f32.mrf.mxu0 }
 0x17f   : > { %v9314_v49 = vadd.f32 %v9313_v18, %v9312_v34  ;;  %v12638_v56 = vadd.f32 %v1815_v52, %v12396_v0 }
 0x180   : > { %v9315_v57 = vpop.f32.mrf.mxu1  ;;  %v12640_v9 = vpop.f32.mrf.mxu0 }
 0x181   : > { %v1820_v27 = vadd.f32 %v9314_v49, %v1819_v4 }
 0x182   : > { %v9316_v62 = vpop.f32.mrf.mxu1  ;;  %v12642_v11 = vpop.f32.mrf.mxu0 }
 0x183   : > { %v9317_v5 = vadd.f32 %v9316_v62, %v9315_v57  ;;  %v12645_v19 = vadd.f32 %v1820_v27, %v12416_v21 }
 0x184   : > { %v9318_v20 = vpop.f32.mrf.mxu1  ;;  %v12647_v38 = vpop.f32.mrf.mxu0 }
 0x185   : > { %16375 = vst [vmem:[#allocation5_spill] sm:$0xff] %v12645_v19  ;;  %v1823_v17 = vadd.f32 %v9317_v5, %v1822_v47  ;;  %v10906_v47 = vld [vmem:[%s16297_s1 + $0x170] sm:$0xff]  }
 0x186   : > { %v9319_v33 = vpop.f32.mrf.mxu1  ;;  %v12649_v34 = vpop.f32.mrf.mxu0  ;;  %10542 = vmatprep.subr.bf16.mxu1 %v10906_v47 }
 0x187   : > { %v9320_v0 = vadd.f32 %v9319_v33, %v9318_v20  ;;  %v12652_v52 = vadd.f32 %v1823_v17, %v12421_v14  ;;  %10543 = vmatpush3.bf16.msra.mxu1 %v10906_v47 }
 0x188   : > { %v9321_v18 = vpop.f32.mrf.mxu1  ;;  %v12654_v4 = vpop.f32.mrf.mxu0 }
 0x189   : > { %16376 = vst [vmem:[#allocation8_spill] sm:$0xff] %v12652_v52  ;;  %v1828_v49 = vadd.f32 %v12582_v63, %v9320_v0 }
 0x18a   : > { %v9322_v57 = vpop.f32.mrf.mxu1  ;;  %v12657_v62 = vpop.f32.mrf.mxu0 }
 0x18b   : > { %v9323_v21 = vadd.f32 %v9322_v57, %v9321_v18  ;;  %v12660_v27 = vadd.f32 %v1828_v49, %v12419_v30 }
 0x18c   : > { %v9324_v33 = vpop.f32.mrf.mxu1  ;;  %v12665_v5 = vpop.f32.mrf.mxu0 }
 0x18d   : > { %16377 = vst [vmem:[#allocation6_spill] sm:$0xff] %v12660_v27  ;;  %v1831_v14 = vadd.f32 %v12591_v58, %v9323_v21 }
 0x18e   : > { %v9325_v20 = vpop.f32.mrf.mxu1  ;;  %v12668_v17 = vpop.f32.mrf.mxu0 }
 0x18f   : > { %v9326_v63 = vadd.f32 %v9325_v20, %v9324_v33  ;;  %v12671_v0 = vadd.f32 %v1831_v14, %v12423_v10 }
 0x190   : > { %v9327_v30 = vpop.f32.mrf.mxu1  ;;  %v12673_v18 = vpop.f32.mrf.mxu0 }
 0x191   : > { %v1836_v49 = vadd.f32 %v9326_v63, %v12598_v23 }
 0x192   : > { %v9328_v57 = vpop.f32.mrf.mxu1  ;;  %v12676_v52 = vpop.f32.mrf.mxu0 }
 0x193   : > { %v9329_v19 = vadd.f32 %v9328_v57, %v9327_v30  ;;  %v12679_v58 = vadd.f32 %v1836_v49, %v12445_v37 }
 0x194   : > { %v9330_v21 = vpop.f32.mrf.mxu1  ;;  %v12681_v27 = vpop.f32.mrf.mxu0 }
 0x195   : > { %16378 = vst [vmem:[#allocation15_spill] sm:$0xff] %v12679_v58  ;;  %v1839_v47 = vadd.f32 %v9329_v19, %v12606_v40 }
 0x196   : > { %v9331_v33 = vpop.f32.mrf.mxu1  ;;  %v12684_v10 = vpop.f32.mrf.mxu0 }
 0x197   : > { %v9332_v14 = vadd.f32 %v9331_v33, %v9330_v21  ;;  %v12687_v20 = vadd.f32 %v1839_v47, %v12450_v46 }
 0x198   : > { %v9333_v23 = vpop.f32.mrf.mxu1  ;;  %v12689_v63 = vpop.f32.mrf.mxu0 }
 0x199   : > { %16379 = vst [vmem:[#allocation11_spill] sm:$0xff] %v12687_v20  ;;  %v1844_v30 = vadd.f32 %v12596_v16, %v9332_v14 }
 0x19a   : > { %v9334_v57 = vpop.f32.mrf.mxu1  ;;  %v12692_v37 = vpop.f32.mrf.mxu0 }
 0x19b   : > { %v9335_v49 = vadd.f32 %v9334_v57, %v9333_v23  ;;  %v12695_v58 = vadd.f32 %v1844_v30, %v12468_v32  ;;  %v9205_v23 = vadd.f32 %v12508_v24, %v12493_v29  ;;  %v10911_v30 = vld [vmem:[%s16297_s1 + $0x168] sm:$0xff]   ;;  %v10916_v29 = vld [vmem:[%s16297_s1 + $0x160] sm:$0xff]  }
 0x19c   : > { %v9336_v19 = vpop.f32.mrf.mxu1  ;;  %v12697_v40 = vpop.f32.mrf.mxu0  ;;  %10544 = vmatprep.subr.bf16.mxu1 %v10911_v30 }
 0x19d   : > { %16380 = vst [vmem:[#allocation7_spill] sm:$0xff] %v12695_v58  ;;  %v1847_v21 = vadd.f32 %v12604_v31, %v9335_v49  ;;  %10545 = vmatpush3.bf16.msra.mxu1 %v10911_v30  ;;  %v1052_v24 = vadd.f32 %v9205_v23, %v12473_v53 }
 0x19e   : > { %v9337_v33 = vpop.f32.mrf.mxu1  ;;  %v12700_v46 = vpop.f32.mrf.mxu0  ;;  %10546 = vmatprep.subr.bf16.mxu1 %v10916_v29 }
 0x19f   : > { %v9338_v47 = vadd.f32 %v9337_v33, %v9336_v19  ;;  %v12703_v20 = vadd.f32 %v1847_v21, %v12476_v55 }
 0x1a0   : > { %v9339_v16 = vpop.f32.mrf.mxu1  ;;  %v12705_v14 = vpop.f32.mrf.mxu0 }
 0x1a1   : > { %16381 = vst [vmem:[#allocation13_spill] sm:$0xff] %v12703_v20  ;;  %v1852_v32 = vadd.f32 %v9338_v47, %v12613_v35  ;;  %10547 = vmatpush3.bf16.msra.mxu1 %v10916_v29 }
 0x1a2   : > { %v9340_v31 = vpop.f32.mrf.mxu1  ;;  %v12713_v57 = vpop.f32.mrf.mxu0 }
 0x1a3   : > { %v9341_v49 = vadd.f32 %v9340_v31, %v9339_v16  ;;  %v12716_v19 = vadd.f32 %v1852_v32, %v12503_v7 }
 0x1a4   : > { %v9342_v55 = vpop.f32.mrf.mxu1  ;;  %v12718_v21 = vpop.f32.mrf.mxu0 }
 0x1a5   : > { %16382 = vst [vmem:[#allocation14_spill] sm:$0xff] %v12716_v19  ;;  %v1855_v35 = vadd.f32 %v9341_v49, %v12627_v13 }
 0x1a6   : > { %v9343_v33 = vpop.f32.mrf.mxu1  ;;  %v12725_v47 = vpop.f32.mrf.mxu0 }
 0x1a7   : > { %v9344_v16 = vadd.f32 %v9343_v33, %v9342_v55  ;;  %v12727_v7 = vadd.f32 %v1855_v35, %v1052_v24 }
 0x1a8   : > { %v9345_v32 = vpop.f32.mrf.mxu1  ;;  %v12729_v31 = vpop.f32.mrf.mxu0 }
 0x1a9   : > { %16383 = vst [vmem:[#allocation17_spill] sm:$0xff] %v12727_v7  ;;  %v1860_v30 = vadd.f32 %v12611_v22, %v9344_v16 }
 0x1aa   : > { %v9346_v19 = vpop.f32.mrf.mxu1  ;;  %v12732_v20 = vpop.f32.mrf.mxu0 }
 0x1ab   : > { %v9347_v58 = vadd.f32 %v9346_v19, %v9345_v32  ;;  %v12735_v53 = vadd.f32 %v1860_v30, %v12527_v54 }
 0x1ac   : > { %v9348_v13 = vpop.f32.mrf.mxu1  ;;  %v12737_v23 = vpop.f32.mrf.mxu0 }
 0x1ad   : > { %16384 = vst [vmem:[#allocation18_spill] sm:$0xff] %v12735_v53  ;;  %v1863_v49 = vadd.f32 %v12618_v1, %v9347_v58 }
 0x1ae   : > { %v9349_v55 = vpop.f32.mrf.mxu1  ;;  %v12740_v24 = vpop.f32.mrf.mxu0 }
 0x1af   : > { %v9350_v35 = vadd.f32 %v9349_v55, %v9348_v13  ;;  %v12743_v29 = vadd.f32 %v1863_v49, %v12534_v3  ;;  %v10921_v3 = vld [vmem:[%s16297_s1 + $0x158] sm:$0xff]   ;;  %v16387_v13 = vld [vmem:[#allocation10_spill] sm:$0xff] }
 0x1b0   : > { %v9351_v22 = vpop.f32.mrf.mxu1  ;;  %v12745_v33 = vpop.f32.mrf.mxu0  ;;  %v1068_v49 = vadd.f32 %v16387_v13, %v12510_v51  ;;  %10548 = vmatprep.subr.bf16.mxu1 %v10921_v3 }
 0x1b1   : > { %16385 = vst [vmem:[#allocation19_spill] sm:$0xff] %v12743_v29  ;;  %v1868_v19 = vadd.f32 %v9350_v35, %v12635_v25  ;;  %10549 = vmatpush3.bf16.msra.mxu1 %v10921_v3 }
 0x1b2   : > { %v9352_v16 = vpop.f32.mrf.mxu1  ;;  %v12748_v54 = vpop.f32.mrf.mxu0 }
 0x1b3   : > { %v9353_v32 = vadd.f32 %v9352_v16, %v9351_v22  ;;  %v12751_v30 = vadd.f32 %v1868_v19, %v12491_v6 }
 0x1b4   : > { %v9354_v1 = vpop.f32.mrf.mxu1  ;;  %v12753_v58 = vpop.f32.mrf.mxu0 }
 0x1b5   : > { %16386 = vst [vmem:[#allocation20_spill] sm:$0xff] %v12751_v30  ;;  %v1871_v55 = vadd.f32 %v9353_v32, %v12642_v11 }
 0x1b6   : > { %v9355_v25 = vpop.f32.mrf.mxu1  ;;  %v12761_v35 = vpop.f32.mrf.mxu0 }
 0x1b7   : > { %v9356_v22 = vadd.f32 %v9355_v25, %v9354_v1  ;;  %v12763_v16 = vadd.f32 %v1871_v55, %v1068_v49 }
 0x1b8   : > { %v9357_v6 = vpop.f32.mrf.mxu1  ;;  %v12765_v19 = vpop.f32.mrf.mxu0 }
 0x1b9   : > { %16388 = vst [vmem:[#allocation10_spill] sm:$0xff] %v12763_v16  ;;  %v1876_v30 = vadd.f32 %v12632_v60, %v9356_v22 }
 0x1ba   : > { %v9358_v7 = vpop.f32.mrf.mxu1  ;;  %v12768_v29 = vpop.f32.mrf.mxu0 }
 0x1bb   : > { %v9359_v53 = vadd.f32 %v9358_v7, %v9357_v6  ;;  %v12771_v51 = vadd.f32 %v1876_v30, %v12479_v15 }
 0x1bc   : > { %v9360_v11 = vpop.f32.mrf.mxu1  ;;  %v12773_v32 = vpop.f32.mrf.mxu0 }
 0x1bd   : > { %v1879_v1 = vadd.f32 %v12640_v9, %v9359_v53 }
 0x1be   : > { %v9361_v13 = vpop.f32.mrf.mxu1  ;;  %v12776_v49 = vpop.f32.mrf.mxu0 }
 0x1bf   : > { %v9362_v3 = vadd.f32 %v9361_v13, %v9360_v11  ;;  %v12779_v55 = vadd.f32 %v1879_v1, %v12506_v26  ;;  %v10923_v26 = vld [vmem:[%s16297_s1 + $0x150] sm:$0xff]  }
 0x1c0   : > { %v9363_v60 = vpop.f32.mrf.mxu1  ;;  %v12781_v25 = vpop.f32.mrf.mxu0  ;;  %v16391_v11 = vld [vmem:[#allocation16_spill] sm:$0xff]  ;;  %10550 = vmatprep.subr.bf16.mxu1 %v10923_v26 }
 0x1c1   : > { %16389 = vst [vmem:[#allocation21_spill] sm:$0xff] %v12779_v55  ;;  %v1884_v7 = vadd.f32 %v9362_v3, %v12649_v34  ;;  %v1084_v1 = vadd.f32 %v16391_v11, %v12532_v12  ;;  %10551 = vmatpush3.bf16.msra.mxu1 %v10923_v26  ;;  %v9420_v12 = vadd.f32 %v12684_v10, %v12681_v27 }
 0x1c2   : > { %v9364_v22 = vpop.f32.mrf.mxu1  ;;  %v12784_v15 = vpop.f32.mrf.mxu0  ;;  %v9414_v26 = vadd.f32 %v12668_v17, %v12665_v5 }
 0x1c3   : > { %v9365_v30 = vadd.f32 %v9364_v22, %v9363_v60  ;;  %v12787_v6 = vadd.f32 %v1884_v7, %v12524_v39 }
 0x1c4   : > { %v9366_v9 = vpop.f32.mrf.mxu1  ;;  %v12789_v53 = vpop.f32.mrf.mxu0 }
 0x1c5   : > { %16390 = vst [vmem:[#allocation22_spill] sm:$0xff] %v12787_v6  ;;  %v1887_v13 = vadd.f32 %v9365_v30, %v12657_v62 }
 0x1c6   : > { %v9367_v34 = vpop.f32.mrf.mxu1  ;;  %v12797_v3 = vpop.f32.mrf.mxu0 }
 0x1c7   : > { %v9368_v60 = vadd.f32 %v9367_v34, %v9366_v9  ;;  %v12799_v22 = vadd.f32 %v1887_v13, %v1084_v1 }
 0x1c8   : > { %v9369_v39 = vpop.f32.mrf.mxu1  ;;  %v12801_v7 = vpop.f32.mrf.mxu0 }
 0x1c9   : > { %v1892_v6 = vadd.f32 %v12647_v38, %v9368_v60  ;;  %v12819_v38 = vld [vmem:[%s16298_s2] ss:$0 sm:$0xff] }
 0x1ca   : > { %v9370_v16 = vpop.f32.mrf.mxu1  ;;  %v12804_v55 = vpop.f32.mrf.mxu0 }
 0x1cb   : > { %v12809_v62 = vadd.f32 %v1892_v6, %v12515_v43  ;;  %v9371_v30 = vadd.f32 %v9370_v16, %v9369_v39  ;;  %v9423_v43 = vadd.f32 %v12692_v37, %v12689_v63 }
 0x1cc   : > { %v12811_v11 = vpop.f32.mrf.mxu0  ;;  %v10462_v9 = vpop.f32.mrf.mxu1 }
 0x1cd   : > { %v1895_v1 = vadd.f32 %v12654_v4, %v9371_v30  ;;  %v2648_v13 = vadd.f32 %v10462_v9, %v9420_v12  ;;  %v12832_v4 = vld [vmem:[%s16299_s3] ss:$0 sm:$0xff]  ;;  %v9432_v12 = vadd.f32 %v12725_v47, %v12718_v21  ;;  %v10925_v47 = vld [vmem:[%s16297_s1 + $0x148] sm:$0xff]  }
 0x1ce   : > { %v12821_v34 = vpop.f32.mrf.mxu0  ;;  %v2639_v27 = vpop.f32.mrf.mxu1  ;;  %10552 = vmatprep.subr.bf16.mxu1 %v10925_v47 }
 0x1cf   : > { %v12826_v10 = vadd.f32 %v1895_v1, %v12530_v36  ;;  %v2800_v16 = vadd.f32 %v2648_v13, %v12558_v45  ;;  %v2640_v5 = vadd.f32 %v9414_v26, %v2639_v27  ;;  %v9417_v36 = vadd.f32 %v12676_v52, %v12673_v18  ;;  %v3004_v18 = vld [vmem:[%s11154_s12 + $0x10] sm:$0xff]  ;;  %10553 = vmatpush3.bf16.msra.mxu1 %v10925_v47 }
 0x1d0   : > { %v12834_v17 = vpop.f32.mrf.mxu0  ;;  %v10463_v6 = vpop.f32.mrf.mxu1  ;;  %v9429_v1 = vadd.f32 %v12713_v57, %v12705_v14  ;;  %v9435_v52 = vadd.f32 %v12732_v20, %v12729_v31  ;;  %v12865_v20 = vadd.f32 %v12748_v54, %v12745_v33  ;;  %v9444_v14 = vadd.f32 %v12761_v35, %v12753_v58  ;;  %v3002_v57 = vld [vmem:[%s11154_s12] sm:$0xff]  ;;  %v3005_v54 = vld [vmem:[%s11154_s12 + $0x18] sm:$0xff] }
 0x1d1   : > { %v2902_v60 = vmul.f32 %v12819_v38, %v2800_v16  ;;  %v2798_v39 = vadd.f32 %v2640_v5, %v12543_v48  ;;  %v2651_v63 = vadd.f32 %v10463_v6, %v9423_v43  ;;  %v9426_v48 = vadd.f32 %v12700_v46, %v12697_v40 }
 0x1d2   : > { %v12840_v37 = vpop.f32.mrf.mxu0  ;;  %v2642_v45 = vpop.f32.mrf.mxu1  ;;  %v12861_v46 = vadd.f32 %v12740_v24, %v12737_v23  ;;  %v9447_v24 = vadd.f32 %v12768_v29, %v12765_v19  ;;  %v12877_v33 = vadd.f32 %v12776_v49, %v12773_v32  ;;  %v12885_v29 = vadd.f32 %v12784_v15, %v12781_v25 }
 0x1d3   : > { %v2940_v30 = vadd.f32 %v12832_v4, %v2902_v60  ;;  %v2900_v9 = vmul.f32 %v12819_v38, %v2798_v39  ;;  %v2801_v26 = vadd.f32 %v2651_v63, %v12569_v2  ;;  %v2643_v13 = vadd.f32 %v9417_v36, %v2642_v45 }
 0x1d4   : > { %v9466_v27 = vpop.f32.mrf.mxu0  ;;  %v10466_v21 = vpop.f32.mrf.mxu1  ;;  %v12889_v19 = vadd.f32 %v12797_v3, %v12789_v53  ;;  %v12903_v53 = vadd.f32 %v12821_v34, %v12811_v11  ;;  %v12910_v47 = vadd.f32 %v12840_v37, %v12834_v17 }
 0x1d5   : > { %v2972_v43 = vmax.f32 %v2940_v30, 0.0  ;;  %v2938_v2 = vadd.f32 %v12832_v4, %v2900_v9  ;;  %v2903_v16 = vmul.f32 %v12819_v38, %v2801_v26  ;;  %v2664_v40 = vadd.f32 %v10466_v21, %v9432_v12 }
 0x1d6   : > { %v2799_v31 = vadd.f32 %v2643_v13, %v12546_v59  ;;  %v9467_v5 = vpop.f32.mrf.mxu0  ;;  %v2655_v6 = vpop.f32.mrf.mxu1 }
 0x1d7   : > { %v3036_v60 = vadd.f32 %v3004_v18, %v2972_v43  ;;  %v2970_v39 = vmax.f32 %v2938_v2, 0.0  ;;  %v2941_v63 = vadd.f32 %v12832_v4, %v2903_v16  ;;  %v2804_v23 = vadd.f32 %v2664_v40, %v12594_v44  ;;  %v3003_v18 = vld [vmem:[%s11154_s12 + $0x8] sm:$0xff] }
 0x1d8   : > { %v2901_v59 = vmul.f32 %v12819_v38, %v2799_v31  ;;  %v2656_v58 = vadd.f32 %v9426_v48, %v2655_v6  ;;  %v9469_v35 = vpop.f32.mrf.mxu0  ;;  %v10467_v36 = vpop.f32.mrf.mxu1  ;;  %v12895_v48 = vadd.f32 %v12804_v55, %v12801_v7  ;;  %v12913_v2 = vadd.f32 %v9467_v5, %v9466_v27  ;;  %v3006_v6 = vld [vmem:[%s11154_s12 + $0x20] sm:$0xff] }
 0x1d9   : > { %3068 = vst.msk [vmem:[#allocation2 + $0x30] sm:$0xff] %vm288_vm0, %v3036_v60  ;;  %v3034_v45 = vadd.f32 %v3002_v57, %v2970_v39  ;;  %v2973_v12 = vmax.f32 %v2941_v63, 0.0  ;;  %v2906_v44 = vmul.f32 %v12819_v38, %v2804_v23  ;;  %v2667_v30 = vadd.f32 %v10467_v36, %v9435_v52  ;;  %v3009_v39 = vld [vmem:[%s11154_s12 + $0x38] sm:$0xff] }
 0x1da   : > { %v2939_v32 = vadd.f32 %v12832_v4, %v2901_v59  ;;  %v2802_v49 = vadd.f32 %v2656_v58, %v12580_v41  ;;  %v9470_v9 = vpop.f32.mrf.mxu0  ;;  %v2658_v26 = vpop.f32.mrf.mxu1  ;;  %v3008_v41 = vld [vmem:[%s11154_s12 + $0x30] sm:$0xff] }
 0x1db   : > { %3066 = vst.msk [vmem:[#allocation2 + $0x18] sm:$0xff] %vm288_vm0, %v3034_v45  ;;  %v3037_v52 = vadd.f32 %v3005_v54, %v2973_v12  ;;  %v2944_v25 = vadd.f32 %v12832_v4, %v2906_v44  ;;  %v2805_v15 = vadd.f32 %v2667_v30, %v12602_v42  ;;  %v2659_v21 = vadd.f32 %v9429_v1, %v2658_v26 }
 0x1dc   : > { %v2971_v3 = vmax.f32 %v2939_v32, 0.0  ;;  %v2904_v13 = vmul.f32 %v12819_v38, %v2802_v49  ;;  %v9472_v55 = vpop.f32.mrf.mxu0  ;;  %v10470_v7 = vpop.f32.mrf.mxu1  ;;  %v12919_v17 = vadd.f32 %v9470_v9, %v9469_v35  ;;  %v3007_v9 = vld [vmem:[%s11154_s12 + $0x28] sm:$0xff] }
 0x1dd   : > { %3069 = vst.msk [vmem:[#allocation2 + $0x38] sm:$0xff] %vm288_vm0, %v3037_v52  ;;  %v2976_v43 = vmax.f32 %v2944_v25, 0.0  ;;  %v2907_v42 = vmul.f32 %v12819_v38, %v2805_v15  ;;  %v2680_v11 = vadd.f32 %v10470_v7, %v9444_v14  ;;  %v2803_v1 = vadd.f32 %v2659_v21, %v12586_v50  ;;  %v3012_v25 = vld [vmem:[%s11154_s12 + $0x50] sm:$0xff] }
 0x1de   : > { %v3035_v34 = vadd.f32 %v3003_v18, %v2971_v3  ;;  %v2942_v16 = vadd.f32 %v12832_v4, %v2904_v13  ;;  %v9473_v40 = vpop.f32.mrf.mxu0  ;;  %v2671_v57 = vpop.f32.mrf.mxu1 }
 0x1df   : > { %v3040_v31 = vadd.f32 %v3008_v41, %v2976_v43  ;;  %v2945_v60 = vadd.f32 %v12832_v4, %v2907_v42  ;;  %v2808_v37 = vadd.f32 %v2680_v11, %v12630_v8  ;;  %v2905_v27 = vmul.f32 %v12819_v38, %v2803_v1  ;;  %v16392_v1 = vld [vmem:[#allocation9_spill] sm:$0xff] }
 0x1e0   : > { %3067 = vst.msk [vmem:[#allocation2 + $0x20] sm:$0xff] %vm288_vm0, %v3035_v34  ;;  %v2974_v14 = vmax.f32 %v2942_v16, 0.0  ;;  %v12925_v5 = vadd.f32 %v9473_v40, %v9472_v55  ;;  %v2672_v50 = vadd.f32 %v12861_v46, %v2671_v57  ;;  %v9475_v63 = vpop.f32.mrf.mxu0  ;;  %v10471_v23 = vpop.f32.mrf.mxu1  ;;  %v12928_v54 = vld [vmem:[#allocation2 + $0x30] sm:$0xff]  ;;  %v10972_v40 = vld [vmem:[%s16297_s1 + $0x178] sm:$0xff]  }
 0x1e1   : > { %3072 = vst.msk [vmem:[#allocation2 + $0x60] sm:$0xff] %vm288_vm0, %v3040_v31  ;;  %v2977_v59 = vmax.f32 %v2945_v60, 0.0  ;;  %v2910_v8 = vmul.f32 %v12819_v38, %v2808_v37  ;;  %v2683_v58 = vadd.f32 %v10471_v23, %v9447_v24  ;;  %v12933_v35 = vrot.slane %v12928_v54, 7  ;;  %v16394_v60 = vld [vmem:[#allocation6_spill] sm:$0xff] }
 0x1e2   : > { %v3038_v36 = vadd.f32 %v3006_v6, %v2974_v14  ;;  %v2943_v45 = vadd.f32 %v12832_v4, %v2905_v27  ;;  %v2806_v46 = vadd.f32 %v2672_v50, %v12609_v28  ;;  %v9476_v12 = vpop.f32.mrf.mxu0  ;;  %v2674_v44 = vpop.f32.mrf.mxu1  ;;  %v12937_v30 = vld [vmem:[#allocation2 + $0x18] sm:$0xff]  ;;  %v3264_v32 = vrot.slane %v12928_v54, 1  ;;  %v3010_v6 = vld [vmem:[%s11154_s12 + $0x40] sm:$0xff] }
 0x1e3   : > { %v3041_v49 = vadd.f32 %v3009_v39, %v2977_v59  ;;  %v2948_v26 = vadd.f32 %v12832_v4, %v2910_v8  ;;  %v2809_v24 = vadd.f32 %v2683_v58, %v12638_v56  ;;  %v12943_v52 = vadd.f32 %v9476_v12, %v9475_v63  ;;  %v10927_v56 = vld [vmem:[%s16297_s1 + $0x140] sm:$0xff]   ;;  %v3013_v27 = vld [vmem:[%s11154_s12 + $0x58] sm:$0xff] }
 0x1e4   : > { %3070 = vst.msk [vmem:[#allocation2 + $0x48] sm:$0xff] %vm288_vm0, %v3038_v36  ;;  %v2975_v18 = vmax.f32 %v2943_v45, 0.0  ;;  %v2908_v28 = vmul.f32 %v12819_v38, %v2806_v46  ;;  %v2675_v15 = vadd.f32 %v12865_v20, %v2674_v44  ;;  %v9478_v3 = vpop.f32.mrf.mxu0  ;;  %v10474_v41 = vpop.f32.mrf.mxu1  ;;  %v12950_v13 = vrot.slane %v12937_v30, 7  ;;  %10554 = vmatprep.subr.bf16.mxu1 %v10927_v56 }
 0x1e5   : > { %3073 = vst.msk [vmem:[#allocation2 + $0x68] sm:$0xff] %vm288_vm0, %v3041_v49  ;;  %v2980_v21 = vmax.f32 %v2948_v26, 0.0  ;;  %v2911_v55 = vmul.f32 %v12819_v38, %v2809_v24  ;;  %v2696_v7 = vadd.f32 %v10474_v41, %v12889_v19  ;;  %v3261_v43 = vrot.slane %v12937_v30, 1  ;;  %10555 = vmatpush3.bf16.msra.mxu1 %v10927_v56  ;;  %v16395_v49 = vld [vmem:[#allocation5_spill] sm:$0xff]  ;;  %v16396_v56 = vld [vmem:[#allocation12_spill] sm:$0xff] }
 0x1e6   : > { %v3039_v20 = vadd.f32 %v3007_v9, %v2975_v18  ;;  %v2946_v42 = vadd.f32 %v12832_v4, %v2908_v28  ;;  %v2807_v11 = vadd.f32 %v2675_v15, %v12616_v61  ;;  %v9479_v34 = vpop.f32.mrf.mxu0  ;;  %v2687_v16 = vpop.f32.mrf.mxu1  ;;  %v12965_v57 = vsel %vm419_vm1, %v16392_v1, %v12950_v13 }
 0x1e7   : > { %v3044_v31 = vadd.f32 %v3012_v25, %v2980_v21  ;;  %v2949_v19 = vadd.f32 %v12832_v4, %v2911_v55  ;;  %v2812_v37 = vadd.f32 %v2696_v7, %v16394_v60  ;;  %v12970_v14 = vadd.f32 %v9479_v34, %v9478_v3  ;;  %v3102_v39 = vld [vmem:[#allocation2 + $0x20] sm:$0xff]  ;;  %v3011_v25 = vld [vmem:[%s11154_s12 + $0x48] sm:$0xff]  ;;  %v3016_v3 = vld [vmem:[%s11154_s12 + $0x70] sm:$0xff] }
 0x1e8   : > { %3071 = vst.msk [vmem:[#allocation2 + $0x50] sm:$0xff] %vm288_vm0, %v3039_v20  ;;  %v2978_v61 = vmax.f32 %v2946_v42, 0.0  ;;  %v2909_v50 = vmul.f32 %v12819_v38, %v2807_v11  ;;  %v2688_v63 = vadd.f32 %v12877_v33, %v2687_v16  ;;  %v9481_v23 = vpop.f32.mrf.mxu0  ;;  %v10475_v59 = vpop.f32.mrf.mxu1  ;;  %v3150_v8 = vrot.slane %v3102_v39, 7  ;;  %v13002_v16 = vld [vmem:[#allocation2 + $0x38] sm:$0xff] }
 0x1e9   : > { %3076 = vst.msk [vmem:[#allocation2 + $0x90] sm:$0xff] %vm288_vm0, %v3044_v31  ;;  %v2981_v58 = vmax.f32 %v2949_v19, 0.0  ;;  %v2914_v36 = vmul.f32 %v12819_v38, %v2812_v37  ;;  %v2699_v45 = vadd.f32 %v10475_v59, %v12895_v48  ;;  %v12980_v46 = vpack.c.bf16 %v3102_v39, %v12937_v30  ;;  %v10903_v31 = vld [vmem:[%s16297_s1 + $0xf8] sm:$0xff]  }
 0x1ea   : > { %v3042_v12 = vadd.f32 %v3010_v6, %v2978_v61  ;;  %v2947_v44 = vadd.f32 %v12832_v4, %v2909_v50  ;;  %v2810_v33 = vadd.f32 %v2688_v63, %v16395_v49  ;;  %v3262_v9 = vrot.slane %v3102_v39, 1  ;;  %v9482_v26 = vpop.f32.mrf.mxu0  ;;  %v2690_v24 = vpop.f32.mrf.mxu1  ;;  %v16398_v63 = vld [vmem:[#allocation7_spill] sm:$0xff]  ;;  %v10904_v49 = vld [vmem:[%s16297_s1 + $0x130] sm:$0xff]  }
 0x1eb   : > { %v3045_v18 = vadd.f32 %v3013_v27, %v2981_v58  ;;  %v2952_v28 = vadd.f32 %v12832_v4, %v2914_v36  ;;  %v2813_v15 = vadd.f32 %v2699_v45, %v12671_v0  ;;  %3586 = vmatprep.mubr.bf16.mxu1 %v12980_v46  ;;  %v12988_v48 = vadd.f32 %v9482_v26, %v9481_v23  ;;  %v16397_v27 = vld [vmem:[#allocation8_spill] sm:$0xff]  ;;  %v3017_v58 = vld [vmem:[%s11154_s12 + $0x78] sm:$0xff] }
 0x1ec   : > { %3074 = vst.msk [vmem:[#allocation2 + $0x78] sm:$0xff] %vm288_vm0, %v3042_v12  ;;  %v2979_v30 = vmax.f32 %v2947_v44, 0.0  ;;  %v2912_v41 = vmul.f32 %v12819_v38, %v2810_v33  ;;  %v3334_v21 = vsel %vm532_vm2, %v3262_v9, %v16396_v56  ;;  %v3335_v55 = vsel %vm532_vm2, %v3261_v43, %v3262_v9  ;;  %v9484_v7 = vpop.f32.mrf.mxu0  ;;  %v10478_v0 = vpop.f32.mrf.mxu1 }
 0x1ed   : > { %3077 = vst.msk [vmem:[#allocation2 + $0x98] sm:$0xff] %vm288_vm0, %v3045_v18  ;;  %v2984_v20 = vmax.f32 %v2952_v28, 0.0  ;;  %v2915_v42 = vmul.f32 %v12819_v38, %v2813_v15  ;;  %v2691_v11 = vadd.f32 %v12885_v29, %v2690_v24  ;;  %v2712_v34 = vadd.f32 %v10478_v0, %v12913_v2  ;;  %v3014_v2 = vld [vmem:[%s11154_s12 + $0x60] sm:$0xff]  ;;  %v10905_v24 = vld [vmem:[%s16297_s1 + $0xf0] sm:$0xff]  }
 0x1ee   : > { %v3043_v43 = vadd.f32 %v3011_v25, %v2979_v30  ;;  %v2950_v6 = vadd.f32 %v12832_v4, %v2912_v41  ;;  %v13011_v19 = vsel %vm419_vm1, %v12950_v13, %v3150_v8  ;;  %v3339_v60 = vpack.c.bf16 %v3334_v21, %v3335_v55  ;;  %v9485_v37 = vpop.f32.mrf.mxu0  ;;  %v2703_v29 = vpop.f32.mrf.mxu1  ;;  %v10907_v41 = vld [vmem:[%s16297_s1 + $0x128] sm:$0xff]  }
 0x1ef   : > { %v3048_v39 = vadd.f32 %v3016_v3, %v2984_v20  ;;  %v2953_v61 = vadd.f32 %v12832_v4, %v2915_v42  ;;  %v2811_v50 = vadd.f32 %v2691_v11, %v16397_v27  ;;  %v2816_v23 = vadd.f32 %v2712_v34, %v16398_v63  ;;  %v16401_v42 = vld [vmem:[#allocation15_spill] sm:$0xff]  ;;  %v16402_v34 = vld [vmem:[#allocation13_spill] sm:$0xff] }
 0x1f0   : > { %3075 = vst.msk [vmem:[#allocation2 + $0x80] sm:$0xff] %vm288_vm0, %v3043_v43  ;;  %v2982_v59 = vmax.f32 %v2950_v6, 0.0  ;;  %v3227_v36 = vpack.c.bf16 %v13011_v19, %v12965_v57  ;;  %10509 = vmatmul.mubr.bf16.vlgmr.msra.gmra.mxu0 %v3339_v60  ;;  %v3153_v8 = vrot.slane %v13002_v16, 7  ;;  %v13024_v45 = vpack.c.bf16 %v13002_v16, %v12928_v54  ;;  %v9487_v12 = vpop.f32.mrf.mxu0  ;;  %v10479_v44 = vpop.f32.mrf.mxu1  ;;  %v10929_v60 = vld [vmem:[%s16297_s1 + $0x1f8] sm:$0xff]   ;;  %v13085_v63 = vld [vmem:[#allocation2 + $0x48] sm:$0xff] }
 0x1f1   : > { %3080 = vst.msk [vmem:[#allocation2 + $0xc0] sm:$0xff] %vm288_vm0, %v3048_v39  ;;  %v2985_v33 = vmax.f32 %v2953_v61, 0.0  ;;  %v2913_v9 = vmul.f32 %v12819_v38, %v2811_v50  ;;  %v2918_v57 = vmul.f32 %v12819_v38, %v2816_v23  ;;  %v13033_v26 = vrot.slane %v13002_v16, 1  ;;  %9669 = vmatpush3.bf16.msra.mxu0 %v10903_v31  ;;  %v10908_v39 = vld [vmem:[%s16297_s1 + $0xe8] sm:$0xff]   ;;  %v13087_v23 = vld [vmem:[#allocation2 + $0x50] sm:$0xff]  ;;  %9804 = vmatprep.subr.bf16.mxu1 %v10929_v60  ;;  %v10912_v60 = vld [vmem:[%s16297_s1 + $0x118] sm:$0xff]  }
 0x1f2   : > { %v3046_v18 = vadd.f32 %v3014_v2, %v2982_v59  ;;  %3587 = vmatmul.mubr.bf16.gmra.mxu1 %v3227_v36  ;;  %v13038_v25 = vadd.f32 %v9485_v37, %v9484_v7  ;;  %v2704_v28 = vadd.f32 %v12903_v53, %v2703_v29  ;;  %v2715_v15 = vadd.f32 %v10479_v44, %v12919_v17  ;;  %v9488_v30 = vpop.f32.mrf.mxu0  ;;  %v2706_v3 = vpop.f32.mrf.mxu1  ;;  %v3015_v17 = vld [vmem:[%s11154_s12 + $0x68] sm:$0xff]  ;;  %v3020_v7 = vld [vmem:[%s11154_s12 + $0x90] sm:$0xff] }
 0x1f3   : > { %16399 = vst [vmem:[#allocation16_spill] sm:$0xff] %v13033_v26  ;;  %v3049_v21 = vadd.f32 %v3017_v58, %v2985_v33  ;;  %v2951_v55 = vadd.f32 %v12832_v4, %v2913_v9  ;;  %v2956_v0 = vadd.f32 %v12832_v4, %v2918_v57  ;;  %3594 = vmatprep.mubr.bf16.mxu1 %v13024_v45  ;;  %v10909_v58 = vld [vmem:[%s16297_s1 + $0x120] sm:$0xff]  }
 0x1f4   : > { %v3332_v53 = vsel %vm532_vm2, %v13033_v26, %v16396_v56  ;;  %3078 = vst.msk [vmem:[#allocation2 + $0xa8] sm:$0xff] %vm288_vm0, %v3046_v18  ;;  %v13060_v20 = vsel %vm532_vm2, %v3264_v32, %v13033_v26  ;;  %v2814_v11 = vadd.f32 %v2704_v28, %v16401_v42  ;;  %v2817_v16 = vadd.f32 %v2715_v15, %v16402_v34  ;;  %v13066_v43 = vpop.f32.mrf.mxu0  ;;  %v10482_v6 = vpop.f32.mrf.mxu1  ;;  %v16404_v57 = vld [vmem:[#allocation18_spill] sm:$0xff]  ;;  %v13103_v28 = vld [vmem:[#allocation2 + $0x68] sm:$0xff] }
 0x1f5   : > { %16400 = vst [vmem:[#allocation9_spill] sm:$0xff] %v13060_v20  ;;  %v13064_v31 = vadd.f32 %v9488_v30, %v9487_v12  ;;  %9670 = vmatprep.subr.bf16.mxu0 %v10904_v49  ;;  %3081 = vst.msk [vmem:[#allocation2 + $0xc8] sm:$0xff] %vm288_vm0, %v3049_v21  ;;  %v2983_v54 = vmax.f32 %v2951_v55, 0.0  ;;  %v2988_v37 = vmax.f32 %v2956_v0, 0.0  ;;  %v3340_v32 = vpack.c.bf16 %v3332_v53, %v13060_v20  ;;  %v13097_v49 = vld [vmem:[#allocation2 + $0x60] sm:$0xff]  ;;  %v3027_v20 = vld [vmem:[%s11154_s12 + $0xc8] sm:$0xff] }
 0x1f6   : > { %v2707_v29 = vadd.f32 %v12910_v47, %v2706_v3  ;;  %9671 = vmatpush3.bf16.msra.mxu0 %v10905_v24  ;;  %v2916_v2 = vmul.f32 %v12819_v38, %v2814_v11  ;;  %v2919_v61 = vmul.f32 %v12819_v38, %v2817_v16  ;;  %v2728_v27 = vadd.f32 %v10482_v6, %v12970_v14  ;;  %v9491_v47 = vpop.f32.mrf.mxu0  ;;  %v2719_v59 = vpop.f32.mrf.mxu1  ;;  %v16403_v14 = vld [vmem:[#allocation11_spill] sm:$0xff]  ;;  %v3018_v3 = vld [vmem:[%s11154_s12 + $0x80] sm:$0xff] }
 0x1f7   : > { %v13083_v50 = vsel %vm419_vm1, %v12933_v35, %v3153_v8  ;;  %9672 = vmatprep.subr.bf16.mxu0 %v10907_v41  ;;  %v3047_v36 = vadd.f32 %v3015_v17, %v2983_v54  ;;  %v3052_v12 = vadd.f32 %v3020_v7, %v2988_v37  ;;  %10512 = vmatprep.mubr.bf16.mxu0 %v3340_v32  ;;  %v3021_v41 = vld [vmem:[%s11154_s12 + $0x98] sm:$0xff]  ;;  %v3267_v55 = vrot.slane %v13085_v63, 1  ;;  %v10910_v17 = vld [vmem:[%s16297_s1 + $0xe0] sm:$0xff]  }
 0x1f8   : > { %v2815_v44 = vadd.f32 %v2707_v29, %v16403_v14  ;;  %v3221_v8 = vsel %vm419_vm1, %v16392_v1, %v12933_v35  ;;  %v2954_v33 = vadd.f32 %v12832_v4, %v2916_v2  ;;  %v2957_v9 = vadd.f32 %v12832_v4, %v2919_v61  ;;  %v9493_v15 = vpop.f32.mrf.mxu0  ;;  %v10483_v30 = vpop.f32.mrf.mxu1  ;;  %v3019_v61 = vld [vmem:[%s11154_s12 + $0x88] sm:$0xff] }
 0x1f9   : > { %v2820_v24 = vadd.f32 %v2728_v27, %v16404_v57  ;;  %v3228_v18 = vpack.c.bf16 %v13083_v50, %v3221_v8  ;;  %3079 = vst.msk [vmem:[#allocation2 + $0xb0] sm:$0xff] %vm288_vm0, %v3047_v36  ;;  %3084 = vst.msk [vmem:[#allocation2 + $0xf0] sm:$0xff] %vm288_vm0, %v3052_v12  ;;  %v13112_v0 = vrot.slane %v13087_v23, 1  ;;  %v13116_v53 = vpack.c.bf16 %v13087_v23, %v13085_v63  ;;  %v10913_v57 = vld [vmem:[%s16297_s1 + $0xd8] sm:$0xff]  }
 0x1fa   : > { %v2917_v21 = vmul.f32 %v12819_v38, %v2815_v44  ;;  %9673 = vmatpush3.bf16.msra.mxu0 %v10908_v39  ;;  %v2986_v7 = vmax.f32 %v2954_v33, 0.0  ;;  %v2989_v42 = vmax.f32 %v2957_v9, 0.0  ;;  %v3270_v34 = vrot.slane %v13097_v49, 1  ;;  %v9494_v16 = vpop.f32.mrf.mxu0  ;;  %v2722_v6 = vpop.f32.mrf.mxu1  ;;  %v3024_v44 = vld [vmem:[%s11154_s12 + $0xb0] sm:$0xff] }
 0x1fb   : > { %16405 = vst [vmem:[#allocation6_spill] sm:$0xff] %v13112_v0  ;;  %v2922_v11 = vmul.f32 %v12819_v38, %v2820_v24  ;;  %3595 = vmatmul.mubr.bf16.gmra.mxu1 %v3228_v18  ;;  %9674 = vmatprep.subr.bf16.mxu0 %v10909_v58  ;;  %v3330_v37 = vsel %vm532_vm2, %v13112_v0, %v16396_v56  ;;  %v13138_v29 = vrot.slane %v13103_v28, 1 }
 0x1fc   : > { %v2955_v54 = vadd.f32 %v12832_v4, %v2917_v21  ;;  %v13134_v32 = vsel %vm532_vm2, %v3267_v55, %v13112_v0  ;;  %3602 = vmatprep.mubr.bf16.mxu1 %v13116_v53  ;;  %v3050_v39 = vadd.f32 %v3018_v3, %v2986_v7  ;;  %v3053_v2 = vadd.f32 %v3021_v41, %v2989_v42  ;;  %v13143_v36 = vpop.f32.mrf.mxu0  ;;  %v10486_v12 = vpop.f32.mrf.mxu1  ;;  %v13164_v21 = vld [vmem:[#allocation2 + $0x78] sm:$0xff]  ;;  %v10914_v55 = vld [vmem:[%s16297_s1 + $0x110] sm:$0xff]  }
 0x1fd   : > { %16406 = vst [vmem:[#allocation5_spill] sm:$0xff] %v13134_v32  ;;  %v2960_v27 = vadd.f32 %v12832_v4, %v2922_v11  ;;  %v3341_v58 = vpack.c.bf16 %v3330_v37, %v13134_v32  ;;  %v3328_v8 = vsel %vm532_vm2, %v13138_v29, %v16396_v56  ;;  %v13153_v33 = vsel %vm532_vm2, %v3270_v34, %v13138_v29  ;;  %v16408_v34 = vld [vmem:[#allocation19_spill] sm:$0xff]  ;;  %v3029_v32 = vld [vmem:[%s11154_s12 + $0xd8] sm:$0xff] }
 0x1fe   : > { %v2987_v14 = vmax.f32 %v2955_v54, 0.0  ;;  %v9492_v9 = vadd.f32 %v9491_v47, %v13066_v43  ;;  %9675 = vmatpush3.bf16.msra.mxu0 %v10910_v17  ;;  %3082 = vst.msk [vmem:[#allocation2 + $0xd8] sm:$0xff] %vm288_vm0, %v3050_v39  ;;  %3085 = vst.msk [vmem:[#allocation2 + $0xf8] sm:$0xff] %vm288_vm0, %v3053_v2  ;;  %v3342_v18 = vpack.c.bf16 %v3328_v8, %v13153_v33  ;;  %v13166_v43 = vpop.f32.mrf.mxu0  ;;  %v13168_v47 = vpop.f32.mrf.mxu1  ;;  %v3273_v2 = vrot.slane %v13164_v21, 1 }
 0x1ff   : > { %v2992_v24 = vmax.f32 %v2960_v27, 0.0  ;;  %10513 = vmatmul.mubr.bf16.gmra.mxu0 %v3341_v58  ;;  %v2720_v3 = vadd.f32 %v12925_v5, %v2719_v59  ;;  %v2731_v41 = vadd.f32 %v10483_v30, %v12988_v48  ;;  %9676 = vmatprep.subr.bf16.mxu0 %v10912_v60  ;;  %v13173_v7 = vadd.f32 %v9494_v16, %v9493_v15  ;;  %v13176_v5 = vld [vmem:[#allocation2 + $0x80] sm:$0xff]  ;;  %v16409_v15 = vld [vmem:[#allocation17_spill] sm:$0xff]  ;;  %v13205_v58 = vld [vmem:[#allocation2 + $0x90] sm:$0xff] }
 0x200   : > { %v3051_v17 = vadd.f32 %v3019_v61, %v2987_v14  ;;  %v2723_v42 = vadd.f32 %v12943_v52, %v2722_v6  ;;  %v2744_v11 = vadd.f32 %v10486_v12, %v9492_v9  ;;  %10516 = vmatprep.mubr.bf16.mxu0 %v3342_v18  ;;  %v16407_v59 = vld [vmem:[#allocation14_spill] sm:$0xff]  ;;  %v13181_v60 = vrot.slane %v13085_v63, 7  ;;  %v13183_v37 = vpop.f32.mrf.mxu0  ;;  %v13185_v39 = vpop.f32.mrf.mxu1  ;;  %v10915_v63 = vld [vmem:[%s16297_s1 + $0xd0] sm:$0xff]   ;;  %v13221_v18 = vld [vmem:[#allocation2 + $0x98] sm:$0xff] }
 0x201   : > { %v3056_v48 = vadd.f32 %v3024_v44, %v2992_v24  ;;  %v2818_v30 = vadd.f32 %v2720_v3, %v16407_v59  ;;  %v2821_v54 = vadd.f32 %v2731_v41, %v16408_v34  ;;  %v3156_v6 = vrot.slane %v13087_v23, 7  ;;  %v10917_v44 = vld [vmem:[%s16297_s1 + $0x108] sm:$0xff]   ;;  %v3025_v59 = vld [vmem:[%s11154_s12 + $0xb8] sm:$0xff] }
 0x202   : > { %3083 = vst.msk [vmem:[#allocation2 + $0xe0] sm:$0xff] %vm288_vm0, %v3051_v17  ;;  %v2819_v52 = vadd.f32 %v2723_v42, %v16409_v15  ;;  %v2824_v16 = vadd.f32 %v2744_v11, %v12771_v51  ;;  %9677 = vmatpush3.bf16.msra.mxu0 %v10913_v57  ;;  %v3219_v51 = vsel %vm419_vm1, %v16392_v1, %v13181_v60  ;;  %v13203_v23 = vrot.slane %v13176_v5, 1  ;;  %v9500_v12 = vpop.f32.mrf.mxu0  ;;  %v2738_v14 = vpop.f32.mrf.mxu1 }
 0x203   : > { %3088 = vst.msk [vmem:[#allocation2 + $0x120] sm:$0xff] %vm288_vm0, %v3056_v48  ;;  %v2920_v61 = vmul.f32 %v12819_v38, %v2818_v30  ;;  %v2923_v27 = vmul.f32 %v12819_v38, %v2821_v54  ;;  %9678 = vmatprep.subr.bf16.mxu0 %v10914_v55  ;;  %v13215_v57 = vsel %vm419_vm1, %v13181_v60, %v3156_v6  ;;  %v3022_v48 = vld [vmem:[%s11154_s12 + $0xa0] sm:$0xff]  ;;  %v3276_v15 = vrot.slane %v13205_v58, 1 }
 0x204   : > { %16410 = vst [vmem:[#allocation12_spill] sm:$0xff] %v13203_v23  ;;  %v2921_v8 = vmul.f32 %v12819_v38, %v2819_v52  ;;  %v2926_v9 = vmul.f32 %v12819_v38, %v2824_v16  ;;  %v13219_v24 = vpack.c.bf16 %v13103_v28, %v13097_v49  ;;  %v3229_v55 = vpack.c.bf16 %v13215_v57, %v3219_v51  ;;  %v13230_v42 = vpop.f32.mrf.mxu0  ;;  %v13232_v11 = vpop.f32.mrf.mxu1  ;;  %v10918_v52 = vld [vmem:[%s16297_s1 + $0xc8] sm:$0xff]  }
 0x205   : > { %v2958_v3 = vadd.f32 %v12832_v4, %v2920_v61  ;;  %v2961_v41 = vadd.f32 %v12832_v4, %v2923_v27  ;;  %v3326_v17 = vsel %vm532_vm2, %v13203_v23, %v16396_v56  ;;  %v13241_v54 = vsel %vm532_vm2, %v3273_v2, %v13203_v23  ;;  %v3023_v61 = vld [vmem:[%s11154_s12 + $0xa8] sm:$0xff]  ;;  %v3028_v27 = vld [vmem:[%s11154_s12 + $0xd0] sm:$0xff]  ;;  %v10919_v2 = vld [vmem:[%s16297_s1 + $0x100] sm:$0xff]  }
 0x206   : > { %16411 = vst [vmem:[#allocation8_spill] sm:$0xff] %v13219_v24  ;;  %v2959_v30 = vadd.f32 %v12832_v4, %v2921_v8  ;;  %v2964_v34 = vadd.f32 %v12832_v4, %v2926_v9  ;;  %16412 = vst [vmem:[#allocation7_spill] sm:$0xff] %v13241_v54  ;;  %9679 = vmatpush3.bf16.msra.mxu0 %v10915_v63  ;;  %3603 = vmatmul.mubr.bf16.gmra.mxu1 %v3229_v55  ;;  %v13251_v8 = vrot.slane %v13221_v18, 1  ;;  %v13364_v26 = vld [vmem:[#allocation2 + $0xd8] sm:$0xff] }
 0x207   : > { %v2990_v16 = vmax.f32 %v2958_v3, 0.0  ;;  %v2993_v6 = vmax.f32 %v2961_v41, 0.0  ;;  %v3343_v51 = vpack.c.bf16 %v3326_v17, %v13241_v54  ;;  %9680 = vmatprep.subr.bf16.mxu0 %v10917_v44  ;;  %3610 = vmatprep.mubr.bf16.mxu1 %v13219_v24  ;;  %v9498_v3 = vadd.f32 %v13166_v43, %v13143_v36  ;;  %v13272_v54 = vld [vmem:[#allocation2 + $0xb0] sm:$0xff]  ;;  %v9503_v36 = vpop.f32.mrf.mxu0  ;;  %v2751_v43 = vpop.f32.mrf.mxu1 }
 0x208   : > { %v2991_v63 = vmax.f32 %v2959_v30, 0.0  ;;  %v2996_v9 = vmax.f32 %v2964_v34, 0.0  ;;  %v2736_v41 = vadd.f32 %v13038_v25, %v13168_v47  ;;  %v3324_v44 = vsel %vm532_vm2, %v13251_v8, %v16396_v56  ;;  %v13270_v34 = vld [vmem:[#allocation2 + $0xa8] sm:$0xff] }
 0x209   : > { %v3054_v55 = vadd.f32 %v3022_v48, %v2990_v16  ;;  %v3057_v17 = vadd.f32 %v3025_v59, %v2993_v6  ;;  %10517 = vmatmul.mubr.bf16.gmra.mxu0 %v3343_v51  ;;  %v13268_v30 = vsel %vm532_vm2, %v3276_v15, %v13251_v8  ;;  %v16413_v59 = vld [vmem:[#allocation20_spill] sm:$0xff]  ;;  %v10920_v6 = vld [vmem:[%s16297_s1 + $0xc0] sm:$0xff]   ;;  %v2747_v15 = vadd.f32 %v13185_v39, %v13173_v7  ;;  %v16414_v39 = vld [vmem:[#allocation21_spill] sm:$0xff] }
 0x20a   : > { %v3055_v25 = vadd.f32 %v3023_v61, %v2991_v63  ;;  %v3060_v47 = vadd.f32 %v3028_v27, %v2996_v9  ;;  %v3344_v48 = vpack.c.bf16 %v3324_v44, %v13268_v30  ;;  %v2822_v16 = vadd.f32 %v2736_v41, %v16413_v59  ;;  %9681 = vmatpush3.bf16.msra.mxu0 %v10918_v52  ;;  %v13291_v52 = vld [vmem:[%s16297_s1 + $0x238] sm:$0xff]   ;;  %v13313_v41 = vld [vmem:[#allocation2 + $0xc8] sm:$0xff]  ;;  %v3026_v59 = vld [vmem:[%s11154_s12 + $0xc0] sm:$0xff] }
 0x20b   : > { %3086 = vst.msk [vmem:[#allocation2 + $0x108] sm:$0xff] %vm288_vm0, %v3054_v55  ;;  %3089 = vst.msk [vmem:[#allocation2 + $0x128] sm:$0xff] %vm288_vm0, %v3057_v17  ;;  %v9501_v51 = vadd.f32 %v9500_v12, %v13183_v37  ;;  %v2739_v61 = vadd.f32 %v13064_v31, %v2738_v14  ;;  %v13286_v27 = vrot.slane %v13097_v49, 7  ;;  %9682 = vmatprep.subr.bf16.mxu0 %v10919_v2  ;;  %v3159_v37 = vrot.slane %v13103_v28, 7  ;;  %v16415_v14 = vld [vmem:[#allocation10_spill] sm:$0xff]  ;;  %v9505_v55 = vpop.f32.mrf.mxu0  ;;  %v10491_v17 = vpop.f32.mrf.mxu1 }
 0x20c   : > { %3087 = vst.msk [vmem:[#allocation2 + $0x110] sm:$0xff] %vm288_vm0, %v3055_v25  ;;  %3092 = vst.msk [vmem:[#allocation2 + $0x150] sm:$0xff] %vm288_vm0, %v3060_v47  ;;  %10520 = vmatprep.mubr.bf16.mxu0 %v3344_v48  ;;  %v2924_v7 = vmul.f32 %v12819_v38, %v2822_v16  ;;  %v3279_v31 = vrot.slane %v13270_v34, 1  ;;  %v13299_v49 = vrot.slane %v13272_v54, 1  ;;  %v2825_v12 = vadd.f32 %v2747_v15, %v16414_v39  ;;  %v13311_v28 = vld [vmem:[#allocation2 + $0xc0] sm:$0xff] }
 0x20d   : > { %v2823_v2 = vadd.f32 %v2739_v61, %v16415_v14  ;;  %v3217_v63 = vsel %vm419_vm1, %v16392_v1, %v13286_v27  ;;  %v13309_v9 = vpack.c.bf16 %v13176_v5, %v13164_v21  ;;  %v13319_v25 = vsel %vm419_vm1, %v13286_v27, %v3159_v37 }
 0x20e   : > { %v2962_v44 = vadd.f32 %v12832_v4, %v2924_v7  ;;  %v3322_v47 = vsel %vm532_vm2, %v13299_v49, %v16396_v56  ;;  %v13328_v48 = vsel %vm532_vm2, %v3279_v31, %v13299_v49  ;;  %9683 = vmatpush3.bf16.msra.mxu0 %v10920_v6  ;;  %v2927_v16 = vmul.f32 %v12819_v38, %v2825_v12 }
 0x20f   : > { %16416 = vst [vmem:[#allocation15_spill] sm:$0xff] %v13309_v9  ;;  %v2925_v15 = vmul.f32 %v12819_v38, %v2823_v2  ;;  %v3230_v61 = vpack.c.bf16 %v13319_v25, %v3217_v63  ;;  %v3345_v7 = vpack.c.bf16 %v3322_v47, %v13328_v48  ;;  %10588 = vmatprep.subr.bf16.mxu0 %v13291_v52  ;;  %v3282_v39 = vrot.slane %v13311_v28, 1  ;;  %v9506_v63 = vpop.f32.mrf.mxu0  ;;  %v2754_v47 = vpop.f32.mrf.mxu1 }
 0x210   : > { %v2994_v37 = vmax.f32 %v2962_v44, 0.0  ;;  %v13338_v31 = vrot.slane %v13313_v41, 1  ;;  %v9504_v6 = vadd.f32 %v9503_v36, %v13230_v42  ;;  %v2965_v12 = vadd.f32 %v12832_v4, %v2927_v16  ;;  %v16417_v16 = vld [vmem:[#allocation22_spill] sm:$0xff] }
 0x211   : > { %v2963_v14 = vadd.f32 %v12832_v4, %v2925_v15  ;;  %3611 = vmatmul.mubr.bf16.gmra.mxu1 %v3230_v61  ;;  %10521 = vmatmul.mubr.bf16.gmra.mxu0 %v3345_v7  ;;  %v2752_v2 = vadd.f32 %v9498_v3, %v2751_v43  ;;  %v13344_v23 = vrot.slane %v13164_v21, 7  ;;  %v9507_v7 = vadd.f32 %v9506_v63, %v9505_v55  ;;  %v3030_v63 = vld [vmem:[%s11154_s12 + $0xe0] sm:$0xff] }
 0x212   : > { %v3058_v44 = vadd.f32 %v3026_v59, %v2994_v37  ;;  %3618 = vmatprep.mubr.bf16.mxu1 %v13309_v9  ;;  %v3320_v42 = vsel %vm532_vm2, %v13338_v31, %v16396_v56  ;;  %v13356_v36 = vsel %vm532_vm2, %v3282_v39, %v13338_v31  ;;  %v2760_v3 = vadd.f32 %v13232_v11, %v9504_v6  ;;  %v13366_v39 = vld [vmem:[#allocation2 + $0xe0] sm:$0xff] }
 0x213   : > { %v2997_v43 = vmax.f32 %v2965_v12, 0.0  ;;  %v2995_v21 = vmax.f32 %v2963_v14, 0.0  ;;  %v3346_v59 = vpack.c.bf16 %v3320_v42, %v13356_v36  ;;  %v2826_v15 = vadd.f32 %v2752_v2, %v16417_v16  ;;  %v3032_v42 = vld [vmem:[%s11154_s12 + $0xf0] sm:$0xff] }
 0x214   : > { %3090 = vst.msk [vmem:[#allocation2 + $0x138] sm:$0xff] %vm288_vm0, %v3058_v44  ;;  %v2828_v61 = vadd.f32 %v2760_v3, %v12809_v62  ;;  %v2755_v37 = vadd.f32 %v9501_v51, %v2754_v47  ;;  %v3162_v0 = vrot.slane %v13176_v5, 7  ;;  %v3215_v12 = vsel %vm419_vm1, %v16392_v1, %v13344_v23  ;;  %v13398_v44 = vld [vmem:[#allocation2 + $0xf8] sm:$0xff] }
 0x215   : > { %v3061_v9 = vadd.f32 %v3029_v32, %v2997_v43  ;;  %v3059_v11 = vadd.f32 %v3027_v20, %v2995_v21  ;;  %10524 = vmatprep.mubr.bf16.mxu0 %v3346_v59  ;;  %v2928_v6 = vmul.f32 %v12819_v38, %v2826_v15  ;;  %v2763_v51 = vadd.f32 %v10491_v17, %v9507_v7  ;;  %v13380_v20 = vld [vmem:[#allocation2 + $0xf0] sm:$0xff]  ;;  %v13415_v7 = vld [vmem:[#allocation2 + $0x108] sm:$0xff] }
 0x216   : > { %v2930_v62 = vmul.f32 %v12819_v38, %v2828_v61  ;;  %v2827_v5 = vadd.f32 %v2755_v37, %v12799_v22  ;;  %v13378_v32 = vsel %vm419_vm1, %v13344_v23, %v3162_v0  ;;  %v3285_v17 = vrot.slane %v13364_v26, 1 }
 0x217   : > { %3093 = vst.msk [vmem:[#allocation2 + $0x158] sm:$0xff] %vm288_vm0, %v3061_v9  ;;  %3091 = vst.msk [vmem:[#allocation2 + $0x140] sm:$0xff] %vm288_vm0, %v3059_v11  ;;  %v2966_v55 = vadd.f32 %v12832_v4, %v2928_v6  ;;  %v3231_v14 = vpack.c.bf16 %v13378_v32, %v3215_v12  ;;  %v13388_v2 = vrot.slane %v13366_v39, 1  ;;  %v2829_v0 = vadd.f32 %v2763_v51, %v12826_v10  ;;  %v3031_v11 = vld [vmem:[%s11154_s12 + $0xe8] sm:$0xff] }
 0x218   : > { %v2968_v22 = vadd.f32 %v12832_v4, %v2930_v62  ;;  %v2929_v47 = vmul.f32 %v12819_v38, %v2827_v5  ;;  %v13396_v9 = vpack.c.bf16 %v13221_v18, %v13205_v58  ;;  %v3288_v21 = vrot.slane %v13380_v20, 1 }
 0x219   : > { %v2998_v3 = vmax.f32 %v2966_v55, 0.0  ;;  %3619 = vmatmul.mubr.bf16.gmra.mxu1 %v3231_v14  ;;  %v3318_v43 = vsel %vm532_vm2, %v13388_v2, %v16396_v56  ;;  %v13408_v10 = vsel %vm532_vm2, %v3285_v17, %v13388_v2  ;;  %v2931_v16 = vmul.f32 %v12819_v38, %v2829_v0  ;;  %v13426_v55 = vld [vmem:[#allocation2 + $0x110] sm:$0xff]  ;;  %v13428_v14 = vld [vmem:[#allocation2 + $0x120] sm:$0xff]  ;;  %v13430_v17 = vld [vmem:[#allocation2 + $0x128] sm:$0xff] }
 0x21a   : > { %16418 = vst [vmem:[#allocation13_spill] sm:$0xff] %v13396_v9  ;;  %v3000_v59 = vmax.f32 %v2968_v22, 0.0  ;;  %v2967_v15 = vadd.f32 %v12832_v4, %v2929_v47  ;;  %v3347_v61 = vpack.c.bf16 %v3318_v43, %v13408_v10  ;;  %3626 = vmatprep.mubr.bf16.mxu1 %v13396_v9  ;;  %v13419_v6 = vrot.slane %v13398_v44, 1  ;;  %16419 = vst [vmem:[#allocation11_spill] sm:$0xff] %v13428_v14  ;;  %v3033_v22 = vld [vmem:[%s11154_s12 + $0xf8] sm:$0xff] }
 0x21b   : > { %v3062_v37 = vadd.f32 %v3030_v63, %v2998_v3  ;;  %v13422_v12 = vrot.slane %v13205_v58, 7  ;;  %v3165_v62 = vrot.slane %v13221_v18, 7  ;;  %v2969_v51 = vadd.f32 %v12832_v4, %v2931_v16  ;;  %16420 = vst [vmem:[#allocation18_spill] sm:$0xff] %v13430_v17 }
 0x21c   : > { %v3064_v38 = vadd.f32 %v3032_v42, %v3000_v59  ;;  %v2999_v5 = vmax.f32 %v2967_v15, 0.0  ;;  %10525 = vmatmul.mubr.bf16.gmra.mxu0 %v3347_v61  ;;  %v3316_v58 = vsel %vm532_vm2, %v13419_v6, %v16396_v56  ;;  %v13441_v4 = vsel %vm532_vm2, %v3288_v21, %v13419_v6 }
 0x21d   : > { %3094 = vst.msk [vmem:[#allocation2 + $0x168] sm:$0xff] %vm288_vm0, %v3062_v37  ;;  %v13446_v18 = vsel %vm419_vm1, %v13422_v12, %v3165_v62  ;;  %v3291_v63 = vrot.slane %v13415_v7, 1  ;;  %v3001_v0 = vmax.f32 %v2969_v51, 0.0  ;;  %v3348_v42 = vpack.c.bf16 %v3316_v58, %v13441_v4 }
 0x21e   : > { %3096 = vst.msk [vmem:[#allocation2 + $0x180] sm:$0xff] %vm288_vm0, %v3064_v38  ;;  %v3063_v47 = vadd.f32 %v3031_v11, %v2999_v5  ;;  %v3213_v3 = vsel %vm419_vm1, %v16392_v1, %v13422_v12  ;;  %v13457_v21 = vrot.slane %v13426_v55, 1  ;;  %v3294_v59 = vrot.slane %v13428_v14, 1  ;;  %v13469_v11 = vld [vmem:[#allocation2 + $0x138] sm:$0xff]  ;;  %v13471_v62 = vld [vmem:[#allocation2 + $0x140] sm:$0xff] }
 0x21f   : > { %v3232_v43 = vpack.c.bf16 %v13446_v18, %v3213_v3  ;;  %v13461_v16 = vrot.slane %v13430_v17, 1  ;;  %v3065_v15 = vadd.f32 %v3033_v22, %v3001_v0  ;;  %10528 = vmatprep.mubr.bf16.mxu0 %v3348_v42  ;;  %v13466_v61 = vpack.c.bf16 %v13272_v54, %v13270_v34  ;;  %v13491_v22 = vld [vmem:[#allocation2 + $0x158] sm:$0xff]  ;;  %v13502_v3 = vld [vmem:[#allocation2 + $0x150] sm:$0xff] }
 0x220   : > { %3095 = vst.msk [vmem:[#allocation2 + $0x170] sm:$0xff] %vm288_vm0, %v3063_v47  ;;  %v3168_v37 = vrot.slane %v13272_v54, 7  ;;  %v3314_v38 = vsel %vm532_vm2, %v13457_v21, %v16396_v56  ;;  %v13480_v51 = vsel %vm532_vm2, %v3291_v63, %v13457_v21  ;;  %16422 = vst [vmem:[#allocation19_spill] sm:$0xff] %v13491_v22  ;;  %v3167_v63 = vrot.slane %v13270_v34, 7 }
 0x221   : > { %16421 = vst [vmem:[#allocation14_spill] sm:$0xff] %v13466_v61  ;;  %3627 = vmatmul.mubr.bf16.gmra.mxu1 %v3232_v43  ;;  %v3312_v54 = vsel %vm532_vm2, %v13461_v16, %v16396_v56  ;;  %v13489_v5 = vsel %vm532_vm2, %v3294_v59, %v13461_v16  ;;  %3097 = vst.msk [vmem:[#allocation2 + $0x188] sm:$0xff] %vm288_vm0, %v3065_v15  ;;  %v3349_v58 = vpack.c.bf16 %v3314_v38, %v13480_v51  ;;  %v11027_v38 = vld [vmem:[#allocation2] sm:$0xff] }
 0x222   : > { %3634 = vmatprep.mubr.bf16.mxu1 %v13466_v61  ;;  %v3350_v0 = vpack.c.bf16 %v3312_v54, %v13489_v5  ;;  %v3297_v47 = vrot.slane %v13469_v11, 1  ;;  %v13500_v42 = vrot.slane %v13471_v62, 1  ;;  %16423 = vst [vmem:[#allocation17_spill] sm:$0xff] %v13502_v3  ;;  %v13506_v43 = vsel %vm419_vm1, %v3167_v63, %v3168_v37 }
 0x223   : > { %v3301_v59 = vrot.slane %v13491_v22, 1  ;;  %v13518_v54 = vrot.slane %v11027_v38, 7  ;;  %v3211_v37 = vsel %vm419_vm1, %v16392_v1, %v3167_v63 }
 0x224   : > { %10529 = vmatmul.mubr.bf16.gmra.mxu0 %v3349_v58  ;;  %v3310_v34 = vsel %vm532_vm2, %v13500_v42, %v16396_v56  ;;  %v13516_v15 = vsel %vm532_vm2, %v3297_v47, %v13500_v42  ;;  %v3300_v58 = vrot.slane %v13502_v3, 1  ;;  %v3233_v61 = vpack.c.bf16 %v13506_v43, %v3211_v37  ;;  %v13544_v3 = vld [vmem:[#allocation2 + $0x168] sm:$0xff] }
 0x225   : > { %10532 = vmatprep.mubr.bf16.mxu0 %v3350_v0  ;;  %v13524_v0 = vrot.slane %v11027_v38, 1  ;;  %v13529_v56 = vpack.c.bf16 %v13313_v41, %v13311_v28  ;;  %v3171_v47 = vrot.slane %v13313_v41, 7  ;;  %v4027_v22 = vsel %vm419_vm1, %v13518_v54, %v12950_v13 }
 0x226   : > { %v3351_v24 = vpack.c.bf16 %v3310_v34, %v13516_v15  ;;  %v3309_v37 = vsel %vm532_vm2, %v3300_v58, %v3301_v59  ;;  %v4028_v41 = vpack.c.bf16 %v13011_v19, %v4027_v22  ;;  %v3170_v13 = vrot.slane %v13311_v28, 7 }
 0x227   : > { %v13532_v9 = vld [vmem:[#allocation2 + $0x170] sm:$0xff]  ;;  %v3308_v38 = vsel %vm532_vm2, %v3301_v59, %v13524_v0  ;;  %v3303_v34 = vrot.slane %v13544_v3, 1  ;;  %v13557_v59 = vsel %vm419_vm1, %v13518_v54, %v12933_v35  ;;  %v13573_v35 = vsel %vm419_vm1, %v13518_v54, %v13181_v60 }
 0x228   : > { %v3304_v17 = vrot.slane %v13532_v9, 1  ;;  %v13550_v14 = vpack.c.bf16 %v3308_v38, %v3309_v37  ;;  %v3208_v19 = vsel %vm419_vm1, %v3170_v13, %v3171_v47  ;;  %v13584_v47 = vsel %vm419_vm1, %v13518_v54, %v13286_v27 }
 0x229   : > { %3635 = vmatmul.mubr.bf16.gmra.mxu1 %v3233_v61  ;;  %v13594_v37 = vpack.c.bf16 %v13366_v39, %v13364_v26  ;;  %v13602_v27 = vsel %vm419_vm1, %v13518_v54, %v13344_v23  ;;  %v3177_v23 = vrot.slane %v13398_v44, 7  ;;  %v3179_v38 = vrot.slane %v13415_v7, 7 }
 0x22a   : > { %3642 = vmatprep.mubr.bf16.mxu1 %v13529_v56  ;;  %v3306_v28 = vsel %vm532_vm2, %v3304_v17, %v13524_v0  ;;  %v3307_v22 = vsel %vm532_vm2, %v3303_v34, %v3304_v17  ;;  %v3173_v34 = vrot.slane %v13364_v26, 7  ;;  %v3186_v61 = vrot.slane %v13471_v62, 7 }
 0x22b   : > { %v13590_v60 = vpack.c.bf16 %v3306_v28, %v3307_v22  ;;  %v13626_v22 = vsel %vm419_vm1, %v13518_v54, %v3167_v63 }
 0x22c   : > { %10533 = vmatmul.mubr.bf16.gmra.mxu0 %v3351_v24  ;;  %v3209_v24 = vsel %vm419_vm1, %v13518_v54, %v3170_v13  ;;  %v3174_v13 = vrot.slane %v13366_v39, 7  ;;  %v13612_v39 = vsel %vm419_vm1, %v13518_v54, %v13422_v12  ;;  %v3207_v12 = vsel %vm419_vm1, %v16392_v1, %v3173_v34 }
 0x22d   : > { %10536 = vmatprep.mubr.bf16.mxu0 %v13550_v14  ;;  %v13586_v17 = vpack.c.bf16 %v3208_v19, %v3209_v24  ;;  %16424 = vst [vmem:[#allocation20_spill] sm:$0xff] %v13590_v60  ;;  %v3176_v24 = vrot.slane %v13380_v20, 7  ;;  %v13646_v58 = vsel %vm419_vm1, %v13518_v54, %v3173_v34 }
 0x22e   : > { %v13617_v28 = vsel %vm419_vm1, %v3173_v34, %v3174_v13  ;;  %v3180_v13 = vrot.slane %v13426_v55, 7 }
 0x22f   : > { %v3235_v26 = vpack.c.bf16 %v13617_v28, %v3207_v12  ;;  %v3204_v63 = vsel %vm419_vm1, %v3176_v24, %v3177_v23  ;;  %v10924_v23 = vld [vmem:[%s16297_s1 + $0x230] sm:$0xff]   ;;  %v13677_v12 = vsel %vm532_vm2, %v13251_v8, %v13524_v0 }
 0x230   : > { %v13663_v34 = vsel %vm419_vm1, %v3179_v38, %v3180_v13 }
 0x231   : > { %3643 = vmatmul.mubr.bf16.gmra.mxu1 %v13586_v17 }
 0x232   : > { %3650 = vmatprep.mubr.bf16.mxu1 %v13594_v37 }
 0x234   : > { %10537 = vmatmul.mubr.bf16.gmra.mxu0 %v13590_v60  ;;  %v16426_v60 = vld [vmem:[#allocation11_spill] sm:$0xff] }
 0x235   : > { %4380 = vmatprep.mubr.bf16.mxu0 %v12980_v46  ;;  %v13638_v46 = vpack.c.bf16 %v13398_v44, %v13380_v20  ;;  %v13655_v20 = vsel %vm532_vm2, %v13138_v29, %v13524_v0  ;;  %v3205_v44 = vsel %vm419_vm1, %v13518_v54, %v3176_v24  ;;  %v13671_v29 = vrot.slane %v13469_v11, 7 }
 0x236   : > { %v13683_v24 = vsel %vm532_vm2, %v13299_v49, %v13524_v0  ;;  %v13685_v13 = vpack.c.bf16 %v3204_v63, %v3205_v44  ;;  %v13756_v44 = vsel %vm532_vm2, %v13461_v16, %v13524_v0  ;;  %v10928_v16 = vld [vmem:[%s16297_s1 + $0x220] sm:$0xff]   ;;  %v10931_v63 = vld [vmem:[%s16297_s1 + $0x218] sm:$0xff]  }
 0x237   : > { %v13700_v49 = vsel %vm419_vm1, %v13671_v29, %v3186_v61  ;;  %v13724_v61 = vsel %vm532_vm2, %v13388_v2, %v13524_v0  ;;  %v13746_v2 = vsel %vm419_vm1, %v13518_v54, %v13671_v29 }
 0x239   : > { %3651 = vmatmul.mubr.bf16.gmra.mxu1 %v3235_v26  ;;  %v13689_v26 = vpack.c.bf16 %v13426_v55, %v13415_v7  ;;  %v13705_v7 = vsel %vm419_vm1, %v13518_v54, %v3179_v38  ;;  %v13711_v55 = vsel %vm532_vm2, %v13338_v31, %v13524_v0  ;;  %v13730_v31 = vsel %vm532_vm2, %v13419_v6, %v13524_v0 }
 0x23a   : > { %3658 = vmatprep.mubr.bf16.mxu1 %v13638_v46 }
 0x23c   : > { %4381 = vmatmul.mubr.bf16.vlgmr.msra.gmra.mxu0 %v4028_v41  ;;  %v9548_v41 = vpop.f32.mrf.mxu1 }
 0x23d   : > { %4388 = vmatprep.mubr.bf16.mxu0 %v13024_v45  ;;  %10589 = vmatpush3.bf16.msra.mxu0 %v13291_v52  ;;  %v10926_v45 = vld [vmem:[%s16297_s1 + $0x228] sm:$0xff]   ;;  %v13740_v52 = vsel %vm532_vm2, %v13457_v21, %v13524_v0  ;;  %v13762_v21 = vsel %vm532_vm2, %v13500_v42, %v13524_v0  ;;  %v16425_v42 = vpack.c.bf16 %v13083_v50, %v13557_v59  ;;  %v16427_v50 = vld [vmem:[#allocation18_spill] sm:$0xff] }
 0x23e   : > { %10590 = vmatprep.subr.bf16.mxu0 %v10924_v23  ;;  %v9549_v6 = vpop.f32.mrf.mxu1  ;;  %v13788_v59 = vpack.c.bf16 %v16427_v50, %v16426_v60 }
 0x23f   : > { %v13784_v19 = vadd.f32 %v9549_v6, %v9548_v41  ;;  %v16428_v41 = vpack.c.bf16 %v13215_v57, %v13573_v35  ;;  %v13812_v57 = vpack.c.bf16 %v13471_v62, %v13469_v11  ;;  %v10946_v35 = vld [vmem:[%s16297_s1 + $0x200] sm:$0xff]   ;;  %v3199_v11 = vsel %vm419_vm1, %v16392_v1, %v13671_v29 }
 0x240   : > { %v3239_v62 = vpack.c.bf16 %v13700_v49, %v3199_v11  ;;  %v16434_v29 = vpack.c.bf16 %v13378_v32, %v13602_v27  ;;  %v13856_v32 = vpack.c.bf16 %v13532_v9, %v13544_v3  ;;  %v3192_v27 = vrot.slane %v13532_v9, 7 }
 0x241   : > { %3659 = vmatmul.mubr.bf16.gmra.mxu1 %v13685_v13  ;;  %10591 = vmatpush3.bf16.msra.mxu0 %v10924_v23  ;;  %v3203_v23 = vsel %vm419_vm1, %v16392_v1, %v3179_v38  ;;  %v3182_v38 = vrot.slane %v16426_v60, 7  ;;  %v10941_v60 = vld [vmem:[%s16297_s1 + $0x208] sm:$0xff]  }
 0x242   : > { %3666 = vmatprep.mubr.bf16.mxu1 %v13689_v26  ;;  %10592 = vmatprep.subr.bf16.mxu0 %v10926_v45  ;;  %v3237_v8 = vpack.c.bf16 %v13663_v34, %v3203_v23  ;;  %v16431_v23 = vld [vmem:[#allocation15_spill] sm:$0xff] }
 0x244   : > { %4389 = vmatmul.mubr.bf16.gmra.mxu0 %v16425_v42  ;;  %v16429_v42 = vld [vmem:[#allocation8_spill] sm:$0xff] }
 0x245   : > { %4396 = vmatprep.mubr.bf16.mxu0 %v13116_v53  ;;  %10593 = vmatpush3.bf16.msra.mxu0 %v10926_v45  ;;  %v3183_v53 = vrot.slane %v16427_v50, 7  ;;  %v10936_v45 = vld [vmem:[%s16297_s1 + $0x210] sm:$0xff]   ;;  %v16432_v50 = vld [vmem:[#allocation17_spill] sm:$0xff] }
 0x246   : > { %10594 = vmatprep.subr.bf16.mxu0 %v10928_v16 }
 0x247   : > { %v3200_v6 = vsel %vm419_vm1, %v3182_v38, %v3183_v53  ;;  %v16433_v53 = vld [vmem:[#allocation19_spill] sm:$0xff] }
 0x249   : > { %3667 = vmatmul.mubr.bf16.gmra.mxu1 %v3237_v8  ;;  %10595 = vmatpush3.bf16.msra.mxu0 %v10928_v16  ;;  %v3201_v8 = vsel %vm419_vm1, %v13518_v54, %v3182_v38  ;;  %v13830_v38 = vpack.c.bf16 %v16433_v53, %v16432_v50 }
 0x24a   : > { %3674 = vmatprep.mubr.bf16.mxu1 %v13788_v59  ;;  %10596 = vmatprep.subr.bf16.mxu0 %v10931_v63  ;;  %v13808_v16 = vpack.c.bf16 %v3200_v6, %v3201_v8 }
 0x24c   : > { %4397 = vmatmul.mubr.bf16.gmra.mxu0 %v16428_v41  ;;  %v13833_v41 = vld [vmem:[#allocation2 + $0x188] sm:$0xff] }
 0x24d   : > { %4404 = vmatprep.mubr.bf16.mxu0 %v16429_v42  ;;  %10597 = vmatpush3.bf16.msra.mxu0 %v10931_v63  ;;  %v16430_v63 = vpack.c.bf16 %v13319_v25, %v13584_v47  ;;  %v3188_v25 = vrot.slane %v16432_v50, 7  ;;  %v13837_v47 = vld [vmem:[#allocation2 + $0x180] sm:$0xff]  ;;  %v4106_v1 = vrot.slane %v13833_v41, 1  ;;  %v16435_v42 = vld [vmem:[#allocation13_spill] sm:$0xff]  ;;  %v3191_v50 = vrot.slane %v13544_v3, 7 }
 0x24e   : > { %10598 = vmatprep.subr.bf16.mxu0 %v10936_v45  ;;  %v4105_v8 = vrot.slane %v13837_v47, 1 }
 0x24f   : > { %v3194_v9 = vsel %vm419_vm1, %v3191_v50, %v3192_v27 }
 0x251   : > { %3675 = vmatmul.mubr.bf16.gmra.mxu1 %v13808_v16  ;;  %10599 = vmatpush3.bf16.msra.mxu0 %v10936_v45  ;;  %v3189_v45 = vrot.slane %v16433_v53, 7 }
 0x252   : > { %3682 = vmatprep.mubr.bf16.mxu1 %v13812_v57  ;;  %10600 = vmatprep.subr.bf16.mxu0 %v10941_v60 }
 0x253   : > { %v3196_v6 = vsel %vm419_vm1, %v3188_v25, %v3189_v45  ;;  %v11029_v45 = vld [vmem:[#allocation2 + $0x18] sm:$0xff] }
 0x254   : > { %4405 = vmatmul.mubr.bf16.gmra.mxu0 %v16430_v63  ;;  %v4109_v63 = vsel %vm532_vm2, %v4105_v8, %v4106_v1  ;;  %v3195_v8 = vsel %vm419_vm1, %v13518_v54, %v3191_v50 }
 0x255   : > { %4412 = vmatprep.mubr.bf16.mxu0 %v16431_v23  ;;  %10601 = vmatpush3.bf16.msra.mxu0 %v10941_v60  ;;  %v3197_v60 = vsel %vm419_vm1, %v13518_v54, %v3188_v25  ;;  %v11028_v23 = vld [vmem:[#allocation2 + $0x20] sm:$0xff]  ;;  %v4060_v25 = vrot.slane %v11029_v45, 1 }
 0x256   : > { %10602 = vmatprep.subr.bf16.mxu0 %v10946_v35  ;;  %v4061_v11 = vrot.slane %v11028_v23, 1  ;;  %v16440_v45 = vld [vmem:[#allocation6_spill] sm:$0xff] }
 0x258   : > { %v4139_v3 = vsel %vm532_vm2, %v4060_v25, %v4061_v11  ;;  %v4134_v25 = vsel %vm532_vm2, %v16440_v45, %v13524_v0  ;;  %v4773_v45 = vld [vmem:[#allocation2 + $0x68] sm:$0xff] }
 0x259   : > { %3683 = vmatmul.mubr.bf16.gmra.mxu1 %v3239_v62  ;;  %10603 = vmatpush3.bf16.msra.mxu0 %v10946_v35  ;;  %v13850_v35 = vpack.c.bf16 %v3196_v6, %v3197_v60  ;;  %v4976_v62 = vsel %vm532_vm2, %v4106_v1, %v13524_v0  ;;  %v3994_v6 = vrot.slane %v13833_v41, 7  ;;  %v4138_v1 = vsel %vm532_vm2, %v4061_v11, %v13524_v0 }
 0x25a   : > { %3690 = vmatprep.mubr.bf16.mxu1 %v13830_v38  ;;  %v13865_v53 = vpack.c.bf16 %v4976_v62, %v4109_v63  ;;  %v4140_v60 = vpack.c.bf16 %v4138_v1, %v4139_v3  ;;  %v16438_v11 = vpack.c.bf16 %v13506_v43, %v13626_v22  ;;  %v16439_v62 = vld [vmem:[#allocation16_spill] sm:$0xff]  ;;  %v16442_v22 = vld [vmem:[#allocation5_spill] sm:$0xff]  ;;  %v10934_v1 = vld [vmem:[%s16297_s1 + $0x1e8] sm:$0xff]  }
 0x25b   : > { %v4136_v50 = vsel %vm532_vm2, %v16439_v62, %v13524_v0  ;;  %v10932_v43 = vld [vmem:[%s16297_s1 + $0x1f0] sm:$0xff]   ;;  %v16446_v62 = vpack.c.bf16 %v13617_v28, %v13646_v58  ;;  %v16448_v58 = vpack.c.bf16 %v13683_v24, %v13328_v48  ;;  %v10947_v48 = vld [vmem:[%s16297_s1 + $0x1c0] sm:$0xff]   ;;  %v16450_v24 = vpack.c.bf16 %v13724_v61, %v13408_v10 }
 0x25c   : > { %4413 = vmatmul.mubr.bf16.gmra.mxu0 %v16434_v29  ;;  %v16436_v29 = vpack.c.bf16 %v13446_v18, %v13612_v39  ;;  %v3993_v18 = vrot.slane %v13837_v47, 7  ;;  %v13883_v39 = vpack.c.bf16 %v3194_v9, %v3195_v8  ;;  %v16441_v9 = vld [vmem:[#allocation9_spill] sm:$0xff]  ;;  %v16443_v3 = vld [vmem:[#allocation12_spill] sm:$0xff]  ;;  %v16453_v10 = vpack.c.bf16 %v13740_v52, %v13480_v51 }
 0x25d   : > { %4420 = vmatprep.mubr.bf16.mxu0 %v16435_v42  ;;  %v16437_v42 = vld [vmem:[#allocation14_spill] sm:$0xff]  ;;  %v4130_v8 = vsel %vm532_vm2, %v16443_v3, %v13524_v0  ;;  %v10943_v28 = vld [vmem:[%s16297_s1 + $0x190] sm:$0xff]  }
 0x25e   : > { %v3996_v63 = vsel %vm419_vm1, %v3993_v18, %v3994_v6  ;;  %v4865_v27 = vsel %vm419_vm1, %v13518_v54, %v3993_v18  ;;  %v4141_v6 = vpack.c.bf16 %v4136_v50, %v16441_v9  ;;  %v10935_v18 = vld [vmem:[%s16297_s1 + $0x1a8] sm:$0xff]   ;;  %v16447_v50 = vpack.c.bf16 %v13677_v12, %v13268_v30  ;;  %v16457_v51 = vld [vmem:[#allocation20_spill] sm:$0xff] }
 0x25f   : > { %v13891_v23 = vpack.c.bf16 %v3996_v63, %v4865_v27  ;;  %v16444_v63 = vld [vmem:[#allocation7_spill] sm:$0xff]  ;;  %v16449_v12 = vpack.c.bf16 %v13711_v55, %v13356_v36  ;;  %v16452_v36 = vpack.c.bf16 %v13730_v31, %v13441_v4  ;;  %v16454_v55 = vpack.c.bf16 %v13756_v44, %v13489_v5  ;;  %v4767_v5 = vld [vmem:[#allocation2 + $0x38] sm:$0xff]  ;;  %v9551_v31 = vpop.f32.mrf.mxu1 }
 0x260   : > { %v4144_v27 = vpack.c.bf16 %v4130_v8, %v16444_v63  ;;  %v10945_v30 = vld [vmem:[%s16297_s1 + $0x188] sm:$0xff]   ;;  %v16456_v4 = vpack.c.bf16 %v13700_v49, %v13746_v2  ;;  %v4815_v52 = vrot.slane %v4767_v5, 7  ;;  %v14009_v49 = vpack.c.bf16 %v13833_v41, %v13837_v47  ;;  %v4770_v2 = vld [vmem:[#allocation2 + $0x50] sm:$0xff] }
 0x261   : > { %3691 = vmatmul.mubr.bf16.gmra.mxu1 %v13850_v35  ;;  %v4927_v44 = vrot.slane %v4767_v5, 1  ;;  %v4818_v41 = vrot.slane %v4770_v2, 7 }
 0x262   : > { %3698 = vmatprep.mubr.bf16.mxu1 %v13856_v32 }
 0x264   : > { %4421 = vmatmul.mubr.bf16.gmra.mxu0 %v16436_v29  ;;  %v10930_v29 = vld [vmem:[%s16297_s1 + $0x1b8] sm:$0xff]  }
 0x265   : > { %4428 = vmatprep.mubr.bf16.mxu0 %v16437_v42  ;;  %v4142_v42 = vpack.c.bf16 %v4134_v25, %v16442_v22 }
 0x269   : > { %3699 = vmatmul.mubr.bf16.gmra.mxu1 %v13883_v39 }
 0x26a   : > { %10556 = vmatprep.mubr.bf16.mxu1 %v4140_v60  ;;  %v10937_v60 = vld [vmem:[%s16297_s1 + $0x1e0] sm:$0xff]  }
 0x26c   : > { %4429 = vmatmul.mubr.bf16.gmra.mxu0 %v16438_v11  ;;  %v10939_v11 = vld [vmem:[%s16297_s1 + $0x1d8] sm:$0xff]  }
 0x26d   : > { %4436 = vmatprep.mubr.bf16.mxu0 %v13529_v56  ;;  %v10933_v56 = vld [vmem:[%s16297_s1 + $0x1b0] sm:$0xff]  }
 0x271   : > { %10557 = vmatmul.mubr.bf16.vlgmr.msra.gmra.mxu1 %v4141_v6 }
 0x272   : > { %10560 = vmatprep.mubr.bf16.mxu1 %v4142_v42  ;;  %9805 = vmatpush3.bf16.msra.mxu1 %v10930_v29  ;;  %v4930_v29 = vrot.slane %v4770_v2, 1 }
 0x273   : > { %9806 = vmatprep.subr.bf16.mxu1 %v10932_v43  ;;  %v4772_v43 = vld [vmem:[#allocation2 + $0x60] sm:$0xff] }
 0x274   : > { %4437 = vmatmul.mubr.bf16.gmra.mxu0 %v13586_v17  ;;  %v16445_v17 = vpack.c.bf16 %v13655_v20, %v13153_v33  ;;  %v10940_v33 = vld [vmem:[%s16297_s1 + $0x198] sm:$0xff]   ;;  %v10942_v20 = vld [vmem:[%s16297_s1 + $0x1d0] sm:$0xff]   ;;  %v5002_v63 = vsel %vm532_vm2, %v4930_v29, %v13524_v0 }
 0x275   : > { %4444 = vmatprep.mubr.bf16.mxu0 %v13594_v37  ;;  %v10938_v37 = vld [vmem:[%s16297_s1 + $0x1a0] sm:$0xff]  }
 0x276   : > { %9807 = vmatpush3.bf16.msra.mxu1 %v10933_v56  ;;  %v4933_v56 = vrot.slane %v4773_v45, 1 }
 0x277   : > { %9808 = vmatprep.subr.bf16.mxu1 %v10934_v1 }
 0x279   : > { %10561 = vmatmul.mubr.bf16.gmra.mxu1 %v16445_v17  ;;  %v4932_v17 = vrot.slane %v4772_v43, 1 }
 0x27a   : > { %10564 = vmatprep.mubr.bf16.mxu1 %v4144_v27  ;;  %9809 = vmatpush3.bf16.msra.mxu1 %v10935_v18 }
 0x27b   : > { %9810 = vmatprep.subr.bf16.mxu1 %v10937_v60 }
 0x27c   : > { %4445 = vmatmul.mubr.bf16.gmra.mxu0 %v16446_v62  ;;  %v4821_v62 = vrot.slane %v4773_v45, 7 }
 0x27d   : > { %4452 = vmatprep.mubr.bf16.mxu0 %v13638_v46  ;;  %v10944_v46 = vld [vmem:[%s16297_s1 + $0x1c8] sm:$0xff]  }
 0x27e   : > { %9811 = vmatpush3.bf16.msra.mxu1 %v10938_v37 }
 0x27f   : > { %9812 = vmatprep.subr.bf16.mxu1 %v10939_v11 }
 0x281   : > { %10565 = vmatmul.mubr.bf16.gmra.mxu1 %v16447_v50 }
 0x282   : > { %10568 = vmatprep.mubr.bf16.mxu1 %v16448_v58  ;;  %9813 = vmatpush3.bf16.msra.mxu1 %v10940_v33  ;;  %v4912_v33 = vpack.c.bf16 %v4773_v45, %v4772_v43  ;;  %v5000_v58 = vsel %vm532_vm2, %v4933_v56, %v13524_v0 }
 0x283   : > { %9814 = vmatprep.subr.bf16.mxu1 %v10942_v20 }
 0x284   : > { %4453 = vmatmul.mubr.bf16.gmra.mxu0 %v13685_v13  ;;  %v16451_v13 = vpack.c.bf16 %v13663_v34, %v13705_v7  ;;  %v16455_v34 = vpack.c.bf16 %v13762_v21, %v13516_v15  ;;  %v4766_v7 = vld [vmem:[#allocation2 + $0x30] sm:$0xff] }
 0x285   : > { %4460 = vmatprep.mubr.bf16.mxu0 %v13689_v26  ;;  %v10948_v26 = vld [vmem:[%s16297_s1 + $0x180] sm:$0xff]   ;;  %v4910_v61 = vpack.c.bf16 %v4767_v5, %v4766_v7  ;;  %v4814_v15 = vrot.slane %v4766_v7, 7 }
 0x286   : > { %9815 = vmatpush3.bf16.msra.mxu1 %v10943_v28  ;;  %v5001_v28 = vsel %vm532_vm2, %v4932_v17, %v4933_v56 }
 0x287   : > { %9816 = vmatprep.subr.bf16.mxu1 %v10944_v46  ;;  %v4893_v21 = vsel %vm419_vm1, %v13518_v54, %v4814_v15 }
 0x289   : > { %10569 = vmatmul.mubr.bf16.gmra.mxu1 %v16449_v12 }
 0x28a   : > { %10572 = vmatprep.mubr.bf16.mxu1 %v16450_v24  ;;  %9817 = vmatpush3.bf16.msra.mxu1 %v10945_v30  ;;  %v14046_v24 = vld [vmem:[#allocation2 + $0x98] sm:$0xff] }
 0x28b   : > { %9818 = vmatprep.subr.bf16.mxu1 %v10947_v48  ;;  %v4776_v48 = vld [vmem:[#allocation2 + $0x80] sm:$0xff] }
 0x28c   : > { %4461 = vmatmul.mubr.bf16.gmra.mxu0 %v16451_v13  ;;  %v4820_v13 = vrot.slane %v4772_v43, 7 }
 0x28d   : > { %4468 = vmatprep.mubr.bf16.mxu0 %v13788_v59  ;;  %v4926_v59 = vrot.slane %v4766_v7, 1 }
 0x28e   : > { %9819 = vmatpush3.bf16.msra.mxu1 %v10948_v26  ;;  %v4888_v7 = vsel %vm419_vm1, %v4820_v13, %v4821_v62 }
 0x291   : > { %10573 = vmatmul.mubr.bf16.gmra.mxu1 %v16452_v36 }
 0x292   : > { %10576 = vmatprep.mubr.bf16.mxu1 %v16453_v10  ;;  %v4775_v10 = vld [vmem:[#allocation2 + $0x78] sm:$0xff] }
 0x293   : > { %v4823_v43 = vrot.slane %v4775_v10, 7 }
 0x294   : > { %4469 = vmatmul.mubr.bf16.gmra.mxu0 %v13808_v16 }
 0x295   : > { %4476 = vmatprep.mubr.bf16.mxu0 %v13812_v57  ;;  %v4769_v57 = vld [vmem:[#allocation2 + $0x48] sm:$0xff] }
 0x296   : > { %v4911_v47 = vpack.c.bf16 %v4770_v2, %v4769_v57  ;;  %v4817_v25 = vrot.slane %v4769_v57, 7  ;;  %v4929_v3 = vrot.slane %v4769_v57, 1 }
 0x298   : > { %v4890_v42 = vsel %vm419_vm1, %v4817_v25, %v4818_v41  ;;  %v4891_v27 = vsel %vm419_vm1, %v13518_v54, %v4817_v25  ;;  %v5003_v11 = vsel %vm532_vm2, %v4929_v3, %v4930_v29  ;;  %v14071_v25 = vld [vmem:[#allocation2 + $0xc8] sm:$0xff] }
 0x299   : > { %10577 = vmatmul.mubr.bf16.gmra.mxu1 %v16454_v55  ;;  %v5007_v26 = vpack.c.bf16 %v5002_v63, %v5003_v11  ;;  %v5008_v55 = vpack.c.bf16 %v5000_v58, %v5001_v28 }
 0x29a   : > { %10580 = vmatprep.mubr.bf16.mxu1 %v16455_v34 }
 0x29c   : > { %4477 = vmatmul.mubr.bf16.gmra.mxu0 %v16456_v4  ;;  %v4936_v4 = vrot.slane %v4776_v48, 1 }
 0x29d   : > { %4484 = vmatprep.mubr.bf16.mxu0 %v13830_v38  ;;  %v9552_v38 = vpop.f32.mrf.mxu1 }
 0x29e   : > { %v9553_v8 = vadd.f32 %v9552_v38, %v9551_v31  ;;  %v4889_v31 = vsel %vm419_vm1, %v13518_v54, %v4820_v13  ;;  %v4913_v38 = vpack.c.bf16 %v4776_v48, %v4775_v10 }
 0x2a1   : > { %10581 = vmatmul.mubr.bf16.gmra.mxu1 %v13550_v14  ;;  %v4892_v14 = vsel %vm419_vm1, %v4814_v15, %v4815_v52  ;;  %v4939_v52 = vrot.slane %v14046_v24, 1 }
 0x2a2   : > { %10584 = vmatprep.mubr.bf16.mxu1 %v16457_v51  ;;  %v4894_v16 = vpack.c.bf16 %v4892_v14, %v4893_v21  ;;  %v14048_v51 = vld [vmem:[#allocation2 + $0x90] sm:$0xff]  ;;  %v4896_v21 = vpack.c.bf16 %v4888_v7, %v4889_v31 }
 0x2a3   : > { %v4938_v14 = vrot.slane %v14048_v51, 1  ;;  %v4996_v41 = vsel %vm532_vm2, %v4939_v52, %v13524_v0 }
 0x2a4   : > { %4485 = vmatmul.mubr.bf16.gmra.mxu0 %v13850_v35  ;;  %v5004_v35 = vsel %vm532_vm2, %v4927_v44, %v13524_v0 }
 0x2a5   : > { %4492 = vmatprep.mubr.bf16.mxu0 %v13856_v32  ;;  %v5005_v32 = vsel %vm532_vm2, %v4926_v59, %v4927_v44  ;;  %v4998_v59 = vsel %vm532_vm2, %v4936_v4, %v13524_v0 }
 0x2a6   : > { %v5006_v9 = vpack.c.bf16 %v5004_v35, %v5005_v32  ;;  %v4824_v35 = vrot.slane %v4776_v48, 7  ;;  %v14069_v32 = vld [vmem:[#allocation2 + $0xb0] sm:$0xff]  ;;  %v4827_v48 = vrot.slane %v14046_v24, 7 }
 0x2a7   : > { %v4942_v3 = vrot.slane %v14069_v32, 1 }
 0x2a9   : > { %10585 = vmatmul.mubr.bf16.gmra.mxu1 %v13865_v53 }
 0x2aa   : > { %5246 = vmatprep.mubr.bf16.mxu1 %v4910_v61  ;;  %v4935_v61 = vrot.slane %v4775_v10, 1 }
 0x2ac   : > { %4493 = vmatmul.mubr.bf16.gmra.mxu0 %v13883_v39 }
 0x2ad   : > { %4500 = vmatprep.mubr.bf16.mxu0 %v14009_v49 }
 0x2b0   : > { %v10510_v39 = vpop.f32.mrf.mxu0 }
 0x2b1   : > { %5247 = vmatmul.mubr.bf16.vlgmr.msra.gmra.mxu1 %v4894_v16  ;;  %v4999_v16 = vsel %vm532_vm2, %v4935_v61, %v4936_v4  ;;  %v14110_v4 = vld [vmem:[#allocation2 + $0xd8] sm:$0xff] }
 0x2b2   : > { %5254 = vmatprep.mubr.bf16.mxu1 %v4911_v47  ;;  %v9554_v6 = vpop.f32.mrf.mxu1  ;;  %v3741_v22 = vpop.f32.mrf.mxu0  ;;  %v4997_v47 = vsel %vm532_vm2, %v4938_v14, %v4939_v52  ;;  %v5009_v29 = vpack.c.bf16 %v4998_v59, %v4999_v16  ;;  %v4947_v59 = vrot.slane %v14110_v4, 1 }
 0x2b3   : > { %v14027_v1 = vadd.f32 %v13784_v19, %v3741_v22  ;;  %v4895_v19 = vpack.c.bf16 %v4890_v42, %v4891_v27  ;;  %v14075_v22 = vld [vmem:[#allocation2 + $0xa8] sm:$0xff]  ;;  %v5010_v42 = vpack.c.bf16 %v4996_v41, %v4997_v47 }
 0x2b4   : > { %4501 = vmatmul.mubr.bf16.gmra.mxu0 %v13891_v23  ;;  %v9555_v18 = vpop.f32.mrf.mxu1  ;;  %v10511_v60 = vpop.f32.mrf.mxu0  ;;  %v4941_v27 = vrot.slane %v14075_v22, 1 }
 0x2b5   : > { %10604 = vmatprep.mubr.bf16.mxu0 %v5006_v9  ;;  %v9556_v37 = vadd.f32 %v9555_v18, %v9554_v6  ;;  %v4886_v18 = vsel %vm419_vm1, %v4823_v43, %v4824_v35 }
 0x2b6   : > { %v9557_v20 = vpop.f32.mrf.mxu1  ;;  %v3744_v50 = vpop.f32.mrf.mxu0 }
 0x2b7   : > { %v14042_v46 = vadd.f32 %v10510_v39, %v9556_v37  ;;  %v14044_v30 = vadd.f32 %v9553_v8, %v3744_v50  ;;  %v14078_v8 = vld [vmem:[#allocation2 + $0xc0] sm:$0xff]  ;;  %v4887_v37 = vsel %vm419_vm1, %v13518_v54, %v4823_v43  ;;  %v4914_v50 = vpack.c.bf16 %v14046_v24, %v14048_v51 }
 0x2b8   : > { %v9558_v12 = vpop.f32.mrf.mxu1  ;;  %v4944_v11 = vrot.slane %v14078_v8, 1  ;;  %v4897_v62 = vpack.c.bf16 %v4886_v18, %v4887_v37  ;;  %v4830_v43 = vrot.slane %v14069_v32, 7 }
 0x2b9   : > { %5255 = vmatmul.mubr.bf16.gmra.mxu1 %v4895_v19  ;;  %v9559_v36 = vadd.f32 %v9558_v12, %v9557_v20  ;;  %v4995_v20 = vsel %vm532_vm2, %v4941_v27, %v4942_v3  ;;  %v14103_v12 = vld [vmem:[#allocation2 + $0xe0] sm:$0xff]  ;;  %v14149_v27 = vld [vmem:[#allocation2 + $0x108] sm:$0xff] }
 0x2ba   : > { %5262 = vmatprep.mubr.bf16.mxu1 %v4912_v33  ;;  %v4994_v33 = vsel %vm532_vm2, %v4942_v3, %v13524_v0  ;;  %v4948_v24 = vrot.slane %v14103_v12, 1 }
 0x2bb   : > { %v9560_v34 = vpop.f32.mrf.mxu1  ;;  %v14050_v5 = vadd.f32 %v10511_v60, %v9559_v36  ;;  %v4945_v60 = vrot.slane %v14071_v25, 1  ;;  %v14107_v36 = vld [vmem:[#allocation2 + $0xf8] sm:$0xff]  ;;  %v5011_v10 = vpack.c.bf16 %v4994_v33, %v4995_v20 }
 0x2bc   : > { %10605 = vmatmul.mubr.bf16.vlgmr.msra.gmra.mxu0 %v5007_v26  ;;  %v4990_v47 = vsel %vm532_vm2, %v4948_v24, %v13524_v0  ;;  %v4991_v35 = vsel %vm532_vm2, %v4947_v59, %v4948_v24 }
 0x2bd   : > { %10608 = vmatprep.mubr.bf16.mxu0 %v5008_v55  ;;  %v9561_v15 = vpop.f32.mrf.mxu1  ;;  %v4992_v58 = vsel %vm532_vm2, %v4945_v60, %v13524_v0  ;;  %v4993_v28 = vsel %vm532_vm2, %v4944_v11, %v4945_v60  ;;  %v14146_v60 = vld [vmem:[#allocation2 + $0x128] sm:$0xff] }
 0x2be   : > { %v9562_v44 = vadd.f32 %v9561_v15, %v9560_v34  ;;  %v4826_v34 = vrot.slane %v14048_v51, 7  ;;  %v5012_v7 = vpack.c.bf16 %v4992_v58, %v4993_v28  ;;  %v14113_v15 = vld [vmem:[#allocation2 + $0xf0] sm:$0xff]  ;;  %v10950_v58 = vld [vmem:[%s16297_s1 + $0x38] sm:$0xff]  }
 0x2bf   : > { %v10514_v2 = vpop.f32.mrf.mxu0  ;;  %v9563_v57 = vpop.f32.mrf.mxu1 }
 0x2c0   : > { %v4884_v14 = vsel %vm419_vm1, %v4826_v34, %v4827_v48 }
 0x2c1   : > { %5263 = vmatmul.mubr.bf16.gmra.mxu1 %v4896_v21  ;;  %v3757_v39 = vpop.f32.mrf.mxu0  ;;  %v9564_v45 = vpop.f32.mrf.mxu1 }
 0x2c2   : > { %5270 = vmatprep.mubr.bf16.mxu1 %v4913_v38  ;;  %v14073_v9 = vadd.f32 %v9562_v44, %v3757_v39  ;;  %v9565_v6 = vadd.f32 %v9564_v45, %v9563_v57  ;;  %v4951_v44 = vrot.slane %v14107_v36, 1  ;;  %v4885_v57 = vsel %vm419_vm1, %v13518_v54, %v4826_v34 }
 0x2c3   : > { %v10515_v56 = vpop.f32.mrf.mxu0  ;;  %v4950_v38 = vrot.slane %v14113_v15, 1  ;;  %v4898_v41 = vpack.c.bf16 %v4884_v14, %v4885_v57  ;;  %v4915_v39 = vpack.c.bf16 %v14069_v32, %v14075_v22 }
 0x2c4   : > { %10609 = vmatmul.mubr.bf16.gmra.mxu0 %v5009_v29  ;;  %v4988_v29 = vsel %vm532_vm2, %v4951_v44, %v13524_v0 }
 0x2c5   : > { %10612 = vmatprep.mubr.bf16.mxu0 %v5010_v42  ;;  %v3760_v63 = vpop.f32.mrf.mxu0  ;;  %v14142_v42 = vld [vmem:[#allocation2 + $0x110] sm:$0xff] }
 0x2c6   : > { %v14084_v17 = vadd.f32 %v9565_v6, %v3760_v63  ;;  %v9566_v19 = vpop.f32.mrf.mxu1  ;;  %v4989_v6 = vsel %vm532_vm2, %v4950_v38, %v4951_v44  ;;  %v5013_v63 = vpack.c.bf16 %v4990_v47, %v4991_v35  ;;  %v4954_v32 = vrot.slane %v14142_v42, 1  ;;  %v10951_v44 = vld [vmem:[%s16297_s1 + $0xb8] sm:$0xff]  }
 0x2c7   : > { %v5014_v37 = vpack.c.bf16 %v4988_v29, %v4989_v6  ;;  %v4833_v38 = vrot.slane %v14071_v25, 7  ;;  %v14194_v35 = vld [vmem:[#allocation2 + $0x158] sm:$0xff]  ;;  %10636 = vmatprep.subr.bf16.mxu1 %v10951_v44  ;;  %v4832_v6 = vrot.slane %v14078_v8, 7 }
 0x2c8   : > { %v9567_v13 = vpop.f32.mrf.mxu1  ;;  %v4986_v24 = vsel %vm532_vm2, %v4954_v32, %v13524_v0  ;;  %10637 = vmatpush3.bf16.msra.mxu1 %v10951_v44 }
 0x2c9   : > { %v14105_v26 = vpop.f32.mrf.mxu0  ;;  %5271 = vmatmul.mubr.bf16.gmra.mxu1 %v4897_v62  ;;  %v9568_v55 = vadd.f32 %v9567_v13, %v9566_v19  ;;  %v14154_v62 = vld [vmem:[#allocation2 + $0x120] sm:$0xff]  ;;  %v4953_v13 = vrot.slane %v14149_v27, 1 }
 0x2ca   : > { %5278 = vmatprep.mubr.bf16.mxu1 %v4914_v50  ;;  %v9569_v61 = vpop.f32.mrf.mxu1  ;;  %v4957_v50 = vrot.slane %v14146_v60, 1  ;;  %v4956_v34 = vrot.slane %v14154_v62, 1 }
 0x2cb   : > { %v3773_v52 = vpop.f32.mrf.mxu0  ;;  %v14115_v31 = vadd.f32 %v10514_v2, %v9568_v55  ;;  %v4987_v14 = vsel %vm532_vm2, %v4953_v13, %v4954_v32  ;;  %v4963_v32 = vrot.slane %v14194_v35, 1 }
 0x2cc   : > { %10613 = vmatmul.mubr.bf16.gmra.mxu0 %v5011_v10  ;;  %v9570_v51 = vpop.f32.mrf.mxu1  ;;  %v4985_v57 = vsel %vm532_vm2, %v4956_v34, %v4957_v50  ;;  %v5015_v29 = vpack.c.bf16 %v4986_v24, %v4987_v14 }
 0x2cd   : > { %10616 = vmatprep.mubr.bf16.mxu0 %v5012_v7  ;;  %v14120_v21 = vpop.f32.mrf.mxu0  ;;  %v9571_v16 = vadd.f32 %v9570_v51, %v9569_v61 }
 0x2cf   : > { %v3776_v2 = vpop.f32.mrf.mxu0  ;;  %v14134_v45 = vadd.f32 %v10515_v56, %v9571_v16  ;;  %v4829_v56 = vrot.slane %v14075_v22, 7  ;;  %v10949_v22 = vld [vmem:[%s16297_s1 + $0x78] sm:$0xff]   ;;  %v4984_v16 = vsel %vm532_vm2, %v4957_v50, %v13524_v0 }
 0x2d0   : > { %9940 = vmatprep.subr.bf16.mxu0 %v10949_v22 }
 0x2d1   : > { %v9572_v3 = vpop.f32.mrf.mxu1  ;;  %v14144_v18 = vpop.f32.mrf.mxu0  ;;  %5279 = vmatmul.mubr.bf16.gmra.mxu1 %v4898_v41  ;;  %v4882_v20 = vsel %vm419_vm1, %v4829_v56, %v4830_v43  ;;  %v4883_v55 = vsel %vm419_vm1, %v13518_v54, %v4829_v56  ;;  %9941 = vmatpush3.bf16.msra.mxu0 %v10950_v58  ;;  %v14192_v41 = vld [vmem:[#allocation2 + $0x140] sm:$0xff]  ;;  %v14199_v43 = vld [vmem:[#allocation2 + $0x138] sm:$0xff]  ;;  %v14202_v56 = vld [vmem:[#allocation2 + $0x150] sm:$0xff] }
 0x2d2   : > { %5286 = vmatprep.mubr.bf16.mxu1 %v4915_v39  ;;  %v4899_v61 = vpack.c.bf16 %v4882_v20, %v4883_v55  ;;  %v4959_v50 = vrot.slane %v14199_v43, 1  ;;  %v4962_v13 = vrot.slane %v14202_v56, 1 }
 0x2d3   : > { %v9573_v11 = vpop.f32.mrf.mxu1  ;;  %v14151_v19 = vpop.f32.mrf.mxu0 }
 0x2d4   : > { %10617 = vmatmul.mubr.bf16.gmra.mxu0 %v5013_v63  ;;  %v9574_v33 = vadd.f32 %v9573_v11, %v9572_v3  ;;  %v5016_v3 = vpack.c.bf16 %v4984_v16, %v4985_v57  ;;  %v4981_v44 = vsel %vm532_vm2, %v4962_v13, %v4963_v32  ;;  %v14240_v16 = vld [vmem:[#allocation2 + $0x170] sm:$0xff] }
 0x2d5   : > { %10620 = vmatprep.mubr.bf16.mxu0 %v5014_v37  ;;  %v9575_v28 = vpop.f32.mrf.mxu1  ;;  %v14165_v48 = vpop.f32.mrf.mxu0 }
 0x2d6   : > { %v14168_v10 = vadd.f32 %v9574_v33, %v3773_v52  ;;  %v4916_v52 = vpack.c.bf16 %v14071_v25, %v14078_v8  ;;  %v4960_v25 = vrot.slane %v14192_v41, 1  ;;  %v10952_v8 = vld [vmem:[%s16297_s1 + $0x70] sm:$0xff]  }
 0x2d7   : > { %v9576_v7 = vpop.f32.mrf.mxu1  ;;  %v14184_v59 = vpop.f32.mrf.mxu0  ;;  %v10953_v33 = vld [vmem:[%s16297_s1 + $0x30] sm:$0xff]   ;;  %9942 = vmatprep.subr.bf16.mxu0 %v10952_v8 }
 0x2d8   : > { %v9577_v51 = vadd.f32 %v9576_v7, %v9575_v28  ;;  %v4881_v28 = vsel %vm419_vm1, %v13518_v54, %v4832_v6  ;;  %v4982_v7 = vsel %vm532_vm2, %v4960_v25, %v13524_v0  ;;  %9943 = vmatpush3.bf16.msra.mxu0 %v10953_v33 }
 0x2d9   : > { %v9578_v47 = vpop.f32.mrf.mxu1  ;;  %5287 = vmatmul.mubr.bf16.gmra.mxu1 %v4899_v61  ;;  %v4983_v61 = vsel %vm532_vm2, %v4959_v50, %v4960_v25 }
 0x2da   : > { %v14196_v39 = vadd.f32 %v9577_v51, %v3776_v2  ;;  %5294 = vmatprep.mubr.bf16.mxu1 %v4916_v52  ;;  %v4880_v2 = vsel %vm419_vm1, %v4832_v6, %v4833_v38  ;;  %v4980_v52 = vsel %vm532_vm2, %v4963_v32, %v13524_v0  ;;  %v4836_v51 = vrot.slane %v14103_v12, 7  ;;  %v10954_v32 = vld [vmem:[%s16297_s1 + $0x68] sm:$0xff]  }
 0x2db   : > { %v9579_v63 = vpop.f32.mrf.mxu1  ;;  %v4900_v34 = vpack.c.bf16 %v4880_v2, %v4881_v28  ;;  %v4835_v6 = vrot.slane %v14110_v4, 7  ;;  %9944 = vmatprep.subr.bf16.mxu0 %v10954_v32 }
 0x2dc   : > { %v14204_v37 = vpop.f32.mrf.mxu0  ;;  %10621 = vmatmul.mubr.bf16.gmra.mxu0 %v5015_v29  ;;  %v9580_v11 = vadd.f32 %v9579_v63, %v9578_v47  ;;  %v5017_v29 = vpack.c.bf16 %v4982_v7, %v4983_v61  ;;  %v5018_v63 = vpack.c.bf16 %v4980_v52, %v4981_v44 }
 0x2dd   : > { %10624 = vmatprep.mubr.bf16.mxu0 %v5016_v3  ;;  %v9581_v20 = vpop.f32.mrf.mxu1  ;;  %v14248_v3 = vld [vmem:[#allocation2 + $0x168] sm:$0xff]  ;;  %v4879_v28 = vsel %vm419_vm1, %v13518_v54, %v4835_v6 }
 0x2de   : > { %v14217_v22 = vadd.f32 %v14105_v26, %v9580_v11  ;;  %v14219_v58 = vpop.f32.mrf.mxu0  ;;  %v4917_v26 = vpack.c.bf16 %v14103_v12, %v14110_v4  ;;  %v4966_v11 = vrot.slane %v14240_v16, 1  ;;  %v10955_v4 = vld [vmem:[%s16297_s1 + $0x28] sm:$0xff]   ;;  %v4965_v33 = vrot.slane %v14248_v3, 1 }
 0x2df   : > { %v9582_v55 = vpop.f32.mrf.mxu1  ;;  %9945 = vmatpush3.bf16.msra.mxu0 %v10955_v4 }
 0x2e0   : > { %v14232_v24 = vpop.f32.mrf.mxu0  ;;  %v9583_v14 = vadd.f32 %v9582_v55, %v9581_v20  ;;  %v4979_v7 = vsel %vm532_vm2, %v4965_v33, %v4966_v11 }
 0x2e1   : > { %v9584_v57 = vpop.f32.mrf.mxu1  ;;  %5295 = vmatmul.mubr.bf16.gmra.mxu1 %v4900_v34  ;;  %v4978_v34 = vsel %vm532_vm2, %v4966_v11, %v13524_v0 }
 0x2e2   : > { %v14243_v38 = vadd.f32 %v14120_v21, %v9583_v14  ;;  %v14245_v47 = vpop.f32.mrf.mxu0  ;;  %5302 = vmatprep.mubr.bf16.mxu1 %v4917_v26  ;;  %v4878_v21 = vsel %vm419_vm1, %v4835_v6, %v4836_v51  ;;  %v4918_v26 = vpack.c.bf16 %v14107_v36, %v14113_v15  ;;  %v4839_v14 = vrot.slane %v14107_v36, 7 }
 0x2e3   : > { %v9585_v25 = vpop.f32.mrf.mxu1  ;;  %v4901_v55 = vpack.c.bf16 %v4878_v21, %v4879_v28  ;;  %v4919_v28 = vpack.c.bf16 %v14142_v42, %v14149_v27 }
 0x2e4   : > { %v14251_v12 = vpop.f32.mrf.mxu0  ;;  %10625 = vmatmul.mubr.bf16.gmra.mxu0 %v5017_v29  ;;  %v9586_v2 = vadd.f32 %v9585_v25, %v9584_v57  ;;  %v5019_v57 = vpack.c.bf16 %v4978_v34, %v4979_v7  ;;  %v4838_v29 = vrot.slane %v14113_v15, 7 }
 0x2e5   : > { %10628 = vmatprep.mubr.bf16.mxu0 %v5018_v63  ;;  %v9587_v8 = vpop.f32.mrf.mxu1  ;;  %v10956_v63 = vld [vmem:[%s16297_s1 + $0xb0] sm:$0xff]  }
 0x2e6   : > { %v14263_v20 = vadd.f32 %v9586_v2, %v14151_v19  ;;  %v14265_v50 = vpop.f32.mrf.mxu0  ;;  %v4876_v11 = vsel %vm419_vm1, %v4838_v29, %v4839_v14  ;;  %10638 = vmatprep.subr.bf16.mxu1 %v10956_v63  ;;  %v4877_v21 = vsel %vm419_vm1, %v13518_v54, %v4838_v29 }
 0x2e7   : > { %v9588_v13 = vpop.f32.mrf.mxu1  ;;  %10639 = vmatpush3.bf16.msra.mxu1 %v10956_v63  ;;  %v4902_v4 = vpack.c.bf16 %v4876_v11, %v4877_v21  ;;  %v10960_v21 = vld [vmem:[%s16297_s1 + $0x18] sm:$0xff]  }
 0x2e8   : > { %v14275_v61 = vpop.f32.mrf.mxu0  ;;  %v9589_v19 = vadd.f32 %v9588_v13, %v9587_v8  ;;  %v10957_v8 = vld [vmem:[%s16297_s1 + $0x60] sm:$0xff]   ;;  %v4842_v13 = vrot.slane %v14142_v42, 7 }
 0x2e9   : > { %v9590_v52 = vpop.f32.mrf.mxu1  ;;  %5303 = vmatmul.mubr.bf16.gmra.mxu1 %v4901_v55  ;;  %v5021_v55 = vpack.c.bf16 %v13524_v0, %v13524_v0  ;;  %9946 = vmatprep.subr.bf16.mxu0 %v10957_v8  ;;  %v4845_v8 = vrot.slane %v14146_v60, 7 }
 0x2ea   : > { %v14281_v44 = vadd.f32 %v9589_v19, %v14184_v59  ;;  %v14283_v51 = vpop.f32.mrf.mxu0  ;;  %5310 = vmatprep.mubr.bf16.mxu1 %v4918_v26  ;;  %v4841_v26 = vrot.slane %v14149_v27, 7 }
 0x2eb   : > { %v9591_v6 = vpop.f32.mrf.mxu1 }
 0x2ec   : > { %v14289_v25 = vpop.f32.mrf.mxu0  ;;  %10629 = vmatmul.mubr.bf16.gmra.mxu0 %v5019_v57  ;;  %v9592_v36 = vadd.f32 %v9591_v6, %v9590_v52  ;;  %v14321_v52 = vld [vmem:[#allocation2] sm:$0xff]  ;;  %v4875_v63 = vsel %vm419_vm1, %v13518_v54, %v4841_v26 }
 0x2ed   : > { %10632 = vmatprep.mubr.bf16.mxu0 %v13865_v53  ;;  %v9593_v59 = vpop.f32.mrf.mxu1  ;;  %v10958_v53 = vld [vmem:[%s16297_s1 + $0x20] sm:$0xff]   ;;  %v14325_v42 = vpack.c.bf16 %v14321_v52, %v14321_v52 }
 0x2ee   : > { %v14295_v2 = vadd.f32 %v14144_v18, %v9592_v36  ;;  %v14297_v15 = vpop.f32.mrf.mxu0  ;;  %9947 = vmatpush3.bf16.msra.mxu0 %v10958_v53 }
 0x2ef   : > { %v9594_v32 = vpop.f32.mrf.mxu1 }
 0x2f0   : > { %v14308_v33 = vpop.f32.mrf.mxu0  ;;  %v9595_v18 = vadd.f32 %v9594_v32, %v9593_v59  ;;  %v10959_v59 = vld [vmem:[%s16297_s1 + $0x58] sm:$0xff]  }
 0x2f1   : > { %v9596_v34 = vpop.f32.mrf.mxu1  ;;  %5311 = vmatmul.mubr.bf16.gmra.mxu1 %v4902_v4  ;;  %v4920_v4 = vpack.c.bf16 %v14146_v60, %v14154_v62  ;;  %9948 = vmatprep.subr.bf16.mxu0 %v10959_v59  ;;  %v10963_v59 = vld [vmem:[%s16297_s1 + $0x10] sm:$0xff]  }
 0x2f2   : > { %v14316_v7 = vadd.f32 %v14165_v48, %v9595_v18  ;;  %v14318_v19 = vpop.f32.mrf.mxu0  ;;  %5318 = vmatprep.mubr.bf16.mxu1 %v4919_v28  ;;  %v4874_v48 = vsel %vm419_vm1, %v4841_v26, %v4842_v13  ;;  %v4844_v13 = vrot.slane %v14154_v62, 7  ;;  %9949 = vmatpush3.bf16.msra.mxu0 %v10960_v21 }
 0x2f3   : > { %v9597_v14 = vpop.f32.mrf.mxu1  ;;  %v4903_v11 = vpack.c.bf16 %v4874_v48, %v4875_v63 }
 0x2f4   : > { %v14327_v0 = vpop.f32.mrf.mxu0  ;;  %v9598_v57 = vadd.f32 %v9597_v14, %v9596_v34  ;;  %10633 = vmatmul.mubr.bf16.gmra.mxu0 %v5021_v55  ;;  %v10961_v34 = vld [vmem:[%s16297_s1 + $0xa8] sm:$0xff]   ;;  %v4872_v60 = vsel %vm419_vm1, %v4844_v13, %v4845_v8  ;;  %v4873_v62 = vsel %vm419_vm1, %v13518_v54, %v4844_v13 }
 0x2f5   : > { %v9599_v29 = vpop.f32.mrf.mxu1  ;;  %6336 = vmatprep.mubr.bf16.mxu0 %v14325_v42  ;;  %10640 = vmatprep.subr.bf16.mxu1 %v10961_v34 }
 0x2f6   : > { %v14333_v27 = vadd.f32 %v9598_v57, %v14219_v58  ;;  %v14335_v6 = vpop.f32.mrf.mxu0  ;;  %10641 = vmatpush3.bf16.msra.mxu1 %v10961_v34 }
 0x2f7   : > { %v9600_v36 = vpop.f32.mrf.mxu1 }
 0x2f8   : > { %v14346_v32 = vpop.f32.mrf.mxu0  ;;  %v9601_v58 = vadd.f32 %v9600_v36, %v9599_v29  ;;  %v4904_v36 = vpack.c.bf16 %v4872_v60, %v4873_v62 }
 0x2f9   : > { %v9602_v53 = vpop.f32.mrf.mxu1  ;;  %5319 = vmatmul.mubr.bf16.gmra.mxu1 %v4903_v11  ;;  %v10962_v11 = vld [vmem:[%s16297_s1 + $0x50] sm:$0xff]  }
 0x2fa   : > { %v14352_v18 = vadd.f32 %v9601_v58, %v14245_v47  ;;  %v14354_v28 = vpop.f32.mrf.mxu0  ;;  %5326 = vmatprep.mubr.bf16.mxu1 %v4920_v4  ;;  %v4921_v58 = vpack.c.bf16 %v14192_v41, %v14199_v43  ;;  %v4848_v4 = vrot.slane %v14192_v41, 7  ;;  %9950 = vmatprep.subr.bf16.mxu0 %v10962_v11 }
 0x2fb   : > { %16458 = vst [vmem:[#allocation21_spill] sm:$0xff] %v14354_v28  ;;  %v9603_v55 = vpop.f32.mrf.mxu1  ;;  %9951 = vmatpush3.bf16.msra.mxu0 %v10963_v59  ;;  %v4922_v59 = vpack.c.bf16 %v14194_v35, %v14202_v56 }
 0x2fc   : > { %v9684_v26 = vpop.f32.mrf.mxu0  ;;  %v9604_v14 = vadd.f32 %v9603_v55, %v9602_v53  ;;  %v4847_v55 = vrot.slane %v14199_v43, 7 }
 0x2fd   : > { %v9605_v57 = vpop.f32.mrf.mxu1 }
 0x2fe   : > { %v14363_v47 = vadd.f32 %v14204_v37, %v9604_v14  ;;  %v9685_v48 = vpop.f32.mrf.mxu0  ;;  %v4870_v60 = vsel %vm419_vm1, %v4847_v55, %v4848_v4  ;;  %v4850_v4 = vrot.slane %v14202_v56, 7  ;;  %v10964_v56 = vld [vmem:[%s16297_s1 + $0x48] sm:$0xff]  }
 0x2ff   : > { %v14368_v29 = vadd.f32 %v9685_v48, %v9684_v26  ;;  %v9606_v63 = vpop.f32.mrf.mxu1  ;;  %9952 = vmatprep.subr.bf16.mxu0 %v10964_v56 }
 0x300   : > { %v14376_v37 = vpop.f32.mrf.mxu0  ;;  %v9607_v21 = vadd.f32 %v9606_v63, %v9605_v57 }
 0x301   : > { %v9608_v8 = vpop.f32.mrf.mxu1  ;;  %5327 = vmatmul.mubr.bf16.gmra.mxu1 %v4904_v36 }
 0x302   : > { %v14382_v53 = vadd.f32 %v14232_v24, %v9607_v21  ;;  %v14384_v13 = vpop.f32.mrf.mxu0  ;;  %5334 = vmatprep.mubr.bf16.mxu1 %v4921_v58  ;;  %v4871_v24 = vsel %vm419_vm1, %v13518_v54, %v4847_v55  ;;  %v4851_v21 = vrot.slane %v14194_v35, 7  ;;  %v4869_v35 = vsel %vm419_vm1, %v13518_v54, %v4850_v4 }
 0x303   : > { %v9609_v34 = vpop.f32.mrf.mxu1  ;;  %v4905_v43 = vpack.c.bf16 %v4870_v60, %v4871_v24 }
 0x304   : > { %v9690_v26 = vpop.f32.mrf.mxu0  ;;  %v9610_v14 = vadd.f32 %v9609_v34, %v9608_v8 }
 0x305   : > { %v9611_v57 = vpop.f32.mrf.mxu1 }
 0x306   : > { %v14390_v41 = vadd.f32 %v9610_v14, %v14265_v50  ;;  %v9691_v48 = vpop.f32.mrf.mxu0 }
 0x307   : > { %v14395_v62 = vadd.f32 %v9691_v48, %v9690_v26  ;;  %v9612_v63 = vpop.f32.mrf.mxu1  ;;  %v4868_v26 = vsel %vm419_vm1, %v4850_v4, %v4851_v21  ;;  %v4923_v21 = vpack.c.bf16 %v14240_v16, %v14248_v3 }
 0x308   : > { %v14397_v36 = vpop.f32.mrf.mxu0  ;;  %v14399_v11 = vadd.f32 %v9612_v63, %v9611_v57  ;;  %v4906_v63 = vpack.c.bf16 %v4868_v26, %v4869_v35 }
 0x309   : > { %v9614_v50 = vpop.f32.mrf.mxu1  ;;  %5335 = vmatmul.mubr.bf16.gmra.mxu1 %v4905_v43  ;;  %v10965_v43 = vld [vmem:[%s16297_s1 + $0x8] sm:$0xff]  }
 0x30a   : > { %v14404_v58 = vpop.f32.mrf.mxu0  ;;  %5342 = vmatprep.mubr.bf16.mxu1 %v4922_v59  ;;  %9953 = vmatpush3.bf16.msra.mxu0 %v10965_v43 }
 0x30b   : > { %v9615_v8 = vpop.f32.mrf.mxu1 }
 0x30c   : > { %v9696_v55 = vpop.f32.mrf.mxu0  ;;  %v9616_v34 = vadd.f32 %v9615_v8, %v9614_v50  ;;  %v4854_v50 = vrot.slane %v14240_v16, 7 }
 0x30d   : > { %v9617_v14 = vpop.f32.mrf.mxu1 }
 0x30e   : > { %v14410_v60 = vadd.f32 %v14251_v12, %v9616_v34  ;;  %v9697_v57 = vpop.f32.mrf.mxu0  ;;  %v4853_v34 = vrot.slane %v14248_v3, 7 }
 0x30f   : > { %v14415_v48 = vadd.f32 %v9697_v57, %v9696_v55  ;;  %v9618_v24 = vpop.f32.mrf.mxu1 }
 0x310   : > { %v14423_v59 = vpop.f32.mrf.mxu0  ;;  %v9619_v12 = vadd.f32 %v9618_v24, %v9617_v14  ;;  %v10966_v14 = vld [vmem:[%s16297_s1 + $0xa0] sm:$0xff]   ;;  %v4866_v16 = vsel %vm419_vm1, %v4853_v34, %v4854_v50  ;;  %v4867_v3 = vsel %vm419_vm1, %v13518_v54, %v4853_v34  ;;  %v10969_v50 = vld [vmem:[%s16297_s1 + $0x98] sm:$0xff]  }
 0x311   : > { %v9620_v4 = vpop.f32.mrf.mxu1  ;;  %5343 = vmatmul.mubr.bf16.gmra.mxu1 %v4906_v63  ;;  %10642 = vmatprep.subr.bf16.mxu1 %v10966_v14 }
 0x312   : > { %v14429_v8 = vadd.f32 %v14275_v61, %v9619_v12  ;;  %v14431_v55 = vpop.f32.mrf.mxu0  ;;  %5350 = vmatprep.mubr.bf16.mxu1 %v4923_v21  ;;  %10643 = vmatpush3.bf16.msra.mxu1 %v10966_v14  ;;  %v4907_v12 = vpack.c.bf16 %v4866_v16, %v4867_v3  ;;  %v10967_v21 = vld [vmem:[%s16297_s1 + $0x40] sm:$0xff]   ;;  %v14466_v14 = vrot.slane %v14321_v52, 7 }
 0x313   : > { %v9621_v26 = vpop.f32.mrf.mxu1  ;;  %9954 = vmatprep.subr.bf16.mxu0 %v10967_v21  ;;  %10644 = vmatprep.subr.bf16.mxu1 %v10969_v50 }
 0x314   : > { %v9702_v57 = vpop.f32.mrf.mxu0  ;;  %v9622_v35 = vadd.f32 %v9621_v26, %v9620_v4  ;;  %16459 = vst [vmem:[#allocation10_spill] sm:$0xff] %v14466_v14 }
 0x315   : > { %v14439_v24 = vpop.f32.mrf.mxu1 }
 0x316   : > { %v14442_v61 = vadd.f32 %v9622_v35, %v14297_v15  ;;  %v9703_v63 = vpop.f32.mrf.mxu0  ;;  %v10968_v15 = vld [vmem:[%s16297_s1] sm:$0xff]   ;;  %10645 = vmatpush3.bf16.msra.mxu1 %v10969_v50 }
 0x317   : > { %v14447_v56 = vadd.f32 %v9703_v63, %v9702_v57  ;;  %v14449_v43 = vpop.f32.mrf.mxu1  ;;  %9955 = vmatpush3.bf16.msra.mxu0 %v10968_v15  ;;  %v10970_v57 = vld [vmem:[%s16297_s1 + $0x90] sm:$0xff]   ;;  %v10971_v15 = vld [vmem:[%s16297_s1 + $0x88] sm:$0xff]  }
 0x318   : > { %v14460_v4 = vpop.f32.mrf.mxu0  ;;  %10646 = vmatprep.subr.bf16.mxu1 %v10970_v57  ;;  %10684 = vmatprep.subr.bf16.mxu0 %v10972_v40 }
 0x319   : > { %v9626_v34 = vpop.f32.mrf.mxu1  ;;  %5351 = vmatmul.mubr.bf16.gmra.mxu1 %v4907_v12  ;;  %v5984_v12 = vpack.c.bf16 %v14466_v14, %v14466_v14 }
 0x31a   : > { %v14462_v26 = vpop.f32.mrf.mxu0  ;;  %5358 = vmatprep.mubr.bf16.mxu1 %v14009_v49  ;;  %10647 = vmatpush3.bf16.msra.mxu1 %v10970_v57  ;;  %v10973_v57 = vld [vmem:[%s16297_s1 + $0x80] sm:$0xff]  }
 0x31b   : > { %v9627_v35 = vpop.f32.mrf.mxu1  ;;  %6337 = vmatmul.mubr.bf16.vlgmr.msra.gmra.mxu0 %v5984_v12  ;;  %10648 = vmatprep.subr.bf16.mxu1 %v10971_v15 }
 0x31c   : > { %v9708_v16 = vpop.f32.mrf.mxu0  ;;  %v9628_v63 = vadd.f32 %v9627_v35, %v9626_v34  ;;  %10685 = vmatpush3.bf16.msra.mxu0 %v10972_v40 }
 0x31d   : > { %v9629_v3 = vpop.f32.mrf.mxu1 }
 0x31e   : > { %v14474_v49 = vadd.f32 %v14289_v25, %v9628_v63  ;;  %v9709_v21 = vpop.f32.mrf.mxu0  ;;  %10649 = vmatpush3.bf16.msra.mxu1 %v10971_v15 }
 0x31f   : > { %v14482_v28 = vadd.f32 %v9709_v21, %v9708_v16  ;;  %v9630_v50 = vpop.f32.mrf.mxu1  ;;  %v14494_v16 = vrot.slane %v14321_v52, 1  ;;  %10650 = vmatprep.subr.bf16.mxu1 %v10973_v57 }
 0x320   : > { %v14484_v34 = vpop.f32.mrf.mxu0  ;;  %v9631_v35 = vadd.f32 %v9630_v50, %v9629_v3 }
 0x321   : > { %v9632_v25 = vpop.f32.mrf.mxu1  ;;  %5359 = vmatmul.mubr.bf16.gmra.mxu1 %v13891_v23  ;;  %16461 = vst [vmem:[#allocation11_spill] sm:$0xff] %v14494_v16 }
 0x322   : > { %v14488_v63 = vadd.f32 %v14308_v33, %v9631_v35  ;;  %v14490_v14 = vpop.f32.mrf.mxu0  ;;  %5366 = vmatprep.mubr.bf16.mxu1 %v14325_v42  ;;  %v4909_v33 = vpack.c.bf16 %v13518_v54, %v13518_v54  ;;  %v6096_v35 = vpack.c.bf16 %v14494_v16, %v14494_v16  ;;  %10651 = vmatpush3.bf16.msra.mxu1 %v10973_v57 }
 0x323   : > { %v9633_v3 = vpop.f32.mrf.mxu1 }
 0x324   : > { %16460 = vst [vmem:[#allocation22_spill] sm:$0xff] %v14488_v63  ;;  %v9714_v12 = vpop.f32.mrf.mxu0  ;;  %v9634_v21 = vadd.f32 %v9633_v3, %v9632_v25 }
 0x325   : > { %v14499_v23 = vpop.f32.mrf.mxu1 }
 0x326   : > { %16462 = vst [vmem:[#allocation18_spill] sm:$0xff] %v14499_v23  ;;  %v14504_v42 = vadd.f32 %v9634_v21, %v14335_v6  ;;  %v9715_v52 = vpop.f32.mrf.mxu0 }
 0x327   : > { %v14506_v50 = vadd.f32 %v9715_v52, %v9714_v12  ;;  %v14508_v40 = vpop.f32.mrf.mxu1  ;;  %v10974_v52 = vld [vmem:[%s16297_s1 + $0x170] sm:$0xff]  }
 0x328   : > { %16463 = vst [vmem:[#allocation8_spill] sm:$0xff] %v14504_v42  ;;  %16464 = vst [vmem:[#allocation15_spill] sm:$0xff] %v14508_v40  ;;  %v14512_v63 = vpop.f32.mrf.mxu0  ;;  %10686 = vmatprep.subr.bf16.mxu0 %v10974_v52 }
 0x329   : > { %v9638_v15 = vpop.f32.mrf.mxu1  ;;  %5367 = vmatmul.mubr.bf16.gmra.mxu1 %v4909_v33  ;;  %10687 = vmatpush3.bf16.msra.mxu0 %v10974_v52  ;;  %v9689_v52 = vadd.f32 %v14384_v13, %v14376_v37 }
 0x32a   : > { %v9718_v25 = vpop.f32.mrf.mxu0  ;;  %10652 = vmatprep.mubr.bf16.mxu1 %v6096_v35 }
 0x32b   : > { %v9639_v54 = vpop.f32.mrf.mxu1 }
 0x32c   : > { %v9720_v3 = vpop.f32.mrf.mxu0  ;;  %v9640_v23 = vadd.f32 %v9639_v54, %v9638_v15 }
 0x32d   : > { %v9641_v6 = vpop.f32.mrf.mxu1 }
 0x32e   : > { %v14515_v21 = vadd.f32 %v14327_v0, %v9640_v23  ;;  %v9721_v12 = vpop.f32.mrf.mxu0 }
 0x32f   : > { %v14520_v16 = vadd.f32 %v9721_v12, %v9720_v3  ;;  %v9642_v42 = vpop.f32.mrf.mxu1 }
 0x330   : > { %16465 = vst [vmem:[#allocation17_spill] sm:$0xff] %v14515_v21  ;;  %v14522_v57 = vpop.f32.mrf.mxu0  ;;  %v9643_v33 = vadd.f32 %v9642_v42, %v9641_v6  ;;  %v9695_v21 = vadd.f32 %v14404_v58, %v14397_v36 }
 0x331   : > { %v10558_v35 = vpop.f32.mrf.mxu1 }
 0x332   : > { %v14525_v15 = vadd.f32 %v14346_v32, %v9643_v33  ;;  %v14527_v54 = vpop.f32.mrf.mxu0  ;;  %v4552_v0 = vadd.f32 %v10558_v35, %v14395_v62 }
 0x333   : > { %v4543_v23 = vpop.f32.mrf.mxu1 }
 0x334   : > { %16466 = vst [vmem:[#allocation19_spill] sm:$0xff] %v14525_v15  ;;  %v9726_v3 = vpop.f32.mrf.mxu0  ;;  %v14533_v12 = vadd.f32 %v4552_v0, %v14042_v46  ;;  %v4544_v42 = vadd.f32 %v14368_v29, %v4543_v23 }
 0x335   : > { %v10559_v6 = vpop.f32.mrf.mxu1 }
 0x336   : > { %v9727_v32 = vpop.f32.mrf.mxu0  ;;  %v14539_v33 = vadd.f32 %v4544_v42, %v14027_v1  ;;  %v4555_v15 = vadd.f32 %v10559_v6, %v9695_v21  ;;  %v9707_v1 = vadd.f32 %v14462_v26, %v14460_v4 }
 0x337   : > { %v9728_v62 = vadd.f32 %v9727_v32, %v9726_v3  ;;  %v4546_v35 = vpop.f32.mrf.mxu1 }
 0x338   : > { %v9729_v40 = vpop.f32.mrf.mxu0  ;;  %v14542_v36 = vadd.f32 %v4555_v15, %v14050_v5  ;;  %v4547_v58 = vadd.f32 %v9689_v52, %v4546_v35  ;;  %v9701_v15 = vadd.f32 %v14431_v55, %v14423_v59 }
 0x339   : > { %v10562_v46 = vpop.f32.mrf.mxu1 }
 0x33a   : > { %v9730_v0 = vpop.f32.mrf.mxu0  ;;  %v14545_v29 = vadd.f32 %v4547_v58, %v14044_v30  ;;  %v4568_v23 = vadd.f32 %v10562_v46, %v14447_v56  ;;  %v10975_v56 = vld [vmem:[%s16297_s1 + $0x168] sm:$0xff]   ;;  %v9719_v58 = vadd.f32 %v9718_v25, %v14512_v63 }
 0x33b   : > { %v4559_v37 = vpop.f32.mrf.mxu1  ;;  %10688 = vmatprep.subr.bf16.mxu0 %v10975_v56 }
 0x33c   : > { %v9732_v13 = vpop.f32.mrf.mxu0  ;;  %v14551_v21 = vadd.f32 %v4568_v23, %v14115_v31  ;;  %v4560_v3 = vadd.f32 %v14415_v48, %v4559_v37  ;;  %10689 = vmatpush3.bf16.msra.mxu0 %v10975_v56 }
 0x33d   : > { %v10563_v5 = vpop.f32.mrf.mxu1 }
 0x33e   : > { %v9733_v42 = vpop.f32.mrf.mxu0  ;;  %v14557_v30 = vadd.f32 %v4560_v3, %v14073_v9  ;;  %v4571_v6 = vadd.f32 %v10563_v5, %v9707_v1  ;;  %v9713_v1 = vadd.f32 %v14490_v14, %v14484_v34  ;;  %v9731_v14 = vadd.f32 %v9730_v0, %v9729_v40 }
 0x33f   : > { %v9734_v4 = vadd.f32 %v9733_v42, %v9732_v13  ;;  %v4562_v26 = vpop.f32.mrf.mxu1 }
 0x340   : > { %v9735_v52 = vpop.f32.mrf.mxu0  ;;  %v14563_v31 = vadd.f32 %v4571_v6, %v14134_v45  ;;  %v4563_v48 = vadd.f32 %v9701_v15, %v4562_v26 }
 0x341   : > { %v10566_v32 = vpop.f32.mrf.mxu1 }
 0x342   : > { %v9736_v59 = vpop.f32.mrf.mxu0  ;;  %v14566_v55 = vadd.f32 %v4563_v48, %v14084_v17  ;;  %v4584_v9 = vadd.f32 %v10566_v32, %v14506_v50 }
 0x343   : > { %v4575_v35 = vpop.f32.mrf.mxu1 }
 0x344   : > { %v9738_v46 = vpop.f32.mrf.mxu0  ;;  %v14571_v23 = vadd.f32 %v4584_v9, %v14217_v22  ;;  %v4576_v45 = vadd.f32 %v14482_v28, %v4575_v35 }
 0x345   : > { %v10567_v37 = vpop.f32.mrf.mxu1 }
 0x346   : > { %v9739_v13 = vpop.f32.mrf.mxu0  ;;  %v14577_v3 = vadd.f32 %v4576_v45, %v14168_v10  ;;  %v4587_v17 = vadd.f32 %v10567_v37, %v9719_v58 }
 0x347   : > { %v9740_v5 = vadd.f32 %v9739_v13, %v9738_v46  ;;  %v4578_v50 = vpop.f32.mrf.mxu1 }
 0x348   : > { %v9741_v15 = vpop.f32.mrf.mxu0  ;;  %v14580_v63 = vadd.f32 %v4587_v17, %v14243_v38  ;;  %v4579_v25 = vadd.f32 %v9713_v1, %v4578_v50  ;;  %v9725_v38 = vadd.f32 %v14527_v54, %v14522_v57  ;;  %v9737_v50 = vadd.f32 %v9736_v59, %v9735_v52 }
 0x349   : > { %v10570_v22 = vpop.f32.mrf.mxu1 }
 0x34a   : > { %v9742_v42 = vpop.f32.mrf.mxu0  ;;  %v14583_v28 = vadd.f32 %v4579_v25, %v14196_v39  ;;  %v4600_v6 = vadd.f32 %v10570_v22, %v9728_v62  ;;  %v10976_v39 = vld [vmem:[%s16297_s1 + $0x160] sm:$0xff]  }
 0x34b   : > { %v4591_v56 = vpop.f32.mrf.mxu1  ;;  %10690 = vmatprep.subr.bf16.mxu0 %v10976_v39  ;;  %v9743_v45 = vadd.f32 %v9742_v42, %v9741_v15 }
 0x34c   : > { %v9744_v34 = vpop.f32.mrf.mxu0  ;;  %v14586_v10 = vadd.f32 %v4600_v6, %v14295_v2  ;;  %v4592_v26 = vadd.f32 %v14520_v16, %v4591_v56  ;;  %10691 = vmatpush3.bf16.msra.mxu0 %v10976_v39 }
 0x34d   : > { %v10571_v48 = vpop.f32.mrf.mxu1 }
 0x34e   : > { %v9745_v32 = vpop.f32.mrf.mxu0  ;;  %v14592_v9 = vadd.f32 %v4592_v26, %v14263_v20  ;;  %v4603_v35 = vadd.f32 %v10571_v48, %v9731_v14 }
 0x34f   : > { %v9746_v40 = vadd.f32 %v9745_v32, %v9744_v34  ;;  %v4594_v62 = vpop.f32.mrf.mxu1 }
 0x350   : > { %v9747_v0 = vpop.f32.mrf.mxu0  ;;  %v14598_v2 = vadd.f32 %v4603_v35, %v14316_v7  ;;  %v4595_v16 = vadd.f32 %v9725_v38, %v4594_v62 }
 0x351   : > { %v10574_v58 = vpop.f32.mrf.mxu1 }
 0x352   : > { %v9748_v57 = vpop.f32.mrf.mxu0  ;;  %v14601_v54 = vadd.f32 %v4595_v16, %v14281_v44  ;;  %v4616_v20 = vadd.f32 %v10574_v58, %v9740_v5  ;;  %v3825_v16 = vadd.f32 %v14399_v11, %v14283_v51 }
 0x353   : > { %v4607_v46 = vpop.f32.mrf.mxu1  ;;  %v9749_v38 = vadd.f32 %v9748_v57, %v9747_v0 }
 0x354   : > { %v9750_v37 = vpop.f32.mrf.mxu0  ;;  %v14604_v1 = vadd.f32 %v4616_v20, %v14363_v47  ;;  %v4608_v13 = vadd.f32 %v9734_v4, %v4607_v46  ;;  %v10978_v20 = vld [vmem:[%s16297_s1 + $0x138] sm:$0xff]  }
 0x355   : > { %v10575_v17 = vpop.f32.mrf.mxu1  ;;  %10076 = vmatprep.subr.bf16.mxu1 %v10978_v20 }
 0x356   : > { %v9751_v7 = vpop.f32.mrf.mxu0  ;;  %v14607_v25 = vadd.f32 %v4608_v13, %v14333_v27  ;;  %v4619_v22 = vadd.f32 %v10575_v17, %v9743_v45  ;;  %v9625_v45 = vadd.f32 %v14449_v43, %v14439_v24 }
 0x357   : > { %v9752_v6 = vadd.f32 %v9751_v7, %v9750_v37  ;;  %v4610_v56 = vpop.f32.mrf.mxu1 }
 0x358   : > { %v9753_v14 = vpop.f32.mrf.mxu0  ;;  %v14610_v44 = vadd.f32 %v4619_v22, %v14382_v53  ;;  %v4611_v5 = vadd.f32 %v9737_v50, %v4610_v56  ;;  %v3841_v22 = vadd.f32 %v9625_v45, %v14318_v19  ;;  %v10982_v19 = vld [vmem:[%s16297_s1 + $0x150] sm:$0xff]   ;;  %v16471_v45 = vld [vmem:[#allocation21_spill] sm:$0xff] }
 0x359   : > { %v10578_v15 = vpop.f32.mrf.mxu1 }
 0x35a   : > { %v9754_v42 = vpop.f32.mrf.mxu0  ;;  %v14613_v47 = vadd.f32 %v4611_v5, %v14352_v18  ;;  %v4632_v4 = vadd.f32 %v10578_v15, %v9752_v6  ;;  %v10977_v18 = vld [vmem:[%s16297_s1 + $0x158] sm:$0xff]  }
 0x35b   : > { %v4623_v34 = vpop.f32.mrf.mxu1  ;;  %v9755_v52 = vadd.f32 %v9754_v42, %v9753_v14  ;;  %10692 = vmatprep.subr.bf16.mxu0 %v10977_v18 }
 0x35c   : > { %v9756_v59 = vpop.f32.mrf.mxu0  ;;  %v14616_v27 = vadd.f32 %v4632_v4, %v14410_v60  ;;  %v4624_v26 = vadd.f32 %v9746_v40, %v4623_v34  ;;  %10693 = vmatpush3.bf16.msra.mxu0 %v10977_v18  ;;  %v16468_v18 = vld [vmem:[#allocation18_spill] sm:$0xff] }
 0x35d   : > { %v10579_v48 = vpop.f32.mrf.mxu1  ;;  %10694 = vmatprep.subr.bf16.mxu0 %v10982_v19 }
 0x35e   : > { %v9757_v32 = vpop.f32.mrf.mxu0  ;;  %v14619_v53 = vadd.f32 %v4624_v26, %v14390_v41  ;;  %v4635_v35 = vadd.f32 %v10579_v48, %v9755_v52  ;;  %v16467_v26 = vld [vmem:[#allocation22_spill] sm:$0xff] }
 0x35f   : > { %v9758_v39 = vadd.f32 %v9757_v32, %v9756_v59  ;;  %v4626_v62 = vpop.f32.mrf.mxu1 }
 0x360   : > { %v9759_v58 = vpop.f32.mrf.mxu0  ;;  %v14627_v60 = vadd.f32 %v4635_v35, %v14429_v8  ;;  %v4627_v40 = vadd.f32 %v9749_v38, %v4626_v62  ;;  %10695 = vmatpush3.bf16.msra.mxu0 %v10982_v19 }
 0x361   : > { %v10582_v0 = vpop.f32.mrf.mxu1 }
 0x362   : > { %v9760_v41 = vpop.f32.mrf.mxu0  ;;  %v14629_v57 = vadd.f32 %v4627_v40, %v3825_v16  ;;  %v16470_v40 = vld [vmem:[#allocation8_spill] sm:$0xff] }
 0x363   : > { %v4639_v46 = vpop.f32.mrf.mxu1  ;;  %v9761_v37 = vadd.f32 %v9760_v41, %v9759_v58 }
 0x364   : > { %v9762_v51 = vpop.f32.mrf.mxu0  ;;  %v4640_v11 = vadd.f32 %v9758_v39, %v4639_v46 }
 0x365   : > { %v10583_v8 = vpop.f32.mrf.mxu1 }
 0x366   : > { %v9763_v13 = vpop.f32.mrf.mxu0  ;;  %v14637_v17 = vadd.f32 %v4640_v11, %v14442_v61 }
 0x367   : > { %v9764_v50 = vadd.f32 %v9763_v13, %v9762_v51  ;;  %v4642_v7 = vpop.f32.mrf.mxu1 }
 0x368   : > { %v9765_v6 = vpop.f32.mrf.mxu0  ;;  %v4643_v56 = vadd.f32 %v9761_v37, %v4642_v7 }
 0x369   : > { %v4648_v14 = vadd.f32 %v10582_v0, %v9764_v50  ;;  %v10586_v5 = vpop.f32.mrf.mxu1 }
 0x36a   : > { %v9766_v15 = vpop.f32.mrf.mxu0  ;;  %v14640_v42 = vadd.f32 %v4643_v56, %v3841_v22 }
 0x36b   : > { %v14643_v24 = vadd.f32 %v4648_v14, %v14474_v49  ;;  %v9767_v43 = vadd.f32 %v9766_v15, %v9765_v6  ;;  %v4655_v4 = vpop.f32.mrf.mxu1  ;;  %v16469_v49 = vld [vmem:[#allocation15_spill] sm:$0xff]  ;;  %v16472_v15 = vld [vmem:[#allocation17_spill] sm:$0xff] }
 0x36c   : > { %v9768_v34 = vpop.f32.mrf.mxu0  ;;  %v9637_v39 = vadd.f32 %v16469_v49, %v16468_v18  ;;  %v10987_v18 = vld [vmem:[%s16297_s1 + $0x148] sm:$0xff]  }
 0x36d   : > { %v4651_v52 = vadd.f32 %v10583_v8, %v9767_v43  ;;  %v10587_v61 = vpop.f32.mrf.mxu1  ;;  %v16473_v49 = vld [vmem:[#allocation19_spill] sm:$0xff]  ;;  %10696 = vmatprep.subr.bf16.mxu0 %v10987_v18 }
 0x36e   : > { %v9769_v59 = vpop.f32.mrf.mxu0  ;;  %v3857_v51 = vadd.f32 %v9637_v39, %v16471_v45  ;;  %10697 = vmatpush3.bf16.msra.mxu0 %v10987_v18 }
 0x36f   : > { %v14649_v48 = vadd.f32 %v4651_v52, %v16467_v26  ;;  %v9770_v38 = vadd.f32 %v9769_v59, %v9768_v34  ;;  %v4658_v32 = vpop.f32.mrf.mxu1 }
 0x370   : > { %v9771_v35 = vpop.f32.mrf.mxu0 }
 0x371   : > { %v4656_v62 = vadd.f32 %v9770_v38, %v4655_v4  ;;  %v9820_v16 = vpop.f32.mrf.mxu1 }
 0x372   : > { %v9772_v58 = vpop.f32.mrf.mxu0 }
 0x373   : > { %v14654_v0 = vadd.f32 %v4656_v62, %v16470_v40  ;;  %v9773_v41 = vadd.f32 %v9772_v58, %v9771_v35  ;;  %v9821_v20 = vpop.f32.mrf.mxu1 }
 0x374   : > { %v9774_v46 = vpop.f32.mrf.mxu0  ;;  %v9822_v19 = vadd.f32 %v9821_v20, %v9820_v16  ;;  %v14673_v20 = vld [vmem:[%s16298_s2] ss:$0 sm:$0xff] }
 0x375   : > { %v4659_v11 = vadd.f32 %v9773_v41, %v4658_v32  ;;  %v9823_v8 = vpop.f32.mrf.mxu1 }
 0x376   : > { %v9775_v37 = vpop.f32.mrf.mxu0 }
 0x377   : > { %v14657_v13 = vadd.f32 %v4659_v11, %v3857_v51  ;;  %v9776_v50 = vadd.f32 %v9775_v37, %v9774_v46  ;;  %v9824_v7 = vpop.f32.mrf.mxu1 }
 0x378   : > { %v9777_v22 = vpop.f32.mrf.mxu0  ;;  %v9825_v46 = vadd.f32 %v9824_v7, %v9823_v8 }
 0x379   : > { %v4664_v6 = vadd.f32 %v10586_v5, %v9776_v50  ;;  %v9826_v56 = vpop.f32.mrf.mxu1 }
 0x37a   : > { %v9778_v14 = vpop.f32.mrf.mxu0 }
 0x37b   : > { %v14660_v43 = vadd.f32 %v4664_v6, %v16472_v15  ;;  %v9779_v4 = vadd.f32 %v9778_v14, %v9777_v22  ;;  %v9827_v34 = vpop.f32.mrf.mxu1 }
 0x37c   : > { %v10606_v52 = vpop.f32.mrf.mxu0  ;;  %v9828_v59 = vadd.f32 %v9827_v34, %v9826_v56  ;;  %v5762_v56 = vld [vmem:[%s11154_s12 + $0x10] sm:$0xff]  ;;  %v10992_v34 = vld [vmem:[%s16297_s1 + $0x140] sm:$0xff]  }
 0x37d   : > { %v4667_v26 = vadd.f32 %v10587_v61, %v9779_v4  ;;  %v9829_v38 = vpop.f32.mrf.mxu1  ;;  %10698 = vmatprep.subr.bf16.mxu0 %v10992_v34 }
 0x37e   : > { %v5418_v32 = vadd.f32 %v10606_v52, %v9828_v59  ;;  %v5409_v35 = vpop.f32.mrf.mxu0  ;;  %v5760_v59 = vld [vmem:[%s11154_s12] sm:$0xff]  ;;  %10699 = vmatpush3.bf16.msra.mxu0 %v10992_v34 }
 0x37f   : > { %v14666_v5 = vadd.f32 %v4667_v26, %v16473_v49  ;;  %v5410_v39 = vadd.f32 %v9822_v19, %v5409_v35  ;;  %v9830_v62 = vpop.f32.mrf.mxu1 }
 0x380   : > { %v5570_v58 = vadd.f32 %v5418_v32, %v14533_v12  ;;  %v10607_v40 = vpop.f32.mrf.mxu0  ;;  %v9831_v41 = vadd.f32 %v9830_v62, %v9829_v38 }
 0x381   : > { %v5568_v61 = vadd.f32 %v5410_v39, %v14539_v33  ;;  %v9832_v16 = vpop.f32.mrf.mxu1  ;;  %v14680_v33 = vld [vmem:[%s16299_s3] ss:$0 sm:$0xff] }
 0x382   : > { %v5666_v45 = vmul.f32 %v14673_v20, %v5570_v58  ;;  %v5421_v51 = vadd.f32 %v10607_v40, %v9831_v41  ;;  %v5412_v11 = vpop.f32.mrf.mxu0  ;;  %v5763_v58 = vld [vmem:[%s11154_s12 + $0x18] sm:$0xff] }
 0x383   : > { %v5664_v12 = vmul.f32 %v14673_v20, %v5568_v61  ;;  %v5413_v37 = vadd.f32 %v9825_v46, %v5412_v11  ;;  %v9833_v50 = vpop.f32.mrf.mxu1 }
 0x384   : > { %v5698_v8 = vadd.f32 %v14680_v33, %v5666_v45  ;;  %v5571_v7 = vadd.f32 %v5421_v51, %v14542_v36  ;;  %v10610_v22 = vpop.f32.mrf.mxu0  ;;  %v9834_v6 = vadd.f32 %v9833_v50, %v9832_v16  ;;  %v5761_v16 = vld [vmem:[%s11154_s12 + $0x8] sm:$0xff] }
 0x385   : > { %v5696_v14 = vadd.f32 %v14680_v33, %v5664_v12  ;;  %v5569_v15 = vadd.f32 %v5413_v37, %v14545_v29  ;;  %v9835_v4 = vpop.f32.mrf.mxu1 }
 0x386   : > { %v5730_v52 = vmax.f32 %v5698_v8, 0.0  ;;  %v5667_v19 = vmul.f32 %v14673_v20, %v5571_v7  ;;  %v5425_v26 = vpop.f32.mrf.mxu0 }
 0x387   : > { %v5728_v38 = vmax.f32 %v5696_v14, 0.0  ;;  %v5665_v36 = vmul.f32 %v14673_v20, %v5569_v15  ;;  %v5426_v32 = vadd.f32 %v9834_v6, %v5425_v26  ;;  %v9836_v35 = vpop.f32.mrf.mxu1  ;;  %v5764_v15 = vld [vmem:[%s11154_s12 + $0x20] sm:$0xff] }
 0x388   : > { %v5794_v18 = vadd.f32 %v5762_v56, %v5730_v52  ;;  %v5699_v29 = vadd.f32 %v14680_v33, %v5667_v19  ;;  %v10611_v49 = vpop.f32.mrf.mxu0  ;;  %v9837_v39 = vadd.f32 %v9836_v35, %v9835_v4  ;;  %v5765_v35 = vld [vmem:[%s11154_s12 + $0x28] sm:$0xff] }
 0x389   : > { %v5792_v62 = vadd.f32 %v5760_v59, %v5728_v38  ;;  %v5697_v40 = vadd.f32 %v14680_v33, %v5665_v36  ;;  %v5572_v41 = vadd.f32 %v5426_v32, %v14557_v30  ;;  %v9838_v46 = vpop.f32.mrf.mxu1 }
 0x38a   : > { %5826 = vst.msk [vmem:[#allocation2 + $0x30] sm:$0xff] %vm288_vm0, %v5794_v18  ;;  %v5731_v61 = vmax.f32 %v5699_v29, 0.0  ;;  %v5428_v45 = vpop.f32.mrf.mxu0 }
 0x38b   : > { %5824 = vst.msk [vmem:[#allocation2 + $0x18] sm:$0xff] %vm288_vm0, %v5792_v62  ;;  %v5729_v51 = vmax.f32 %v5697_v40, 0.0  ;;  %v5668_v11 = vmul.f32 %v14673_v20, %v5572_v41  ;;  %v5429_v12 = vadd.f32 %v9837_v39, %v5428_v45  ;;  %v9839_v37 = vpop.f32.mrf.mxu1 }
 0x38c   : > { %v5795_v50 = vadd.f32 %v5763_v58, %v5731_v61  ;;  %v9840_v8 = vadd.f32 %v9839_v37, %v9838_v46  ;;  %v14703_v56 = vpop.f32.mrf.mxu0  ;;  %v10997_v37 = vld [vmem:[%s16297_s1 + $0x1f8] sm:$0xff]  }
 0x38d   : > { %v5793_v7 = vadd.f32 %v5761_v16, %v5729_v51  ;;  %v5700_v6 = vadd.f32 %v14680_v33, %v5668_v11  ;;  %v5573_v30 = vadd.f32 %v5429_v12, %v14566_v55  ;;  %v9841_v14 = vpop.f32.mrf.mxu1  ;;  %v5766_v16 = vld [vmem:[%s11154_s12 + $0x30] sm:$0xff]  ;;  %10212 = vmatprep.subr.bf16.mxu0 %v10997_v37 }
 0x38e   : > { %5827 = vst.msk [vmem:[#allocation2 + $0x38] sm:$0xff] %vm288_vm0, %v5795_v50  ;;  %v5434_v4 = vadd.f32 %v10610_v22, %v9840_v8  ;;  %v5441_v36 = vpop.f32.mrf.mxu0 }
 0x38f   : > { %5825 = vst.msk [vmem:[#allocation2 + $0x20] sm:$0xff] %vm288_vm0, %v5793_v7  ;;  %v5732_v34 = vmax.f32 %v5700_v6, 0.0  ;;  %v5669_v52 = vmul.f32 %v14673_v20, %v5573_v30  ;;  %v9842_v59 = vpop.f32.mrf.mxu1  ;;  %v16474_v6 = vld [vmem:[#allocation10_spill] sm:$0xff] }
 0x390   : > { %v5574_v19 = vadd.f32 %v5434_v4, %v14551_v21  ;;  %v9843_v26 = vadd.f32 %v9842_v59, %v9841_v14  ;;  %v14719_v45 = vpop.f32.mrf.mxu0 }
 0x391   : > { %v5796_v38 = vadd.f32 %v5764_v15, %v5732_v34  ;;  %v5701_v55 = vadd.f32 %v14680_v33, %v5669_v52  ;;  %v9844_v32 = vpop.f32.mrf.mxu1  ;;  %v14713_v39 = vld [vmem:[#allocation2 + $0x30] sm:$0xff] }
 0x392   : > { %v5670_v18 = vmul.f32 %v14673_v20, %v5574_v19  ;;  %v5437_v29 = vadd.f32 %v10611_v49, %v9843_v26  ;;  %v5859_v22 = vld [vmem:[#allocation2 + $0x18] sm:$0xff]  ;;  %v6022_v12 = vrot.slane %v14713_v39, 1 }
 0x393   : > { %5828 = vst.msk [vmem:[#allocation2 + $0x48] sm:$0xff] %vm288_vm0, %v5796_v38  ;;  %v5733_v62 = vmax.f32 %v5701_v55, 0.0  ;;  %v9845_v58 = vpop.f32.mrf.mxu1  ;;  %v5907_v40 = vrot.slane %v5859_v22, 7  ;;  %v6019_v11 = vrot.slane %v5859_v22, 1 }
 0x394   : > { %v5702_v21 = vadd.f32 %v14680_v33, %v5670_v18  ;;  %v5575_v41 = vadd.f32 %v5437_v29, %v14563_v31  ;;  %v9846_v46 = vadd.f32 %v9845_v58, %v9844_v32  ;;  %v5444_v32 = vpop.f32.mrf.mxu0 }
 0x395   : > { %v5797_v61 = vadd.f32 %v5765_v35, %v5733_v62  ;;  %v9847_v51 = vpop.f32.mrf.mxu1  ;;  %v14721_v49 = vld [vmem:[#allocation2 + $0x38] sm:$0xff]  ;;  %v5981_v14 = vsel %vm419_vm1, %v16474_v6, %v5907_v40  ;;  %v16476_v35 = vld [vmem:[#allocation11_spill] sm:$0xff] }
 0x396   : > { %v5734_v50 = vmax.f32 %v5702_v21, 0.0  ;;  %v5671_v8 = vmul.f32 %v14673_v20, %v5575_v41  ;;  %v5442_v31 = vadd.f32 %v9846_v46, %v5441_v36  ;;  %v5860_v7 = vld [vmem:[#allocation2 + $0x20] sm:$0xff]  ;;  %v5911_v59 = vrot.slane %v14721_v49, 7  ;;  %v5767_v36 = vld [vmem:[%s11154_s12 + $0x38] sm:$0xff] }
 0x397   : > { %5829 = vst.msk [vmem:[#allocation2 + $0x50] sm:$0xff] %vm288_vm0, %v5797_v61  ;;  %v5908_v15 = vrot.slane %v5860_v7, 7  ;;  %v6001_v4 = vpack.c.bf16 %v5860_v7, %v5859_v22  ;;  %v6020_v34 = vrot.slane %v5860_v7, 1  ;;  %v9848_v52 = vpop.f32.mrf.mxu1  ;;  %v6023_v58 = vrot.slane %v14721_v49, 1 }
 0x398   : > { %v5798_v19 = vadd.f32 %v5766_v16, %v5734_v50  ;;  %v5703_v26 = vadd.f32 %v14680_v33, %v5671_v8  ;;  %v5576_v38 = vadd.f32 %v5442_v31, %v14577_v3  ;;  %v9849_v55 = vadd.f32 %v9848_v52, %v9847_v51  ;;  %v10979_v3 = vld [vmem:[%s16297_s1 + $0xf8] sm:$0xff]   ;;  %v10980_v16 = vld [vmem:[%s16297_s1 + $0x130] sm:$0xff]  }
 0x399   : > { %v6092_v18 = vsel %vm532_vm2, %v6020_v34, %v16476_v35  ;;  %v6093_v29 = vsel %vm532_vm2, %v6019_v11, %v6020_v34  ;;  %6344 = vmatprep.mubr.bf16.mxu0 %v6001_v4  ;;  %v9850_v22 = vpop.f32.mrf.mxu1  ;;  %v5980_v62 = vsel %vm419_vm1, %v5907_v40, %v5908_v15  ;;  %v6002_v40 = vpack.c.bf16 %v14721_v49, %v14713_v39  ;;  %v5768_v49 = vld [vmem:[%s11154_s12 + $0x40] sm:$0xff] }
 0x39a   : > { %5830 = vst.msk [vmem:[#allocation2 + $0x60] sm:$0xff] %vm288_vm0, %v5798_v19  ;;  %v5735_v21 = vmax.f32 %v5703_v26, 0.0  ;;  %v5672_v41 = vmul.f32 %v14673_v20, %v5576_v38  ;;  %v6097_v46 = vpack.c.bf16 %v6092_v18, %v6093_v29  ;;  %v5445_v61 = vadd.f32 %v9849_v55, %v5444_v32  ;;  %v14761_v4 = vld [vmem:[#allocation2 + $0x48] sm:$0xff] }
 0x39b   : > { %v5985_v51 = vpack.c.bf16 %v5980_v62, %v5981_v14  ;;  %v9851_v11 = vpop.f32.mrf.mxu1  ;;  %v6090_v37 = vsel %vm532_vm2, %v6023_v58, %v16476_v35  ;;  %v6091_v50 = vsel %vm532_vm2, %v6022_v12, %v6023_v58  ;;  %v14763_v14 = vpop.f32.mrf.mxu0  ;;  %v5910_v34 = vrot.slane %v14713_v39, 7  ;;  %v10981_v12 = vld [vmem:[%s16297_s1 + $0xf0] sm:$0xff]   ;;  %v10983_v39 = vld [vmem:[%s16297_s1 + $0x128] sm:$0xff]  }
 0x39c   : > { %v5799_v8 = vadd.f32 %v5767_v36, %v5735_v21  ;;  %v5704_v31 = vadd.f32 %v14680_v33, %v5672_v41  ;;  %v5577_v7 = vadd.f32 %v5445_v61, %v14583_v28  ;;  %10653 = vmatmul.mubr.bf16.vlgmr.msra.gmra.mxu1 %v6097_v46  ;;  %v9852_v15 = vadd.f32 %v9851_v11, %v9850_v22  ;;  %v5769_v21 = vld [vmem:[%s11154_s12 + $0x48] sm:$0xff] }
 0x39d   : > { %6345 = vmatmul.mubr.bf16.gmra.mxu0 %v5985_v51  ;;  %v6098_v52 = vpack.c.bf16 %v6090_v37, %v6091_v50  ;;  %v9853_v19 = vpop.f32.mrf.mxu1  ;;  %10077 = vmatpush3.bf16.msra.mxu1 %v10979_v3  ;;  %v5978_v32 = vsel %vm419_vm1, %v5910_v34, %v5911_v59  ;;  %v6025_v18 = vrot.slane %v14761_v4, 1  ;;  %v5457_v3 = vpop.f32.mrf.mxu0  ;;  %v5979_v46 = vsel %vm419_vm1, %v16474_v6, %v5910_v34  ;;  %v10985_v37 = vld [vmem:[%s16297_s1 + $0x120] sm:$0xff]  }
 0x39e   : > { %5831 = vst.msk [vmem:[#allocation2 + $0x68] sm:$0xff] %vm288_vm0, %v5799_v8  ;;  %v5736_v28 = vmax.f32 %v5704_v31, 0.0  ;;  %v5673_v26 = vmul.f32 %v14673_v20, %v5577_v7  ;;  %6352 = vmatprep.mubr.bf16.mxu0 %v6002_v40  ;;  %v5450_v38 = vadd.f32 %v14703_v56, %v9852_v15  ;;  %v5866_v55 = vld [vmem:[#allocation2 + $0x50] sm:$0xff]  ;;  %10078 = vmatprep.subr.bf16.mxu1 %v10980_v16 }
 0x39f   : > { %10656 = vmatprep.mubr.bf16.mxu1 %v6098_v52  ;;  %v9854_v36 = vpop.f32.mrf.mxu1  ;;  %v6026_v29 = vrot.slane %v5866_v55, 1  ;;  %v5986_v50 = vpack.c.bf16 %v5978_v32, %v5979_v46  ;;  %v5914_v8 = vrot.slane %v5866_v55, 7  ;;  %v6003_v31 = vpack.c.bf16 %v5866_v55, %v14761_v4  ;;  %v10986_v55 = vld [vmem:[%s16297_s1 + $0xe0] sm:$0xff]  }
 0x3a0   : > { %v5800_v22 = vadd.f32 %v5768_v49, %v5736_v28  ;;  %v5705_v62 = vadd.f32 %v14680_v33, %v5673_v26  ;;  %v5578_v58 = vadd.f32 %v5450_v38, %v14571_v23  ;;  %v9855_v56 = vadd.f32 %v9854_v36, %v9853_v19  ;;  %v10984_v23 = vld [vmem:[%s16297_s1 + $0xe8] sm:$0xff]  }
 0x3a1   : > { %v9856_v41 = vpop.f32.mrf.mxu1  ;;  %v6088_v59 = vsel %vm532_vm2, %v6026_v29, %v16476_v35  ;;  %v6089_v61 = vsel %vm532_vm2, %v6025_v18, %v6026_v29  ;;  %10079 = vmatpush3.bf16.msra.mxu1 %v10981_v12  ;;  %v14802_v19 = vld [vmem:[#allocation2 + $0x60] sm:$0xff]  ;;  %v5770_v12 = vld [vmem:[%s11154_s12 + $0x50] sm:$0xff]  ;;  %v5913_v28 = vrot.slane %v14761_v4, 7  ;;  %v10988_v4 = vld [vmem:[%s16297_s1 + $0x118] sm:$0xff]  }
 0x3a2   : > { %5832 = vst.msk [vmem:[#allocation2 + $0x78] sm:$0xff] %vm288_vm0, %v5800_v22  ;;  %v5737_v16 = vmax.f32 %v5705_v62, 0.0  ;;  %v5674_v51 = vmul.f32 %v14673_v20, %v5578_v58  ;;  %v5453_v40 = vadd.f32 %v14719_v45, %v9855_v56  ;;  %v6099_v11 = vpack.c.bf16 %v6088_v59, %v6089_v61  ;;  %10080 = vmatprep.subr.bf16.mxu1 %v10983_v39  ;;  %v14804_v45 = vpop.f32.mrf.mxu0 }
 0x3a3   : > { %v9857_v7 = vpop.f32.mrf.mxu1  ;;  %v5976_v18 = vsel %vm419_vm1, %v5913_v28, %v5914_v8  ;;  %v6028_v29 = vrot.slane %v14802_v19, 1  ;;  %v5977_v59 = vsel %vm419_vm1, %v16474_v6, %v5913_v28 }
 0x3a4   : > { %v5801_v15 = vadd.f32 %v5769_v21, %v5737_v16  ;;  %v5706_v49 = vadd.f32 %v14680_v33, %v5674_v51  ;;  %v5579_v34 = vadd.f32 %v5453_v40, %v14580_v63  ;;  %v9858_v52 = vadd.f32 %v9857_v7, %v9856_v41  ;;  %10657 = vmatmul.mubr.bf16.gmra.mxu1 %v6099_v11  ;;  %v5460_v41 = vpop.f32.mrf.mxu0 }
 0x3a5   : > { %6353 = vmatmul.mubr.bf16.gmra.mxu0 %v5986_v50  ;;  %v9859_v26 = vpop.f32.mrf.mxu1  ;;  %v5869_v38 = vld [vmem:[#allocation2 + $0x68] sm:$0xff]  ;;  %10081 = vmatpush3.bf16.msra.mxu1 %v10984_v23  ;;  %v5987_v50 = vpack.c.bf16 %v5976_v18, %v5977_v59 }
 0x3a6   : > { %5833 = vst.msk [vmem:[#allocation2 + $0x80] sm:$0xff] %vm288_vm0, %v5801_v15  ;;  %v5738_v63 = vmax.f32 %v5706_v49, 0.0  ;;  %v5675_v39 = vmul.f32 %v14673_v20, %v5579_v34  ;;  %6360 = vmatprep.mubr.bf16.mxu0 %v6003_v31  ;;  %v5458_v36 = vadd.f32 %v9858_v52, %v5457_v3  ;;  %10082 = vmatprep.subr.bf16.mxu1 %v10985_v37  ;;  %v6029_v22 = vrot.slane %v5869_v38, 1  ;;  %v5771_v3 = vld [vmem:[%s11154_s12 + $0x58] sm:$0xff]  ;;  %v10990_v37 = vld [vmem:[%s16297_s1 + $0x110] sm:$0xff]   ;;  %v14843_v28 = vpop.f32.mrf.mxu0 }
 0x3a7   : > { %v9860_v32 = vpop.f32.mrf.mxu1  ;;  %v5917_v8 = vrot.slane %v5869_v38, 7  ;;  %v6004_v31 = vpack.c.bf16 %v5869_v38, %v14802_v19  ;;  %v10991_v38 = vld [vmem:[%s16297_s1 + $0xd0] sm:$0xff]  }
 0x3a8   : > { %v5802_v62 = vadd.f32 %v5770_v12, %v5738_v63  ;;  %v5707_v58 = vadd.f32 %v14680_v33, %v5675_v39  ;;  %v5580_v56 = vadd.f32 %v5458_v36, %v14592_v9  ;;  %v9861_v21 = vadd.f32 %v9860_v32, %v9859_v26  ;;  %v10989_v9 = vld [vmem:[%s16297_s1 + $0xd8] sm:$0xff]   ;;  %v5772_v26 = vld [vmem:[%s11154_s12 + $0x60] sm:$0xff] }
 0x3a9   : > { %v9862_v46 = vpop.f32.mrf.mxu1  ;;  %v6086_v61 = vsel %vm532_vm2, %v6029_v22, %v16476_v35  ;;  %v6087_v23 = vsel %vm532_vm2, %v6028_v29, %v6029_v22  ;;  %10083 = vmatpush3.bf16.msra.mxu1 %v10986_v55  ;;  %v14841_v12 = vld [vmem:[#allocation2 + $0x78] sm:$0xff]  ;;  %v5916_v55 = vrot.slane %v14802_v19, 7  ;;  %v10993_v19 = vld [vmem:[%s16297_s1 + $0x108] sm:$0xff]  }
 0x3aa   : > { %5834 = vst.msk [vmem:[#allocation2 + $0x90] sm:$0xff] %vm288_vm0, %v5802_v62  ;;  %v5739_v16 = vmax.f32 %v5707_v58, 0.0  ;;  %v5676_v51 = vmul.f32 %v14673_v20, %v5580_v56  ;;  %v5461_v40 = vadd.f32 %v9861_v21, %v5460_v41  ;;  %v6100_v11 = vpack.c.bf16 %v6086_v61, %v6087_v23  ;;  %10084 = vmatprep.subr.bf16.mxu1 %v10988_v4  ;;  %v5473_v41 = vpop.f32.mrf.mxu0 }
 0x3ab   : > { %v9863_v7 = vpop.f32.mrf.mxu1  ;;  %v5974_v18 = vsel %vm419_vm1, %v5916_v55, %v5917_v8  ;;  %v6031_v29 = vrot.slane %v14841_v12, 1 }
 0x3ac   : > { %v5803_v15 = vadd.f32 %v5771_v3, %v5739_v16  ;;  %v5708_v49 = vadd.f32 %v14680_v33, %v5676_v51  ;;  %v5581_v34 = vadd.f32 %v5461_v40, %v14601_v54  ;;  %v9864_v52 = vadd.f32 %v9863_v7, %v9862_v46  ;;  %10660 = vmatprep.mubr.bf16.mxu1 %v6100_v11  ;;  %v10995_v40 = vld [vmem:[%s16297_s1 + $0x100] sm:$0xff]  }
 0x3ad   : > { %6361 = vmatmul.mubr.bf16.gmra.mxu0 %v5987_v50  ;;  %v9865_v63 = vpop.f32.mrf.mxu1  ;;  %v5872_v39 = vld [vmem:[#allocation2 + $0x80] sm:$0xff]  ;;  %10085 = vmatpush3.bf16.msra.mxu1 %v10989_v9  ;;  %v5975_v46 = vsel %vm419_vm1, %v16474_v6, %v5916_v55 }
 0x3ae   : > { %5835 = vst.msk [vmem:[#allocation2 + $0x98] sm:$0xff] %vm288_vm0, %v5803_v15  ;;  %v5740_v54 = vmax.f32 %v5708_v49, 0.0  ;;  %v5677_v36 = vmul.f32 %v14673_v20, %v5581_v34  ;;  %6368 = vmatprep.mubr.bf16.mxu0 %v6004_v31  ;;  %v5466_v4 = vadd.f32 %v14763_v14, %v9864_v52  ;;  %10086 = vmatprep.subr.bf16.mxu1 %v10990_v37  ;;  %v6032_v22 = vrot.slane %v5872_v39, 1  ;;  %v5773_v14 = vld [vmem:[%s11154_s12 + $0x68] sm:$0xff]  ;;  %v5774_v52 = vld [vmem:[%s11154_s12 + $0x70] sm:$0xff] }
 0x3af   : > { %v9866_v32 = vpop.f32.mrf.mxu1  ;;  %v5988_v11 = vpack.c.bf16 %v5974_v18, %v5975_v46  ;;  %v5920_v37 = vrot.slane %v5872_v39, 7  ;;  %v6005_v50 = vpack.c.bf16 %v5872_v39, %v14841_v12  ;;  %v10996_v39 = vld [vmem:[%s16297_s1 + $0xc0] sm:$0xff]  }
 0x3b0   : > { %v5804_v62 = vadd.f32 %v5772_v26, %v5740_v54  ;;  %v5709_v58 = vadd.f32 %v14680_v33, %v5677_v36  ;;  %v5582_v56 = vadd.f32 %v5466_v4, %v14586_v10  ;;  %v9867_v21 = vadd.f32 %v9866_v32, %v9865_v63  ;;  %v10994_v10 = vld [vmem:[%s16297_s1 + $0xc8] sm:$0xff]  }
 0x3b1   : > { %v9868_v3 = vpop.f32.mrf.mxu1  ;;  %v6084_v59 = vsel %vm532_vm2, %v6032_v22, %v16476_v35  ;;  %v6085_v61 = vsel %vm532_vm2, %v6031_v29, %v6032_v22  ;;  %10087 = vmatpush3.bf16.msra.mxu1 %v10991_v38  ;;  %v14882_v34 = vld [vmem:[#allocation2 + $0x90] sm:$0xff]  ;;  %v5919_v26 = vrot.slane %v14841_v12, 7  ;;  %v14896_v12 = vld [vmem:[%s16297_s1 + $0x238] sm:$0xff]  }
 0x3b2   : > { %5836 = vst.msk [vmem:[#allocation2 + $0xa8] sm:$0xff] %vm288_vm0, %v5804_v62  ;;  %v5741_v23 = vmax.f32 %v5709_v58, 0.0  ;;  %v5678_v9 = vmul.f32 %v14673_v20, %v5582_v56  ;;  %v5469_v16 = vadd.f32 %v14804_v45, %v9867_v21  ;;  %v6101_v51 = vpack.c.bf16 %v6084_v59, %v6085_v61  ;;  %10088 = vmatprep.subr.bf16.mxu1 %v10993_v19  ;;  %v14884_v45 = vpop.f32.mrf.mxu0  ;;  %v5775_v56 = vld [vmem:[%s11154_s12 + $0x78] sm:$0xff] }
 0x3b3   : > { %v9869_v8 = vpop.f32.mrf.mxu1  ;;  %v5972_v4 = vsel %vm419_vm1, %v5919_v26, %v5920_v37  ;;  %v6034_v19 = vrot.slane %v14882_v34, 1 }
 0x3b4   : > { %v5805_v31 = vadd.f32 %v5773_v14, %v5741_v23  ;;  %v5710_v7 = vadd.f32 %v14680_v33, %v5678_v9  ;;  %v5583_v15 = vadd.f32 %v5469_v16, %v14598_v2  ;;  %v9870_v49 = vadd.f32 %v9869_v8, %v9868_v3  ;;  %10661 = vmatmul.mubr.bf16.gmra.mxu1 %v6101_v51  ;;  %v5476_v58 = vpop.f32.mrf.mxu0 }
 0x3b5   : > { %6369 = vmatmul.mubr.bf16.gmra.mxu0 %v5988_v11  ;;  %v9871_v55 = vpop.f32.mrf.mxu1  ;;  %v5875_v63 = vld [vmem:[#allocation2 + $0x98] sm:$0xff]  ;;  %10089 = vmatpush3.bf16.msra.mxu1 %v10994_v10 }
 0x3b6   : > { %5837 = vst.msk [vmem:[#allocation2 + $0xb0] sm:$0xff] %vm288_vm0, %v5805_v31  ;;  %v5742_v2 = vmax.f32 %v5710_v7, 0.0  ;;  %v5679_v38 = vmul.f32 %v14673_v20, %v5583_v15  ;;  %6376 = vmatprep.mubr.bf16.mxu0 %v6005_v50  ;;  %v5474_v54 = vadd.f32 %v9870_v49, %v5473_v41  ;;  %10090 = vmatprep.subr.bf16.mxu1 %v10995_v40  ;;  %v6035_v32 = vrot.slane %v5875_v63, 1  ;;  %v14918_v8 = vpop.f32.mrf.mxu0  ;;  %v5776_v31 = vld [vmem:[%s11154_s12 + $0x80] sm:$0xff] }
 0x3b7   : > { %v9872_v36 = vpop.f32.mrf.mxu1  ;;  %v5973_v41 = vsel %vm419_vm1, %v16474_v6, %v5919_v26  ;;  %v5923_v23 = vrot.slane %v5875_v63, 7  ;;  %v6006_v9 = vpack.c.bf16 %v5875_v63, %v14882_v34  ;;  %v5922_v7 = vrot.slane %v14882_v34, 7 }
 0x3b8   : > { %v5806_v18 = vadd.f32 %v5774_v52, %v5742_v2  ;;  %v5711_v29 = vadd.f32 %v14680_v33, %v5679_v38  ;;  %v5584_v22 = vadd.f32 %v5474_v54, %v14607_v25  ;;  %v9873_v62 = vadd.f32 %v9872_v36, %v9871_v55 }
 0x3b9   : > { %v9874_v21 = vpop.f32.mrf.mxu1  ;;  %v6082_v14 = vsel %vm532_vm2, %v6035_v32, %v16476_v35  ;;  %v6083_v3 = vsel %vm532_vm2, %v6034_v19, %v6035_v32  ;;  %10091 = vmatpush3.bf16.msra.mxu1 %v10996_v39  ;;  %v5989_v10 = vpack.c.bf16 %v5972_v4, %v5973_v41  ;;  %v5877_v50 = vld [vmem:[#allocation2 + $0xa8] sm:$0xff]  ;;  %v5970_v63 = vsel %vm419_vm1, %v5922_v7, %v5923_v23  ;;  %v5489_v4 = vpop.f32.mrf.mxu0  ;;  %v5778_v23 = vld [vmem:[%s11154_s12 + $0x90] sm:$0xff] }
 0x3ba   : > { %5838 = vst.msk [vmem:[#allocation2 + $0xc0] sm:$0xff] %vm288_vm0, %v5806_v18  ;;  %v5743_v46 = vmax.f32 %v5711_v29, 0.0  ;;  %v5680_v25 = vmul.f32 %v14673_v20, %v5584_v22  ;;  %v5477_v59 = vadd.f32 %v9873_v62, %v5476_v58  ;;  %v6102_v61 = vpack.c.bf16 %v6082_v14, %v6083_v3  ;;  %10732 = vmatprep.subr.bf16.mxu1 %v14896_v12  ;;  %v5777_v19 = vld [vmem:[%s11154_s12 + $0x88] sm:$0xff] }
 0x3bb   : > { %v9875_v16 = vpop.f32.mrf.mxu1  ;;  %v6037_v39 = vrot.slane %v5877_v50, 1 }
 0x3bc   : > { %v5807_v51 = vadd.f32 %v5775_v56, %v5743_v46  ;;  %v5712_v40 = vadd.f32 %v14680_v33, %v5680_v25  ;;  %v5585_v11 = vadd.f32 %v5477_v59, %v14613_v47  ;;  %v9876_v37 = vadd.f32 %v9875_v16, %v9874_v21  ;;  %10664 = vmatprep.mubr.bf16.mxu1 %v6102_v61 }
 0x3bd   : > { %6377 = vmatmul.mubr.bf16.gmra.mxu0 %v5989_v10  ;;  %v9877_v15 = vpop.f32.mrf.mxu1  ;;  %v5878_v49 = vld [vmem:[#allocation2 + $0xb0] sm:$0xff]  ;;  %v14952_v10 = vpop.f32.mrf.mxu0 }
 0x3be   : > { %5839 = vst.msk [vmem:[#allocation2 + $0xc8] sm:$0xff] %vm288_vm0, %v5807_v51  ;;  %v5744_v52 = vmax.f32 %v5712_v40, 0.0  ;;  %v5681_v26 = vmul.f32 %v14673_v20, %v5585_v11  ;;  %6384 = vmatprep.mubr.bf16.mxu0 %v6006_v9  ;;  %v5482_v47 = vadd.f32 %v14843_v28, %v9876_v37  ;;  %v14927_v2 = vrot.slane %v5878_v49, 1 }
 0x3bf   : > { %v9878_v55 = vpop.f32.mrf.mxu1  ;;  %v5971_v28 = vsel %vm419_vm1, %v16474_v6, %v5922_v7  ;;  %v5926_v21 = vrot.slane %v5878_v49, 7  ;;  %v14948_v41 = vpack.c.bf16 %v5878_v49, %v5877_v50 }
 0x3c0   : > { %v5808_v38 = vadd.f32 %v5776_v31, %v5744_v52  ;;  %v5713_v34 = vadd.f32 %v14680_v33, %v5681_v26  ;;  %v5586_v54 = vadd.f32 %v5482_v47, %v14604_v1  ;;  %v9879_v36 = vadd.f32 %v9878_v55, %v9877_v15  ;;  %v5492_v26 = vpop.f32.mrf.mxu0  ;;  %v5779_v47 = vld [vmem:[%s11154_s12 + $0x98] sm:$0xff] }
 0x3c1   : > { %v9880_v32 = vpop.f32.mrf.mxu1  ;;  %v6080_v18 = vsel %vm532_vm2, %v14927_v2, %v16476_v35  ;;  %v14942_v29 = vsel %vm532_vm2, %v6037_v39, %v14927_v2  ;;  %v5990_v56 = vpack.c.bf16 %v5970_v63, %v5971_v28  ;;  %v5880_v61 = vld [vmem:[#allocation2 + $0xc0] sm:$0xff] }
 0x3c2   : > { %5840 = vst.msk [vmem:[#allocation2 + $0xd8] sm:$0xff] %vm288_vm0, %v5808_v38  ;;  %v5745_v1 = vmax.f32 %v5713_v34, 0.0  ;;  %v5682_v22 = vmul.f32 %v14673_v20, %v5586_v54  ;;  %v5485_v62 = vadd.f32 %v14884_v45, %v9879_v36  ;;  %v6103_v58 = vpack.c.bf16 %v6080_v18, %v14942_v29 }
 0x3c3   : > { %v9881_v14 = vpop.f32.mrf.mxu1  ;;  %v14955_v45 = vrot.slane %v5877_v50, 7  ;;  %v6040_v31 = vrot.slane %v5880_v61, 1 }
 0x3c4   : > { %v5809_v3 = vadd.f32 %v5777_v19, %v5745_v1  ;;  %v5714_v46 = vadd.f32 %v14680_v33, %v5682_v22  ;;  %v5587_v25 = vadd.f32 %v5485_v62, %v14610_v44  ;;  %v9882_v59 = vadd.f32 %v9881_v14, %v9880_v32  ;;  %10665 = vmatmul.mubr.bf16.gmra.mxu1 %v6103_v58 }
 0x3c5   : > { %6385 = vmatmul.mubr.bf16.gmra.mxu0 %v5990_v56  ;;  %v9883_v9 = vpop.f32.mrf.mxu1  ;;  %v5881_v16 = vld [vmem:[#allocation2 + $0xc8] sm:$0xff]  ;;  %v14963_v37 = vsel %vm419_vm1, %v14955_v45, %v5926_v21  ;;  %v5969_v63 = vsel %vm419_vm1, %v16474_v6, %v14955_v45  ;;  %v14991_v56 = vpop.f32.mrf.mxu0  ;;  %v5780_v21 = vld [vmem:[%s11154_s12 + $0xa0] sm:$0xff]  ;;  %v14994_v14 = vrot.slane %v5880_v61, 7 }
 0x3c6   : > { %5841 = vst.msk [vmem:[#allocation2 + $0xe0] sm:$0xff] %vm288_vm0, %v5809_v3  ;;  %v5746_v51 = vmax.f32 %v5714_v46, 0.0  ;;  %v5683_v40 = vmul.f32 %v14673_v20, %v5587_v25  ;;  %6392 = vmatprep.mubr.bf16.mxu0 %v14948_v41  ;;  %v5490_v44 = vadd.f32 %v9882_v59, %v5489_v4  ;;  %v14965_v50 = vrot.slane %v5881_v16, 1 }
 0x3c7   : > { %v9884_v11 = vpop.f32.mrf.mxu1  ;;  %v5991_v4 = vpack.c.bf16 %v14963_v37, %v5969_v63  ;;  %v5929_v19 = vrot.slane %v5881_v16, 7  ;;  %v14987_v32 = vpack.c.bf16 %v5881_v16, %v5880_v61 }
 0x3c8   : > { %v5810_v7 = vadd.f32 %v5778_v23, %v5746_v51  ;;  %v5715_v15 = vadd.f32 %v14680_v33, %v5683_v40  ;;  %v5588_v49 = vadd.f32 %v5490_v44, %v14619_v53  ;;  %v9885_v52 = vadd.f32 %v9884_v11, %v9883_v9 }
 0x3c9   : > { %v9886_v55 = vpop.f32.mrf.mxu1  ;;  %v6078_v39 = vsel %vm532_vm2, %v14965_v50, %v16476_v35  ;;  %v14981_v38 = vsel %vm532_vm2, %v6040_v31, %v14965_v50  ;;  %v5883_v58 = vld [vmem:[#allocation2 + $0xd8] sm:$0xff]  ;;  %v15003_v9 = vsel %vm419_vm1, %v14994_v14, %v5929_v19  ;;  %v5505_v31 = vpop.f32.mrf.mxu0 }
 0x3ca   : > { %5842 = vst.msk [vmem:[#allocation2 + $0xf0] sm:$0xff] %vm288_vm0, %v5810_v7  ;;  %v5747_v53 = vmax.f32 %v5715_v15, 0.0  ;;  %v5684_v34 = vmul.f32 %v14673_v20, %v5588_v49  ;;  %v5493_v54 = vadd.f32 %v9885_v52, %v5492_v26  ;;  %v6104_v36 = vpack.c.bf16 %v6078_v39, %v14981_v38  ;;  %v5781_v7 = vld [vmem:[%s11154_s12 + $0xa8] sm:$0xff] }
 0x3cb   : > { %v9887_v28 = vpop.f32.mrf.mxu1  ;;  %v6043_v61 = vrot.slane %v5883_v58, 1 }
 0x3cc   : > { %v5811_v18 = vadd.f32 %v5779_v47, %v5747_v53  ;;  %v5716_v1 = vadd.f32 %v14680_v33, %v5684_v34  ;;  %v5589_v22 = vadd.f32 %v5493_v54, %v14629_v57  ;;  %v9888_v62 = vadd.f32 %v9887_v28, %v9886_v55  ;;  %10668 = vmatprep.mubr.bf16.mxu1 %v6104_v36  ;;  %v11033_v54 = vld [vmem:[#allocation2] sm:$0xff] }
 0x3cd   : > { %6393 = vmatmul.mubr.bf16.gmra.mxu0 %v5991_v4  ;;  %v9889_v3 = vpop.f32.mrf.mxu1  ;;  %v5884_v46 = vld [vmem:[#allocation2 + $0xe0] sm:$0xff]  ;;  %v15030_v36 = vrot.slane %v11033_v54, 1 }
 0x3ce   : > { %5843 = vst.msk [vmem:[#allocation2 + $0xf8] sm:$0xff] %vm288_vm0, %v5811_v18  ;;  %v5748_v25 = vmax.f32 %v5716_v1, 0.0  ;;  %v5685_v59 = vmul.f32 %v14673_v20, %v5589_v22  ;;  %6400 = vmatprep.mubr.bf16.mxu0 %v14987_v32  ;;  %v5498_v57 = vadd.f32 %v14918_v8, %v9888_v62  ;;  %v15005_v16 = vrot.slane %v5884_v46, 1  ;;  %v5782_v22 = vld [vmem:[%s11154_s12 + $0xb0] sm:$0xff] }
 0x3cf   : > { %v9890_v23 = vpop.f32.mrf.mxu1  ;;  %v5967_v8 = vsel %vm419_vm1, %v16474_v6, %v14994_v14  ;;  %v5932_v39 = vrot.slane %v5884_v46, 7  ;;  %v15028_v53 = vpack.c.bf16 %v5884_v46, %v5883_v58  ;;  %v15037_v62 = vrot.slane %v5883_v58, 7 }
 0x3d0   : > { %v5812_v51 = vadd.f32 %v5780_v21, %v5748_v25  ;;  %v5717_v40 = vadd.f32 %v14680_v33, %v5685_v59  ;;  %v5590_v44 = vadd.f32 %v5498_v57, %v14616_v27  ;;  %v9891_v11 = vadd.f32 %v9890_v23, %v9889_v3 }
 0x3d1   : > { %v9892_v15 = vpop.f32.mrf.mxu1  ;;  %v6076_v49 = vsel %vm532_vm2, %v15005_v16, %v16476_v35  ;;  %v15021_v52 = vsel %vm532_vm2, %v6043_v61, %v15005_v16  ;;  %v5992_v63 = vpack.c.bf16 %v15003_v9, %v5967_v8  ;;  %v5886_v1 = vld [vmem:[#allocation2 + $0xf0] sm:$0xff]  ;;  %v15043_v46 = vsel %vm532_vm2, %v14927_v2, %v15030_v36  ;;  %v5787_v2 = vld [vmem:[%s11154_s12 + $0xd8] sm:$0xff] }
 0x3d2   : > { %5844 = vst.msk [vmem:[#allocation2 + $0x108] sm:$0xff] %vm288_vm0, %v5812_v51  ;;  %v5749_v27 = vmax.f32 %v5717_v40, 0.0  ;;  %v5686_v26 = vmul.f32 %v14673_v20, %v5590_v44  ;;  %v5501_v47 = vadd.f32 %v14952_v10, %v9891_v11  ;;  %v6105_v55 = vpack.c.bf16 %v6076_v49, %v15021_v52  ;;  %v15034_v10 = vpop.f32.mrf.mxu0 }
 0x3d3   : > { %v9893_v34 = vpop.f32.mrf.mxu1  ;;  %v15051_v58 = vsel %vm419_vm1, %v15037_v62, %v5932_v39  ;;  %v6046_v23 = vrot.slane %v5886_v1, 1  ;;  %v5965_v8 = vsel %vm419_vm1, %v16474_v6, %v15037_v62  ;;  %v15076_v39 = vld [vmem:[#allocation2 + $0x18] sm:$0xff] }
 0x3d4   : > { %v5813_v4 = vadd.f32 %v5781_v7, %v5749_v27  ;;  %v5718_v19 = vadd.f32 %v14680_v33, %v5686_v26  ;;  %v5591_v28 = vadd.f32 %v5501_v47, %v14627_v60  ;;  %v9894_v18 = vadd.f32 %v9893_v34, %v9892_v15  ;;  %10669 = vmatmul.mubr.bf16.gmra.mxu1 %v6105_v55  ;;  %v5508_v7 = vpop.f32.mrf.mxu0  ;;  %v15078_v34 = vld [vmem:[#allocation2 + $0x20] sm:$0xff] }
 0x3d5   : > { %6401 = vmatmul.mubr.bf16.gmra.mxu0 %v5992_v63  ;;  %v9895_v21 = vpop.f32.mrf.mxu1  ;;  %v5887_v3 = vld [vmem:[#allocation2 + $0xf8] sm:$0xff] }
 0x3d6   : > { %5845 = vst.msk [vmem:[#allocation2 + $0x110] sm:$0xff] %vm288_vm0, %v5813_v4  ;;  %v5750_v60 = vmax.f32 %v5718_v19, 0.0  ;;  %v5687_v25 = vmul.f32 %v14673_v20, %v5591_v28  ;;  %6408 = vmatprep.mubr.bf16.mxu0 %v15028_v53  ;;  %v5506_v59 = vadd.f32 %v9894_v18, %v5505_v31  ;;  %v15053_v61 = vrot.slane %v5887_v3, 1  ;;  %v5783_v31 = vld [vmem:[%s11154_s12 + $0xb8] sm:$0xff]  ;;  %v15085_v18 = vpop.f32.mrf.mxu0 }
 0x3d7   : > { %v9896_v57 = vpop.f32.mrf.mxu1  ;;  %v5935_v49 = vrot.slane %v5887_v3, 7  ;;  %v15081_v4 = vrot.slane %v5886_v1, 7  ;;  %v15083_v19 = vpack.c.bf16 %v5887_v3, %v5886_v1  ;;  %v6706_v1 = vrot.slane %v15076_v39, 7 }
 0x3d8   : > { %v5814_v51 = vadd.f32 %v5782_v22, %v5750_v60  ;;  %v5719_v40 = vadd.f32 %v14680_v33, %v5687_v25  ;;  %v5592_v44 = vadd.f32 %v5506_v59, %v14637_v17  ;;  %v9897_v11 = vadd.f32 %v9896_v57, %v9895_v21 }
 0x3d9   : > { %v9898_v15 = vpop.f32.mrf.mxu1  ;;  %v6074_v27 = vsel %vm532_vm2, %v15053_v61, %v16476_v35  ;;  %v15071_v26 = vsel %vm532_vm2, %v6046_v23, %v15053_v61  ;;  %v5993_v35 = vpack.c.bf16 %v15051_v58, %v5965_v8  ;;  %16477 = vst [vmem:[#allocation13_spill] sm:$0xff] %v15083_v19  ;;  %v15087_v22 = vrot.slane %v11033_v54, 7  ;;  %v5889_v57 = vld [vmem:[#allocation2 + $0x108] sm:$0xff]  ;;  %v5784_v23 = vld [vmem:[%s11154_s12 + $0xc0] sm:$0xff]  ;;  %v5521_v8 = vpop.f32.mrf.mxu0 }
 0x3da   : > { %5846 = vst.msk [vmem:[#allocation2 + $0x120] sm:$0xff] %vm288_vm0, %v5814_v51  ;;  %v5751_v17 = vmax.f32 %v5719_v40, 0.0  ;;  %v5688_v47 = vmul.f32 %v14673_v20, %v5592_v44  ;;  %v5509_v55 = vadd.f32 %v9897_v11, %v5508_v7  ;;  %v6106_v63 = vpack.c.bf16 %v6074_v27, %v15071_v26 }
 0x3db   : > { %v9899_v28 = vpop.f32.mrf.mxu1  ;;  %v6707_v3 = vrot.slane %v15078_v34, 7  ;;  %v15100_v54 = vsel %vm532_vm2, %v14965_v50, %v15030_v36  ;;  %v15109_v7 = vsel %vm419_vm1, %v15081_v4, %v5935_v49 }
 0x3dc   : > { %v5815_v21 = vadd.f32 %v5783_v31, %v5751_v17  ;;  %v5720_v60 = vadd.f32 %v14680_v33, %v5688_v47  ;;  %v5593_v25 = vadd.f32 %v5509_v55, %v14640_v42  ;;  %v9900_v59 = vadd.f32 %v9899_v28, %v9898_v15  ;;  %10672 = vmatprep.mubr.bf16.mxu1 %v6106_v63  ;;  %v5785_v55 = vld [vmem:[%s11154_s12 + $0xc8] sm:$0xff] }
 0x3dd   : > { %6409 = vmatmul.mubr.bf16.gmra.mxu0 %v5993_v35  ;;  %v9901_v51 = vpop.f32.mrf.mxu1  ;;  %v15092_v40 = vld [vmem:[#allocation2 + $0x110] sm:$0xff]  ;;  %v6049_v15 = vrot.slane %v5889_v57, 1  ;;  %v5963_v35 = vsel %vm419_vm1, %v16474_v6, %v15081_v4 }
 0x3de   : > { %5847 = vst.msk [vmem:[#allocation2 + $0x128] sm:$0xff] %vm288_vm0, %v5815_v21  ;;  %v5752_v42 = vmax.f32 %v5720_v60, 0.0  ;;  %v5689_v44 = vmul.f32 %v14673_v20, %v5593_v25  ;;  %6416 = vmatprep.mubr.bf16.mxu0 %v15083_v19  ;;  %v5514_v11 = vadd.f32 %v14991_v56, %v9900_v59  ;;  %v6050_v50 = vrot.slane %v15092_v40, 1  ;;  %v15138_v21 = vld [vmem:[%s16298_s2] ss:$0 sm:$0xff] }
 0x3df   : > { %v9902_v31 = vpop.f32.mrf.mxu1  ;;  %v15118_v20 = vsel %vm532_vm2, %v15005_v16, %v15030_v36 }
 0x3e0   : > { %v5816_v56 = vadd.f32 %v5784_v23, %v5752_v42  ;;  %v5721_v17 = vadd.f32 %v14680_v33, %v5689_v44  ;;  %v5594_v49 = vadd.f32 %v5514_v11, %v14643_v24  ;;  %v9903_v47 = vadd.f32 %v9902_v31, %v9901_v51  ;;  %v15144_v23 = vld [vmem:[#allocation2 + $0x60] sm:$0xff]  ;;  %v15151_v31 = vpop.f32.mrf.mxu0 }
 0x3e1   : > { %v9904_v63 = vpop.f32.mrf.mxu1  ;;  %v6072_v28 = vsel %vm532_vm2, %v6050_v50, %v15030_v36  ;;  %v6073_v16 = vsel %vm532_vm2, %v6049_v15, %v6050_v50  ;;  %v5994_v51 = vpack.c.bf16 %v15109_v7, %v5963_v35  ;;  %v5938_v42 = vrot.slane %v15092_v40, 7  ;;  %v5786_v35 = vld [vmem:[%s11154_s12 + $0xd0] sm:$0xff] }
 0x3e2   : > { %5848 = vst.msk [vmem:[#allocation2 + $0x138] sm:$0xff] %vm288_vm0, %v5816_v56  ;;  %v5753_v24 = vmax.f32 %v5721_v17, 0.0  ;;  %v5690_v60 = vmul.f32 %v15138_v21, %v5594_v49  ;;  %v5517_v25 = vadd.f32 %v15034_v10, %v9903_v47  ;;  %v15142_v59 = vpack.c.bf16 %v6072_v28, %v6073_v16  ;;  %v15158_v10 = vld [vmem:[#allocation2 + $0x68] sm:$0xff]  ;;  %v15163_v56 = vld [vmem:[%s16299_s3] ss:$0 sm:$0xff]  ;;  %v5524_v33 = vpop.f32.mrf.mxu0 }
 0x3e3   : > { %v15149_v44 = vpack.c.bf16 %v15092_v40, %v5889_v57  ;;  %v9905_v11 = vpop.f32.mrf.mxu1  ;;  %v15156_v15 = vsel %vm419_vm1, %v15087_v22, %v6706_v1  ;;  %v15168_v47 = vld [vmem:[#allocation2 + $0x120] sm:$0xff]  ;;  %v15171_v28 = vrot.slane %v5889_v57, 7 }
 0x3e4   : > { %v5817_v50 = vadd.f32 %v5785_v55, %v5753_v24  ;;  %v5722_v17 = vadd.f32 %v15163_v56, %v5690_v60  ;;  %v5595_v40 = vadd.f32 %v5517_v25, %v14649_v48  ;;  %v9906_v49 = vadd.f32 %v9905_v11, %v9904_v63  ;;  %10673 = vmatmul.mubr.bf16.gmra.mxu1 %v15142_v59 }
 0x3e5   : > { %16478 = vst [vmem:[#allocation14_spill] sm:$0xff] %v15149_v44  ;;  %6417 = vmatmul.mubr.bf16.gmra.mxu0 %v5994_v51  ;;  %v9907_v16 = vpop.f32.mrf.mxu1  ;;  %v5893_v55 = vld [vmem:[#allocation2 + $0x128] sm:$0xff]  ;;  %v15175_v24 = vsel %vm419_vm1, %v6706_v1, %v6707_v3  ;;  %v6716_v51 = vrot.slane %v15158_v10, 7  ;;  %v15187_v1 = vsel %vm419_vm1, %v15171_v28, %v5938_v42  ;;  %v6052_v3 = vrot.slane %v15168_v47, 1 }
 0x3e6   : > { %5849 = vst.msk [vmem:[#allocation2 + $0x140] sm:$0xff] %vm288_vm0, %v5817_v50  ;;  %v5754_v63 = vmax.f32 %v5722_v17, 0.0  ;;  %v5691_v25 = vmul.f32 %v15138_v21, %v5595_v40  ;;  %6424 = vmatprep.mubr.bf16.mxu0 %v15149_v44  ;;  %v5522_v57 = vadd.f32 %v9906_v49, %v5521_v8  ;;  %v6053_v27 = vrot.slane %v5893_v55, 1 }
 0x3e7   : > { %v9908_v11 = vpop.f32.mrf.mxu1  ;;  %v15194_v50 = vsel %vm532_vm2, %v15053_v61, %v15030_v36  ;;  %v5961_v42 = vsel %vm419_vm1, %v16474_v6, %v15171_v28  ;;  %v5940_v48 = vrot.slane %v15168_v47, 7  ;;  %v15217_v44 = vpack.c.bf16 %v5893_v55, %v15168_v47 }
 0x3e8   : > { %v5818_v17 = vadd.f32 %v5786_v35, %v5754_v63  ;;  %v5723_v8 = vadd.f32 %v15163_v56, %v5691_v25  ;;  %v5596_v40 = vadd.f32 %v5522_v57, %v14654_v0  ;;  %v9909_v49 = vadd.f32 %v9908_v11, %v9907_v16  ;;  %v15213_v57 = vld [vmem:[#allocation2 + $0x78] sm:$0xff] }
 0x3e9   : > { %v9910_v60 = vpop.f32.mrf.mxu1  ;;  %v6070_v61 = vsel %vm532_vm2, %v6053_v27, %v15030_v36  ;;  %v6071_v35 = vsel %vm532_vm2, %v6052_v3, %v6053_v27  ;;  %v5995_v6 = vpack.c.bf16 %v15187_v1, %v5961_v42  ;;  %v5941_v11 = vrot.slane %v5893_v55, 7  ;;  %16479 = vst [vmem:[#allocation16_spill] sm:$0xff] %v15217_v44 }
 0x3ea   : > { %5850 = vst.msk [vmem:[#allocation2 + $0x150] sm:$0xff] %vm288_vm0, %v5818_v17  ;;  %v5755_v0 = vmax.f32 %v5723_v8, 0.0  ;;  %v5692_v16 = vmul.f32 %v15138_v21, %v5596_v40  ;;  %v5525_v63 = vadd.f32 %v9909_v49, %v5524_v33  ;;  %v15211_v25 = vpack.c.bf16 %v6070_v61, %v6071_v35  ;;  %v5895_v40 = vld [vmem:[#allocation2 + $0x138] sm:$0xff]  ;;  %v5788_v49 = vld [vmem:[%s11154_s12 + $0xe0] sm:$0xff] }
 0x3eb   : > { %v9911_v19 = vpop.f32.mrf.mxu1  ;;  %v16480_v55 = vrot.slane %v15144_v23, 7 }
 0x3ec   : > { %v5819_v3 = vadd.f32 %v5787_v2, %v5755_v0  ;;  %v5724_v17 = vadd.f32 %v15163_v56, %v5692_v16  ;;  %v5597_v8 = vadd.f32 %v5525_v63, %v14657_v13  ;;  %v9912_v33 = vadd.f32 %v9911_v19, %v9910_v60  ;;  %10676 = vmatprep.mubr.bf16.mxu1 %v15211_v25  ;;  %v15240_v16 = vld [vmem:[#allocation2 + $0x80] sm:$0xff] }
 0x3ed   : > { %6425 = vmatmul.mubr.bf16.gmra.mxu0 %v5995_v6  ;;  %v9913_v42 = vpop.f32.mrf.mxu1  ;;  %v5896_v61 = vld [vmem:[#allocation2 + $0x140] sm:$0xff]  ;;  %v15230_v35 = vsel %vm419_vm1, %v16480_v55, %v6716_v51  ;;  %v5959_v0 = vsel %vm419_vm1, %v15087_v22, %v5940_v48  ;;  %v5958_v63 = vsel %vm419_vm1, %v5940_v48, %v5941_v11  ;;  %v5943_v6 = vrot.slane %v5895_v40, 7 }
 0x3ee   : > { %5851 = vst.msk [vmem:[#allocation2 + $0x158] sm:$0xff] %vm288_vm0, %v5819_v3  ;;  %v5756_v13 = vmax.f32 %v5724_v17, 0.0  ;;  %v5693_v19 = vmul.f32 %v15138_v21, %v5597_v8  ;;  %6432 = vmatprep.mubr.bf16.mxu0 %v15217_v44  ;;  %v5530_v60 = vadd.f32 %v15085_v18, %v9912_v33  ;;  %v6055_v3 = vrot.slane %v5895_v40, 1  ;;  %v5789_v18 = vld [vmem:[%s11154_s12 + $0xe8] sm:$0xff] }
 0x3ef   : > { %v9914_v51 = vpop.f32.mrf.mxu1  ;;  %v6056_v55 = vrot.slane %v5896_v61, 1  ;;  %v5944_v33 = vrot.slane %v5896_v61, 7  ;;  %v6719_v48 = vrot.slane %v15240_v16, 7 }
 0x3f0   : > { %v5820_v17 = vadd.f32 %v5788_v49, %v5756_v13  ;;  %v5725_v8 = vadd.f32 %v15163_v56, %v5693_v19  ;;  %v5598_v27 = vadd.f32 %v5530_v60, %v14660_v43  ;;  %v9915_v47 = vadd.f32 %v9914_v51, %v9913_v42  ;;  %v15258_v13 = vld [vmem:[#allocation2 + $0x90] sm:$0xff]  ;;  %v15260_v19 = vld [vmem:[#allocation2 + $0x98] sm:$0xff] }
 0x3f1   : > { %v6068_v2 = vsel %vm532_vm2, %v6056_v55, %v15030_v36  ;;  %v6069_v44 = vsel %vm532_vm2, %v6055_v3, %v6056_v55  ;;  %v15262_v60 = vpack.c.bf16 %v5958_v63, %v5959_v0  ;;  %v15264_v51 = vpack.c.bf16 %v5896_v61, %v5895_v40  ;;  %v5898_v55 = vld [vmem:[#allocation2 + $0x150] sm:$0xff] }
 0x3f2   : > { %5852 = vst.msk [vmem:[#allocation2 + $0x168] sm:$0xff] %vm288_vm0, %v5820_v17  ;;  %v5757_v11 = vmax.f32 %v5725_v8, 0.0  ;;  %v5694_v49 = vmul.f32 %v15138_v21, %v5598_v27  ;;  %v5533_v43 = vadd.f32 %v15151_v31, %v9915_v47  ;;  %v15256_v42 = vpack.c.bf16 %v6068_v2, %v6069_v44  ;;  %v5790_v44 = vld [vmem:[%s11154_s12 + $0xf0] sm:$0xff] }
 0x3f3   : > { %v5957_v3 = vsel %vm419_vm1, %v15087_v22, %v5943_v6  ;;  %v5956_v47 = vsel %vm419_vm1, %v5943_v6, %v5944_v33  ;;  %v6722_v2 = vrot.slane %v15260_v19, 7  ;;  %v15285_v6 = vsel %vm419_vm1, %v15087_v22, %v14955_v45 }
 0x3f4   : > { %v5821_v17 = vadd.f32 %v5789_v18, %v5757_v11  ;;  %v5726_v27 = vadd.f32 %v15163_v56, %v5694_v49  ;;  %v5599_v31 = vadd.f32 %v5533_v43, %v14666_v5  ;;  %10677 = vmatmul.mubr.bf16.gmra.mxu1 %v15256_v42  ;;  %v6058_v5 = vrot.slane %v5898_v55, 1  ;;  %v9956_v18 = vpop.f32.mrf.mxu0 }
 0x3f5   : > { %6433 = vmatmul.mubr.bf16.gmra.mxu0 %v15262_v60  ;;  %v5899_v40 = vld [vmem:[#allocation2 + $0x158] sm:$0xff]  ;;  %v15288_v49 = vpack.c.bf16 %v5956_v47, %v5957_v3 }
 0x3f6   : > { %5853 = vst.msk [vmem:[#allocation2 + $0x170] sm:$0xff] %vm288_vm0, %v5821_v17  ;;  %v5758_v0 = vmax.f32 %v5726_v27, 0.0  ;;  %v5695_v63 = vmul.f32 %v15138_v21, %v5599_v31  ;;  %6440 = vmatprep.mubr.bf16.mxu0 %v15264_v51  ;;  %v6059_v8 = vrot.slane %v5899_v40, 1  ;;  %v5791_v21 = vld [vmem:[%s11154_s12 + $0xf8] sm:$0xff]  ;;  %v5947_v17 = vrot.slane %v5899_v40, 7 }
 0x3f7   : > { %v15309_v61 = vpack.c.bf16 %v5899_v40, %v5898_v55 }
 0x3f8   : > { %v5822_v33 = vadd.f32 %v5790_v44, %v5758_v0  ;;  %v5727_v11 = vadd.f32 %v15163_v56, %v5695_v63  ;;  %v6066_v27 = vsel %vm532_vm2, %v6059_v8, %v15030_v36  ;;  %v6067_v31 = vsel %vm532_vm2, %v6058_v5, %v6059_v8  ;;  %v9957_v63 = vpop.f32.mrf.mxu0 }
 0x3f9   : > { %v5946_v44 = vrot.slane %v5898_v55, 7  ;;  %v15299_v0 = vpack.c.bf16 %v6066_v27, %v6067_v31  ;;  %v15305_v56 = vsel %vm419_vm1, %v15087_v22, %v14994_v14  ;;  %v5901_v3 = vld [vmem:[#allocation2 + $0x168] sm:$0xff]  ;;  %v15312_v5 = vadd.f32 %v9957_v63, %v9956_v18 }
 0x3fa   : > { %5854 = vst.msk [vmem:[#allocation2 + $0x180] sm:$0xff] %vm288_vm0, %v5822_v33  ;;  %v5759_v45 = vmax.f32 %v5727_v11, 0.0  ;;  %v16481_v14 = vrot.slane %v15213_v57, 7  ;;  %v15325_v55 = vsel %vm419_vm1, %v15087_v22, %v15037_v62  ;;  %v6061_v40 = vrot.slane %v5901_v3, 1 }
 0x3fb   : > { %10680 = vmatprep.mubr.bf16.mxu1 %v15299_v0  ;;  %v5954_v8 = vsel %vm419_vm1, %v5946_v44, %v5947_v17  ;;  %v5955_v27 = vsel %vm419_vm1, %v15087_v22, %v5946_v44 }
 0x3fc   : > { %v5823_v43 = vadd.f32 %v5791_v21, %v5759_v45  ;;  %v6776_v11 = vsel %vm419_vm1, %v16481_v14, %v6719_v48  ;;  %v16482_v21 = vrot.slane %v15258_v13, 7  ;;  %v15338_v62 = vpack.c.bf16 %v5954_v8, %v5955_v27 }
 0x3fd   : > { %6441 = vmatmul.mubr.bf16.gmra.mxu0 %v15288_v49  ;;  %v5902_v33 = vld [vmem:[#allocation2 + $0x170] sm:$0xff]  ;;  %v15361_v8 = vsel %vm419_vm1, %v15087_v22, %v15171_v28 }
 0x3fe   : > { %5855 = vst.msk [vmem:[#allocation2 + $0x188] sm:$0xff] %vm288_vm0, %v5823_v43  ;;  %6448 = vmatprep.mubr.bf16.mxu0 %v15309_v61  ;;  %v6062_v18 = vrot.slane %v5902_v33, 1  ;;  %v6774_v17 = vsel %vm419_vm1, %v16482_v21, %v6722_v2  ;;  %v5950_v45 = vrot.slane %v5902_v33, 7  ;;  %v15351_v2 = vsel %vm419_vm1, %v15087_v22, %v15081_v4 }
 0x3ff   : > { %v15353_v14 = vpack.c.bf16 %v5902_v33, %v5901_v3  ;;  %v16485_v33 = vpack.c.bf16 %v15078_v34, %v15076_v39  ;;  %v16486_v21 = vrot.slane %v15213_v57, 7 }
 0x400   : > { %v6064_v43 = vsel %vm532_vm2, %v6062_v18, %v15030_v36  ;;  %v6065_v31 = vsel %vm532_vm2, %v6061_v40, %v6062_v18  ;;  %v16484_v40 = vrot.slane %v15144_v23, 7 }
 0x401   : > { %v15345_v63 = vpack.c.bf16 %v6064_v43, %v6065_v31  ;;  %16483 = vst [vmem:[#allocation6_spill] sm:$0xff] %v15353_v14  ;;  %v7645_v28 = vsel %vm419_vm1, %v15087_v22, %v16486_v21  ;;  %v5949_v31 = vrot.slane %v5901_v3, 7 }
 0x402   : > { %v7647_v4 = vsel %vm419_vm1, %v15087_v22, %v16484_v40  ;;  %v15383_v43 = vpack.c.bf16 %v6776_v11, %v7645_v28  ;;  %v6662_v40 = vld [vmem:[#allocation2 + $0x38] sm:$0xff]  ;;  %v16488_v11 = vrot.slane %v15258_v13, 7 }
 0x403   : > { %10681 = vmatmul.mubr.bf16.gmra.mxu1 %v15345_v63  ;;  %v15373_v18 = vpack.c.bf16 %v15230_v35, %v7647_v4  ;;  %v6786_v35 = vpack.c.bf16 %v15175_v24, %v15156_v15  ;;  %v6818_v4 = vrot.slane %v15076_v39, 1  ;;  %v5952_v27 = vsel %vm419_vm1, %v5949_v31, %v5950_v45  ;;  %v6661_v15 = vld [vmem:[#allocation2 + $0x30] sm:$0xff] }
 0x404   : > { %7138 = vmatprep.mubr.bf16.mxu1 %v16485_v33  ;;  %v16487_v33 = vrot.slane %v15078_v34, 1  ;;  %v7643_v3 = vsel %vm419_vm1, %v15087_v22, %v16488_v11  ;;  %v6710_v24 = vrot.slane %v6662_v40, 7  ;;  %v5953_v45 = vsel %vm419_vm1, %v15087_v22, %v5949_v31  ;;  %v6665_v11 = vld [vmem:[#allocation2 + $0x50] sm:$0xff]  ;;  %v11009_v31 = vld [vmem:[%s16297_s1 + $0x228] sm:$0xff]  }
 0x405   : > { %6449 = vmatmul.mubr.bf16.gmra.mxu0 %v15338_v62  ;;  %v15408_v44 = vpack.c.bf16 %v6774_v17, %v7643_v3  ;;  %v15413_v48 = vpack.c.bf16 %v6662_v40, %v6661_v15  ;;  %v15415_v47 = vpack.c.bf16 %v5952_v27, %v5953_v45  ;;  %v6822_v34 = vrot.slane %v6662_v40, 1  ;;  %v11014_v45 = vld [vmem:[%s16297_s1 + $0x220] sm:$0xff]  }
 0x406   : > { %6456 = vmatprep.mubr.bf16.mxu0 %v15353_v14  ;;  %v6896_v21 = vsel %vm532_vm2, %v16487_v33, %v15030_v36  ;;  %v16489_v28 = vmov %v16487_v33  ;;  %v11004_v33 = vld [vmem:[%s16297_s1 + $0x230] sm:$0xff]   ;;  %v6664_v14 = vld [vmem:[#allocation2 + $0x48] sm:$0xff]  ;;  %v6825_v17 = vrot.slane %v6665_v11, 1  ;;  %v6821_v27 = vrot.slane %v6661_v15, 1 }
 0x407   : > { %v6897_v39 = vsel %vm532_vm2, %v6818_v4, %v16489_v28  ;;  %16490 = vst [vmem:[#allocation9_spill] sm:$0xff] %v15415_v47  ;;  %v6709_v28 = vrot.slane %v6661_v15, 7 }
 0x408   : > { %v6898_v4 = vpack.c.bf16 %v6896_v21, %v6897_v39  ;;  %v6824_v21 = vrot.slane %v6664_v14, 1  ;;  %v6892_v39 = vsel %vm532_vm2, %v6825_v17, %v15030_v36 }
 0x409   : > { %v6782_v40 = vsel %vm419_vm1, %v6709_v28, %v6710_v24  ;;  %v6783_v3 = vsel %vm419_vm1, %v15087_v22, %v6709_v28 }
 0x40a   : > { %v6893_v15 = vsel %vm532_vm2, %v6824_v21, %v6825_v17  ;;  %v15438_v24 = vpack.c.bf16 %v6782_v40, %v6783_v3  ;;  %v11000_v17 = vld [vmem:[%s16297_s1 + $0x1f0] sm:$0xff]   ;;  %v6828_v40 = vrot.slane %v15158_v10, 1  ;;  %v6712_v21 = vrot.slane %v6664_v14, 7 }
 0x40b   : > { %7139 = vmatmul.mubr.bf16.vlgmr.msra.gmra.mxu1 %v6786_v35  ;;  %v6894_v35 = vsel %vm532_vm2, %v6822_v34, %v15030_v36  ;;  %v11001_v3 = vld [vmem:[%s16297_s1 + $0x1b0] sm:$0xff]  }
 0x40c   : > { %7146 = vmatprep.mubr.bf16.mxu1 %v15413_v48  ;;  %10733 = vmatpush3.bf16.msra.mxu1 %v14896_v12  ;;  %v6895_v12 = vsel %vm532_vm2, %v6821_v27, %v6822_v34  ;;  %v10998_v34 = vld [vmem:[%s16297_s1 + $0x1b8] sm:$0xff]   ;;  %v15454_v27 = vpack.c.bf16 %v6892_v39, %v6893_v15  ;;  %v11002_v39 = vld [vmem:[%s16297_s1 + $0x1e8] sm:$0xff]   ;;  %v6890_v15 = vsel %vm532_vm2, %v6828_v40, %v15030_v36 }
 0x40d   : > { %6457 = vmatmul.mubr.bf16.gmra.mxu0 %v15415_v47  ;;  %10734 = vmatprep.subr.bf16.mxu1 %v11004_v33  ;;  %v15448_v28 = vpack.c.bf16 %v6894_v35, %v6895_v12  ;;  %v11017_v35 = vld [vmem:[%s16297_s1 + $0x218] sm:$0xff]   ;;  %v6827_v12 = vrot.slane %v15144_v23, 1  ;;  %v11018_v47 = vld [vmem:[%s16297_s1 + $0x210] sm:$0xff]  }
 0x40e   : > { %10700 = vmatprep.mubr.bf16.mxu0 %v6898_v4  ;;  %v15446_v4 = vpack.c.bf16 %v6665_v11, %v6664_v14  ;;  %16492 = vst [vmem:[#allocation12_spill] sm:$0xff] %v15454_v27 }
 0x40f   : > { %16491 = vst [vmem:[#allocation5_spill] sm:$0xff] %v15448_v28 }
 0x410   : > { %10735 = vmatpush3.bf16.msra.mxu1 %v11004_v33  ;;  %v6713_v33 = vrot.slane %v6665_v11, 7  ;;  %v6831_v11 = vrot.slane %v15240_v16, 1 }
 0x411   : > { %10736 = vmatprep.subr.bf16.mxu1 %v11009_v31 }
 0x412   : > { %v6780_v14 = vsel %vm419_vm1, %v6712_v21, %v6713_v33  ;;  %v6888_v33 = vsel %vm532_vm2, %v6831_v11, %v15030_v36 }
 0x413   : > { %7147 = vmatmul.mubr.bf16.gmra.mxu1 %v15438_v24 }
 0x414   : > { %7154 = vmatprep.mubr.bf16.mxu1 %v15446_v4  ;;  %10737 = vmatpush3.bf16.msra.mxu1 %v11009_v31  ;;  %v6830_v31 = vrot.slane %v15213_v57, 1 }
 0x415   : > { %10701 = vmatmul.mubr.bf16.vlgmr.msra.gmra.mxu0 %v15448_v28  ;;  %10738 = vmatprep.subr.bf16.mxu1 %v11014_v45 }
 0x416   : > { %10704 = vmatprep.mubr.bf16.mxu0 %v15454_v27  ;;  %10213 = vmatpush3.bf16.msra.mxu0 %v10998_v34  ;;  %v6891_v34 = vsel %vm532_vm2, %v6827_v12, %v6828_v40  ;;  %v6781_v27 = vsel %vm419_vm1, %v15087_v22, %v6712_v21  ;;  %v15494_v40 = vpack.c.bf16 %v15158_v10, %v15144_v23  ;;  %v6834_v23 = vrot.slane %v15260_v19, 1  ;;  %v11019_v10 = vld [vmem:[%s16297_s1 + $0x208] sm:$0xff]  }
 0x417   : > { %10214 = vmatprep.subr.bf16.mxu0 %v11000_v17  ;;  %v6889_v17 = vsel %vm532_vm2, %v6830_v31, %v6831_v11  ;;  %v15487_v28 = vpack.c.bf16 %v6780_v14, %v6781_v27  ;;  %v15499_v21 = vpack.c.bf16 %v6890_v15, %v6891_v34  ;;  %v11005_v27 = vld [vmem:[%s16297_s1 + $0x1e0] sm:$0xff]   ;;  %v6833_v12 = vrot.slane %v15258_v13, 1 }
 0x418   : > { %10739 = vmatpush3.bf16.msra.mxu1 %v11014_v45  ;;  %v11003_v45 = vld [vmem:[%s16297_s1 + $0x1a8] sm:$0xff]   ;;  %v15505_v11 = vpack.c.bf16 %v6888_v33, %v6889_v17  ;;  %v6886_v14 = vsel %vm532_vm2, %v6834_v23, %v15030_v36  ;;  %v11020_v15 = vld [vmem:[%s16297_s1 + $0x200] sm:$0xff]   ;;  %v15533_v34 = vpack.c.bf16 %v15240_v16, %v15213_v57  ;;  %v11008_v33 = vld [vmem:[%s16297_s1 + $0x198] sm:$0xff]  }
 0x419   : > { %10740 = vmatprep.subr.bf16.mxu1 %v11017_v35  ;;  %v6887_v31 = vsel %vm532_vm2, %v6833_v12, %v6834_v23  ;;  %v15538_v17 = vld [vmem:[#allocation2 + $0x180] sm:$0xff]  ;;  %v16493_v12 = vpack.c.bf16 %v15043_v46, %v14942_v29 }
 0x41a   : > { %10215 = vmatpush3.bf16.msra.mxu0 %v11001_v3  ;;  %v11006_v3 = vld [vmem:[%s16297_s1 + $0x1a0] sm:$0xff]   ;;  %v6863_v16 = vrot.slane %v15538_v17, 1  ;;  %v6751_v23 = vrot.slane %v15538_v17, 7 }
 0x41b   : > { %7155 = vmatmul.mubr.bf16.gmra.mxu1 %v15487_v28  ;;  %10216 = vmatprep.subr.bf16.mxu0 %v11002_v39  ;;  %v15526_v39 = vld [vmem:[#allocation2 + $0x188] sm:$0xff] }
 0x41c   : > { %7162 = vmatprep.mubr.bf16.mxu1 %v15494_v40  ;;  %10741 = vmatpush3.bf16.msra.mxu1 %v11017_v35  ;;  %v11007_v35 = vld [vmem:[%s16297_s1 + $0x1d8] sm:$0xff]   ;;  %v6752_v57 = vrot.slane %v15526_v39, 7  ;;  %v7623_v46 = vsel %vm419_vm1, %v15087_v22, %v6751_v23 }
 0x41d   : > { %10705 = vmatmul.mubr.bf16.gmra.mxu0 %v15499_v21  ;;  %10742 = vmatprep.subr.bf16.mxu1 %v11018_v47 }
 0x41e   : > { %10708 = vmatprep.mubr.bf16.mxu0 %v15505_v11  ;;  %10217 = vmatpush3.bf16.msra.mxu0 %v11003_v45  ;;  %v15540_v45 = vpack.c.bf16 %v6886_v14, %v6887_v31  ;;  %v6754_v14 = vsel %vm419_vm1, %v6751_v23, %v6752_v57  ;;  %v15573_v31 = vpack.c.bf16 %v15260_v19, %v15258_v13  ;;  %v11016_v57 = vld [vmem:[%s16297_s1 + $0x180] sm:$0xff]  }
 0x41f   : > { %10218 = vmatprep.subr.bf16.mxu0 %v11005_v27  ;;  %v6864_v27 = vrot.slane %v15526_v39, 1  ;;  %v16494_v13 = vpack.c.bf16 %v15100_v54, %v14981_v38  ;;  %v16495_v19 = vpack.c.bf16 %v15118_v20, %v15021_v52  ;;  %v16497_v38 = vpack.c.bf16 %v14963_v37, %v15285_v6  ;;  %v16500_v37 = vld [vmem:[#allocation13_spill] sm:$0xff]  ;;  %v16504_v20 = vld [vmem:[#allocation16_spill] sm:$0xff] }
 0x420   : > { %10743 = vmatpush3.bf16.msra.mxu1 %v11018_v47  ;;  %v11010_v47 = vld [vmem:[%s16297_s1 + $0x1d0] sm:$0xff]   ;;  %v16498_v52 = vpack.c.bf16 %v15003_v9, %v15305_v56  ;;  %v16502_v9 = vld [vmem:[#allocation14_spill] sm:$0xff] }
 0x421   : > { %10744 = vmatprep.subr.bf16.mxu1 %v11019_v10  ;;  %v7734_v29 = vsel %vm532_vm2, %v6864_v27, %v15030_v36 }
 0x422   : > { %10219 = vmatpush3.bf16.msra.mxu0 %v11006_v3  ;;  %v11011_v3 = vld [vmem:[%s16297_s1 + $0x190] sm:$0xff]  }
 0x423   : > { %7163 = vmatmul.mubr.bf16.gmra.mxu1 %v15373_v18  ;;  %10220 = vmatprep.subr.bf16.mxu0 %v11007_v35  ;;  %v6867_v35 = vsel %vm532_vm2, %v6863_v16, %v6864_v27  ;;  %v11015_v27 = vld [vmem:[%s16297_s1 + $0x1c0] sm:$0xff]   ;;  %v16496_v16 = vpack.c.bf16 %v15194_v50, %v15071_v26  ;;  %v16503_v26 = vpack.c.bf16 %v15187_v1, %v15361_v8 }
 0x424   : > { %7170 = vmatprep.mubr.bf16.mxu1 %v15533_v34  ;;  %10745 = vmatpush3.bf16.msra.mxu1 %v11019_v10  ;;  %v11012_v10 = vld [vmem:[%s16297_s1 + $0x1c8] sm:$0xff]  }
 0x425   : > { %10709 = vmatmul.mubr.bf16.gmra.mxu0 %v15540_v45  ;;  %10746 = vmatprep.subr.bf16.mxu1 %v11020_v15 }
 0x426   : > { %10712 = vmatprep.mubr.bf16.mxu0 %v16493_v12  ;;  %10221 = vmatpush3.bf16.msra.mxu0 %v11008_v33  ;;  %v11013_v33 = vld [vmem:[%s16297_s1 + $0x188] sm:$0xff]  }
 0x427   : > { %10222 = vmatprep.subr.bf16.mxu0 %v11010_v47  ;;  %v15578_v47 = vpack.c.bf16 %v7734_v29, %v6867_v35  ;;  %v15663_v29 = vld [vmem:[#allocation2 + $0xa8] sm:$0xff] }
 0x428   : > { %10747 = vmatpush3.bf16.msra.mxu1 %v11020_v15  ;;  %v15580_v15 = vpack.c.bf16 %v6754_v14, %v7623_v46 }
 0x42a   : > { %10223 = vmatpush3.bf16.msra.mxu0 %v11011_v3 }
 0x42b   : > { %7171 = vmatmul.mubr.bf16.gmra.mxu1 %v15383_v43  ;;  %10224 = vmatprep.subr.bf16.mxu0 %v11012_v10  ;;  %v15657_v10 = vld [vmem:[#allocation2 + $0xb0] sm:$0xff] }
 0x42c   : > { %7178 = vmatprep.mubr.bf16.mxu1 %v15573_v31  ;;  %v7673_v46 = vpack.c.bf16 %v15657_v10, %v15663_v29 }
 0x42d   : > { %10713 = vmatmul.mubr.bf16.gmra.mxu0 %v16494_v13 }
 0x42e   : > { %10716 = vmatprep.mubr.bf16.mxu0 %v16495_v19  ;;  %10225 = vmatpush3.bf16.msra.mxu0 %v11013_v33  ;;  %v16505_v33 = vld [vmem:[#allocation6_spill] sm:$0xff]  ;;  %v7587_v19 = vrot.slane %v15663_v29, 7 }
 0x42f   : > { %10226 = vmatprep.subr.bf16.mxu0 %v11015_v27 }
 0x432   : > { %10227 = vmatpush3.bf16.msra.mxu0 %v11016_v57 }
 0x433   : > { %7179 = vmatmul.mubr.bf16.gmra.mxu1 %v15408_v44 }
 0x434   : > { %7186 = vmatprep.mubr.bf16.mxu1 %v14948_v41  ;;  %v16499_v41 = vpack.c.bf16 %v15051_v58, %v15325_v55 }
 0x435   : > { %10717 = vmatmul.mubr.bf16.gmra.mxu0 %v16496_v16 }
 0x436   : > { %10720 = vmatprep.mubr.bf16.mxu0 %v15142_v59 }
 0x43b   : > { %7187 = vmatmul.mubr.bf16.gmra.mxu1 %v16497_v38 }
 0x43c   : > { %7194 = vmatprep.mubr.bf16.mxu1 %v14987_v32  ;;  %v16501_v32 = vpack.c.bf16 %v15109_v7, %v15351_v2 }
 0x43d   : > { %10721 = vmatmul.mubr.bf16.gmra.mxu0 %v15211_v25 }
 0x43e   : > { %10724 = vmatprep.mubr.bf16.mxu0 %v15256_v42 }
 0x443   : > { %7195 = vmatmul.mubr.bf16.gmra.mxu1 %v16498_v52 }
 0x444   : > { %7202 = vmatprep.mubr.bf16.mxu1 %v15028_v53  ;;  %v15626_v53 = vpop.f32.mrf.mxu0 }
 0x445   : > { %10725 = vmatmul.mubr.bf16.gmra.mxu0 %v15299_v0 }
 0x446   : > { %10728 = vmatprep.mubr.bf16.mxu0 %v15345_v63  ;;  %v15628_v58 = vpop.f32.mrf.mxu0 }
 0x44b   : > { %7203 = vmatmul.mubr.bf16.gmra.mxu1 %v16499_v41 }
 0x44c   : > { %7210 = vmatprep.mubr.bf16.mxu1 %v16500_v37  ;;  %v15676_v37 = vld [vmem:[#allocation2 + $0xc8] sm:$0xff] }
 0x44d   : > { %10729 = vmatmul.mubr.bf16.gmra.mxu0 %v15578_v47 }
 0x44e   : > { %8004 = vmatprep.mubr.bf16.mxu0 %v15413_v48 }
 0x453   : > { %7211 = vmatmul.mubr.bf16.gmra.mxu1 %v16501_v32 }
 0x454   : > { %7218 = vmatprep.mubr.bf16.mxu1 %v16502_v9  ;;  %v15685_v9 = vpack.c.bf16 %v15526_v39, %v15538_v17 }
 0x455   : > { %8005 = vmatmul.mubr.bf16.vlgmr.msra.gmra.mxu0 %v15438_v24 }
 0x456   : > { %8012 = vmatprep.mubr.bf16.mxu0 %v15446_v4 }
 0x45b   : > { %7219 = vmatmul.mubr.bf16.gmra.mxu1 %v16503_v26 }
 0x45c   : > { %v10654_v54 = vpop.f32.mrf.mxu1  ;;  %7226 = vmatprep.mubr.bf16.mxu1 %v16504_v20 }
 0x45d   : > { %v9962_v59 = vpop.f32.mrf.mxu0  ;;  %8013 = vmatmul.mubr.bf16.gmra.mxu0 %v15487_v28 }
 0x45e   : > { %8020 = vmatprep.mubr.bf16.mxu0 %v15494_v40  ;;  %v6499_v7 = vpop.f32.mrf.mxu1 }
 0x45f   : > { %v9963_v50 = vpop.f32.mrf.mxu0  ;;  %v15637_v25 = vadd.f32 %v15312_v5, %v6499_v7  ;;  %v16506_v7 = vld [vmem:[#allocation9_spill] sm:$0xff] }
 0x460   : > { %v9964_v42 = vadd.f32 %v9963_v50, %v9962_v59  ;;  %v10655_v6 = vpop.f32.mrf.mxu1  ;;  %v15687_v59 = vld [vmem:[#allocation2 + $0xc0] sm:$0xff] }
 0x461   : > { %v9965_v0 = vpop.f32.mrf.mxu0  ;;  %v7590_v39 = vrot.slane %v15687_v59, 7 }
 0x462   : > { %v15639_v56 = vadd.f32 %v10654_v54, %v9964_v42  ;;  %v15641_v1 = vpop.f32.mrf.mxu1  ;;  %v7591_v42 = vrot.slane %v15676_v37, 7 }
 0x463   : > { %v9966_v55 = vpop.f32.mrf.mxu0  ;;  %7227 = vmatmul.mubr.bf16.gmra.mxu1 %v15262_v60 }
 0x464   : > { %v9967_v48 = vadd.f32 %v9966_v55, %v9965_v0  ;;  %v10658_v63 = vpop.f32.mrf.mxu1  ;;  %7234 = vmatprep.mubr.bf16.mxu1 %v15264_v51 }
 0x465   : > { %v9968_v2 = vpop.f32.mrf.mxu0  ;;  %8021 = vmatmul.mubr.bf16.gmra.mxu0 %v15373_v18 }
 0x466   : > { %v15646_v8 = vadd.f32 %v10655_v6, %v9967_v48  ;;  %8028 = vmatprep.mubr.bf16.mxu0 %v15533_v34  ;;  %v6515_v24 = vpop.f32.mrf.mxu1  ;;  %v7674_v6 = vpack.c.bf16 %v15676_v37, %v15687_v59 }
 0x467   : > { %v9969_v5 = vpop.f32.mrf.mxu0 }
 0x468   : > { %v9970_v4 = vadd.f32 %v9969_v5, %v9968_v2  ;;  %v10659_v18 = vpop.f32.mrf.mxu1  ;;  %v15699_v5 = vld [vmem:[#allocation2 + $0xe0] sm:$0xff] }
 0x469   : > { %v9971_v28 = vpop.f32.mrf.mxu0 }
 0x46a   : > { %v15649_v40 = vadd.f32 %v9970_v4, %v6515_v24  ;;  %v15659_v35 = vpop.f32.mrf.mxu1  ;;  %v7639_v4 = vsel %vm419_vm1, %v15087_v22, %v7590_v39 }
 0x46b   : > { %v9972_v23 = vpop.f32.mrf.mxu0  ;;  %7235 = vmatmul.mubr.bf16.gmra.mxu1 %v15288_v49 }
 0x46c   : > { %v15652_v60 = vadd.f32 %v9972_v23, %v9971_v28  ;;  %7242 = vmatprep.mubr.bf16.mxu1 %v15309_v61 }
 0x46d   : > { %v9974_v51 = vpop.f32.mrf.mxu0  ;;  %8029 = vmatmul.mubr.bf16.gmra.mxu0 %v15383_v43  ;;  %v7588_v43 = vrot.slane %v15657_v10, 7 }
 0x46e   : > { %8036 = vmatprep.mubr.bf16.mxu0 %v15573_v31 }
 0x46f   : > { %v9975_v34 = vpop.f32.mrf.mxu0  ;;  %v7640_v52 = vsel %vm419_vm1, %v7587_v19, %v7588_v43 }
 0x470   : > { %v9976_v12 = vadd.f32 %v9975_v34, %v9974_v51  ;;  %v15706_v51 = vld [vmem:[#allocation2 + $0xd8] sm:$0xff]  ;;  %v7594_v34 = vrot.slane %v15699_v5, 7 }
 0x471   : > { %v9977_v3 = vpop.f32.mrf.mxu0 }
 0x472   : > { %v15661_v14 = vadd.f32 %v10658_v63, %v9976_v12  ;;  %v7638_v63 = vsel %vm419_vm1, %v7590_v39, %v7591_v42  ;;  %v7675_v12 = vpack.c.bf16 %v15699_v5, %v15706_v51 }
 0x473   : > { %v9978_v49 = vpop.f32.mrf.mxu0  ;;  %7243 = vmatmul.mubr.bf16.gmra.mxu1 %v15338_v62  ;;  %v7658_v23 = vpack.c.bf16 %v7638_v63, %v7639_v4  ;;  %v15737_v4 = vld [vmem:[#allocation2 + $0x110] sm:$0xff] }
 0x474   : > { %v9979_v61 = vadd.f32 %v9978_v49, %v9977_v3  ;;  %v10662_v31 = vpop.f32.mrf.mxu1  ;;  %7250 = vmatprep.mubr.bf16.mxu1 %v16505_v33  ;;  %v16507_v49 = vld [vmem:[#allocation5_spill] sm:$0xff] }
 0x475   : > { %v9980_v27 = vpop.f32.mrf.mxu0  ;;  %8037 = vmatmul.mubr.bf16.gmra.mxu0 %v15408_v44  ;;  %v7641_v44 = vsel %vm419_vm1, %v15087_v22, %v7587_v19 }
 0x476   : > { %v15671_v13 = vadd.f32 %v10659_v18, %v9979_v61  ;;  %8044 = vmatprep.mubr.bf16.mxu0 %v7673_v46  ;;  %v6531_v57 = vpop.f32.mrf.mxu1  ;;  %v7657_v20 = vpack.c.bf16 %v7640_v52, %v7641_v44  ;;  %v7593_v46 = vrot.slane %v15706_v51, 7 }
 0x477   : > { %v9981_v16 = vpop.f32.mrf.mxu0 }
 0x478   : > { %v9982_v62 = vadd.f32 %v9981_v16, %v9980_v27  ;;  %v10663_v38 = vpop.f32.mrf.mxu1 }
 0x479   : > { %v9983_v41 = vpop.f32.mrf.mxu0 }
 0x47a   : > { %v15678_v32 = vadd.f32 %v9982_v62, %v6531_v57  ;;  %v6534_v54 = vpop.f32.mrf.mxu1  ;;  %v7636_v57 = vsel %vm419_vm1, %v7593_v46, %v7594_v34  ;;  %v15718_v62 = vld [vmem:[#allocation2 + $0xf8] sm:$0xff] }
 0x47b   : > { %v9984_v26 = vpop.f32.mrf.mxu0  ;;  %7251 = vmatmul.mubr.bf16.gmra.mxu1 %v16506_v7 }
 0x47c   : > { %v9985_v50 = vadd.f32 %v9984_v26, %v9983_v41  ;;  %7258 = vmatprep.mubr.bf16.mxu1 %v15685_v9 }
 0x47d   : > { %v9986_v0 = vpop.f32.mrf.mxu0  ;;  %8045 = vmatmul.mubr.bf16.gmra.mxu0 %v7657_v20  ;;  %v16508_v20 = vld [vmem:[#allocation12_spill] sm:$0xff] }
 0x47e   : > { %v15694_v55 = vadd.f32 %v9985_v50, %v6534_v54  ;;  %8052 = vmatprep.mubr.bf16.mxu0 %v7674_v6  ;;  %v15725_v54 = vld [vmem:[#allocation2 + $0xf0] sm:$0xff]  ;;  %v7597_v50 = vrot.slane %v15718_v62, 7 }
 0x47f   : > { %v9987_v17 = vpop.f32.mrf.mxu0  ;;  %v7676_v42 = vpack.c.bf16 %v15718_v62, %v15725_v54  ;;  %v7596_v39 = vrot.slane %v15725_v54, 7 }
 0x480   : > { %v9988_v48 = vadd.f32 %v9987_v17, %v9986_v0 }
 0x481   : > { %v9989_v2 = vpop.f32.mrf.mxu0  ;;  %v7634_v63 = vsel %vm419_vm1, %v7596_v39, %v7597_v50  ;;  %v7706_v50 = vrot.slane %v15699_v5, 1  ;;  %v7708_v5 = vrot.slane %v15725_v54, 1 }
 0x482   : > { %v15701_v24 = vadd.f32 %v10662_v31, %v9988_v48 }
 0x483   : > { %v9990_v28 = vpop.f32.mrf.mxu0  ;;  %7259 = vmatmul.mubr.bf16.gmra.mxu1 %v15580_v15 }
 0x484   : > { %v9991_v18 = vadd.f32 %v9990_v28, %v9989_v2  ;;  %v10666_v3 = vpop.f32.mrf.mxu1  ;;  %10748 = vmatprep.mubr.bf16.mxu1 %v16507_v49  ;;  %v7700_v28 = vrot.slane %v15657_v10, 1  ;;  %v15746_v49 = vld [vmem:[#allocation2 + $0x108] sm:$0xff] }
 0x485   : > { %v9992_v61 = vpop.f32.mrf.mxu0  ;;  %8053 = vmatmul.mubr.bf16.gmra.mxu0 %v7658_v23  ;;  %v7677_v10 = vpack.c.bf16 %v15737_v4, %v15746_v49 }
 0x486   : > { %v15713_v43 = vadd.f32 %v10663_v38, %v9991_v18  ;;  %8060 = vmatprep.mubr.bf16.mxu0 %v7675_v12  ;;  %v6547_v31 = vpop.f32.mrf.mxu1  ;;  %v7637_v38 = vsel %vm419_vm1, %v15087_v22, %v7593_v46  ;;  %v7703_v18 = vrot.slane %v15676_v37, 1 }
 0x487   : > { %v9993_v33 = vpop.f32.mrf.mxu0  ;;  %v7659_v26 = vpack.c.bf16 %v7636_v57, %v7637_v38  ;;  %v7599_v57 = vrot.slane %v15746_v49, 7 }
 0x488   : > { %v9994_v27 = vadd.f32 %v9993_v33, %v9992_v61  ;;  %v10667_v19 = vpop.f32.mrf.mxu1  ;;  %v7699_v61 = vrot.slane %v15663_v29, 1  ;;  %v7702_v33 = vrot.slane %v15687_v59, 1  ;;  %v7752_v29 = vsel %vm532_vm2, %v7700_v28, %v15030_v36 }
 0x489   : > { %v9995_v16 = vpop.f32.mrf.mxu0 }
 0x48a   : > { %v15720_v52 = vadd.f32 %v9994_v27, %v6547_v31  ;;  %v6550_v44 = vpop.f32.mrf.mxu1  ;;  %v7600_v31 = vrot.slane %v15737_v4, 7  ;;  %v7751_v59 = vsel %vm532_vm2, %v7702_v33, %v7703_v18 }
 0x48b   : > { %v9996_v41 = vpop.f32.mrf.mxu0  ;;  %10749 = vmatmul.mubr.bf16.vlgmr.msra.gmra.mxu1 %v16508_v20  ;;  %v7555_v20 = vld [vmem:[#allocation2 + $0x128] sm:$0xff] }
 0x48c   : > { %v9997_v7 = vadd.f32 %v9996_v41, %v9995_v16  ;;  %10752 = vmatprep.mubr.bf16.mxu1 %v15499_v21  ;;  %v7635_v21 = vsel %vm419_vm1, %v15087_v22, %v7596_v39  ;;  %v7753_v16 = vsel %vm532_vm2, %v7699_v61, %v7700_v28  ;;  %v7554_v28 = vld [vmem:[#allocation2 + $0x120] sm:$0xff] }
 0x48d   : > { %v9998_v6 = vpop.f32.mrf.mxu0  ;;  %8061 = vmatmul.mubr.bf16.gmra.mxu0 %v7659_v26  ;;  %v7660_v12 = vpack.c.bf16 %v7634_v63, %v7635_v21  ;;  %v7705_v21 = vrot.slane %v15706_v51, 1 }
 0x48e   : > { %v15732_v0 = vadd.f32 %v9997_v7, %v6550_v44  ;;  %8068 = vmatprep.mubr.bf16.mxu0 %v7676_v42  ;;  %v7632_v44 = vsel %vm419_vm1, %v7599_v57, %v7600_v31  ;;  %v7769_v7 = vpack.c.bf16 %v7752_v29, %v7753_v16  ;;  %v7602_v31 = vrot.slane %v7554_v28, 7  ;;  %v7558_v29 = vld [vmem:[#allocation2 + $0x140] sm:$0xff] }
 0x48f   : > { %v9999_v17 = vpop.f32.mrf.mxu0 }
 0x490   : > { %v10000_v48 = vadd.f32 %v9999_v17, %v9998_v6  ;;  %v7633_v6 = vsel %vm419_vm1, %v15087_v22, %v7599_v57  ;;  %v7709_v17 = vrot.slane %v15718_v62, 1  ;;  %v7748_v62 = vsel %vm532_vm2, %v7706_v50, %v15030_v36 }
 0x491   : > { %v10001_v2 = vpop.f32.mrf.mxu0 }
 0x492   : > { %v15740_v23 = vadd.f32 %v10666_v3, %v10000_v48  ;;  %v7746_v33 = vsel %vm532_vm2, %v7709_v17, %v15030_v36  ;;  %v7747_v54 = vsel %vm532_vm2, %v7708_v5, %v7709_v17  ;;  %v7606_v17 = vrot.slane %v7558_v29, 7 }
 0x493   : > { %v10002_v34 = vpop.f32.mrf.mxu0  ;;  %10753 = vmatmul.mubr.bf16.gmra.mxu1 %v15505_v11 }
 0x494   : > { %v10003_v46 = vadd.f32 %v10002_v34, %v10001_v2  ;;  %v10670_v3 = vpop.f32.mrf.mxu1  ;;  %10756 = vmatprep.mubr.bf16.mxu1 %v15540_v45  ;;  %v7750_v45 = vsel %vm532_vm2, %v7703_v18, %v15030_v36  ;;  %v7661_v2 = vpack.c.bf16 %v7632_v44, %v7633_v6  ;;  %v7603_v34 = vrot.slane %v7555_v20, 7 }
 0x495   : > { %v10004_v37 = vpop.f32.mrf.mxu0  ;;  %8069 = vmatmul.mubr.bf16.gmra.mxu0 %v7660_v12  ;;  %v7770_v39 = vpack.c.bf16 %v7750_v45, %v7751_v59  ;;  %v7678_v12 = vpack.c.bf16 %v7555_v20, %v7554_v28  ;;  %v7631_v59 = vsel %vm419_vm1, %v15087_v22, %v7602_v31  ;;  %v7715_v44 = vrot.slane %v7555_v20, 1 }
 0x496   : > { %v15755_v27 = vadd.f32 %v10667_v19, %v10003_v46  ;;  %8076 = vmatprep.mubr.bf16.mxu0 %v7677_v10  ;;  %v6563_v11 = vpop.f32.mrf.mxu1  ;;  %v7749_v10 = vsel %vm532_vm2, %v7705_v21, %v7706_v50  ;;  %v7630_v57 = vsel %vm419_vm1, %v7602_v31, %v7603_v34  ;;  %v7557_v50 = vld [vmem:[#allocation2 + $0x138] sm:$0xff]  ;;  %v7711_v6 = vrot.slane %v15746_v49, 1 }
 0x497   : > { %v10005_v38 = vpop.f32.mrf.mxu0  ;;  %v7771_v16 = vpack.c.bf16 %v7748_v62, %v7749_v10  ;;  %v7605_v21 = vrot.slane %v7557_v50, 7  ;;  %v7561_v31 = vld [vmem:[#allocation2 + $0x158] sm:$0xff] }
 0x498   : > { %v10006_v19 = vadd.f32 %v10005_v38, %v10004_v37  ;;  %v10671_v41 = vpop.f32.mrf.mxu1  ;;  %v7712_v38 = vrot.slane %v15737_v4, 1  ;;  %v7714_v4 = vrot.slane %v7554_v28, 1 }
 0x499   : > { %v10007_v26 = vpop.f32.mrf.mxu0 }
 0x49a   : > { %v15771_v42 = vadd.f32 %v10006_v19, %v6563_v11  ;;  %v6566_v63 = vpop.f32.mrf.mxu1  ;;  %v7772_v19 = vpack.c.bf16 %v7746_v33, %v7747_v54  ;;  %v7744_v20 = vsel %vm532_vm2, %v7712_v38, %v15030_v36  ;;  %v7745_v49 = vsel %vm532_vm2, %v7711_v6, %v7712_v38 }
 0x49b   : > { %v10008_v48 = vpop.f32.mrf.mxu0  ;;  %10757 = vmatmul.mubr.bf16.gmra.mxu1 %v7769_v7  ;;  %v7662_v7 = vpack.c.bf16 %v7630_v57, %v7631_v59  ;;  %v7743_v28 = vsel %vm532_vm2, %v7714_v4, %v7715_v44  ;;  %v7773_v10 = vpack.c.bf16 %v7744_v20, %v7745_v49  ;;  %v7629_v54 = vsel %vm419_vm1, %v15087_v22, %v7605_v21 }
 0x49c   : > { %v10009_v18 = vadd.f32 %v10008_v48, %v10007_v26  ;;  %10760 = vmatprep.mubr.bf16.mxu1 %v7770_v39  ;;  %v7679_v48 = vpack.c.bf16 %v7558_v29, %v7557_v50  ;;  %v7721_v59 = vrot.slane %v7561_v31, 1 }
 0x49d   : > { %v10010_v61 = vpop.f32.mrf.mxu0  ;;  %8077 = vmatmul.mubr.bf16.gmra.mxu0 %v7661_v2 }
 0x49e   : > { %v15779_v46 = vadd.f32 %v10009_v18, %v6566_v63  ;;  %8084 = vmatprep.mubr.bf16.mxu0 %v7678_v12  ;;  %v7742_v12 = vsel %vm532_vm2, %v7715_v44, %v15030_v36 }
 0x49f   : > { %v10011_v51 = vpop.f32.mrf.mxu0  ;;  %v7774_v57 = vpack.c.bf16 %v7742_v12, %v7743_v28  ;;  %v7563_v12 = vld [vmem:[#allocation2 + $0x168] sm:$0xff] }
 0x4a0   : > { %v10012_v37 = vadd.f32 %v10011_v51, %v10010_v61  ;;  %v7628_v61 = vsel %vm419_vm1, %v7605_v21, %v7606_v17  ;;  %v7718_v51 = vrot.slane %v7558_v29, 1  ;;  %v7738_v21 = vsel %vm532_vm2, %v7721_v59, %v15030_v36 }
 0x4a1   : > { %v10013_v11 = vpop.f32.mrf.mxu0  ;;  %v7663_v38 = vpack.c.bf16 %v7628_v61, %v7629_v54 }
 0x4a2   : > { %v15794_v45 = vadd.f32 %v10670_v3, %v10012_v37  ;;  %v7560_v37 = vld [vmem:[#allocation2 + $0x150] sm:$0xff] }
 0x4a3   : > { %v10014_v26 = vpop.f32.mrf.mxu0  ;;  %10761 = vmatmul.mubr.bf16.gmra.mxu1 %v7771_v16  ;;  %v7720_v29 = vrot.slane %v7560_v37, 1  ;;  %v7608_v17 = vrot.slane %v7560_v37, 7 }
 0x4a4   : > { %v10015_v39 = vadd.f32 %v10014_v26, %v10013_v11  ;;  %v10674_v63 = vpop.f32.mrf.mxu1  ;;  %10764 = vmatprep.mubr.bf16.mxu1 %v7772_v19  ;;  %v7717_v19 = vrot.slane %v7557_v50, 1  ;;  %v7609_v26 = vrot.slane %v7561_v31, 7  ;;  %v7564_v50 = vld [vmem:[#allocation2 + $0x170] sm:$0xff] }
 0x4a5   : > { %v10016_v3 = vpop.f32.mrf.mxu0  ;;  %8085 = vmatmul.mubr.bf16.gmra.mxu0 %v7662_v7  ;;  %v7680_v7 = vpack.c.bf16 %v7561_v31, %v7560_v37  ;;  %v7627_v61 = vsel %vm419_vm1, %v15087_v22, %v7608_v17  ;;  %v7724_v31 = vrot.slane %v7564_v50, 1  ;;  %v7612_v37 = vrot.slane %v7564_v50, 7 }
 0x4a6   : > { %v15800_v2 = vadd.f32 %v10671_v41, %v10015_v39  ;;  %8092 = vmatprep.mubr.bf16.mxu0 %v7679_v48  ;;  %v6579_v18 = vpop.f32.mrf.mxu1  ;;  %v7740_v48 = vsel %vm532_vm2, %v7718_v51, %v15030_v36  ;;  %v7741_v4 = vsel %vm532_vm2, %v7717_v19, %v7718_v51  ;;  %v7626_v49 = vsel %vm419_vm1, %v7608_v17, %v7609_v26 }
 0x4a7   : > { %v10017_v34 = vpop.f32.mrf.mxu0  ;;  %v7775_v28 = vpack.c.bf16 %v7740_v48, %v7741_v4  ;;  %v7664_v51 = vpack.c.bf16 %v7626_v49, %v7627_v61 }
 0x4a8   : > { %v10018_v41 = vadd.f32 %v10017_v34, %v10016_v3  ;;  %v10675_v5 = vpop.f32.mrf.mxu1 }
 0x4a9   : > { %v10019_v62 = vpop.f32.mrf.mxu0 }
 0x4aa   : > { %v15814_v33 = vadd.f32 %v10018_v41, %v6579_v18  ;;  %v6582_v16 = vpop.f32.mrf.mxu1  ;;  %v7739_v18 = vsel %vm532_vm2, %v7720_v29, %v7721_v59 }
 0x4ab   : > { %v10020_v11 = vpop.f32.mrf.mxu0  ;;  %10765 = vmatmul.mubr.bf16.gmra.mxu1 %v7773_v10 }
 0x4ac   : > { %v10021_v44 = vadd.f32 %v10020_v11, %v10019_v62  ;;  %10768 = vmatprep.mubr.bf16.mxu1 %v7774_v57  ;;  %v7776_v62 = vpack.c.bf16 %v7738_v21, %v7739_v18  ;;  %v7681_v57 = vpack.c.bf16 %v7564_v50, %v7563_v12  ;;  %v7723_v11 = vrot.slane %v7563_v12, 1 }
 0x4ad   : > { %v10022_v6 = vpop.f32.mrf.mxu0  ;;  %8093 = vmatmul.mubr.bf16.gmra.mxu0 %v7663_v38 }
 0x4ae   : > { %v15819_v39 = vadd.f32 %v10021_v44, %v6582_v16  ;;  %8100 = vmatprep.mubr.bf16.mxu0 %v7680_v7  ;;  %v7736_v44 = vsel %vm532_vm2, %v7724_v31, %v15030_v36  ;;  %v7737_v26 = vsel %vm532_vm2, %v7723_v11, %v7724_v31 }
 0x4af   : > { %v10023_v3 = vpop.f32.mrf.mxu0  ;;  %v7777_v4 = vpack.c.bf16 %v7736_v44, %v7737_v26 }
 0x4b0   : > { %v10024_v20 = vadd.f32 %v10023_v3, %v10022_v6 }
 0x4b1   : > { %v10025_v34 = vpop.f32.mrf.mxu0 }
 0x4b2   : > { %v15833_v41 = vadd.f32 %v10674_v63, %v10024_v20  ;;  %v7611_v63 = vrot.slane %v7563_v12, 7 }
 0x4b3   : > { %v10026_v10 = vpop.f32.mrf.mxu0  ;;  %10769 = vmatmul.mubr.bf16.gmra.mxu1 %v7775_v28  ;;  %v7779_v28 = vpack.c.bf16 %v15030_v36, %v15030_v36 }
 0x4b4   : > { %v10027_v54 = vadd.f32 %v10026_v10, %v10025_v34  ;;  %v10678_v16 = vpop.f32.mrf.mxu1  ;;  %10772 = vmatprep.mubr.bf16.mxu1 %v7776_v62  ;;  %v7624_v17 = vsel %vm419_vm1, %v7611_v63, %v7612_v37  ;;  %v7625_v3 = vsel %vm419_vm1, %v15087_v22, %v7611_v63  ;;  %v11036_v62 = vld [vmem:[#allocation2] sm:$0xff] }
 0x4b5   : > { %v10028_v38 = vpop.f32.mrf.mxu0  ;;  %8101 = vmatmul.mubr.bf16.gmra.mxu0 %v7664_v51  ;;  %v7665_v18 = vpack.c.bf16 %v7624_v17, %v7625_v3  ;;  %v7683_v10 = vpack.c.bf16 %v11036_v62, %v11036_v62 }
 0x4b6   : > { %v15838_v59 = vadd.f32 %v10675_v5, %v10027_v54  ;;  %8108 = vmatprep.mubr.bf16.mxu0 %v7681_v57  ;;  %v6595_v19 = vpop.f32.mrf.mxu1 }
 0x4b7   : > { %v10029_v7 = vpop.f32.mrf.mxu0 }
 0x4b8   : > { %v10030_v6 = vadd.f32 %v10029_v7, %v10028_v38  ;;  %v10679_v29 = vpop.f32.mrf.mxu1 }
 0x4b9   : > { %v10031_v48 = vpop.f32.mrf.mxu0 }
 0x4ba   : > { %v15847_v5 = vadd.f32 %v10030_v6, %v6595_v19  ;;  %v6598_v21 = vpop.f32.mrf.mxu1 }
 0x4bb   : > { %v10032_v50 = vpop.f32.mrf.mxu0  ;;  %10773 = vmatmul.mubr.bf16.gmra.mxu1 %v7777_v4 }
 0x4bc   : > { %v10033_v20 = vadd.f32 %v10032_v50, %v10031_v48  ;;  %10776 = vmatprep.mubr.bf16.mxu1 %v15578_v47 }
 0x4bd   : > { %v10034_v49 = vpop.f32.mrf.mxu0  ;;  %8109 = vmatmul.mubr.bf16.gmra.mxu0 %v7665_v18 }
 0x4be   : > { %v15853_v34 = vadd.f32 %v10033_v20, %v6598_v21  ;;  %8116 = vmatprep.mubr.bf16.mxu0 %v15685_v9 }
 0x4bf   : > { %v10035_v12 = vpop.f32.mrf.mxu0 }
 0x4c0   : > { %v10036_v61 = vadd.f32 %v10035_v12, %v10034_v49 }
 0x4c1   : > { %v10037_v30 = vpop.f32.mrf.mxu0 }
 0x4c2   : > { %v15858_v31 = vadd.f32 %v10678_v16, %v10036_v61  ;;  %v7667_v16 = vpack.c.bf16 %v15087_v22, %v15087_v22 }
 0x4c3   : > { %v10038_v51 = vpop.f32.mrf.mxu0  ;;  %v10682_v54 = vpop.f32.mrf.mxu1  ;;  %10777 = vmatmul.mubr.bf16.gmra.mxu1 %v7779_v28 }
 0x4c4   : > { %v10039_v47 = vadd.f32 %v10038_v51, %v10037_v30 }
 0x4c5   : > { %v10040_v37 = vpop.f32.mrf.mxu0  ;;  %8117 = vmatmul.mubr.bf16.gmra.mxu0 %v15580_v15  ;;  %v6611_v57 = vpop.f32.mrf.mxu1 }
 0x4c6   : > { %v15861_v11 = vadd.f32 %v10679_v29, %v10039_v47  ;;  %8124 = vmatprep.mubr.bf16.mxu0 %v7683_v10 }
 0x4c7   : > { %v10041_v9 = vpop.f32.mrf.mxu0  ;;  %v10683_v38 = vpop.f32.mrf.mxu1 }
 0x4c8   : > { %v10042_v36 = vadd.f32 %v10041_v9, %v10040_v37 }
 0x4c9   : > { %v10043_v63 = vpop.f32.mrf.mxu0  ;;  %v6614_v19 = vpop.f32.mrf.mxu1 }
 0x4ca   : > { %v15865_v44 = vadd.f32 %v10042_v36, %v6611_v57 }
 0x4cb   : > { %v10044_v26 = vpop.f32.mrf.mxu0  ;;  %v10092_v7 = vpop.f32.mrf.mxu1 }
 0x4cc   : > { %v10045_v6 = vadd.f32 %v10044_v26, %v10043_v63  ;;  %v9961_v63 = vadd.f32 %v15628_v58, %v15626_v53 }
 0x4cd   : > { %v10046_v17 = vpop.f32.mrf.mxu0  ;;  %8125 = vmatmul.mubr.bf16.gmra.mxu0 %v7667_v16  ;;  %v10093_v15 = vpop.f32.mrf.mxu1 }
 0x4ce   : > { %v15867_v48 = vadd.f32 %v10045_v6, %v6614_v19  ;;  %v10094_v29 = vadd.f32 %v10093_v15, %v10092_v7  ;;  %v6503_v7 = vadd.f32 %v9961_v63, %v15641_v1 }
 0x4cf   : > { %v10047_v4 = vpop.f32.mrf.mxu0  ;;  %v10095_v3 = vpop.f32.mrf.mxu1 }
 0x4d0   : > { %v10048_v50 = vadd.f32 %v10047_v4, %v10046_v17 }
 0x4d1   : > { %v10049_v21 = vpop.f32.mrf.mxu0  ;;  %v10096_v18 = vpop.f32.mrf.mxu1 }
 0x4d2   : > { %v15869_v20 = vadd.f32 %v10682_v54, %v10048_v50  ;;  %v10097_v49 = vadd.f32 %v10096_v18, %v10095_v3 }
 0x4d3   : > { %v10050_v22 = vpop.f32.mrf.mxu0  ;;  %v10098_v12 = vpop.f32.mrf.mxu1 }
 0x4d4   : > { %v10051_v28 = vadd.f32 %v10050_v22, %v10049_v21 }
 0x4d5   : > { %v10702_v61 = vpop.f32.mrf.mxu0  ;;  %v10099_v30 = vpop.f32.mrf.mxu1 }
 0x4d6   : > { %v15871_v62 = vadd.f32 %v10683_v38, %v10051_v28  ;;  %v10100_v10 = vadd.f32 %v10099_v30, %v10098_v12  ;;  %v6519_v12 = vadd.f32 %v15652_v60, %v15659_v35 }
 0x4d7   : > { %v7301_v51 = vpop.f32.mrf.mxu0  ;;  %v10101_v47 = vpop.f32.mrf.mxu1 }
 0x4d8   : > { %v7302_v37 = vadd.f32 %v10094_v29, %v7301_v51  ;;  %v7310_v57 = vadd.f32 %v10702_v61, %v10100_v10 }
 0x4d9   : > { %v10703_v9 = vpop.f32.mrf.mxu0  ;;  %v10102_v36 = vpop.f32.mrf.mxu1 }
 0x4da   : > { %v15876_v54 = vadd.f32 %v7302_v37, %v15637_v25  ;;  %v10103_v19 = vadd.f32 %v10102_v36, %v10101_v47  ;;  %v15879_v16 = vadd.f32 %v7310_v57, %v15639_v56 }
 0x4db   : > { %v7304_v26 = vpop.f32.mrf.mxu0  ;;  %v10104_v38 = vpop.f32.mrf.mxu1 }
 0x4dc   : > { %v7305_v6 = vadd.f32 %v10097_v49, %v7304_v26  ;;  %v7313_v17 = vadd.f32 %v10703_v9, %v10103_v19 }
 0x4dd   : > { %v10706_v15 = vpop.f32.mrf.mxu0  ;;  %v10105_v29 = vpop.f32.mrf.mxu1 }
 0x4de   : > { %v15882_v4 = vadd.f32 %v7305_v6, %v6503_v7  ;;  %v10106_v3 = vadd.f32 %v10105_v29, %v10104_v38  ;;  %v15885_v53 = vadd.f32 %v7313_v17, %v15646_v8 }
 0x4df   : > { %v7317_v58 = vpop.f32.mrf.mxu0  ;;  %v10107_v25 = vpop.f32.mrf.mxu1 }
 0x4e0   : > { %v7318_v50 = vadd.f32 %v10106_v3, %v7317_v58 }
 0x4e1   : > { %v10707_v21 = vpop.f32.mrf.mxu0  ;;  %v10108_v56 = vpop.f32.mrf.mxu1 }
 0x4e2   : > { %v10109_v18 = vadd.f32 %v10108_v56, %v10107_v25  ;;  %v15888_v22 = vadd.f32 %v7318_v50, %v15649_v40 }
 0x4e3   : > { %v7320_v1 = vpop.f32.mrf.mxu0  ;;  %v10110_v49 = vpop.f32.mrf.mxu1 }
 0x4e4   : > { %v7321_v28 = vadd.f32 %v10109_v18, %v7320_v1 }
 0x4e5   : > { %v10710_v61 = vpop.f32.mrf.mxu0  ;;  %v10111_v30 = vpop.f32.mrf.mxu1 }
 0x4e6   : > { %v10112_v10 = vadd.f32 %v10111_v30, %v10110_v49  ;;  %v15892_v8 = vadd.f32 %v7321_v28, %v6519_v12 }
 0x4e7   : > { %v7333_v51 = vpop.f32.mrf.mxu0  ;;  %v10113_v47 = vpop.f32.mrf.mxu1 }
 0x4e8   : > { %v7326_v37 = vadd.f32 %v10706_v15, %v10112_v10 }
 0x4e9   : > { %v10711_v57 = vpop.f32.mrf.mxu0  ;;  %v10114_v9 = vpop.f32.mrf.mxu1 }
 0x4ea   : > { %v10115_v36 = vadd.f32 %v10114_v9, %v10113_v47  ;;  %v15895_v40 = vadd.f32 %v7326_v37, %v15661_v14 }
 0x4eb   : > { %v7336_v63 = vpop.f32.mrf.mxu0  ;;  %v10116_v19 = vpop.f32.mrf.mxu1 }
 0x4ec   : > { %v7329_v26 = vadd.f32 %v10707_v21, %v10115_v36 }
 0x4ed   : > { %v10714_v38 = vpop.f32.mrf.mxu0  ;;  %v10117_v60 = vpop.f32.mrf.mxu1 }
 0x4ee   : > { %v10118_v35 = vadd.f32 %v10117_v60, %v10116_v19  ;;  %v15898_v7 = vadd.f32 %v7329_v26, %v15671_v13 }
 0x4ef   : > { %v7349_v6 = vpop.f32.mrf.mxu0  ;;  %v10119_v17 = vpop.f32.mrf.mxu1 }
 0x4f0   : > { %v7334_v29 = vadd.f32 %v10118_v35, %v7333_v51 }
 0x4f1   : > { %v10715_v3 = vpop.f32.mrf.mxu0  ;;  %v10120_v15 = vpop.f32.mrf.mxu1 }
 0x4f2   : > { %v10121_v58 = vadd.f32 %v10120_v15, %v10119_v17  ;;  %v15901_v25 = vadd.f32 %v7334_v29, %v15678_v32 }
 0x4f3   : > { %v7352_v14 = vpop.f32.mrf.mxu0  ;;  %v10122_v50 = vpop.f32.mrf.mxu1 }
 0x4f4   : > { %v7337_v56 = vadd.f32 %v10121_v58, %v7336_v63 }
 0x4f5   : > { %v10718_v18 = vpop.f32.mrf.mxu0  ;;  %v10123_v21 = vpop.f32.mrf.mxu1 }
 0x4f6   : > { %v10124_v1 = vadd.f32 %v10123_v21, %v10122_v50  ;;  %v15904_v49 = vadd.f32 %v7337_v56, %v15694_v55 }
 0x4f7   : > { %v7365_v13 = vpop.f32.mrf.mxu0  ;;  %v10125_v12 = vpop.f32.mrf.mxu1 }
 0x4f8   : > { %v7342_v28 = vadd.f32 %v10710_v61, %v10124_v1 }
 0x4f9   : > { %v10719_v30 = vpop.f32.mrf.mxu0  ;;  %v10126_v10 = vpop.f32.mrf.mxu1 }
 0x4fa   : > { %v10127_v51 = vadd.f32 %v10126_v10, %v10125_v12  ;;  %v15907_v47 = vadd.f32 %v7342_v28, %v15701_v24 }
 0x4fb   : > { %v7368_v32 = vpop.f32.mrf.mxu0  ;;  %v10128_v37 = vpop.f32.mrf.mxu1 }
 0x4fc   : > { %v7345_v9 = vadd.f32 %v10711_v57, %v10127_v51 }
 0x4fd   : > { %v15909_v36 = vpop.f32.mrf.mxu0  ;;  %v10129_v63 = vpop.f32.mrf.mxu1 }
 0x4fe   : > { %v10130_v19 = vadd.f32 %v10129_v63, %v10128_v37  ;;  %v15912_v26 = vadd.f32 %v7345_v9, %v15713_v43 }
 0x4ff   : > { %v7381_v55 = vpop.f32.mrf.mxu0  ;;  %v10131_v60 = vpop.f32.mrf.mxu1 }
 0x500   : > { %v7350_v35 = vadd.f32 %v10130_v19, %v7349_v6 }
 0x501   : > { %v15914_v61 = vpop.f32.mrf.mxu0  ;;  %v10132_v17 = vpop.f32.mrf.mxu1 }
 0x502   : > { %v10133_v29 = vadd.f32 %v10132_v17, %v10131_v60  ;;  %v15917_v24 = vadd.f32 %v7350_v35, %v15720_v52 }
 0x503   : > { %v7384_v15 = vpop.f32.mrf.mxu0  ;;  %v10134_v58 = vpop.f32.mrf.mxu1 }
 0x504   : > { %v7353_v57 = vadd.f32 %v10133_v29, %v7352_v14 }
 0x505   : > { %v15919_v50 = vpop.f32.mrf.mxu0  ;;  %v10135_v56 = vpop.f32.mrf.mxu1 }
 0x506   : > { %v10136_v21 = vadd.f32 %v10135_v56, %v10134_v58  ;;  %v15922_v43 = vadd.f32 %v7353_v57, %v15732_v0 }
 0x507   : > { %v15924_v1 = vpop.f32.mrf.mxu0  ;;  %v10137_v6 = vpop.f32.mrf.mxu1 }
 0x508   : > { %v7358_v12 = vadd.f32 %v10714_v38, %v10136_v21 }
 0x509   : > { %v15926_v28 = vpop.f32.mrf.mxu0  ;;  %v10138_v10 = vpop.f32.mrf.mxu1 }
 0x50a   : > { %v10139_v51 = vadd.f32 %v10138_v10, %v10137_v6  ;;  %v15929_v52 = vadd.f32 %v7358_v12, %v15740_v23 }
 0x50b   : > { %v15931_v37 = vpop.f32.mrf.mxu0  ;;  %v10140_v14 = vpop.f32.mrf.mxu1 }
 0x50c   : > { %v7361_v9 = vadd.f32 %v10715_v3, %v10139_v51 }
 0x50d   : > { %v15933_v63 = vpop.f32.mrf.mxu0  ;;  %v10141_v19 = vpop.f32.mrf.mxu1 }
 0x50e   : > { %v10142_v0 = vadd.f32 %v10141_v19, %v10140_v14  ;;  %v15936_v60 = vadd.f32 %v7361_v9, %v15755_v27 }
 0x50f   : > { %v15938_v35 = vpop.f32.mrf.mxu0  ;;  %v10143_v38 = vpop.f32.mrf.mxu1 }
 0x510   : > { %v7366_v17 = vadd.f32 %v10142_v0, %v7365_v13 }
 0x511   : > { %v15940_v29 = vpop.f32.mrf.mxu0  ;;  %v10144_v58 = vpop.f32.mrf.mxu1 }
 0x512   : > { %v10145_v23 = vadd.f32 %v10144_v58, %v10143_v38  ;;  %v15943_v57 = vadd.f32 %v7366_v17, %v15771_v42 }
 0x513   : > { %v15945_v56 = vpop.f32.mrf.mxu0  ;;  %v10146_v3 = vpop.f32.mrf.mxu1 }
 0x514   : > { %v7369_v21 = vadd.f32 %v10145_v23, %v7368_v32 }
 0x515   : > { %v15947_v6 = vpop.f32.mrf.mxu0  ;;  %v10147_v12 = vpop.f32.mrf.mxu1 }
 0x516   : > { %v10148_v27 = vadd.f32 %v10147_v12, %v10146_v3  ;;  %v15950_v10 = vadd.f32 %v7369_v21, %v15779_v46 }
 0x517   : > { %v15952_v51 = vpop.f32.mrf.mxu0  ;;  %v10149_v13 = vpop.f32.mrf.mxu1 }
 0x518   : > { %16509 = vst [vmem:[#allocation7_spill] sm:$0xff] %v15950_v10  ;;  %v7374_v14 = vadd.f32 %v10718_v18, %v10148_v27 }
 0x519   : > { %v15954_v9 = vpop.f32.mrf.mxu0  ;;  %v10150_v19 = vpop.f32.mrf.mxu1 }
 0x51a   : > { %v10151_v42 = vadd.f32 %v10150_v19, %v10149_v13  ;;  %v15957_v0 = vadd.f32 %v7374_v14, %v15794_v45 }
 0x51b   : > { %v15959_v38 = vpop.f32.mrf.mxu0  ;;  %v10152_v32 = vpop.f32.mrf.mxu1 }
 0x51c   : > { %v7377_v17 = vadd.f32 %v10719_v30, %v10151_v42 }
 0x51d   : > { %v15961_v58 = vpop.f32.mrf.mxu0  ;;  %v10153_v23 = vpop.f32.mrf.mxu1 }
 0x51e   : > { %v10154_v46 = vadd.f32 %v10153_v23, %v10152_v32  ;;  %v15964_v3 = vadd.f32 %v7377_v17, %v15800_v2 }
 0x51f   : > { %v15966_v21 = vpop.f32.mrf.mxu0  ;;  %v10155_v18 = vpop.f32.mrf.mxu1 }
 0x520   : > { %v7382_v12 = vadd.f32 %v10154_v46, %v7381_v55 }
 0x521   : > { %v15968_v27 = vpop.f32.mrf.mxu0  ;;  %v10156_v13 = vpop.f32.mrf.mxu1 }
 0x522   : > { %v10157_v45 = vadd.f32 %v10156_v13, %v10155_v18  ;;  %v15971_v14 = vadd.f32 %v7382_v12, %v15814_v33 }
 0x523   : > { %v15973_v19 = vpop.f32.mrf.mxu0  ;;  %v10158_v30 = vpop.f32.mrf.mxu1 }
 0x524   : > { %16510 = vst [vmem:[#allocation20_spill] sm:$0xff] %v15971_v14  ;;  %v7385_v42 = vadd.f32 %v10157_v45, %v7384_v15 }
 0x525   : > { %v15975_v10 = vpop.f32.mrf.mxu0  ;;  %v10159_v32 = vpop.f32.mrf.mxu1 }
 0x526   : > { %v10160_v2 = vadd.f32 %v10159_v32, %v10158_v30  ;;  %v15978_v17 = vadd.f32 %v7385_v42, %v15819_v39 }
 0x527   : > { %v15980_v23 = vpop.f32.mrf.mxu0  ;;  %v10161_v55 = vpop.f32.mrf.mxu1 }
 0x528   : > { %16511 = vst [vmem:[#allocation22_spill] sm:$0xff] %v15978_v17  ;;  %v7390_v46 = vadd.f32 %v15909_v36, %v10160_v2 }
 0x529   : > { %v15983_v18 = vpop.f32.mrf.mxu0  ;;  %v10162_v33 = vpop.f32.mrf.mxu1 }
 0x52a   : > { %v10163_v12 = vadd.f32 %v10162_v33, %v10161_v55  ;;  %v15986_v13 = vadd.f32 %v7390_v46, %v15833_v41 }
 0x52b   : > { %v15988_v15 = vpop.f32.mrf.mxu0  ;;  %v10164_v45 = vpop.f32.mrf.mxu1 }
 0x52c   : > { %v7393_v30 = vadd.f32 %v15914_v61, %v10163_v12 }
 0x52d   : > { %v15991_v32 = vpop.f32.mrf.mxu0  ;;  %v10165_v39 = vpop.f32.mrf.mxu1 }
 0x52e   : > { %v10166_v42 = vadd.f32 %v10165_v39, %v10164_v45  ;;  %v15994_v17 = vadd.f32 %v7393_v30, %v15838_v59 }
 0x52f   : > { %v15996_v36 = vpop.f32.mrf.mxu0  ;;  %v10167_v2 = vpop.f32.mrf.mxu1 }
 0x530   : > { %16512 = vst [vmem:[#allocation18_spill] sm:$0xff] %v15994_v17  ;;  %v7398_v55 = vadd.f32 %v10166_v42, %v15924_v1 }
 0x531   : > { %v15999_v33 = vpop.f32.mrf.mxu0  ;;  %v10168_v41 = vpop.f32.mrf.mxu1 }
 0x532   : > { %v10169_v46 = vadd.f32 %v10168_v41, %v10167_v2  ;;  %v16002_v14 = vadd.f32 %v7398_v55, %v15847_v5 }
 0x533   : > { %v16004_v61 = vpop.f32.mrf.mxu0  ;;  %v10170_v12 = vpop.f32.mrf.mxu1 }
 0x534   : > { %16513 = vst [vmem:[#allocation15_spill] sm:$0xff] %v16002_v14  ;;  %v7401_v45 = vadd.f32 %v10169_v46, %v15931_v37 }
 0x535   : > { %v16007_v39 = vpop.f32.mrf.mxu0  ;;  %v10171_v59 = vpop.f32.mrf.mxu1 }
 0x536   : > { %v10172_v30 = vadd.f32 %v10171_v59, %v10170_v12  ;;  %v16010_v17 = vadd.f32 %v7401_v45, %v15853_v34 }
 0x537   : > { %v16012_v1 = vpop.f32.mrf.mxu0  ;;  %v10173_v42 = vpop.f32.mrf.mxu1 }
 0x538   : > { %16514 = vst [vmem:[#allocation8_spill] sm:$0xff] %v16010_v17  ;;  %v7406_v2 = vadd.f32 %v15919_v50, %v10172_v30 }
 0x539   : > { %v16015_v41 = vpop.f32.mrf.mxu0  ;;  %v10174_v5 = vpop.f32.mrf.mxu1 }
 0x53a   : > { %v10175_v55 = vadd.f32 %v10174_v5, %v10173_v42  ;;  %v16018_v14 = vadd.f32 %v7406_v2, %v15858_v31 }
 0x53b   : > { %v16020_v37 = vpop.f32.mrf.mxu0  ;;  %v10176_v46 = vpop.f32.mrf.mxu1 }
 0x53c   : > { %16515 = vst [vmem:[#allocation21_spill] sm:$0xff] %v16018_v14  ;;  %v7409_v12 = vadd.f32 %v15926_v28, %v10175_v55 }
 0x53d   : > { %v16023_v59 = vpop.f32.mrf.mxu0  ;;  %v10177_v34 = vpop.f32.mrf.mxu1 }
 0x53e   : > { %v10178_v45 = vadd.f32 %v10177_v34, %v10176_v46  ;;  %v16026_v17 = vadd.f32 %v7409_v12, %v15861_v11 }
 0x53f   : > { %v16028_v50 = vpop.f32.mrf.mxu0  ;;  %v10179_v30 = vpop.f32.mrf.mxu1 }
 0x540   : > { %16516 = vst [vmem:[#allocation17_spill] sm:$0xff] %v16026_v17  ;;  %v7414_v42 = vadd.f32 %v10178_v45, %v15938_v35 }
 0x541   : > { %v16031_v5 = vpop.f32.mrf.mxu0  ;;  %v10180_v31 = vpop.f32.mrf.mxu1 }
 0x542   : > { %v10181_v2 = vadd.f32 %v10180_v31, %v10179_v30  ;;  %v16034_v14 = vadd.f32 %v7414_v42, %v15865_v44  ;;  %v10236_v42 = vadd.f32 %v15966_v21, %v15961_v58 }
 0x543   : > { %v16036_v28 = vpop.f32.mrf.mxu0  ;;  %v10182_v55 = vpop.f32.mrf.mxu1 }
 0x544   : > { %16517 = vst [vmem:[#allocation19_spill] sm:$0xff] %v16034_v14  ;;  %v7417_v46 = vadd.f32 %v10181_v2, %v15945_v56 }
 0x545   : > { %v16039_v34 = vpop.f32.mrf.mxu0  ;;  %v10183_v11 = vpop.f32.mrf.mxu1 }
 0x546   : > { %v10184_v12 = vadd.f32 %v10183_v11, %v10182_v55  ;;  %v16042_v17 = vadd.f32 %v7417_v46, %v15867_v48  ;;  %v10230_v48 = vadd.f32 %v15952_v51, %v15947_v6  ;;  %v16074_v6 = vld [vmem:[%s16298_s2] ss:$0 sm:$0xff] }
 0x547   : > { %v16044_v35 = vpop.f32.mrf.mxu0  ;;  %v10185_v45 = vpop.f32.mrf.mxu1 }
 0x548   : > { %16518 = vst [vmem:[#allocation10_spill] sm:$0xff] %v16042_v17  ;;  %v7422_v30 = vadd.f32 %v15933_v63, %v10184_v12  ;;  %v10239_v17 = vadd.f32 %v15973_v19, %v15968_v27 }
 0x549   : > { %v16047_v31 = vpop.f32.mrf.mxu0  ;;  %v10186_v44 = vpop.f32.mrf.mxu1 }
 0x54a   : > { %v16052_v56 = vadd.f32 %v7422_v30, %v15869_v20  ;;  %v10187_v2 = vadd.f32 %v10186_v44, %v10185_v45  ;;  %v16083_v44 = vld [vmem:[%s16299_s3] ss:$0 sm:$0xff] }
 0x54b   : > { %v16054_v14 = vpop.f32.mrf.mxu0  ;;  %v10750_v55 = vpop.f32.mrf.mxu1 }
 0x54c   : > { %v7425_v46 = vadd.f32 %v15940_v29, %v10187_v2  ;;  %v8176_v11 = vadd.f32 %v10750_v55, %v10236_v42  ;;  %v10233_v29 = vadd.f32 %v15959_v38, %v15954_v9  ;;  %v10248_v55 = vadd.f32 %v15996_v36, %v15991_v32 }
 0x54d   : > { %v16059_v63 = vpop.f32.mrf.mxu0  ;;  %v8167_v12 = vpop.f32.mrf.mxu1 }
 0x54e   : > { %v16064_v58 = vadd.f32 %v7425_v46, %v15871_v62  ;;  %v8328_v20 = vadd.f32 %v8176_v11, %v15879_v16  ;;  %v8168_v21 = vadd.f32 %v10230_v48, %v8167_v12  ;;  %v10242_v48 = vadd.f32 %v15980_v23, %v15975_v10 }
 0x54f   : > { %v16067_v45 = vpop.f32.mrf.mxu0  ;;  %v10751_v30 = vpop.f32.mrf.mxu1 }
 0x550   : > { %v8424_v51 = vmul.f32 %v16074_v6, %v8328_v20  ;;  %v8326_v62 = vadd.f32 %v8168_v21, %v15876_v54  ;;  %v8179_v27 = vadd.f32 %v10751_v30, %v10239_v17  ;;  %v10251_v21 = vadd.f32 %v16004_v61, %v15999_v33 }
 0x551   : > { %v16078_v19 = vpop.f32.mrf.mxu0  ;;  %v8170_v16 = vpop.f32.mrf.mxu1 }
 0x552   : > { %v8456_v9 = vadd.f32 %v16083_v44, %v8424_v51  ;;  %v8422_v38 = vmul.f32 %v16074_v6, %v8326_v62  ;;  %v8329_v42 = vadd.f32 %v8179_v27, %v15885_v53  ;;  %v8171_v2 = vadd.f32 %v10233_v29, %v8170_v16 }
 0x553   : > { %v16097_v54 = vpop.f32.mrf.mxu0  ;;  %v10754_v17 = vpop.f32.mrf.mxu1 }
 0x554   : > { %v8488_v46 = vmax.f32 %v8456_v9, 0.0  ;;  %v8454_v53 = vadd.f32 %v16083_v44, %v8422_v38  ;;  %v8425_v11 = vmul.f32 %v16074_v6, %v8329_v42  ;;  %v8327_v36 = vadd.f32 %v8171_v2, %v15882_v4 }
 0x555   : > { %v16103_v32 = vpop.f32.mrf.mxu0  ;;  %v8192_v12 = vadd.f32 %v10754_v17, %v10248_v55  ;;  %v8183_v20 = vpop.f32.mrf.mxu1  ;;  %v10245_v4 = vadd.f32 %v15988_v15, %v15983_v18  ;;  %v10260_v55 = vadd.f32 %v16028_v50, %v16023_v59 }
 0x556   : > { %8520 = vst.msk [vmem:[%s16095_s26 + $0x10] sm:$0xff] %vm288_vm0, %v8488_v46  ;;  %v8486_v30 = vmax.f32 %v8454_v53, 0.0  ;;  %v8457_v10 = vadd.f32 %v16083_v44, %v8425_v11  ;;  %v8184_v23 = vadd.f32 %v10242_v48, %v8183_v20  ;;  %v8423_v29 = vmul.f32 %v16074_v6, %v8327_v36 }
 0x557   : > { %v16112_v51 = vpop.f32.mrf.mxu0  ;;  %v8332_v62 = vadd.f32 %v8192_v12, %v15895_v40  ;;  %v10755_v27 = vpop.f32.mrf.mxu1  ;;  %v10254_v53 = vadd.f32 %v16012_v1, %v16007_v39  ;;  %v10263_v39 = vadd.f32 %v16036_v28, %v16031_v5 }
 0x558   : > { %8518 = vst.msk [vmem:[%s16095_s26] sm:$0xff] %vm288_vm0, %v8486_v30  ;;  %v8489_v33 = vmax.f32 %v8457_v10, 0.0  ;;  %v8330_v61 = vadd.f32 %v8184_v23, %v15888_v22  ;;  %v8195_v16 = vadd.f32 %v10755_v27, %v10251_v21  ;;  %v8455_v9 = vadd.f32 %v16083_v44, %v8423_v29 }
 0x559   : > { %v8428_v38 = vmul.f32 %v16074_v6, %v8332_v62  ;;  %v16122_v42 = vpop.f32.mrf.mxu0  ;;  %v8186_v2 = vpop.f32.mrf.mxu1  ;;  %v10257_v62 = vadd.f32 %v16020_v37, %v16015_v41 }
 0x55a   : > { %8521 = vst.msk [vmem:[%s16095_s26 + $0x18] sm:$0xff] %vm288_vm0, %v8489_v33  ;;  %v8426_v40 = vmul.f32 %v16074_v6, %v8330_v61  ;;  %v8333_v18 = vadd.f32 %v8195_v16, %v15898_v7  ;;  %v8187_v15 = vadd.f32 %v10245_v4, %v8186_v2  ;;  %v8487_v22 = vmax.f32 %v8455_v9, 0.0 }
 0x55b   : > { %v8460_v17 = vadd.f32 %v16083_v44, %v8428_v38  ;;  %v16131_v48 = vpop.f32.mrf.mxu0  ;;  %v10758_v46 = vpop.f32.mrf.mxu1 }
 0x55c   : > { %v8458_v11 = vadd.f32 %v16083_v44, %v8426_v40  ;;  %v8429_v36 = vmul.f32 %v16074_v6, %v8333_v18  ;;  %v8331_v7 = vadd.f32 %v8187_v15, %v15892_v8  ;;  %8519 = vst.msk [vmem:[%s16095_s26 + $0x8] sm:$0xff] %vm288_vm0, %v8487_v22  ;;  %v8208_v12 = vadd.f32 %v10758_v46, %v10260_v55 }
 0x55d   : > { %v8492_v59 = vmax.f32 %v8460_v17, 0.0  ;;  %v10282_v50 = vpop.f32.mrf.mxu0  ;;  %v8199_v20 = vpop.f32.mrf.mxu1  ;;  %v10266_v18 = vadd.f32 %v16044_v35, %v16039_v34  ;;  %v10275_v35 = vadd.f32 %v16097_v54, %v16078_v19 }
 0x55e   : > { %v8490_v21 = vmax.f32 %v8458_v11, 0.0  ;;  %v8461_v30 = vadd.f32 %v16083_v44, %v8429_v36  ;;  %v8427_v10 = vmul.f32 %v16074_v6, %v8331_v7  ;;  %v8200_v23 = vadd.f32 %v10254_v53, %v8199_v20 }
 0x55f   : > { %8524 = vst.msk [vmem:[%s16095_s26 + $0x30] sm:$0xff] %vm288_vm0, %v8492_v59  ;;  %v10283_v8 = vpop.f32.mrf.mxu0  ;;  %v8336_v1 = vadd.f32 %v8208_v12, %v15907_v47  ;;  %v10759_v29 = vpop.f32.mrf.mxu1  ;;  %v10272_v47 = vadd.f32 %v16067_v45, %v16059_v63  ;;  %v10269_v59 = vadd.f32 %v16054_v14, %v16047_v31 }
 0x560   : > { %8522 = vst.msk [vmem:[%s16095_s26 + $0x20] sm:$0xff] %vm288_vm0, %v8490_v21  ;;  %v8493_v27 = vmax.f32 %v8461_v30, 0.0  ;;  %v8459_v4 = vadd.f32 %v16083_v44, %v8427_v10  ;;  %v8334_v33 = vadd.f32 %v8200_v23, %v15901_v25  ;;  %v8211_v28 = vadd.f32 %v10759_v29, %v10263_v39 }
 0x561   : > { %v8432_v61 = vmul.f32 %v16074_v6, %v8336_v1  ;;  %v10285_v5 = vpop.f32.mrf.mxu0  ;;  %v8202_v16 = vpop.f32.mrf.mxu1  ;;  %v10284_v31 = vadd.f32 %v10283_v8, %v10282_v50 }
 0x562   : > { %8525 = vst.msk [vmem:[%s16095_s26 + $0x38] sm:$0xff] %vm288_vm0, %v8493_v27  ;;  %v8491_v9 = vmax.f32 %v8459_v4, 0.0  ;;  %v8430_v41 = vmul.f32 %v16074_v6, %v8334_v33  ;;  %v8203_v37 = vadd.f32 %v10257_v62, %v8202_v16  ;;  %v8337_v40 = vadd.f32 %v8211_v28, %v15912_v26 }
 0x563   : > { %v8464_v38 = vadd.f32 %v16083_v44, %v8432_v61  ;;  %v10286_v2 = vpop.f32.mrf.mxu0  ;;  %v10762_v25 = vpop.f32.mrf.mxu1 }
 0x564   : > { %8523 = vst.msk [vmem:[%s16095_s26 + $0x28] sm:$0xff] %vm288_vm0, %v8491_v9  ;;  %v8462_v63 = vadd.f32 %v16083_v44, %v8430_v41  ;;  %v8335_v45 = vadd.f32 %v8203_v37, %v15904_v49  ;;  %v8224_v15 = vadd.f32 %v10762_v25, %v10272_v47  ;;  %v8433_v22 = vmul.f32 %v16074_v6, %v8337_v40 }
 0x565   : > { %v8496_v55 = vmax.f32 %v8464_v38, 0.0  ;;  %v16168_v17 = vpop.f32.mrf.mxu0  ;;  %v8215_v46 = vpop.f32.mrf.mxu1  ;;  %v10287_v16 = vadd.f32 %v10286_v2, %v10285_v5 }
 0x566   : > { %v8494_v26 = vmax.f32 %v8462_v63, 0.0  ;;  %v8431_v53 = vmul.f32 %v16074_v6, %v8335_v45  ;;  %v8340_v11 = vadd.f32 %v8224_v15, %v15929_v52  ;;  %v8216_v34 = vadd.f32 %v10266_v18, %v8215_v46 }
 0x567   : > { %8528 = vst.msk [vmem:[%s16095_s26 + $0x50] sm:$0xff] %vm288_vm0, %v8496_v55  ;;  %v8465_v49 = vadd.f32 %v16083_v44, %v8433_v22  ;;  %v10289_v36 = vpop.f32.mrf.mxu0  ;;  %v10763_v7 = vpop.f32.mrf.mxu1 }
 0x568   : > { %8526 = vst.msk [vmem:[%s16095_s26 + $0x40] sm:$0xff] %vm288_vm0, %v8494_v26  ;;  %v8463_v12 = vadd.f32 %v16083_v44, %v8431_v53  ;;  %v8436_v52 = vmul.f32 %v16074_v6, %v8340_v11  ;;  %v8338_v20 = vadd.f32 %v8216_v34, %v15917_v24  ;;  %v8227_v21 = vadd.f32 %v10763_v7, %v10275_v35  ;;  %v16519_v11 = vld [vmem:[#allocation7_spill] sm:$0xff] }
 0x569   : > { %v8497_v19 = vmax.f32 %v8465_v49, 0.0  ;;  %v16184_v54 = vpop.f32.mrf.mxu0  ;;  %v8218_v30 = vpop.f32.mrf.mxu1  ;;  %v10278_v24 = vadd.f32 %v16112_v51, %v16103_v32  ;;  %v10290_v46 = vadd.f32 %v10289_v36, %v16168_v17 }
 0x56a   : > { %v8495_v10 = vmax.f32 %v8463_v12, 0.0  ;;  %v8468_v23 = vadd.f32 %v16083_v44, %v8436_v52  ;;  %v8434_v39 = vmul.f32 %v16074_v6, %v8338_v20  ;;  %v8219_v14 = vadd.f32 %v10269_v59, %v8218_v30 }
 0x56b   : > { %8529 = vst.msk [vmem:[%s16095_s26 + $0x58] sm:$0xff] %vm288_vm0, %v8497_v19  ;;  %v10292_v1 = vpop.f32.mrf.mxu0  ;;  %v8341_v29 = vadd.f32 %v8227_v21, %v15936_v60  ;;  %v10766_v62 = vpop.f32.mrf.mxu1 }
 0x56c   : > { %8527 = vst.msk [vmem:[%s16095_s26 + $0x48] sm:$0xff] %vm288_vm0, %v8495_v10  ;;  %v8500_v27 = vmax.f32 %v8468_v23, 0.0  ;;  %v8466_v4 = vadd.f32 %v16083_v44, %v8434_v39  ;;  %v8339_v33 = vadd.f32 %v8219_v14, %v15922_v43  ;;  %v8240_v8 = vadd.f32 %v10766_v62, %v10284_v31  ;;  %v16520_v39 = vld [vmem:[#allocation20_spill] sm:$0xff] }
 0x56d   : > { %v8437_v61 = vmul.f32 %v16074_v6, %v8341_v29  ;;  %v10294_v50 = vpop.f32.mrf.mxu0  ;;  %v8231_v28 = vpop.f32.mrf.mxu1  ;;  %v10281_v43 = vadd.f32 %v16131_v48, %v16122_v42  ;;  %v10293_v30 = vadd.f32 %v10292_v1, %v16184_v54 }
 0x56e   : > { %8532 = vst.msk [vmem:[%s16095_s26 + $0x70] sm:$0xff] %vm288_vm0, %v8500_v27  ;;  %v8498_v60 = vmax.f32 %v8466_v4, 0.0  ;;  %v8435_v47 = vmul.f32 %v16074_v6, %v8339_v33  ;;  %v8232_v32 = vadd.f32 %v10278_v24, %v8231_v28  ;;  %v8344_v41 = vadd.f32 %v8240_v8, %v15957_v0  ;;  %v16521_v33 = vld [vmem:[#allocation18_spill] sm:$0xff] }
 0x56f   : > { %v8469_v51 = vadd.f32 %v16083_v44, %v8437_v61  ;;  %v10295_v9 = vpop.f32.mrf.mxu0  ;;  %v10767_v37 = vpop.f32.mrf.mxu1 }
 0x570   : > { %8530 = vst.msk [vmem:[%s16095_s26 + $0x60] sm:$0xff] %vm288_vm0, %v8498_v60  ;;  %v8467_v5 = vadd.f32 %v16083_v44, %v8435_v47  ;;  %v8342_v38 = vadd.f32 %v8232_v32, %v15943_v57  ;;  %v8243_v2 = vadd.f32 %v10767_v37, %v10287_v16  ;;  %v8440_v25 = vmul.f32 %v16074_v6, %v8344_v41  ;;  %v16522_v16 = vld [vmem:[#allocation22_spill] sm:$0xff] }
 0x571   : > { %v8501_v40 = vmax.f32 %v8469_v51, 0.0  ;;  %v10297_v18 = vpop.f32.mrf.mxu0  ;;  %v8234_v63 = vpop.f32.mrf.mxu1  ;;  %v10296_v42 = vadd.f32 %v10295_v9, %v10294_v50 }
 0x572   : > { %v8499_v45 = vmax.f32 %v8467_v5, 0.0  ;;  %v8438_v0 = vmul.f32 %v16074_v6, %v8342_v38  ;;  %v8345_v15 = vadd.f32 %v8243_v2, %v15964_v3  ;;  %v8235_v55 = vadd.f32 %v10281_v43, %v8234_v63  ;;  %v16523_v63 = vld [vmem:[#allocation15_spill] sm:$0xff] }
 0x573   : > { %8533 = vst.msk [vmem:[%s16095_s26 + $0x78] sm:$0xff] %vm288_vm0, %v8501_v40  ;;  %v8472_v48 = vadd.f32 %v16083_v44, %v8440_v25  ;;  %v10298_v57 = vpop.f32.mrf.mxu0  ;;  %v10770_v22 = vpop.f32.mrf.mxu1 }
 0x574   : > { %8531 = vst.msk [vmem:[%s16095_s26 + $0x68] sm:$0xff] %vm288_vm0, %v8499_v45  ;;  %v8470_v26 = vadd.f32 %v16083_v44, %v8438_v0  ;;  %v8441_v53 = vmul.f32 %v16074_v6, %v8345_v15  ;;  %v8343_v3 = vadd.f32 %v8235_v55, %v16519_v11  ;;  %v8256_v49 = vadd.f32 %v10770_v22, %v10296_v42 }
 0x575   : > { %v8504_v34 = vmax.f32 %v8472_v48, 0.0  ;;  %v10300_v35 = vpop.f32.mrf.mxu0  ;;  %v8247_v7 = vpop.f32.mrf.mxu1  ;;  %v10299_v36 = vadd.f32 %v10298_v57, %v10297_v18 }
 0x576   : > { %v8502_v59 = vmax.f32 %v8470_v26, 0.0  ;;  %v8473_v12 = vadd.f32 %v16083_v44, %v8441_v53  ;;  %v8439_v52 = vmul.f32 %v16074_v6, %v8343_v3  ;;  %v8248_v17 = vadd.f32 %v10290_v46, %v8247_v7  ;;  %v16524_v53 = vld [vmem:[#allocation21_spill] sm:$0xff] }
 0x577   : > { %8536 = vst.msk [vmem:[%s16095_s26 + $0x90] sm:$0xff] %vm288_vm0, %v8504_v34  ;;  %v10301_v20 = vpop.f32.mrf.mxu0  ;;  %v8348_v19 = vadd.f32 %v8256_v49, %v15986_v13  ;;  %v10771_v21 = vpop.f32.mrf.mxu1 }
 0x578   : > { %8534 = vst.msk [vmem:[%s16095_s26 + $0x80] sm:$0xff] %vm288_vm0, %v8502_v59  ;;  %v8505_v10 = vmax.f32 %v8473_v12, 0.0  ;;  %v8471_v23 = vadd.f32 %v16083_v44, %v8439_v52  ;;  %v8346_v14 = vadd.f32 %v8248_v17, %v16520_v39  ;;  %v8259_v62 = vadd.f32 %v10771_v21, %v10299_v36 }
 0x579   : > { %v8444_v31 = vmul.f32 %v16074_v6, %v8348_v19  ;;  %v10303_v29 = vpop.f32.mrf.mxu0  ;;  %v8250_v24 = vpop.f32.mrf.mxu1  ;;  %v10302_v8 = vadd.f32 %v10301_v20, %v10300_v35  ;;  %v16525_v35 = vld [vmem:[#allocation8_spill] sm:$0xff] }
 0x57a   : > { %8537 = vst.msk [vmem:[%s16095_s26 + $0x98] sm:$0xff] %vm288_vm0, %v8505_v10  ;;  %v8503_v27 = vmax.f32 %v8471_v23, 0.0  ;;  %v8442_v13 = vmul.f32 %v16074_v6, %v8346_v14  ;;  %v8251_v4 = vadd.f32 %v10293_v30, %v8250_v24  ;;  %v8349_v61 = vadd.f32 %v8259_v62, %v16521_v33  ;;  %v16526_v30 = vld [vmem:[#allocation17_spill] sm:$0xff] }
 0x57b   : > { %v8476_v54 = vadd.f32 %v16083_v44, %v8444_v31  ;;  %v10304_v1 = vpop.f32.mrf.mxu0  ;;  %v10774_v50 = vpop.f32.mrf.mxu1 }
 0x57c   : > { %8535 = vst.msk [vmem:[%s16095_s26 + $0x88] sm:$0xff] %vm288_vm0, %v8503_v27  ;;  %v8474_v28 = vadd.f32 %v16083_v44, %v8442_v13  ;;  %v8347_v60 = vadd.f32 %v8251_v4, %v16522_v16  ;;  %v8445_v32 = vmul.f32 %v16074_v6, %v8349_v61  ;;  %v10305_v40 = vadd.f32 %v10304_v1, %v10303_v29 }
 0x57d   : > { %v8508_v47 = vmax.f32 %v8476_v54, 0.0  ;;  %v10306_v51 = vpop.f32.mrf.mxu0  ;;  %v8263_v9 = vpop.f32.mrf.mxu1  ;;  %v16527_v54 = vld [vmem:[#allocation19_spill] sm:$0xff] }
 0x57e   : > { %v8506_v41 = vmax.f32 %v8474_v28, 0.0  ;;  %v8443_v37 = vmul.f32 %v16074_v6, %v8347_v60  ;;  %v8264_v43 = vadd.f32 %v10302_v8, %v8263_v9  ;;  %v8477_v5 = vadd.f32 %v16083_v44, %v8445_v32 }
 0x57f   : > { %8540 = vst.msk [vmem:[%s16095_s26 + $0xb0] sm:$0xff] %vm288_vm0, %v8508_v47  ;;  %v10307_v38 = vpop.f32.mrf.mxu0  ;;  %v10775_v2 = vpop.f32.mrf.mxu1  ;;  %v16528_v47 = vld [vmem:[#allocation10_spill] sm:$0xff] }
 0x580   : > { %8538 = vst.msk [vmem:[%s16095_s26 + $0xa0] sm:$0xff] %vm288_vm0, %v8506_v41  ;;  %v8475_v25 = vadd.f32 %v16083_v44, %v8443_v37  ;;  %v10308_v18 = vadd.f32 %v10307_v38, %v10306_v51  ;;  %v8350_v45 = vadd.f32 %v8264_v43, %v16523_v63  ;;  %v8509_v0 = vmax.f32 %v8477_v5, 0.0 }
 0x581   : > { %v10309_v15 = vpop.f32.mrf.mxu0  ;;  %v8266_v55 = vpop.f32.mrf.mxu1 }
 0x582   : > { %v8507_v42 = vmax.f32 %v8475_v25, 0.0  ;;  %v8272_v48 = vadd.f32 %v10774_v50, %v10308_v18  ;;  %v8446_v57 = vmul.f32 %v16074_v6, %v8350_v45  ;;  %v8267_v22 = vadd.f32 %v10305_v40, %v8266_v55  ;;  %8541 = vst.msk [vmem:[%s16095_s26 + $0xb8] sm:$0xff] %vm288_vm0, %v8509_v0 }
 0x583   : > { %v10310_v46 = vpop.f32.mrf.mxu0  ;;  %v10778_v26 = vpop.f32.mrf.mxu1 }
 0x584   : > { %8539 = vst.msk [vmem:[%s16095_s26 + $0xa8] sm:$0xff] %vm288_vm0, %v8507_v42  ;;  %v8352_v11 = vadd.f32 %v8272_v48, %v16524_v53  ;;  %v8478_v3 = vadd.f32 %v16083_v44, %v8446_v57  ;;  %v10311_v34 = vadd.f32 %v10310_v46, %v10309_v15  ;;  %v8351_v49 = vadd.f32 %v8267_v22, %v16525_v35 }
 0x585   : > { %v10312_v7 = vpop.f32.mrf.mxu0  ;;  %v8279_v59 = vpop.f32.mrf.mxu1 }
 0x586   : > { %v8448_v12 = vmul.f32 %v16074_v6, %v8352_v11  ;;  %v8510_v52 = vmax.f32 %v8478_v3, 0.0  ;;  %v8275_v17 = vadd.f32 %v10775_v2, %v10311_v34  ;;  %v8447_v36 = vmul.f32 %v16074_v6, %v8351_v49 }
 0x587   : > { %v10313_v20 = vpop.f32.mrf.mxu0  ;;  %v10779_v19 = vpop.f32.mrf.mxu1 }
 0x588   : > { %v8480_v21 = vadd.f32 %v16083_v44, %v8448_v12  ;;  %8542 = vst.msk [vmem:[%s16095_s26 + $0xc0] sm:$0xff] %vm288_vm0, %v8510_v52  ;;  %v8353_v10 = vadd.f32 %v8275_v17, %v16526_v30  ;;  %v8479_v23 = vadd.f32 %v16083_v44, %v8447_v36  ;;  %v10314_v39 = vadd.f32 %v10313_v20, %v10312_v7 }
 0x589   : > { %v10315_v14 = vpop.f32.mrf.mxu0  ;;  %v8282_v13 = vpop.f32.mrf.mxu1 }
 0x58a   : > { %v8512_v31 = vmax.f32 %v8480_v21, 0.0  ;;  %v8449_v29 = vmul.f32 %v16074_v6, %v8353_v10  ;;  %v8511_v62 = vmax.f32 %v8479_v23, 0.0  ;;  %v8280_v24 = vadd.f32 %v10314_v39, %v8279_v59 }
 0x58b   : > { %v10316_v27 = vpop.f32.mrf.mxu0 }
 0x58c   : > { %8544 = vst.msk [vmem:[%s16095_s26 + $0xd0] sm:$0xff] %vm288_vm0, %v8512_v31  ;;  %v8481_v4 = vadd.f32 %v16083_v44, %v8449_v29  ;;  %8543 = vst.msk [vmem:[%s16095_s26 + $0xc8] sm:$0xff] %vm288_vm0, %v8511_v62  ;;  %v8354_v1 = vadd.f32 %v8280_v24, %v16527_v54  ;;  %v10317_v33 = vadd.f32 %v10316_v27, %v10315_v14 }
 0x58d   : > { %v10318_v61 = vpop.f32.mrf.mxu0 }
 0x58e   : > { %v8513_v50 = vmax.f32 %v8481_v4, 0.0  ;;  %v8450_v8 = vmul.f32 %v16074_v6, %v8354_v1  ;;  %v8283_v28 = vadd.f32 %v10317_v33, %v8282_v13 }
 0x58f   : > { %v10319_v16 = vpop.f32.mrf.mxu0 }
 0x590   : > { %8545 = vst.msk [vmem:[%s16095_s26 + $0xd8] sm:$0xff] %vm288_vm0, %v8513_v50  ;;  %v8482_v60 = vadd.f32 %v16083_v44, %v8450_v8  ;;  %v8355_v32 = vadd.f32 %v8283_v28, %v16528_v47  ;;  %v10320_v51 = vadd.f32 %v10319_v16, %v10318_v61 }
 0x591   : > { %v10321_v9 = vpop.f32.mrf.mxu0 }
 0x592   : > { %v8514_v41 = vmax.f32 %v8482_v60, 0.0  ;;  %v8451_v37 = vmul.f32 %v16074_v6, %v8355_v32  ;;  %v8288_v43 = vadd.f32 %v10778_v26, %v10320_v51 }
 0x593   : > { %v10322_v5 = vpop.f32.mrf.mxu0 }
 0x594   : > { %8546 = vst.msk [vmem:[%s16095_s26 + $0xe0] sm:$0xff] %vm288_vm0, %v8514_v41  ;;  %v8483_v38 = vadd.f32 %v16083_v44, %v8451_v37  ;;  %v8356_v2 = vadd.f32 %v8288_v43, %v16052_v56  ;;  %v10323_v40 = vadd.f32 %v10322_v5, %v10321_v9 }
 0x596   : > { %v8515_v25 = vmax.f32 %v8483_v38, 0.0  ;;  %v8452_v18 = vmul.f32 %v16074_v6, %v8356_v2  ;;  %v8291_v63 = vadd.f32 %v10779_v19, %v10323_v40 }
 0x598   : > { %8547 = vst.msk [vmem:[%s16095_s26 + $0xe8] sm:$0xff] %vm288_vm0, %v8515_v25  ;;  %v8484_v45 = vadd.f32 %v16083_v44, %v8452_v18  ;;  %v8357_v0 = vadd.f32 %v8291_v63, %v16064_v58 }
 0x59a   : > { %v8516_v15 = vmax.f32 %v8484_v45, 0.0  ;;  %v8453_v55 = vmul.f32 %v16074_v6, %v8357_v0 }
 0x59c   : > { %8548 = vst.msk [vmem:[%s16095_s26 + $0xf0] sm:$0xff] %vm288_vm0, %v8516_v15  ;;  %v8485_v42 = vadd.f32 %v16083_v44, %v8453_v55 }
 0x59e   : > { %v8517_v48 = vmax.f32 %v8485_v42, 0.0 }
 0x5a0   : > { %8549 = vst.msk [vmem:[%s16095_s26 + $0xf8] sm:$0xff] %vm288_vm0, %v8517_v48 }
 0x5a1 PF: > { %s14_s15 = sadd.s32 1, %s11045_s15  }
 0x5a2   : > { %p11_p4 = scmp.ge.s32.totalorder %s14_s15, 4  }
 0x5a4   :  { %13 = sbr.rel (!%p11_p4) target bundleno = 1 (0x1), region = 70 }

</bundles_post_ra>
